<compile_context>
chip_gen: v5e
topology: v5e:2x2
jax: 0.10.0
libtpu: 0.0.40
codegen_flags: <defaults>
</compile_context>

<pallas_src>
import functools

import jax
import jax.numpy as jnp
from jax.experimental import pallas as pl
from jax.experimental.pallas import tpu as pltpu

LANE = 128  # lane width / channel padding target


def _pad_to(v, m):
    return ((v + m - 1) // m) * m


def _vmem_capacity_bytes():
    """Per-core VMEM capacity; conservative 64 MiB (v7x) fallback."""
    try:
        return int(pltpu.get_tpu_info().vmem_capacity_bytes)
    except Exception:  # info API unavailable -> be conservative
        return 64 * 1024 * 1024


# ----------------------------------------------------------------------------
# Fused Pallas kernel: whole BlockHLA4 forward in one launch.
#
# grid = (4, N_pad // tm), both axes "arbitrary" (each phase consumes the full
# previous-phase activations, so phases must run sequentially):
#   phase 0: h   <- ReLU([X , normAgg(X) ] @ Wc1_a + b1_a)          (block1 conv1)
#   phase 1: o1  <- ReLU((h + ReLU([h, normAgg(h)] @ Wc2_a + b2_a)) @ Wl_a + bl_a)
#   phase 2: h   <- ReLU([o1, normAgg(o1)] @ Wc1_b + b1_b)          (block2 conv1)
#   phase 3: o2 rows + head:  y <- (o1 + o2) @ Wlin + blin
# Activation scratch (h, o1) is persistent bf16 VMEM shared across phases.
# ----------------------------------------------------------------------------
def _blockhla4_kernel(
    a_ref, dinv_ref, x_ref,
    wc1a_ref, b1a_ref, wc2a_ref, b2a_ref, wla_ref, bla_ref,
    wc1b_ref, b1b_ref, wc2b_ref, b2b_ref, wlb_ref, blb_ref,
    wlin_ref, blin_ref,
    y_ref,
    h_scr, o1_scr,
    *, tm, a_resident,
):
    phase = pl.program_id(0)
    r = pl.program_id(1)
    row0 = pl.multiple_of(r * tm, tm)

    # Row block of the raw 0/1 (count) adjacency for this sweep's rows.
    if a_resident:
        a_blk = a_ref[pl.ds(row0, tm), :]      # A fully resident in VMEM
    else:
        a_blk = a_ref[...]                     # streamed (tm, N_pad) row block
    dinv = dinv_ref[pl.ds(row0, tm), :]        # (tm, 1) f32 = 1/deg (row scale)

    def conv(src_full, src_rows, wc_ref, b_ref):
        # Mean-neighbour aggregation (post-matmul f32 degree scale) + fused
        # [self, neigh] @ concat(W_self, W_neigh) matmul, bias, ReLU.
        agg = jnp.dot(a_blk, src_full, preferred_element_type=jnp.float32) * dinv
        cat = jnp.concatenate([src_rows, agg.astype(jnp.bfloat16)], axis=-1)
        h = jnp.dot(cat, wc_ref[...], preferred_element_type=jnp.float32)
        return jnp.maximum(h + b_ref[...], 0.0)  # f32 (tm, Hpad)

    @pl.when(phase == 0)  # block1 / conv1
    def _():
        h1 = conv(x_ref[...], x_ref[pl.ds(row0, tm), :], wc1a_ref, b1a_ref)
        h_scr[pl.ds(row0, tm), :] = h1.astype(jnp.bfloat16)

    @pl.when(phase == 1)  # block1 / conv2 + sum + block1.lin + F.relu(block1)
    def _():
        h1_rows = h_scr[pl.ds(row0, tm), :]
        h2 = conv(h_scr[...], h1_rows, wc2a_ref, b2a_ref)
        s = (h1_rows.astype(jnp.float32) + h2).astype(jnp.bfloat16)  # mode='sum'
        o = jnp.dot(s, wla_ref[...], preferred_element_type=jnp.float32) + bla_ref[...]
        o1_scr[pl.ds(row0, tm), :] = jnp.maximum(o, 0.0).astype(jnp.bfloat16)

    @pl.when(phase == 2)  # block2 / conv1
    def _():
        o1_rows = o1_scr[pl.ds(row0, tm), :]
        h1 = conv(o1_scr[...], o1_rows, wc1b_ref, b1b_ref)
        h_scr[pl.ds(row0, tm), :] = h1.astype(jnp.bfloat16)

    @pl.when(phase == 3)  # block2 / conv2 + lin + F.relu(block2) + head lin
    def _():
        h1_rows = h_scr[pl.ds(row0, tm), :]
        h2 = conv(h_scr[...], h1_rows, wc2b_ref, b2b_ref)
        s = (h1_rows.astype(jnp.float32) + h2).astype(jnp.bfloat16)
        o2 = jnp.maximum(
            jnp.dot(s, wlb_ref[...], preferred_element_type=jnp.float32) + blb_ref[...],
            0.0)
        sh = (o1_scr[pl.ds(row0, tm), :].astype(jnp.float32) + o2).astype(jnp.bfloat16)
        y_ref[...] = (jnp.dot(sh, wlin_ref[...], preferred_element_type=jnp.float32)
                      + blin_ref[...])


# ----------------------------------------------------------------------------
# Parameter construction (deterministic) + padding / packing glue
# ----------------------------------------------------------------------------
def _glorot(key, shape):
    fan_in, fan_out = shape
    limit = jnp.sqrt(6.0 / (fan_in + fan_out))
    return jax.random.uniform(key, shape, jnp.float32, -limit, limit)


def init_block_params(key, in_dim, hidden_dim, out_dim):
    ks = jax.random.split(key, 7)
    return {
        "w1s": _glorot(ks[0], (in_dim, hidden_dim)),
        "w1n": _glorot(ks[1], (in_dim, hidden_dim)),
        # Nonzero conv biases: exercises the padded-row ReLU(b) != 0 masking.
        "b1": 0.1 * jax.random.normal(ks[2], (1, hidden_dim), jnp.float32),
        "w2s": _glorot(ks[3], (hidden_dim, hidden_dim)),
        "w2n": _glorot(ks[4], (hidden_dim, hidden_dim)),
        "b2": 0.1 * jax.random.normal(ks[5], (1, hidden_dim), jnp.float32),
        "wl": _glorot(ks[6], (hidden_dim, out_dim)),      # stored (in, out)
        "bl": jnp.zeros((1, out_dim), jnp.float32),        # zeros() per reset_parameter
    }


def init_blockhla4_params(key, in_dim, hidden_dim, out_dim):
    k1, k2, k3 = jax.random.split(key, 3)
    return {
        "block1": init_block_params(k1, in_dim, hidden_dim, hidden_dim),
        "block2": init_block_params(k2, hidden_dim, hidden_dim, hidden_dim),
        "lin_w": _glorot(k3, (hidden_dim, out_dim)),
        "lin_b": jnp.zeros((1, out_dim), jnp.float32),      # zeros() per reset_parameter
    }


def dense_adjacency(edge_index, num_nodes):
    """Dense raw-count adjacency + f32 inverse-degree ('neighbornorm' stand-in)."""
    src, dst = edge_index[0], edge_index[1]
    a = jnp.zeros((num_nodes, num_nodes), jnp.float32)
    a = a.at[dst, src].add(1.0)
    deg_inv = 1.0 / jnp.maximum(a.sum(axis=1, keepdims=True), 1.0)
    return a, deg_inv


def _pad_and_pack_params(params, in_dim, hidden_dim, out_dim):
    """Zero-pad channel dims to 128 lanes, concat self/neigh weights, bf16 weights."""
    hpad = _pad_to(hidden_dim, LANE)
    opad = _pad_to(out_dim, LANE)
    bf = jnp.bfloat16

    def pad_w(w, r, c):
        return jnp.pad(w, ((0, r - w.shape[0]), (0, c - w.shape[1])))

    def pad_b(b, c):
        return jnp.pad(b, ((0, 0), (0, c - b.shape[1])))

    def pack_block(p, src_dim):
        spad = _pad_to(src_dim, LANE)
        return {
            "wc1": jnp.concatenate([pad_w(p["w1s"], spad, hpad),
                                    pad_w(p["w1n"], spad, hpad)], axis=0).astype(bf),
            "b1": pad_b(p["b1"], hpad).astype(jnp.float32),
            "wc2": jnp.concatenate([pad_w(p["w2s"], hpad, hpad),
                                    pad_w(p["w2n"], hpad, hpad)], axis=0).astype(bf),
            "b2": pad_b(p["b2"], hpad).astype(jnp.float32),
            "wl": pad_w(p["wl"], hpad, hpad).astype(bf),
            "bl": pad_b(p["bl"], hpad).astype(jnp.float32),
        }

    b1 = pack_block(params["block1"], in_dim)
    b2 = pack_block(params["block2"], hidden_dim)
    return {
        "wc1a": b1["wc1"], "b1a": b1["b1"], "wc2a": b1["wc2"], "b2a": b1["b2"],
        "wla": b1["wl"], "bla": b1["bl"],
        "wc1b": b2["wc1"], "b1b": b2["b1"], "wc2b": b2["wc2"], "b2b": b2["b2"],
        "wlb": b2["wl"], "blb": b2["bl"],
        "wlin": pad_w(params["lin_w"], hpad, opad).astype(bf),
        "blin": pad_b(params["lin_b"], opad).astype(jnp.float32),
    }


def _prepare(params, x, edge_index, tm):
    n, in_dim = x.shape
    hidden_dim = params["block1"]["w1s"].shape[1]
    out_dim = params["lin_w"].shape[1]

    cpad = _pad_to(in_dim, LANE)
    hpad = _pad_to(hidden_dim, LANE)
    opad = _pad_to(out_dim, LANE)
    n_pad = _pad_to(n, max(tm, LANE))
    tm = min(tm, n_pad)

    a, dinv = dense_adjacency(edge_index, n)
    a = jnp.pad(a, ((0, n_pad - n), (0, n_pad - n))).astype(jnp.bfloat16)  # 0/1 counts, exact
    dinv = jnp.pad(dinv, ((0, n_pad - n), (0, 0)),
                   constant_values=1.0).astype(jnp.float32)
    x_p = jnp.pad(x, ((0, n_pad - n), (0, cpad - in_dim))).astype(jnp.bfloat16)
    kp = _pad_and_pack_params(params, in_dim, hidden_dim, out_dim)

    dims = dict(n=n, out_dim=out_dim, n_pad=n_pad,
                cpad=cpad, hpad=hpad, opad=opad, tm=tm)
    return a, dinv, x_p, kp, dims


def _nbytes(v):
    return int(v.size) * v.dtype.itemsize


def _plan_vmem(a, dinv, x_p, weight_args, dims, force_tiled):
    """Decide A residency and vmem_limit_bytes from the actual footprint."""
    n_pad, hpad, opad, tm = dims["n_pad"], dims["hpad"], dims["opad"], dims["tm"]
    budget = int(_vmem_capacity_bytes() * 0.85)

    resident_inputs = 2 * (_nbytes(x_p) + sum(_nbytes(v) for v in weight_args))  # dbl-buffered
    dinv_bytes = 2 * n_pad * 512                      # (n_pad,1) f32 lane/sublane padded, x2 bufs
    scratch = 2 * (n_pad * hpad * 2)                  # h_scr + o1_scr bf16
    out_buf = 2 * (tm * opad * 4)                     # output double buffer
    temp_margin = tm * n_pad * 2 + (6 << 20)          # in-kernel temporaries + compiler scratch
    base = resident_inputs + dinv_bytes + scratch + out_buf + temp_margin

    a_res_bytes = 2 * _nbytes(a)                      # resident A, double-buffered bf16
    a_tile_bytes = 2 * tm * n_pad * 2                 # streamed row-block double buffer

    a_resident = (not force_tiled) and (base + a_res_bytes <= budget)
    needed = base + (a_res_bytes if a_resident else a_tile_bytes)
    vmem_limit = int(max(32 << 20, min(budget, needed)))
    return a_resident, vmem_limit


# ----------------------------------------------------------------------------
# Wrapper: one pallas_call for the whole BlockHLA4 forward
# ----------------------------------------------------------------------------
def blockhla4_forward(params, x, edge_index, *, tm=256, force_tiled=False):
    a, dinv, x_p, kp, dims = _prepare(params, x, edge_index, tm)
    n_pad, cpad, hpad, opad, tm = (dims["n_pad"], dims["cpad"], dims["hpad"],
                                   dims["opad"], dims["tm"])
    assert n_pad % tm == 0 and tm % 16 == 0

    weight_args = (kp["wc1a"], kp["b1a"], kp["wc2a"], kp["b2a"], kp["wla"], kp["bla"],
                   kp["wc1b"], kp["b1b"], kp["wc2b"], kp["b2b"], kp["wlb"], kp["blb"],
                   kp["wlin"], kp["blin"])

    a_resident, vmem_limit = _plan_vmem(a, dinv, x_p, weight_args, dims, force_tiled)

    grid = (4, n_pad // tm)

    def resident(arr):
        # Whole array in VMEM, same block for every grid point (fetched once).
        return pl.BlockSpec(arr.shape, lambda p, r: (0, 0))

    if a_resident:
        a_spec = resident(a)                                    # A streamed from HBM once
    else:
        a_spec = pl.BlockSpec((tm, n_pad), lambda p, r: (r, 0))  # row-block streaming fallback

    in_specs = ([a_spec, resident(dinv), resident(x_p)]
                + [resident(v) for v in weight_args])

    # Output writeback gated to phase 3: phases 0-2 keep pointing at block 0
    # (no writes, no copy-out); phase 3 walks and writes every block exactly once.
    out_specs = pl.BlockSpec((tm, opad), lambda p, r: (jnp.where(p == 3, r, 0), 0))

    # Advisory cost estimate so XLA schedules surrounding ops around the call.
    a_hbm_bytes = _nbytes(a) * (1 if a_resident else 4)
    flops = (4 * 2 * n_pad * n_pad * hpad          # 4 neighbour aggregations
             + 4 * 2 * n_pad * (2 * hpad) * hpad   # 4 fused [self,neigh] conv matmuls
             + 2 * 2 * n_pad * hpad * hpad         # 2 block lin layers
             + 2 * n_pad * hpad * opad)            # head lin
    bytes_accessed = (a_hbm_bytes + _nbytes(x_p) + _nbytes(dinv)
                      + sum(_nbytes(v) for v in weight_args) + n_pad * opad * 4)

    y = pl.pallas_call(
        functools.partial(_blockhla4_kernel, tm=tm, a_resident=a_resident),
        out_shape=jax.ShapeDtypeStruct((n_pad, opad), jnp.float32),
        grid_spec=pltpu.PrefetchScalarGridSpec(
            num_scalar_prefetch=0,
            grid=grid,
            in_specs=in_specs,
            out_specs=out_specs,
            scratch_shapes=[pltpu.VMEM((n_pad, hpad), jnp.bfloat16),   # h
                            pltpu.VMEM((n_pad, hpad), jnp.bfloat16)],  # o1
        ),
        compiler_params=pltpu.CompilerParams(
            # Each phase reads activations produced by the previous phase for
            # *all* rows, so both grid axes must stay sequential on one core.
            # TODO(synk): v7x dual-TensorCore split of the row axis w/ barriers.
            dimension_semantics=("arbitrary", "arbitrary"),
            vmem_limit_bytes=vmem_limit,
        ),
        cost_estimate=pl.CostEstimate(flops=int(flops), transcendentals=0,
                                      bytes_accessed=int(bytes_accessed)),
    )(a, dinv, x_p, *weight_args)
    return y[:dims["n"], :dims["out_dim"]]


# ----------------------------------------------------------------------------
# Pure-JAX reference of the identical padded / bf16-operand math
# ----------------------------------------------------------------------------
def _ref_forward_padded(a_bf, dinv, x_bf, kp):
    def conv(src_bf, wc, b):
        agg = jnp.dot(a_bf, src_bf, preferred_element_type=jnp.float32) * dinv
        cat = jnp.concatenate([src_bf, agg.astype(jnp.bfloat16)], axis=-1)
        return jnp.maximum(jnp.dot(cat, wc, preferred_element_type=jnp.float32) + b, 0.0)

    def block(src_bf, wc1, b1, wc2, b2, wl, bl):
        h1 = conv(src_bf, wc1, b1).astype(jnp.bfloat16)
        h2 = conv(h1, wc2, b2)
        s = (h1.astype(jnp.float32) + h2).astype(jnp.bfloat16)
        o = jnp.dot(s, wl, preferred_element_type=jnp.float32) + bl
        return jnp.maximum(o, 0.0)

    o1 = block(x_bf, kp["wc1a"], kp["b1a"], kp["wc2a"], kp["b2a"], kp["wla"], kp["bla"])
    o1_bf = o1.astype(jnp.bfloat16)
    o2 = block(o1_bf, kp["wc1b"], kp["b1b"], kp["wc2b"], kp["b2b"], kp["wlb"], kp["blb"])
    s = (o1_bf.astype(jnp.float32) + o2).astype(jnp.bfloat16)
    return jnp.dot(s, kp["wlin"], preferred_element_type=jnp.float32) + kp["blin"]


# ----------------------------------------------------------------------------
if __name__ == "__main__":
    def run_case(key, num_nodes, num_edges, in_dim, hidden_dim, out_dim, force_tiled):
        k_x, k_e, k_p = jax.random.split(key, 3)
        x = jax.random.normal(k_x, (num_nodes, in_dim), jnp.float32)
        edge_index = jax.random.randint(k_e, (2, num_edges), 0, num_nodes, jnp.int32)
        params = init_blockhla4_params(k_p, in_dim, hidden_dim, out_dim)

        fwd = jax.jit(functools.partial(blockhla4_forward, force_tiled=force_tiled))
        out = fwd(params, x, edge_index)
        jax.block_until_ready(out)

        assert out.shape == (num_nodes, out_dim), out.shape
        assert out.dtype == jnp.float32

        # Reference check (same padded data, same bf16-operand / f32-accum math).
        a_p, dinv_p, x_p, kp, _ = _prepare(params, x, edge_index, tm=256)
        ref = _ref_forward_padded(a_p, dinv_p, x_p, kp)[:num_nodes, :out_dim]
        err = float(jnp.max(jnp.abs(out - ref)))
        assert jnp.allclose(out, ref, atol=3e-2, rtol=3e-2), err

    key = jax.random.PRNGKey(0)
    k1, k2 = jax.random.split(key)

    # Small graph: resident-A fast path, single row block.
    run_case(k1, num_nodes=16, num_edges=40, in_dim=8, hidden_dim=32, out_dim=16,
             force_tiled=False)
    # Larger graph: multiple row blocks + phase-gated output, resident-A path.
    run_case(k2, num_nodes=300, num_edges=1500, in_dim=10, hidden_dim=48, out_dim=7,
             force_tiled=False)
    # Same graph through the streamed row-block A fallback path.
    run_case(k2, num_nodes=300, num_edges=1500, in_dim=10, hidden_dim=48, out_dim=7,
             force_tiled=True)

    print("KERNEL_OK")
</pallas_src>

<mosaic_0001>
module attributes {stable_mosaic.version = 11 : i64} {
  func.func @_blockhla4_kernel(%arg0: i32, %arg1: i32, %arg2: memref<256x256xbf16, #tpu.memory_space<vmem>>, %arg3: memref<256x1xf32, #tpu.memory_space<vmem>>, %arg4: memref<256x128xbf16, #tpu.memory_space<vmem>>, %arg5: memref<256x128xbf16, #tpu.memory_space<vmem>>, %arg6: memref<1x128xf32, #tpu.memory_space<vmem>>, %arg7: memref<256x128xbf16, #tpu.memory_space<vmem>>, %arg8: memref<1x128xf32, #tpu.memory_space<vmem>>, %arg9: memref<128x128xbf16, #tpu.memory_space<vmem>>, %arg10: memref<1x128xf32, #tpu.memory_space<vmem>>, %arg11: memref<256x128xbf16, #tpu.memory_space<vmem>>, %arg12: memref<1x128xf32, #tpu.memory_space<vmem>>, %arg13: memref<256x128xbf16, #tpu.memory_space<vmem>>, %arg14: memref<1x128xf32, #tpu.memory_space<vmem>>, %arg15: memref<128x128xbf16, #tpu.memory_space<vmem>>, %arg16: memref<1x128xf32, #tpu.memory_space<vmem>>, %arg17: memref<128x128xbf16, #tpu.memory_space<vmem>>, %arg18: memref<1x128xf32, #tpu.memory_space<vmem>>, %arg19: memref<256x128xf32, #tpu.memory_space<vmem>>, %arg20: memref<256x128xbf16, #tpu.memory_space<vmem>>, %arg21: memref<256x128xbf16, #tpu.memory_space<vmem>>) attributes {dimension_semantics = [#tpu.dimension_semantics<arbitrary>, #tpu.dimension_semantics<arbitrary>], iteration_bounds = array<i64: 4, 1>, scalar_prefetch = 0 : i64, scratch_operands = 2 : i64, tpu.core_type = #tpu.core_type<tc>, window_params = [{pipeline_mode = #tpu.pipeline_mode<synchronous>, transform_indices = @transform_0, window_bounds = array<i64: 256, 256>}, {pipeline_mode = #tpu.pipeline_mode<synchronous>, transform_indices = @transform_1, window_bounds = array<i64: 256, 1>}, {pipeline_mode = #tpu.pipeline_mode<synchronous>, transform_indices = @transform_2, window_bounds = array<i64: 256, 128>}, {pipeline_mode = #tpu.pipeline_mode<synchronous>, transform_indices = @transform_3, window_bounds = array<i64: 256, 128>}, {pipeline_mode = #tpu.pipeline_mode<synchronous>, transform_indices = @transform_4, window_bounds = array<i64: 1, 128>}, {pipeline_mode = #tpu.pipeline_mode<synchronous>, transform_indices = @transform_5, window_bounds = array<i64: 256, 128>}, {pipeline_mode = #tpu.pipeline_mode<synchronous>, transform_indices = @transform_6, window_bounds = array<i64: 1, 128>}, {pipeline_mode = #tpu.pipeline_mode<synchronous>, transform_indices = @transform_7, window_bounds = array<i64: 128, 128>}, {pipeline_mode = #tpu.pipeline_mode<synchronous>, transform_indices = @transform_8, window_bounds = array<i64: 1, 128>}, {pipeline_mode = #tpu.pipeline_mode<synchronous>, transform_indices = @transform_9, window_bounds = array<i64: 256, 128>}, {pipeline_mode = #tpu.pipeline_mode<synchronous>, transform_indices = @transform_10, window_bounds = array<i64: 1, 128>}, {pipeline_mode = #tpu.pipeline_mode<synchronous>, transform_indices = @transform_11, window_bounds = array<i64: 256, 128>}, {pipeline_mode = #tpu.pipeline_mode<synchronous>, transform_indices = @transform_12, window_bounds = array<i64: 1, 128>}, {pipeline_mode = #tpu.pipeline_mode<synchronous>, transform_indices = @transform_13, window_bounds = array<i64: 128, 128>}, {pipeline_mode = #tpu.pipeline_mode<synchronous>, transform_indices = @transform_14, window_bounds = array<i64: 1, 128>}, {pipeline_mode = #tpu.pipeline_mode<synchronous>, transform_indices = @transform_15, window_bounds = array<i64: 128, 128>}, {pipeline_mode = #tpu.pipeline_mode<synchronous>, transform_indices = @transform_16, window_bounds = array<i64: 1, 128>}, {transform_indices = @transform_17, window_bounds = array<i64: 256, 128>}]} {
    %c256_i32 = arith.constant 256 : i32
    %0 = arith.muli %arg1, %c256_i32 : i32
    %1 = tpu.assume_multiple %0, 256 : i32
    %2 = arith.index_cast %1 : i32 to index
    %c0 = arith.constant 0 : index
    %3 = vector.load %arg2[%2, %c0] : memref<256x256xbf16, #tpu.memory_space<vmem>>, vector<256x256xbf16>
    %4 = arith.index_cast %1 : i32 to index
    %c0_0 = arith.constant 0 : index
    %5 = vector.load %arg3[%4, %c0_0] : memref<256x1xf32, #tpu.memory_space<vmem>>, vector<256x1xf32>
    %c0_i32 = arith.constant 0 : i32
    %6 = arith.cmpi eq, %arg0, %c0_i32 : i32
    %7 = arith.extui %6 : i1 to i32
    %c0_i32_1 = arith.constant 0 : i32
    %8 = arith.cmpi ne, %7, %c0_i32_1 : i32
    scf.if %8 {
      %c0_5 = arith.constant 0 : index
      %c0_6 = arith.constant 0 : index
      %18 = vector.load %arg4[%c0_5, %c0_6] : memref<256x128xbf16, #tpu.memory_space<vmem>>, vector<256x128xbf16>
      %19 = arith.index_cast %1 : i32 to index
      %c0_7 = arith.constant 0 : index
      %20 = vector.load %arg4[%19, %c0_7] : memref<256x128xbf16, #tpu.memory_space<vmem>>, vector<256x128xbf16>
      %cst = arith.constant dense<0.000000e+00> : vector<256x128xf32>
      %21 = tpu.matmul %3, %18, %cst {dimension_numbers = #tpu.dot_dimension_numbers<[1], [0], [0], [1], [0, 0, 1, 1], [], []>} : vector<256x256xbf16>, vector<256x128xbf16>, vector<256x128xf32> -> vector<256x128xf32>
      %22 = vector.broadcast %5 : vector<256x1xf32> to vector<256x128xf32>
      %23 = arith.mulf %21, %22 : vector<256x128xf32>
      %24 = arith.truncf %23 : vector<256x128xf32> to vector<256x128xbf16>
      %25 = tpu.concatenate %20, %24 in 1 : vector<256x128xbf16>, vector<256x128xbf16> -> vector<256x256xbf16>
      %c0_8 = arith.constant 0 : index
      %c0_9 = arith.constant 0 : index
      %26 = vector.load %arg5[%c0_8, %c0_9] : memref<256x128xbf16, #tpu.memory_space<vmem>>, vector<256x128xbf16>
      %cst_10 = arith.constant dense<0.000000e+00> : vector<256x128xf32>
      %27 = tpu.matmul %25, %26, %cst_10 {dimension_numbers = #tpu.dot_dimension_numbers<[1], [0], [0], [1], [0, 0, 1, 1], [], []>} : vector<256x256xbf16>, vector<256x128xbf16>, vector<256x128xf32> -> vector<256x128xf32>
      %c0_11 = arith.constant 0 : index
      %c0_12 = arith.constant 0 : index
      %28 = vector.load %arg6[%c0_11, %c0_12] : memref<1x128xf32, #tpu.memory_space<vmem>>, vector<1x128xf32>
      %29 = vector.broadcast %28 : vector<1x128xf32> to vector<256x128xf32>
      %30 = arith.addf %27, %29 : vector<256x128xf32>
      %cst_13 = arith.constant 0.000000e+00 : f32
      %31 = vector.broadcast %cst_13 : f32 to vector<256x128xf32>
      %32 = arith.maximumf %30, %31 : vector<256x128xf32>
      %33 = arith.truncf %32 : vector<256x128xf32> to vector<256x128xbf16>
      %34 = arith.index_cast %1 : i32 to index
      %c0_14 = arith.constant 0 : index
      %35 = vector.load %arg20[%34, %c0_14] : memref<256x128xbf16, #tpu.memory_space<vmem>>, vector<256x128xbf16>
      tpu.vector_store %arg20[%34, %c0_14], %33 {strides = array<i32>} : memref<256x128xbf16, #tpu.memory_space<vmem>>, vector<256x128xbf16>,
    } else {
    }
    %c1_i32 = arith.constant 1 : i32
    %9 = arith.cmpi eq, %arg0, %c1_i32 : i32
    %10 = arith.extui %9 : i1 to i32
    %c0_i32_2 = arith.constant 0 : i32
    %11 = arith.cmpi ne, %10, %c0_i32_2 : i32
    scf.if %11 {
      %18 = arith.index_cast %1 : i32 to index
      %c0_5 = arith.constant 0 : index
      %19 = vector.load %arg20[%18, %c0_5] : memref<256x128xbf16, #tpu.memory_space<vmem>>, vector<256x128xbf16>
      %c0_6 = arith.constant 0 : index
      %c0_7 = arith.constant 0 : index
      %20 = vector.load %arg20[%c0_6, %c0_7] : memref<256x128xbf16, #tpu.memory_space<vmem>>, vector<256x128xbf16>
      %cst = arith.constant dense<0.000000e+00> : vector<256x128xf32>
      %21 = tpu.matmul %3, %20, %cst {dimension_numbers = #tpu.dot_dimension_numbers<[1], [0], [0], [1], [0, 0, 1, 1], [], []>} : vector<256x256xbf16>, vector<256x128xbf16>, vector<256x128xf32> -> vector<256x128xf32>
      %22 = vector.broadcast %5 : vector<256x1xf32> to vector<256x128xf32>
      %23 = arith.mulf %21, %22 : vector<256x128xf32>
      %24 = arith.truncf %23 : vector<256x128xf32> to vector<256x128xbf16>
      %25 = tpu.concatenate %19, %24 in 1 : vector<256x128xbf16>, vector<256x128xbf16> -> vector<256x256xbf16>
      %c0_8 = arith.constant 0 : index
      %c0_9 = arith.constant 0 : index
      %26 = vector.load %arg7[%c0_8, %c0_9] : memref<256x128xbf16, #tpu.memory_space<vmem>>, vector<256x128xbf16>
      %cst_10 = arith.constant dense<0.000000e+00> : vector<256x128xf32>
      %27 = tpu.matmul %25, %26, %cst_10 {dimension_numbers = #tpu.dot_dimension_numbers<[1], [0], [0], [1], [0, 0, 1, 1], [], []>} : vector<256x256xbf16>, vector<256x128xbf16>, vector<256x128xf32> -> vector<256x128xf32>
      %c0_11 = arith.constant 0 : index
      %c0_12 = arith.constant 0 : index
      %28 = vector.load %arg8[%c0_11, %c0_12] : memref<1x128xf32, #tpu.memory_space<vmem>>, vector<1x128xf32>
      %29 = vector.broadcast %28 : vector<1x128xf32> to vector<256x128xf32>
      %30 = arith.addf %27, %29 : vector<256x128xf32>
      %cst_13 = arith.constant 0.000000e+00 : f32
      %31 = vector.broadcast %cst_13 : f32 to vector<256x128xf32>
      %32 = arith.maximumf %30, %31 : vector<256x128xf32>
      %33 = arith.extf %19 : vector<256x128xbf16> to vector<256x128xf32>
      %34 = arith.addf %33, %32 : vector<256x128xf32>
      %35 = arith.truncf %34 : vector<256x128xf32> to vector<256x128xbf16>
      %c0_14 = arith.constant 0 : index
      %c0_15 = arith.constant 0 : index
      %36 = vector.load %arg9[%c0_14, %c0_15] : memref<128x128xbf16, #tpu.memory_space<vmem>>, vector<128x128xbf16>
      %cst_16 = arith.constant dense<0.000000e+00> : vector<256x128xf32>
      %37 = tpu.matmul %35, %36, %cst_16 {dimension_numbers = #tpu.dot_dimension_numbers<[1], [0], [0], [1], [0, 0, 1, 1], [], []>} : vector<256x128xbf16>, vector<128x128xbf16>, vector<256x128xf32> -> vector<256x128xf32>
      %c0_17 = arith.constant 0 : index
      %c0_18 = arith.constant 0 : index
      %38 = vector.load %arg10[%c0_17, %c0_18] : memref<1x128xf32, #tpu.memory_space<vmem>>, vector<1x128xf32>
      %39 = vector.broadcast %38 : vector<1x128xf32> to vector<256x128xf32>
      %40 = arith.addf %37, %39 : vector<256x128xf32>
      %cst_19 = arith.constant 0.000000e+00 : f32
      %41 = vector.broadcast %cst_19 : f32 to vector<256x128xf32>
      %42 = arith.maximumf %40, %41 : vector<256x128xf32>
      %43 = arith.truncf %42 : vector<256x128xf32> to vector<256x128xbf16>
      %44 = arith.index_cast %1 : i32 to index
      %c0_20 = arith.constant 0 : index
      %45 = vector.load %arg21[%44, %c0_20] : memref<256x128xbf16, #tpu.memory_space<vmem>>, vector<256x128xbf16>
      tpu.vector_store %arg21[%44, %c0_20], %43 {strides = array<i32>} : memref<256x128xbf16, #tpu.memory_space<vmem>>, vector<256x128xbf16>,
    } else {
    }
    %c2_i32 = arith.constant 2 : i32
    %12 = arith.cmpi eq, %arg0, %c2_i32 : i32
    %13 = arith.extui %12 : i1 to i32
    %c0_i32_3 = arith.constant 0 : i32
    %14 = arith.cmpi ne, %13, %c0_i32_3 : i32
    scf.if %14 {
      %18 = arith.index_cast %1 : i32 to index
      %c0_5 = arith.constant 0 : index
      %19 = vector.load %arg21[%18, %c0_5] : memref<256x128xbf16, #tpu.memory_space<vmem>>, vector<256x128xbf16>
      %c0_6 = arith.constant 0 : index
      %c0_7 = arith.constant 0 : index
      %20 = vector.load %arg21[%c0_6, %c0_7] : memref<256x128xbf16, #tpu.memory_space<vmem>>, vector<256x128xbf16>
      %cst = arith.constant dense<0.000000e+00> : vector<256x128xf32>
      %21 = tpu.matmul %3, %20, %cst {dimension_numbers = #tpu.dot_dimension_numbers<[1], [0], [0], [1], [0, 0, 1, 1], [], []>} : vector<256x256xbf16>, vector<256x128xbf16>, vector<256x128xf32> -> vector<256x128xf32>
      %22 = vector.broadcast %5 : vector<256x1xf32> to vector<256x128xf32>
      %23 = arith.mulf %21, %22 : vector<256x128xf32>
      %24 = arith.truncf %23 : vector<256x128xf32> to vector<256x128xbf16>
      %25 = tpu.concatenate %19, %24 in 1 : vector<256x128xbf16>, vector<256x128xbf16> -> vector<256x256xbf16>
      %c0_8 = arith.constant 0 : index
      %c0_9 = arith.constant 0 : index
      %26 = vector.load %arg11[%c0_8, %c0_9] : memref<256x128xbf16, #tpu.memory_space<vmem>>, vector<256x128xbf16>
      %cst_10 = arith.constant dense<0.000000e+00> : vector<256x128xf32>
      %27 = tpu.matmul %25, %26, %cst_10 {dimension_numbers = #tpu.dot_dimension_numbers<[1], [0], [0], [1], [0, 0, 1, 1], [], []>} : vector<256x256xbf16>, vector<256x128xbf16>, vector<256x128xf32> -> vector<256x128xf32>
      %c0_11 = arith.constant 0 : index
      %c0_12 = arith.constant 0 : index
      %28 = vector.load %arg12[%c0_11, %c0_12] : memref<1x128xf32, #tpu.memory_space<vmem>>, vector<1x128xf32>
      %29 = vector.broadcast %28 : vector<1x128xf32> to vector<256x128xf32>
      %30 = arith.addf %27, %29 : vector<256x128xf32>
      %cst_13 = arith.constant 0.000000e+00 : f32
      %31 = vector.broadcast %cst_13 : f32 to vector<256x128xf32>
      %32 = arith.maximumf %30, %31 : vector<256x128xf32>
      %33 = arith.truncf %32 : vector<256x128xf32> to vector<256x128xbf16>
      %34 = arith.index_cast %1 : i32 to index
      %c0_14 = arith.constant 0 : index
      %35 = vector.load %arg20[%34, %c0_14] : memref<256x128xbf16, #tpu.memory_space<vmem>>, vector<256x128xbf16>
      tpu.vector_store %arg20[%34, %c0_14], %33 {strides = array<i32>} : memref<256x128xbf16, #tpu.memory_space<vmem>>, vector<256x128xbf16>,
    } else {
    }
    %c3_i32 = arith.constant 3 : i32
    %15 = arith.cmpi eq, %arg0, %c3_i32 : i32
    %16 = arith.extui %15 : i1 to i32
    %c0_i32_4 = arith.constant 0 : i32
    %17 = arith.cmpi ne, %16, %c0_i32_4 : i32
    scf.if %17 {
      %18 = arith.index_cast %1 : i32 to index
      %c0_5 = arith.constant 0 : index
      %19 = vector.load %arg20[%18, %c0_5] : memref<256x128xbf16, #tpu.memory_space<vmem>>, vector<256x128xbf16>
      %c0_6 = arith.constant 0 : index
      %c0_7 = arith.constant 0 : index
      %20 = vector.load %arg20[%c0_6, %c0_7] : memref<256x128xbf16, #tpu.memory_space<vmem>>, vector<256x128xbf16>
      %cst = arith.constant dense<0.000000e+00> : vector<256x128xf32>
      %21 = tpu.matmul %3, %20, %cst {dimension_numbers = #tpu.dot_dimension_numbers<[1], [0], [0], [1], [0, 0, 1, 1], [], []>} : vector<256x256xbf16>, vector<256x128xbf16>, vector<256x128xf32> -> vector<256x128xf32>
      %22 = vector.broadcast %5 : vector<256x1xf32> to vector<256x128xf32>
      %23 = arith.mulf %21, %22 : vector<256x128xf32>
      %24 = arith.truncf %23 : vector<256x128xf32> to vector<256x128xbf16>
      %25 = tpu.concatenate %19, %24 in 1 : vector<256x128xbf16>, vector<256x128xbf16> -> vector<256x256xbf16>
      %c0_8 = arith.constant 0 : index
      %c0_9 = arith.constant 0 : index
      %26 = vector.load %arg13[%c0_8, %c0_9] : memref<256x128xbf16, #tpu.memory_space<vmem>>, vector<256x128xbf16>
      %cst_10 = arith.constant dense<0.000000e+00> : vector<256x128xf32>
      %27 = tpu.matmul %25, %26, %cst_10 {dimension_numbers = #tpu.dot_dimension_numbers<[1], [0], [0], [1], [0, 0, 1, 1], [], []>} : vector<256x256xbf16>, vector<256x128xbf16>, vector<256x128xf32> -> vector<256x128xf32>
      %c0_11 = arith.constant 0 : index
      %c0_12 = arith.constant 0 : index
      %28 = vector.load %arg14[%c0_11, %c0_12] : memref<1x128xf32, #tpu.memory_space<vmem>>, vector<1x128xf32>
      %29 = vector.broadcast %28 : vector<1x128xf32> to vector<256x128xf32>
      %30 = arith.addf %27, %29 : vector<256x128xf32>
      %cst_13 = arith.constant 0.000000e+00 : f32
      %31 = vector.broadcast %cst_13 : f32 to vector<256x128xf32>
      %32 = arith.maximumf %30, %31 : vector<256x128xf32>
      %33 = arith.extf %19 : vector<256x128xbf16> to vector<256x128xf32>
      %34 = arith.addf %33, %32 : vector<256x128xf32>
      %35 = arith.truncf %34 : vector<256x128xf32> to vector<256x128xbf16>
      %c0_14 = arith.constant 0 : index
      %c0_15 = arith.constant 0 : index
      %36 = vector.load %arg15[%c0_14, %c0_15] : memref<128x128xbf16, #tpu.memory_space<vmem>>, vector<128x128xbf16>
      %cst_16 = arith.constant dense<0.000000e+00> : vector<256x128xf32>
      %37 = tpu.matmul %35, %36, %cst_16 {dimension_numbers = #tpu.dot_dimension_numbers<[1], [0], [0], [1], [0, 0, 1, 1], [], []>} : vector<256x128xbf16>, vector<128x128xbf16>, vector<256x128xf32> -> vector<256x128xf32>
      %c0_17 = arith.constant 0 : index
      %c0_18 = arith.constant 0 : index
      %38 = vector.load %arg16[%c0_17, %c0_18] : memref<1x128xf32, #tpu.memory_space<vmem>>, vector<1x128xf32>
      %39 = vector.broadcast %38 : vector<1x128xf32> to vector<256x128xf32>
      %40 = arith.addf %37, %39 : vector<256x128xf32>
      %cst_19 = arith.constant 0.000000e+00 : f32
      %41 = vector.broadcast %cst_19 : f32 to vector<256x128xf32>
      %42 = arith.maximumf %40, %41 : vector<256x128xf32>
      %43 = arith.index_cast %1 : i32 to index
      %c0_20 = arith.constant 0 : index
      %44 = vector.load %arg21[%43, %c0_20] : memref<256x128xbf16, #tpu.memory_space<vmem>>, vector<256x128xbf16>
      %45 = arith.extf %44 : vector<256x128xbf16> to vector<256x128xf32>
      %46 = arith.addf %45, %42 : vector<256x128xf32>
      %47 = arith.truncf %46 : vector<256x128xf32> to vector<256x128xbf16>
      %c0_21 = arith.constant 0 : index
      %c0_22 = arith.constant 0 : index
      %48 = vector.load %arg17[%c0_21, %c0_22] : memref<128x128xbf16, #tpu.memory_space<vmem>>, vector<128x128xbf16>
      %cst_23 = arith.constant dense<0.000000e+00> : vector<256x128xf32>
      %49 = tpu.matmul %47, %48, %cst_23 {dimension_numbers = #tpu.dot_dimension_numbers<[1], [0], [0], [1], [0, 0, 1, 1], [], []>} : vector<256x128xbf16>, vector<128x128xbf16>, vector<256x128xf32> -> vector<256x128xf32>
      %c0_24 = arith.constant 0 : index
      %c0_25 = arith.constant 0 : index
      %50 = vector.load %arg18[%c0_24, %c0_25] : memref<1x128xf32, #tpu.memory_space<vmem>>, vector<1x128xf32>
      %51 = vector.broadcast %50 : vector<1x128xf32> to vector<256x128xf32>
      %52 = arith.addf %49, %51 : vector<256x128xf32>
      %c0_26 = arith.constant 0 : index
      %c0_27 = arith.constant 0 : index
      %53 = vector.load %arg19[%c0_26, %c0_27] : memref<256x128xf32, #tpu.memory_space<vmem>>, vector<256x128xf32>
      tpu.vector_store %arg19[%c0_26, %c0_27], %52 {strides = array<i32>} : memref<256x128xf32, #tpu.memory_space<vmem>>, vector<256x128xf32>,
    } else {
    }
    return
  }
  func.func @transform_0(%arg0: i32, %arg1: i32) -> (i32, i32) {
    %c0_i32 = arith.constant 0 : i32
    %c0_i32_0 = arith.constant 0 : i32
    %c0_i32_1 = arith.constant 0 : i32
    return %c0_i32, %c0_i32_0 : i32, i32
  }
  func.func @transform_1(%arg0: i32, %arg1: i32) -> (i32, i32) {
    %c0_i32 = arith.constant 0 : i32
    %c0_i32_0 = arith.constant 0 : i32
    %c0_i32_1 = arith.constant 0 : i32
    return %c0_i32, %c0_i32_0 : i32, i32
  }
  func.func @transform_2(%arg0: i32, %arg1: i32) -> (i32, i32) {
    %c0_i32 = arith.constant 0 : i32
    %c0_i32_0 = arith.constant 0 : i32
    %c0_i32_1 = arith.constant 0 : i32
    return %c0_i32, %c0_i32_0 : i32, i32
  }
  func.func @transform_3(%arg0: i32, %arg1: i32) -> (i32, i32) {
    %c0_i32 = arith.constant 0 : i32
    %c0_i32_0 = arith.constant 0 : i32
    %c0_i32_1 = arith.constant 0 : i32
    return %c0_i32, %c0_i32_0 : i32, i32
  }
  func.func @transform_4(%arg0: i32, %arg1: i32) -> (i32, i32) {
    %c0_i32 = arith.constant 0 : i32
    %c0_i32_0 = arith.constant 0 : i32
    %c0_i32_1 = arith.constant 0 : i32
    return %c0_i32, %c0_i32_0 : i32, i32
  }
  func.func @transform_5(%arg0: i32, %arg1: i32) -> (i32, i32) {
    %c0_i32 = arith.constant 0 : i32
    %c0_i32_0 = arith.constant 0 : i32
    %c0_i32_1 = arith.constant 0 : i32
    return %c0_i32, %c0_i32_0 : i32, i32
  }
  func.func @transform_6(%arg0: i32, %arg1: i32) -> (i32, i32) {
    %c0_i32 = arith.constant 0 : i32
    %c0_i32_0 = arith.constant 0 : i32
    %c0_i32_1 = arith.constant 0 : i32
    return %c0_i32, %c0_i32_0 : i32, i32
  }
  func.func @transform_7(%arg0: i32, %arg1: i32) -> (i32, i32) {
    %c0_i32 = arith.constant 0 : i32
    %c0_i32_0 = arith.constant 0 : i32
    %c0_i32_1 = arith.constant 0 : i32
    return %c0_i32, %c0_i32_0 : i32, i32
  }
  func.func @transform_8(%arg0: i32, %arg1: i32) -> (i32, i32) {
    %c0_i32 = arith.constant 0 : i32
    %c0_i32_0 = arith.constant 0 : i32
    %c0_i32_1 = arith.constant 0 : i32
    return %c0_i32, %c0_i32_0 : i32, i32
  }
  func.func @transform_9(%arg0: i32, %arg1: i32) -> (i32, i32) {
    %c0_i32 = arith.constant 0 : i32
    %c0_i32_0 = arith.constant 0 : i32
    %c0_i32_1 = arith.constant 0 : i32
    return %c0_i32, %c0_i32_0 : i32, i32
  }
  func.func @transform_10(%arg0: i32, %arg1: i32) -> (i32, i32) {
    %c0_i32 = arith.constant 0 : i32
    %c0_i32_0 = arith.constant 0 : i32
    %c0_i32_1 = arith.constant 0 : i32
    return %c0_i32, %c0_i32_0 : i32, i32
  }
  func.func @transform_11(%arg0: i32, %arg1: i32) -> (i32, i32) {
    %c0_i32 = arith.constant 0 : i32
    %c0_i32_0 = arith.constant 0 : i32
    %c0_i32_1 = arith.constant 0 : i32
    return %c0_i32, %c0_i32_0 : i32, i32
  }
  func.func @transform_12(%arg0: i32, %arg1: i32) -> (i32, i32) {
    %c0_i32 = arith.constant 0 : i32
    %c0_i32_0 = arith.constant 0 : i32
    %c0_i32_1 = arith.constant 0 : i32
    return %c0_i32, %c0_i32_0 : i32, i32
  }
  func.func @transform_13(%arg0: i32, %arg1: i32) -> (i32, i32) {
    %c0_i32 = arith.constant 0 : i32
    %c0_i32_0 = arith.constant 0 : i32
    %c0_i32_1 = arith.constant 0 : i32
    return %c0_i32, %c0_i32_0 : i32, i32
  }
  func.func @transform_14(%arg0: i32, %arg1: i32) -> (i32, i32) {
    %c0_i32 = arith.constant 0 : i32
    %c0_i32_0 = arith.constant 0 : i32
    %c0_i32_1 = arith.constant 0 : i32
    return %c0_i32, %c0_i32_0 : i32, i32
  }
  func.func @transform_15(%arg0: i32, %arg1: i32) -> (i32, i32) {
    %c0_i32 = arith.constant 0 : i32
    %c0_i32_0 = arith.constant 0 : i32
    %c0_i32_1 = arith.constant 0 : i32
    return %c0_i32, %c0_i32_0 : i32, i32
  }
  func.func @transform_16(%arg0: i32, %arg1: i32) -> (i32, i32) {
    %c0_i32 = arith.constant 0 : i32
    %c0_i32_0 = arith.constant 0 : i32
    %c0_i32_1 = arith.constant 0 : i32
    return %c0_i32, %c0_i32_0 : i32, i32
  }
  func.func @transform_17(%arg0: i32, %arg1: i32) -> (i32, i32) {
    %c3_i32 = arith.constant 3 : i32
    %0 = arith.cmpi eq, %arg0, %c3_i32 : i32
    %c0_i32 = arith.constant 0 : i32
    %1 = arith.select %0, %arg1, %c0_i32 : i32
    %c0_i32_0 = arith.constant 0 : i32
    %c0_i32_1 = arith.constant 0 : i32
    return %1, %c0_i32_0 : i32, i32
  }
}

</mosaic_0001>

<bundles_post_ra>
// kernel: blockhla4_forward.1
= control target key start
LH: loop header
LB: loop body
LE: loop exit
PB: predicated region body
PF: predicated region fallthrough
CT: control target
= control target key end

     0   :  { %s9090_s24 = smov 0   ;;  %s9092_s25 = smov 0   ;;  %s11959_s0 = inlined_call_operand.vmem [shape: bf16[256,256], index: 0, kind: input, shape index: {}]   ;;  %s11960_s1 = inlined_call_operand.vmem [shape: f32[256,1], index: 1, kind: input, shape index: {}]   ;;  %s11961_s2 = inlined_call_operand.vmem [shape: bf16[256,128], index: 2, kind: input, shape index: {}]   ;;  %s11962_s3 = inlined_call_operand.vmem [shape: bf16[256,128], index: 3, kind: input, shape index: {}]   ;;  %s11963_s4 = inlined_call_operand.vmem [shape: f32[1,128], index: 4, kind: input, shape index: {}]   ;;  %s11964_s5 = inlined_call_operand.vmem [shape: bf16[256,128], index: 5, kind: input, shape index: {}]   ;;  %s11965_s6 = inlined_call_operand.vmem [shape: f32[1,128], index: 6, kind: input, shape index: {}]   ;;  %s11966_s7 = inlined_call_operand.vmem [shape: bf16[128,128], index: 7, kind: input, shape index: {}]   ;;  %s11967_s8 = inlined_call_operand.vmem [shape: f32[1,128], index: 8, kind: input, shape index: {}]   ;;  %s11968_s9 = inlined_call_operand.vmem [shape: bf16[256,128], index: 9, kind: input, shape index: {}]   ;;  %s11969_s10 = inlined_call_operand.vmem [shape: f32[1,128], index: 10, kind: input, shape index: {}]   ;;  %s11970_s11 = inlined_call_operand.vmem [shape: bf16[256,128], index: 11, kind: input, shape index: {}]   ;;  %s11971_s12 = inlined_call_operand.vmem [shape: f32[1,128], index: 12, kind: input, shape index: {}]   ;;  %s11972_s13 = inlined_call_operand.vmem [shape: bf16[128,128], index: 13, kind: input, shape index: {}]   ;;  %s11973_s14 = inlined_call_operand.vmem [shape: f32[1,128], index: 14, kind: input, shape index: {}]   ;;  %s11974_s15 = inlined_call_operand.vmem [shape: bf16[128,128], index: 15, kind: input, shape index: {}]   ;;  %s11975_s16 = inlined_call_operand.vmem [shape: f32[1,128], index: 16, kind: input, shape index: {}]   ;;  %s11976_s17 = inlined_call_operand.vmem [shape: f32[256,128], index: 17, kind: output, shape index: {}]  }
   0x1   :  { %11988 = sst [smem:[#allocation243_spill]] %s11959_s0  ;;  %s9094_s26 = smov 0  }
   0x2   :  { %11989 = sst [smem:[#allocation244_spill]] %s11960_s1 }
   0x3 LB: > { %s39_s27 = sadd.s32 1, %s8990_s25  ;;  %p6792_p0 = scmp.ge.s32.totalorder %s8994_s26, 1  ;;  %s8994_s26 = sphi %s9094_s26, %s27_s26   ;;  %s8990_s25 = sphi %s9092_s25, %s12481_s25   ;;  %s8986_s24 = sphi %s9090_s24, %s12480_s24  }
   0x4   : > { %p41_p1 = scmp.ge.s32.totalorder %s39_s27, 4  ;;  %p493_p2 = scmp.lt.s32.totalorder %s8994_s26, 5 }
   0x6   : > { %s12483_s27 = smov (%p41_p1, %s39_s27), 0  ;;  %p494_p3 = pnand %p6792_p0, %p493_p2 }
   0x7   : > { %11990 = sst [smem:[#allocation4_spill]] %s12483_s27 }
   0x8   : > { %497 = sbr.rel (%p494_p3) target bundleno = 3029 (0xbd5), region = 88 }
   0xd   : > { %s11991_s0 = sld [smem:[#allocation243_spill]]  ;;  %p6793_p4 = scmp.ne.s32.totalorder %s8986_s24, 0 }
   0xe   : > { %s12221_s19 = sld [smem:[#allocation244_spill]] }
  0x13   : > { %v9113_v0 = vld [vmem:[%s11991_s0 + $0x4] sm:$0xf]  ;;  %v9118_v1 = vld [vmem:[%s11991_s0] sm:$0xf]  ;;  %v9153_v8 = vld [vmem:[%s11991_s0 + $0x8] sm:$0xf0] }
  0x14   : > { %11992 = vst [vmem:[#allocation5_spill] sm:$0xff] %v9113_v0  ;;  %v9123_v2 = vld [vmem:[%s11991_s0 + $0x4] sm:$0xf]  ;;  %v9128_v3 = vld [vmem:[%s11991_s0] sm:$0xf] }
  0x15   : > { %11993 = vst [vmem:[#allocation6_spill] sm:$0xff] %v9118_v1  ;;  %v9133_v4 = vld [vmem:[%s11991_s0 + $0x4] sm:$0xf]  ;;  %v9138_v5 = vld [vmem:[%s11991_s0] sm:$0xf] }
  0x16   : > { %11994 = vst [vmem:[#allocation7_spill] sm:$0xff] %v9123_v2  ;;  %v9143_v6 = vld [vmem:[%s11991_s0 + $0x4] sm:$0xf]  ;;  %v9148_v7 = vld [vmem:[%s11991_s0] sm:$0xf] }
  0x17   : > { %11995 = vst [vmem:[#allocation8_spill] sm:$0xff] %v9128_v3  ;;  %v9158_v9 = vld [vmem:[%s11991_s0 + $0x4] sm:$0xf0]  ;;  %v9163_v10 = vld [vmem:[%s11991_s0 + $0x8] sm:$0xf0] }
  0x18   : > { %11996 = vst [vmem:[#allocation9_spill] sm:$0xff] %v9133_v4  ;;  %v9168_v11 = vld [vmem:[%s11991_s0 + $0x4] sm:$0xf0]  ;;  %v9173_v12 = vld [vmem:[%s11991_s0 + $0x8] sm:$0xf0] }
  0x19   : > { %11997 = vst [vmem:[#allocation10_spill] sm:$0xff] %v9138_v5  ;;  %v9178_v13 = vld [vmem:[%s11991_s0 + $0x4] sm:$0xf0]  ;;  %v9183_v14 = vld [vmem:[%s11991_s0 + $0x8] sm:$0xf0] }
  0x1a   : > { %11998 = vst [vmem:[#allocation11_spill] sm:$0xff] %v9153_v8  ;;  %v9188_v15 = vld [vmem:[%s11991_s0 + $0x4] sm:$0xf0]  ;;  %v9193_v16 = vld [vmem:[%s11991_s0 + $0x14] sm:$0xf] }
  0x1b   : > { %11999 = vst [vmem:[#allocation12_spill] sm:$0xff] %v9158_v9  ;;  %v9198_v17 = vld [vmem:[%s11991_s0 + $0x10] sm:$0xf]  ;;  %v9203_v18 = vld [vmem:[%s11991_s0 + $0x14] sm:$0xf] }
  0x1c   : > { %12000 = vst [vmem:[#allocation13_spill] sm:$0xff] %v9163_v10  ;;  %v9208_v19 = vld [vmem:[%s11991_s0 + $0x10] sm:$0xf]  ;;  %v9213_v20 = vld [vmem:[%s11991_s0 + $0x14] sm:$0xf] }
  0x1d   : > { %12001 = vst [vmem:[#allocation14_spill] sm:$0xff] %v9168_v11  ;;  %v9218_v21 = vld [vmem:[%s11991_s0 + $0x10] sm:$0xf]  ;;  %v9223_v22 = vld [vmem:[%s11991_s0 + $0x14] sm:$0xf] }
  0x1e   : > { %12002 = vst [vmem:[#allocation15_spill] sm:$0xff] %v9173_v12  ;;  %v9228_v23 = vld [vmem:[%s11991_s0 + $0x10] sm:$0xf]  ;;  %v9233_v24 = vld [vmem:[%s11991_s0 + $0x18] sm:$0xf0] }
  0x1f   : > { %12003 = vst [vmem:[#allocation16_spill] sm:$0xff] %v9178_v13  ;;  %v9238_v25 = vld [vmem:[%s11991_s0 + $0x14] sm:$0xf0]  ;;  %v9243_v26 = vld [vmem:[%s11991_s0 + $0x18] sm:$0xf0] }
  0x20   : > { %12004 = vst [vmem:[#allocation17_spill] sm:$0xff] %v9193_v16  ;;  %v9248_v27 = vld [vmem:[%s11991_s0 + $0x14] sm:$0xf0]  ;;  %v9253_v28 = vld [vmem:[%s11991_s0 + $0x18] sm:$0xf0] }
  0x21   : > { %12005 = vst [vmem:[#allocation18_spill] sm:$0xff] %v9198_v17  ;;  %v9258_v29 = vld [vmem:[%s11991_s0 + $0x14] sm:$0xf0]  ;;  %v9263_v30 = vld [vmem:[%s11991_s0 + $0x18] sm:$0xf0] }
  0x22   : > { %12006 = vst [vmem:[#allocation19_spill] sm:$0xff] %v9203_v18  ;;  %v9268_v31 = vld [vmem:[%s11991_s0 + $0x14] sm:$0xf0]  ;;  %v9273_v32 = vld [vmem:[%s11991_s0 + $0x24] sm:$0xf] }
  0x23   : > { %12007 = vst [vmem:[#allocation20_spill] sm:$0xff] %v9208_v19  ;;  %v9278_v33 = vld [vmem:[%s11991_s0 + $0x20] sm:$0xf]  ;;  %v9283_v34 = vld [vmem:[%s11991_s0 + $0x24] sm:$0xf] }
  0x24   : > { %12008 = vst [vmem:[#allocation21_spill] sm:$0xff] %v9213_v20  ;;  %v9288_v35 = vld [vmem:[%s11991_s0 + $0x20] sm:$0xf]  ;;  %v9293_v36 = vld [vmem:[%s11991_s0 + $0x24] sm:$0xf] }
  0x25   : > { %12009 = vst [vmem:[#allocation22_spill] sm:$0xff] %v9218_v21  ;;  %v9298_v37 = vld [vmem:[%s11991_s0 + $0x20] sm:$0xf]  ;;  %v9303_v38 = vld [vmem:[%s11991_s0 + $0x24] sm:$0xf] }
  0x26   : > { %12010 = vst [vmem:[#allocation23_spill] sm:$0xff] %v9233_v24  ;;  %v9308_v39 = vld [vmem:[%s11991_s0 + $0x20] sm:$0xf]  ;;  %v9313_v40 = vld [vmem:[%s11991_s0 + $0x28] sm:$0xf0] }
  0x27   : > { %12011 = vst [vmem:[#allocation24_spill] sm:$0xff] %v9238_v25  ;;  %v9318_v41 = vld [vmem:[%s11991_s0 + $0x24] sm:$0xf0]  ;;  %v9323_v42 = vld [vmem:[%s11991_s0 + $0x28] sm:$0xf0] }
  0x28   : > { %12012 = vst [vmem:[#allocation25_spill] sm:$0xff] %v9243_v26  ;;  %v9328_v43 = vld [vmem:[%s11991_s0 + $0x24] sm:$0xf0]  ;;  %v9333_v44 = vld [vmem:[%s11991_s0 + $0x28] sm:$0xf0] }
  0x29   : > { %12013 = vst [vmem:[#allocation26_spill] sm:$0xff] %v9248_v27  ;;  %v9338_v45 = vld [vmem:[%s11991_s0 + $0x24] sm:$0xf0]  ;;  %v9343_v46 = vld [vmem:[%s11991_s0 + $0x28] sm:$0xf0] }
  0x2a   : > { %12014 = vst [vmem:[#allocation27_spill] sm:$0xff] %v9253_v28  ;;  %v9348_v47 = vld [vmem:[%s11991_s0 + $0x24] sm:$0xf0]  ;;  %v9353_v48 = vld [vmem:[%s11991_s0 + $0x34] sm:$0xf] }
  0x2b   : > { %12015 = vst [vmem:[#allocation28_spill] sm:$0xff] %v9258_v29  ;;  %v9358_v49 = vld [vmem:[%s11991_s0 + $0x30] sm:$0xf]  ;;  %v9363_v50 = vld [vmem:[%s11991_s0 + $0x34] sm:$0xf] }
  0x2c   : > { %12016 = vst [vmem:[#allocation29_spill] sm:$0xff] %v9273_v32  ;;  %v9368_v51 = vld [vmem:[%s11991_s0 + $0x30] sm:$0xf]  ;;  %v9373_v52 = vld [vmem:[%s11991_s0 + $0x34] sm:$0xf] }
  0x2d   : > { %12017 = vst [vmem:[#allocation30_spill] sm:$0xff] %v9278_v33  ;;  %v9378_v53 = vld [vmem:[%s11991_s0 + $0x30] sm:$0xf]  ;;  %v9383_v54 = vld [vmem:[%s11991_s0 + $0x34] sm:$0xf] }
  0x2e   : > { %12018 = vst [vmem:[#allocation31_spill] sm:$0xff] %v9283_v34  ;;  %v9388_v55 = vld [vmem:[%s11991_s0 + $0x30] sm:$0xf]  ;;  %v9393_v56 = vld [vmem:[%s11991_s0 + $0x38] sm:$0xf0] }
  0x2f   : > { %12019 = vst [vmem:[#allocation32_spill] sm:$0xff] %v9288_v35  ;;  %v9398_v57 = vld [vmem:[%s11991_s0 + $0x34] sm:$0xf0]  ;;  %v9403_v58 = vld [vmem:[%s11991_s0 + $0x38] sm:$0xf0] }
  0x30   : > { %12020 = vst [vmem:[#allocation33_spill] sm:$0xff] %v9293_v36  ;;  %v9408_v59 = vld [vmem:[%s11991_s0 + $0x34] sm:$0xf0]  ;;  %v9413_v60 = vld [vmem:[%s11991_s0 + $0x38] sm:$0xf0] }
  0x31   : > { %12021 = vst [vmem:[#allocation34_spill] sm:$0xff] %v9298_v37  ;;  %v9418_v61 = vld [vmem:[%s11991_s0 + $0x34] sm:$0xf0]  ;;  %v9423_v62 = vld [vmem:[%s11991_s0 + $0x38] sm:$0xf0] }
  0x32   : > { %12022 = vst [vmem:[#allocation35_spill] sm:$0xff] %v9313_v40  ;;  %v9428_v63 = vld [vmem:[%s11991_s0 + $0x34] sm:$0xf0]  ;;  %v9453_v32 = vld [vmem:[%s11991_s0 + $0x44] sm:$0xf] }
  0x33   : > { %12023 = vst [vmem:[#allocation36_spill] sm:$0xff] %v9318_v41  ;;  %v9468_v40 = vld [vmem:[%s11991_s0 + $0x40] sm:$0xf]  ;;  %v9473_v41 = vld [vmem:[%s11991_s0 + $0x48] sm:$0xf0] }
  0x34   : > { %12024 = vst [vmem:[#allocation37_spill] sm:$0xff] %v9323_v42  ;;  %v9478_v33 = vld [vmem:[%s11991_s0 + $0x44] sm:$0xf0]  ;;  %v9483_v16 = vld [vmem:[%s11991_s0 + $0x48] sm:$0xf0] }
  0x35   : > { %12025 = vst [vmem:[#allocation38_spill] sm:$0xff] %v9328_v43  ;;  %v9488_v24 = vld [vmem:[%s11991_s0 + $0x44] sm:$0xf0]  ;;  %v9493_v25 = vld [vmem:[%s11991_s0 + $0x48] sm:$0xf0] }
  0x36   : > { %12026 = vst [vmem:[#allocation39_spill] sm:$0xff] %v9333_v44  ;;  %v9508_v17 = vld [vmem:[%s11991_s0 + $0x44] sm:$0xf0]  ;;  %v9513_v0 = vld [vmem:[%s11991_s0 + $0x54] sm:$0xf] }
  0x37   : > { %12027 = vst [vmem:[#allocation40_spill] sm:$0xff] %v9338_v45  ;;  %v9518_v8 = vld [vmem:[%s11991_s0 + $0x50] sm:$0xf]  ;;  %v9523_v9 = vld [vmem:[%s11991_s0 + $0x54] sm:$0xf] }
  0x38   : > { %12028 = vst [vmem:[#allocation41_spill] sm:$0xff] %v9353_v48  ;;  %v9433_v48 = vld [vmem:[%s11991_s0 + $0x44] sm:$0xf]  ;;  %v9528_v1 = vld [vmem:[%s11991_s0 + $0x50] sm:$0xf] }
  0x39   : > { %12029 = vst [vmem:[#allocation42_spill] sm:$0xff] %v9358_v49  ;;  %v9448_v49 = vld [vmem:[%s11991_s0 + $0x40] sm:$0xf]  ;;  %v9613_v34 = vld [vmem:[%s11991_s0 + $0x64] sm:$0xf] }
  0x3a   : > { %12030 = vst [vmem:[#allocation43_spill] sm:$0xff] %v9363_v50  ;;  %v9573_v50 = vld [vmem:[%s11991_s0 + $0x58] sm:$0xf0]  ;;  %v9638_v42 = vld [vmem:[%s11991_s0 + $0x64] sm:$0xf0] }
  0x3b   : > { %12031 = vst [vmem:[#allocation44_spill] sm:$0xff] %v9368_v51  ;;  %v9608_v51 = vld [vmem:[%s11991_s0 + $0x60] sm:$0xf]  ;;  %v9643_v43 = vld [vmem:[%s11991_s0 + $0x68] sm:$0xf0] }
  0x3c   : > { %12032 = vst [vmem:[#allocation45_spill] sm:$0xff] %v9373_v52  ;;  %v9648_v35 = vld [vmem:[%s11991_s0 + $0x64] sm:$0xf0]  ;;  %v9653_v18 = vld [vmem:[%s11991_s0 + $0x68] sm:$0xf0] }
  0x3d   : > { %12033 = vst [vmem:[#allocation46_spill] sm:$0xff] %v9378_v53  ;;  %v9678_v26 = vld [vmem:[%s11991_s0 + $0x70] sm:$0xf]  ;;  %v9683_v27 = vld [vmem:[%s11991_s0 + $0x74] sm:$0xf] }
  0x3e   : > { %12034 = vst [vmem:[#allocation47_spill] sm:$0xff] %v9393_v56  ;;  %v9438_v56 = vld [vmem:[%s11991_s0 + $0x40] sm:$0xf]  ;;  %v9688_v19 = vld [vmem:[%s11991_s0 + $0x70] sm:$0xf] }
  0x3f   : > { %12035 = vst [vmem:[#allocation48_spill] sm:$0xff] %v9398_v57  ;;  %v9443_v57 = vld [vmem:[%s11991_s0 + $0x44] sm:$0xf]  ;;  %v9693_v2 = vld [vmem:[%s11991_s0 + $0x74] sm:$0xf] }
  0x40   : > { %12036 = vst [vmem:[#allocation49_spill] sm:$0xff] %v9403_v58  ;;  %v9598_v58 = vld [vmem:[%s11991_s0 + $0x60] sm:$0xf]  ;;  %v9718_v10 = vld [vmem:[%s11991_s0 + $0x74] sm:$0xf0] }
  0x41   : > { %12037 = vst [vmem:[#allocation50_spill] sm:$0xff] %v9408_v59  ;;  %v9603_v59 = vld [vmem:[%s11991_s0 + $0x64] sm:$0xf]  ;;  %v9723_v11 = vld [vmem:[%s11991_s0 + $0x78] sm:$0xf0] }
  0x42   : > { %12038 = vst [vmem:[#allocation51_spill] sm:$0xff] %v9413_v60  ;;  %v9728_v3 = vld [vmem:[%s11991_s0 + $0x74] sm:$0xf0]  ;;  %v9843_v52 = vld [vmem:[%s11991_s0 + $0x94] sm:$0xf] }
  0x43   : > { %12039 = vst [vmem:[#allocation52_spill] sm:$0xff] %v9418_v61  ;;  %v9848_v60 = vld [vmem:[%s11991_s0 + $0x90] sm:$0xf]  ;;  %v9893_v36 = vld [vmem:[%s11991_s0 + $0x98] sm:$0xf0] }
  0x44   : > { %12040 = vst [vmem:[#allocation53_spill] sm:$0xff] %v9433_v48  ;;  %v9458_v48 = vld [vmem:[%s11991_s0 + $0x40] sm:$0xf]  ;;  %v9933_v20 = vld [vmem:[%s11991_s0 + $0xa4] sm:$0xf] }
  0x45   : > { %12041 = vst [vmem:[#allocation54_spill] sm:$0xff] %v9438_v56  ;;  %v9463_v56 = vld [vmem:[%s11991_s0 + $0x44] sm:$0xf]  ;;  %v9928_v44 = vld [vmem:[%s11991_s0 + $0xa0] sm:$0xf] }
  0x46   : > { %12042 = vst [vmem:[#allocation55_spill] sm:$0xff] %v9443_v57  ;;  %v9533_v57 = vld [vmem:[%s11991_s0 + $0x54] sm:$0xf]  ;;  %v9968_v28 = vld [vmem:[%s11991_s0 + $0xa4] sm:$0xf0] }
  0x47   : > { %12043 = vst [vmem:[#allocation56_spill] sm:$0xff] %v9448_v49  ;;  %v9568_v49 = vld [vmem:[%s11991_s0 + $0x54] sm:$0xf0]  ;;  %v9973_v61 = vld [vmem:[%s11991_s0 + $0xa8] sm:$0xf0] }
  0x48   : > { %12044 = vst [vmem:[#allocation57_spill] sm:$0xff] %v9453_v32  ;;  %v9808_v32 = vld [vmem:[%s11991_s0 + $0x84] sm:$0xf0]  ;;  %v10008_v53 = vld [vmem:[%s11991_s0 + $0xb0] sm:$0xf] }
  0x49   : > { %12045 = vst [vmem:[#allocation58_spill] sm:$0xff] %v9458_v48  ;;  %v10013_v4 = vld [vmem:[%s11991_s0 + $0xb4] sm:$0xf]  ;;  %v10048_v12 = vld [vmem:[%s11991_s0 + $0xb4] sm:$0xf0] }
  0x4a   : > { %12046 = vst [vmem:[#allocation59_spill] sm:$0xff] %v9473_v41  ;;  %v9498_v41 = vld [vmem:[%s11991_s0 + $0x44] sm:$0xf0]  ;;  %v10053_v45 = vld [vmem:[%s11991_s0 + $0xb8] sm:$0xf0] }
  0x4b   : > { %12047 = vst [vmem:[#allocation60_spill] sm:$0xff] %v9478_v33  ;;  %v9503_v33 = vld [vmem:[%s11991_s0 + $0x48] sm:$0xf0]  ;;  %v10088_v37 = vld [vmem:[%s11991_s0 + $0xc0] sm:$0xf] }
  0x4c   : > { %12048 = vst [vmem:[#allocation61_spill] sm:$0xff] %v9483_v16  ;;  %v9558_v16 = vld [vmem:[%s11991_s0 + $0x54] sm:$0xf0]  ;;  %v10133_v29 = vld [vmem:[%s11991_s0 + $0xc8] sm:$0xf0] }
  0x4d   : > { %12049 = vst [vmem:[#allocation62_spill] sm:$0xff] %v9488_v24  ;;  %v9563_v24 = vld [vmem:[%s11991_s0 + $0x58] sm:$0xf0]  ;;  %v10168_v21 = vld [vmem:[%s11991_s0 + $0xd0] sm:$0xf] }
  0x4e   : > { %12050 = vst [vmem:[#allocation63_spill] sm:$0xff] %v9493_v25  ;;  %v9813_v25 = vld [vmem:[%s11991_s0 + $0x88] sm:$0xf0]  ;;  %v10213_v13 = vld [vmem:[%s11991_s0 + $0xd8] sm:$0xf0] }
  0x4f   : > { %12051 = vst [vmem:[#allocation64_spill] sm:$0xff] %v9498_v41  ;;  %v10248_v5 = vld [vmem:[%s11991_s0 + $0xe0] sm:$0xf]  ;;  %v10293_v41 = vld [vmem:[%s11991_s0 + $0xe8] sm:$0xf0] }
  0x50   : > { %12052 = vst [vmem:[#allocation65_spill] sm:$0xff] %v9513_v0  ;;  %v9538_v0 = vld [vmem:[%s11991_s0 + $0x50] sm:$0xf] }
  0x51   : > { %12053 = vst [vmem:[#allocation66_spill] sm:$0xff] %v9518_v8  ;;  %v9543_v8 = vld [vmem:[%s11991_s0 + $0x54] sm:$0xf]  ;;  %v10328_v48 = vld [vmem:[%s11991_s0 + $0xf0] sm:$0xf] }
  0x52   : > { %12054 = vst [vmem:[#allocation67_spill] sm:$0xff] %v9523_v9  ;;  %v9548_v9 = vld [vmem:[%s11991_s0 + $0x50] sm:$0xf] }
  0x53   : > { %12055 = vst [vmem:[#allocation68_spill] sm:$0xff] %v9528_v1  ;;  %v9553_v1 = vld [vmem:[%s11991_s0 + $0x58] sm:$0xf0] }
  0x54   : > { %12056 = vst [vmem:[#allocation69_spill] sm:$0xff] %v9533_v57  ;;  %v9773_v57 = vld [vmem:[%s11991_s0 + $0x84] sm:$0xf] }
  0x55   : > { %12057 = vst [vmem:[#allocation70_spill] sm:$0xff] %v9538_v0  ;;  %v10288_v0 = vld [vmem:[%s11991_s0 + $0xe4] sm:$0xf0] }
  0x56   : > { %12058 = vst [vmem:[#allocation71_spill] sm:$0xff] %v9553_v1  ;;  %v9578_v1 = vld [vmem:[%s11991_s0 + $0x54] sm:$0xf0] }
  0x57   : > { %12059 = vst [vmem:[#allocation72_spill] sm:$0xff] %v9558_v16  ;;  %v9583_v16 = vld [vmem:[%s11991_s0 + $0x58] sm:$0xf0] }
  0x58   : > { %12060 = vst [vmem:[#allocation73_spill] sm:$0xff] %v9563_v24  ;;  %v9588_v24 = vld [vmem:[%s11991_s0 + $0x54] sm:$0xf0] }
  0x59   : > { %12061 = vst [vmem:[#allocation74_spill] sm:$0xff] %v9568_v49  ;;  %v9593_v49 = vld [vmem:[%s11991_s0 + $0x64] sm:$0xf] }
  0x5a   : > { %12062 = vst [vmem:[#allocation75_spill] sm:$0xff] %v9573_v50  ;;  %v9803_v50 = vld [vmem:[%s11991_s0 + $0x88] sm:$0xf0] }
  0x5b   : > { %12063 = vst [vmem:[#allocation76_spill] sm:$0xff] %v9578_v1  ;;  %v10253_v1 = vld [vmem:[%s11991_s0 + $0xe4] sm:$0xf] }
  0x5c   : > { %12064 = vst [vmem:[#allocation77_spill] sm:$0xff] %v9593_v49  ;;  %v9618_v49 = vld [vmem:[%s11991_s0 + $0x60] sm:$0xf] }
  0x5d   : > { %12065 = vst [vmem:[#allocation78_spill] sm:$0xff] %v9598_v58  ;;  %v9623_v58 = vld [vmem:[%s11991_s0 + $0x64] sm:$0xf] }
  0x5e   : > { %12066 = vst [vmem:[#allocation79_spill] sm:$0xff] %v9603_v59  ;;  %v9628_v59 = vld [vmem:[%s11991_s0 + $0x60] sm:$0xf] }
  0x5f   : > { %12067 = vst [vmem:[#allocation80_spill] sm:$0xff] %v9608_v51  ;;  %v9633_v51 = vld [vmem:[%s11991_s0 + $0x68] sm:$0xf0] }
  0x60   : > { %12068 = vst [vmem:[#allocation81_spill] sm:$0xff] %v9613_v34  ;;  %v9763_v34 = vld [vmem:[%s11991_s0 + $0x84] sm:$0xf] }
  0x61   : > { %12069 = vst [vmem:[#allocation82_spill] sm:$0xff] %v9618_v49  ;;  %v10208_v49 = vld [vmem:[%s11991_s0 + $0xd4] sm:$0xf0] }
  0x62   : > { %12070 = vst [vmem:[#allocation83_spill] sm:$0xff] %v9623_v58 }
  0x63   : > { %12071 = vst [vmem:[#allocation84_spill] sm:$0xff] %v9633_v51  ;;  %v9658_v51 = vld [vmem:[%s11991_s0 + $0x64] sm:$0xf0] }
  0x64   : > { %12072 = vst [vmem:[#allocation85_spill] sm:$0xff] %v9638_v42  ;;  %v9663_v42 = vld [vmem:[%s11991_s0 + $0x68] sm:$0xf0] }
  0x65   : > { %12073 = vst [vmem:[#allocation86_spill] sm:$0xff] %v9643_v43  ;;  %v9668_v43 = vld [vmem:[%s11991_s0 + $0x64] sm:$0xf0] }
  0x66   : > { %12074 = vst [vmem:[#allocation87_spill] sm:$0xff] %v9648_v35  ;;  %v9673_v35 = vld [vmem:[%s11991_s0 + $0x74] sm:$0xf] }
  0x67   : > { %12075 = vst [vmem:[#allocation88_spill] sm:$0xff] %v9653_v18  ;;  %v9768_v18 = vld [vmem:[%s11991_s0 + $0x80] sm:$0xf] }
  0x68   : > { %12076 = vst [vmem:[#allocation89_spill] sm:$0xff] %v9658_v51  ;;  %v10173_v51 = vld [vmem:[%s11991_s0 + $0xd4] sm:$0xf] }
  0x69   : > { %12077 = vst [vmem:[#allocation90_spill] sm:$0xff] %v9673_v35  ;;  %v9698_v35 = vld [vmem:[%s11991_s0 + $0x70] sm:$0xf] }
  0x6a   : > { %12078 = vst [vmem:[#allocation91_spill] sm:$0xff] %v9678_v26  ;;  %v9703_v26 = vld [vmem:[%s11991_s0 + $0x74] sm:$0xf] }
  0x6b   : > { %12079 = vst [vmem:[#allocation92_spill] sm:$0xff] %v9683_v27  ;;  %v9708_v27 = vld [vmem:[%s11991_s0 + $0x70] sm:$0xf] }
  0x6c   : > { %12080 = vst [vmem:[#allocation93_spill] sm:$0xff] %v9688_v19  ;;  %v9713_v19 = vld [vmem:[%s11991_s0 + $0x78] sm:$0xf0] }
  0x6d   : > { %12081 = vst [vmem:[#allocation94_spill] sm:$0xff] %v9693_v2  ;;  %v9733_v2 = vld [vmem:[%s11991_s0 + $0x78] sm:$0xf0] }
  0x6e   : > { %12082 = vst [vmem:[#allocation95_spill] sm:$0xff] %v9698_v35  ;;  %v10128_v35 = vld [vmem:[%s11991_s0 + $0xc4] sm:$0xf0] }
  0x6f   : > { %12083 = vst [vmem:[#allocation96_spill] sm:$0xff] %v9703_v26 }
  0x70   : > { %12084 = vst [vmem:[#allocation97_spill] sm:$0xff] %v9708_v27 }
  0x71   : > { %12085 = vst [vmem:[#allocation98_spill] sm:$0xff] %v9713_v19  ;;  %v9738_v19 = vld [vmem:[%s11991_s0 + $0x74] sm:$0xf0] }
  0x72   : > { %12086 = vst [vmem:[#allocation99_spill] sm:$0xff] %v9718_v10  ;;  %v9743_v10 = vld [vmem:[%s11991_s0 + $0x78] sm:$0xf0] }
  0x73   : > { %12087 = vst [vmem:[#allocation100_spill] sm:$0xff] %v9723_v11  ;;  %v9748_v11 = vld [vmem:[%s11991_s0 + $0x74] sm:$0xf0] }
  0x74   : > { %12088 = vst [vmem:[#allocation101_spill] sm:$0xff] %v9728_v3  ;;  %v9753_v3 = vld [vmem:[%s11991_s0 + $0x84] sm:$0xf] }
  0x75   : > { %12089 = vst [vmem:[#allocation102_spill] sm:$0xff] %v9733_v2  ;;  %v9758_v2 = vld [vmem:[%s11991_s0 + $0x80] sm:$0xf] }
  0x76   : > { %12090 = vst [vmem:[#allocation103_spill] sm:$0xff] %v9738_v19  ;;  %v10093_v19 = vld [vmem:[%s11991_s0 + $0xc4] sm:$0xf] }
  0x77   : > { %12091 = vst [vmem:[#allocation104_spill] sm:$0xff] %v9743_v10 }
  0x78   : > { %12092 = vst [vmem:[#allocation105_spill] sm:$0xff] %v9748_v11 }
  0x79   : > { %12093 = vst [vmem:[#allocation106_spill] sm:$0xff] %v9753_v3  ;;  %v9778_v3 = vld [vmem:[%s11991_s0 + $0x80] sm:$0xf] }
  0x7a   : > { %12094 = vst [vmem:[#allocation107_spill] sm:$0xff] %v9758_v2  ;;  %v9783_v2 = vld [vmem:[%s11991_s0 + $0x84] sm:$0xf] }
  0x7b   : > { %12095 = vst [vmem:[#allocation108_spill] sm:$0xff] %v9763_v34  ;;  %v9788_v34 = vld [vmem:[%s11991_s0 + $0x80] sm:$0xf] }
  0x7c   : > { %12096 = vst [vmem:[#allocation109_spill] sm:$0xff] %v9768_v18  ;;  %v9793_v18 = vld [vmem:[%s11991_s0 + $0x88] sm:$0xf0] }
  0x7d   : > { %12097 = vst [vmem:[#allocation110_spill] sm:$0xff] %v9773_v57  ;;  %v9798_v57 = vld [vmem:[%s11991_s0 + $0x84] sm:$0xf0] }
  0x7e   : > { %12098 = vst [vmem:[#allocation111_spill] sm:$0xff] %v9778_v3  ;;  %v9888_v3 = vld [vmem:[%s11991_s0 + $0x94] sm:$0xf0] }
  0x7f   : > { %12099 = vst [vmem:[#allocation112_spill] sm:$0xff] %v9783_v2  ;;  %v10533_v2 = vld [vmem:[%s12221_s19 + $0xe0] sm:$0xff] }
  0x80   : > { %12100 = vst [vmem:[#allocation113_spill] sm:$0xff] %v9788_v34  ;;  %v10548_v34 = vld [vmem:[%s12221_s19 + $0xf8] sm:$0xff] }
  0x81   : > { %12101 = vst [vmem:[#allocation114_spill] sm:$0xff] %v9793_v18  ;;  %v9818_v18 = vld [vmem:[%s11991_s0 + $0x84] sm:$0xf0] }
  0x82   : > { %12102 = vst [vmem:[#allocation115_spill] sm:$0xff] %v9798_v57  ;;  %v9823_v57 = vld [vmem:[%s11991_s0 + $0x88] sm:$0xf0] }
  0x83   : > { %12103 = vst [vmem:[#allocation116_spill] sm:$0xff] %v9803_v50  ;;  %v9828_v50 = vld [vmem:[%s11991_s0 + $0x84] sm:$0xf0] }
  0x84   : > { %12104 = vst [vmem:[#allocation117_spill] sm:$0xff] %v9808_v32  ;;  %v9833_v32 = vld [vmem:[%s11991_s0 + $0x94] sm:$0xf] }
  0x85   : > { %12105 = vst [vmem:[#allocation118_spill] sm:$0xff] %v9813_v25  ;;  %v9838_v25 = vld [vmem:[%s11991_s0 + $0x90] sm:$0xf] }
  0x86   : > { %12106 = vst [vmem:[#allocation119_spill] sm:$0xff] %v9818_v18  ;;  %v9853_v18 = vld [vmem:[%s11991_s0 + $0x94] sm:$0xf] }
  0x87   : > { %12107 = vst [vmem:[#allocation120_spill] sm:$0xff] %v9823_v57  ;;  %v10538_v57 = vld [vmem:[%s12221_s19 + $0xe8] sm:$0xff] }
  0x88   : > { %12108 = vst [vmem:[#allocation121_spill] sm:$0xff] %v9828_v50  ;;  %v10543_v50 = vld [vmem:[%s12221_s19 + $0xf0] sm:$0xff] }
  0x89   : > { %12109 = vst [vmem:[#allocation122_spill] sm:$0xff] %v9833_v32  ;;  %v9858_v32 = vld [vmem:[%s11991_s0 + $0x90] sm:$0xf] }
  0x8a   : > { %12110 = vst [vmem:[#allocation123_spill] sm:$0xff] %v9838_v25  ;;  %v9863_v25 = vld [vmem:[%s11991_s0 + $0x94] sm:$0xf] }
  0x8b   : > { %12111 = vst [vmem:[#allocation124_spill] sm:$0xff] %v9843_v52  ;;  %v9868_v52 = vld [vmem:[%s11991_s0 + $0x90] sm:$0xf] }
  0x8c   : > { %12112 = vst [vmem:[#allocation125_spill] sm:$0xff] %v9848_v60  ;;  %v9873_v60 = vld [vmem:[%s11991_s0 + $0x98] sm:$0xf0] }
  0x8d   : > { %12113 = vst [vmem:[#allocation126_spill] sm:$0xff] %v9853_v18  ;;  %v9878_v18 = vld [vmem:[%s11991_s0 + $0x94] sm:$0xf0] }
  0x8e   : > { %12114 = vst [vmem:[#allocation127_spill] sm:$0xff] %v9858_v32  ;;  %v9883_v32 = vld [vmem:[%s11991_s0 + $0x98] sm:$0xf0] }
  0x8f   : > { %12115 = vst [vmem:[#allocation128_spill] sm:$0xff] %v9863_v25  ;;  %v10513_v25 = vld [vmem:[%s12221_s19 + $0xc0] sm:$0xff] }
  0x90   : > { %12116 = vst [vmem:[#allocation129_spill] sm:$0xff] %v9868_v52  ;;  %v10528_v52 = vld [vmem:[%s12221_s19 + $0xd8] sm:$0xff] }
  0x91   : > { %12117 = vst [vmem:[#allocation130_spill] sm:$0xff] %v9873_v60  ;;  %v9898_v60 = vld [vmem:[%s11991_s0 + $0x94] sm:$0xf0] }
  0x92   : > { %12118 = vst [vmem:[#allocation131_spill] sm:$0xff] %v9878_v18  ;;  %v9903_v18 = vld [vmem:[%s11991_s0 + $0x98] sm:$0xf0] }
  0x93   : > { %12119 = vst [vmem:[#allocation132_spill] sm:$0xff] %v9883_v32  ;;  %v9908_v32 = vld [vmem:[%s11991_s0 + $0x94] sm:$0xf0] }
  0x94   : > { %12120 = vst [vmem:[#allocation133_spill] sm:$0xff] %v9888_v3  ;;  %v9913_v3 = vld [vmem:[%s11991_s0 + $0xa4] sm:$0xf] }
  0x95   : > { %12121 = vst [vmem:[#allocation134_spill] sm:$0xff] %v9893_v36  ;;  %v9918_v36 = vld [vmem:[%s11991_s0 + $0xa0] sm:$0xf] }
  0x96   : > { %12122 = vst [vmem:[#allocation135_spill] sm:$0xff] %v9898_v60  ;;  %v9923_v60 = vld [vmem:[%s11991_s0 + $0xa4] sm:$0xf] }
  0x97   : > { %12123 = vst [vmem:[#allocation136_spill] sm:$0xff] %v9903_v18  ;;  %v10518_v18 = vld [vmem:[%s12221_s19 + $0xc8] sm:$0xff] }
  0x98   : > { %12124 = vst [vmem:[#allocation137_spill] sm:$0xff] %v9908_v32  ;;  %v10523_v32 = vld [vmem:[%s12221_s19 + $0xd0] sm:$0xff] }
  0x99   : > { %12125 = vst [vmem:[#allocation138_spill] sm:$0xff] %v9913_v3  ;;  %v9938_v3 = vld [vmem:[%s11991_s0 + $0xa0] sm:$0xf] }
  0x9a   : > { %12126 = vst [vmem:[#allocation139_spill] sm:$0xff] %v9918_v36  ;;  %v9943_v36 = vld [vmem:[%s11991_s0 + $0xa4] sm:$0xf] }
  0x9b   : > { %12127 = vst [vmem:[#allocation140_spill] sm:$0xff] %v9923_v60  ;;  %v9948_v60 = vld [vmem:[%s11991_s0 + $0xa0] sm:$0xf] }
  0x9c   : > { %12128 = vst [vmem:[#allocation141_spill] sm:$0xff] %v9928_v44  ;;  %v9953_v44 = vld [vmem:[%s11991_s0 + $0xa8] sm:$0xf0] }
  0x9d   : > { %12129 = vst [vmem:[#allocation142_spill] sm:$0xff] %v9933_v20  ;;  %v9958_v20 = vld [vmem:[%s11991_s0 + $0xa4] sm:$0xf0] }
  0x9e   : > { %12130 = vst [vmem:[#allocation143_spill] sm:$0xff] %v9938_v3  ;;  %v9963_v3 = vld [vmem:[%s11991_s0 + $0xa8] sm:$0xf0] }
  0x9f   : > { %12131 = vst [vmem:[#allocation144_spill] sm:$0xff] %v9943_v36  ;;  %v10493_v36 = vld [vmem:[%s12221_s19 + $0xa0] sm:$0xff] }
  0xa0   : > { %12132 = vst [vmem:[#allocation145_spill] sm:$0xff] %v9948_v60  ;;  %v10508_v60 = vld [vmem:[%s12221_s19 + $0xb8] sm:$0xff] }
  0xa1   : > { %12133 = vst [vmem:[#allocation146_spill] sm:$0xff] %v9953_v44  ;;  %v9978_v44 = vld [vmem:[%s11991_s0 + $0xa4] sm:$0xf0] }
  0xa2   : > { %12134 = vst [vmem:[#allocation147_spill] sm:$0xff] %v9958_v20  ;;  %v9983_v20 = vld [vmem:[%s11991_s0 + $0xa8] sm:$0xf0] }
  0xa3   : > { %12135 = vst [vmem:[#allocation148_spill] sm:$0xff] %v9963_v3  ;;  %v9988_v3 = vld [vmem:[%s11991_s0 + $0xa4] sm:$0xf0] }
  0xa4   : > { %12136 = vst [vmem:[#allocation149_spill] sm:$0xff] %v9968_v28  ;;  %v9993_v28 = vld [vmem:[%s11991_s0 + $0xb4] sm:$0xf] }
  0xa5   : > { %12137 = vst [vmem:[#allocation150_spill] sm:$0xff] %v9973_v61  ;;  %v9998_v61 = vld [vmem:[%s11991_s0 + $0xb0] sm:$0xf] }
  0xa6   : > { %12138 = vst [vmem:[#allocation151_spill] sm:$0xff] %v9978_v44  ;;  %v10003_v44 = vld [vmem:[%s11991_s0 + $0xb4] sm:$0xf] }
  0xa7   : > { %12139 = vst [vmem:[#allocation152_spill] sm:$0xff] %v9983_v20  ;;  %v10498_v20 = vld [vmem:[%s12221_s19 + $0xa8] sm:$0xff] }
  0xa8   : > { %12140 = vst [vmem:[#allocation153_spill] sm:$0xff] %v9988_v3  ;;  %v10503_v3 = vld [vmem:[%s12221_s19 + $0xb0] sm:$0xff] }
  0xa9   : > { %12141 = vst [vmem:[#allocation154_spill] sm:$0xff] %v9993_v28  ;;  %v10018_v28 = vld [vmem:[%s11991_s0 + $0xb0] sm:$0xf] }
  0xaa   : > { %12142 = vst [vmem:[#allocation155_spill] sm:$0xff] %v9998_v61  ;;  %v10023_v61 = vld [vmem:[%s11991_s0 + $0xb4] sm:$0xf] }
  0xab   : > { %12143 = vst [vmem:[#allocation156_spill] sm:$0xff] %v10003_v44  ;;  %v10028_v44 = vld [vmem:[%s11991_s0 + $0xb0] sm:$0xf] }
  0xac   : > { %12144 = vst [vmem:[#allocation157_spill] sm:$0xff] %v10008_v53  ;;  %v10033_v53 = vld [vmem:[%s11991_s0 + $0xb8] sm:$0xf0] }
  0xad   : > { %12145 = vst [vmem:[#allocation158_spill] sm:$0xff] %v10013_v4  ;;  %v10038_v4 = vld [vmem:[%s11991_s0 + $0xb4] sm:$0xf0] }
  0xae   : > { %12146 = vst [vmem:[#allocation159_spill] sm:$0xff] %v10018_v28  ;;  %v10043_v28 = vld [vmem:[%s11991_s0 + $0xb8] sm:$0xf0] }
  0xaf   : > { %12147 = vst [vmem:[#allocation160_spill] sm:$0xff] %v10023_v61  ;;  %v10473_v61 = vld [vmem:[%s12221_s19 + $0x80] sm:$0xff] }
  0xb0   : > { %12148 = vst [vmem:[#allocation161_spill] sm:$0xff] %v10028_v44  ;;  %v10488_v44 = vld [vmem:[%s12221_s19 + $0x98] sm:$0xff] }
  0xb1   : > { %12149 = vst [vmem:[#allocation162_spill] sm:$0xff] %v10033_v53  ;;  %v10058_v53 = vld [vmem:[%s11991_s0 + $0xb4] sm:$0xf0] }
  0xb2   : > { %12150 = vst [vmem:[#allocation163_spill] sm:$0xff] %v10038_v4  ;;  %v10063_v4 = vld [vmem:[%s11991_s0 + $0xb8] sm:$0xf0] }
  0xb3   : > { %12151 = vst [vmem:[#allocation164_spill] sm:$0xff] %v10043_v28  ;;  %v10068_v28 = vld [vmem:[%s11991_s0 + $0xb4] sm:$0xf0] }
  0xb4   : > { %12152 = vst [vmem:[#allocation165_spill] sm:$0xff] %v10048_v12  ;;  %v10073_v12 = vld [vmem:[%s11991_s0 + $0xc4] sm:$0xf] }
  0xb5   : > { %12153 = vst [vmem:[#allocation166_spill] sm:$0xff] %v10053_v45  ;;  %v10078_v45 = vld [vmem:[%s11991_s0 + $0xc0] sm:$0xf] }
  0xb6   : > { %12154 = vst [vmem:[#allocation167_spill] sm:$0xff] %v10058_v53  ;;  %v10083_v53 = vld [vmem:[%s11991_s0 + $0xc4] sm:$0xf] }
  0xb7   : > { %12155 = vst [vmem:[#allocation168_spill] sm:$0xff] %v10063_v4  ;;  %v10478_v4 = vld [vmem:[%s12221_s19 + $0x88] sm:$0xff] }
  0xb8   : > { %12156 = vst [vmem:[#allocation169_spill] sm:$0xff] %v10068_v28  ;;  %v10483_v28 = vld [vmem:[%s12221_s19 + $0x90] sm:$0xff] }
  0xb9   : > { %12157 = vst [vmem:[#allocation170_spill] sm:$0xff] %v10073_v12  ;;  %v10098_v12 = vld [vmem:[%s11991_s0 + $0xc0] sm:$0xf] }
  0xba   : > { %12158 = vst [vmem:[#allocation171_spill] sm:$0xff] %v10078_v45  ;;  %v10103_v45 = vld [vmem:[%s11991_s0 + $0xc4] sm:$0xf] }
  0xbb   : > { %12159 = vst [vmem:[#allocation172_spill] sm:$0xff] %v10083_v53  ;;  %v10108_v53 = vld [vmem:[%s11991_s0 + $0xc0] sm:$0xf] }
  0xbc   : > { %12160 = vst [vmem:[#allocation173_spill] sm:$0xff] %v10088_v37  ;;  %v10113_v37 = vld [vmem:[%s11991_s0 + $0xc8] sm:$0xf0] }
  0xbd   : > { %12161 = vst [vmem:[#allocation174_spill] sm:$0xff] %v10093_v19  ;;  %v10118_v19 = vld [vmem:[%s11991_s0 + $0xc4] sm:$0xf0] }
  0xbe   : > { %12162 = vst [vmem:[#allocation175_spill] sm:$0xff] %v10098_v12  ;;  %v10123_v12 = vld [vmem:[%s11991_s0 + $0xc8] sm:$0xf0] }
  0xbf   : > { %12163 = vst [vmem:[#allocation176_spill] sm:$0xff] %v10103_v45  ;;  %v10453_v45 = vld [vmem:[%s12221_s19 + $0x60] sm:$0xff] }
  0xc0   : > { %12164 = vst [vmem:[#allocation177_spill] sm:$0xff] %v10108_v53  ;;  %v10468_v53 = vld [vmem:[%s12221_s19 + $0x78] sm:$0xff] }
  0xc1   : > { %12165 = vst [vmem:[#allocation178_spill] sm:$0xff] %v10113_v37  ;;  %v10138_v37 = vld [vmem:[%s11991_s0 + $0xc4] sm:$0xf0] }
  0xc2   : > { %12166 = vst [vmem:[#allocation179_spill] sm:$0xff] %v10118_v19  ;;  %v10143_v19 = vld [vmem:[%s11991_s0 + $0xc8] sm:$0xf0] }
  0xc3   : > { %12167 = vst [vmem:[#allocation180_spill] sm:$0xff] %v10123_v12  ;;  %v10148_v12 = vld [vmem:[%s11991_s0 + $0xc4] sm:$0xf0] }
  0xc4   : > { %12168 = vst [vmem:[#allocation181_spill] sm:$0xff] %v10128_v35  ;;  %v10153_v35 = vld [vmem:[%s11991_s0 + $0xd4] sm:$0xf] }
  0xc5   : > { %12169 = vst [vmem:[#allocation182_spill] sm:$0xff] %v10133_v29  ;;  %v10158_v29 = vld [vmem:[%s11991_s0 + $0xd0] sm:$0xf] }
  0xc6   : > { %12170 = vst [vmem:[#allocation183_spill] sm:$0xff] %v10138_v37  ;;  %v10163_v37 = vld [vmem:[%s11991_s0 + $0xd4] sm:$0xf] }
  0xc7   : > { %12171 = vst [vmem:[#allocation184_spill] sm:$0xff] %v10143_v19  ;;  %v10458_v19 = vld [vmem:[%s12221_s19 + $0x68] sm:$0xff] }
  0xc8   : > { %12172 = vst [vmem:[#allocation185_spill] sm:$0xff] %v10148_v12  ;;  %v10463_v12 = vld [vmem:[%s12221_s19 + $0x70] sm:$0xff] }
  0xc9   : > { %12173 = vst [vmem:[#allocation186_spill] sm:$0xff] %v10153_v35  ;;  %v10178_v35 = vld [vmem:[%s11991_s0 + $0xd0] sm:$0xf] }
  0xca   : > { %12174 = vst [vmem:[#allocation187_spill] sm:$0xff] %v10158_v29  ;;  %v10183_v29 = vld [vmem:[%s11991_s0 + $0xd4] sm:$0xf] }
  0xcb   : > { %12175 = vst [vmem:[#allocation188_spill] sm:$0xff] %v10163_v37  ;;  %v10188_v37 = vld [vmem:[%s11991_s0 + $0xd0] sm:$0xf] }
  0xcc   : > { %12176 = vst [vmem:[#allocation189_spill] sm:$0xff] %v10168_v21  ;;  %v10193_v21 = vld [vmem:[%s11991_s0 + $0xd8] sm:$0xf0] }
  0xcd   : > { %12177 = vst [vmem:[#allocation190_spill] sm:$0xff] %v10173_v51  ;;  %v10198_v51 = vld [vmem:[%s11991_s0 + $0xd4] sm:$0xf0] }
  0xce   : > { %12178 = vst [vmem:[#allocation191_spill] sm:$0xff] %v10178_v35  ;;  %v10203_v35 = vld [vmem:[%s11991_s0 + $0xd8] sm:$0xf0] }
  0xcf   : > { %12179 = vst [vmem:[#allocation192_spill] sm:$0xff] %v10183_v29  ;;  %v10433_v29 = vld [vmem:[%s12221_s19 + $0x40] sm:$0xff] }
  0xd0   : > { %12180 = vst [vmem:[#allocation193_spill] sm:$0xff] %v10188_v37  ;;  %v10448_v37 = vld [vmem:[%s12221_s19 + $0x58] sm:$0xff] }
  0xd1   : > { %12181 = vst [vmem:[#allocation194_spill] sm:$0xff] %v10193_v21  ;;  %v10218_v21 = vld [vmem:[%s11991_s0 + $0xd4] sm:$0xf0] }
  0xd2   : > { %12182 = vst [vmem:[#allocation195_spill] sm:$0xff] %v10198_v51  ;;  %v10223_v51 = vld [vmem:[%s11991_s0 + $0xd8] sm:$0xf0] }
  0xd3   : > { %12183 = vst [vmem:[#allocation196_spill] sm:$0xff] %v10203_v35  ;;  %v10228_v35 = vld [vmem:[%s11991_s0 + $0xd4] sm:$0xf0] }
  0xd4   : > { %12184 = vst [vmem:[#allocation197_spill] sm:$0xff] %v10208_v49  ;;  %v10233_v49 = vld [vmem:[%s11991_s0 + $0xe4] sm:$0xf] }
  0xd5   : > { %12185 = vst [vmem:[#allocation198_spill] sm:$0xff] %v10213_v13  ;;  %v10238_v13 = vld [vmem:[%s11991_s0 + $0xe0] sm:$0xf] }
  0xd6   : > { %12186 = vst [vmem:[#allocation199_spill] sm:$0xff] %v10218_v21  ;;  %v10243_v21 = vld [vmem:[%s11991_s0 + $0xe4] sm:$0xf] }
  0xd7   : > { %12187 = vst [vmem:[#allocation200_spill] sm:$0xff] %v10223_v51  ;;  %v10438_v51 = vld [vmem:[%s12221_s19 + $0x48] sm:$0xff] }
  0xd8   : > { %12188 = vst [vmem:[#allocation201_spill] sm:$0xff] %v10228_v35  ;;  %v10443_v35 = vld [vmem:[%s12221_s19 + $0x50] sm:$0xff] }
  0xd9   : > { %12189 = vst [vmem:[#allocation202_spill] sm:$0xff] %v10233_v49  ;;  %v10258_v49 = vld [vmem:[%s11991_s0 + $0xe0] sm:$0xf] }
  0xda   : > { %12190 = vst [vmem:[#allocation203_spill] sm:$0xff] %v10238_v13  ;;  %v10263_v13 = vld [vmem:[%s11991_s0 + $0xe4] sm:$0xf] }
  0xdb   : > { %12191 = vst [vmem:[#allocation204_spill] sm:$0xff] %v10243_v21  ;;  %v10268_v21 = vld [vmem:[%s11991_s0 + $0xe0] sm:$0xf] }
  0xdc   : > { %12192 = vst [vmem:[#allocation205_spill] sm:$0xff] %v10248_v5  ;;  %v10273_v5 = vld [vmem:[%s11991_s0 + $0xe8] sm:$0xf0] }
  0xdd   : > { %12193 = vst [vmem:[#allocation206_spill] sm:$0xff] %v10253_v1  ;;  %v10278_v1 = vld [vmem:[%s11991_s0 + $0xe4] sm:$0xf0] }
  0xde   : > { %12194 = vst [vmem:[#allocation207_spill] sm:$0xff] %v10258_v49  ;;  %v10283_v49 = vld [vmem:[%s11991_s0 + $0xe8] sm:$0xf0] }
  0xdf   : > { %12195 = vst [vmem:[#allocation208_spill] sm:$0xff] %v10263_v13  ;;  %v10333_v13 = vld [vmem:[%s11991_s0 + $0xf4] sm:$0xf] }
  0xe0   : > { %12196 = vst [vmem:[#allocation209_spill] sm:$0xff] %v10268_v21  ;;  %v10428_v21 = vld [vmem:[%s12221_s19 + $0x38] sm:$0xff] }
  0xe1   : > { %12197 = vst [vmem:[#allocation210_spill] sm:$0xff] %v10273_v5  ;;  %v10298_v5 = vld [vmem:[%s11991_s0 + $0xe4] sm:$0xf0] }
  0xe2   : > { %12198 = vst [vmem:[#allocation211_spill] sm:$0xff] %v10278_v1  ;;  %v10303_v1 = vld [vmem:[%s11991_s0 + $0xe8] sm:$0xf0] }
  0xe3   : > { %12199 = vst [vmem:[#allocation212_spill] sm:$0xff] %v10283_v49  ;;  %v10308_v49 = vld [vmem:[%s11991_s0 + $0xe4] sm:$0xf0] }
  0xe4   : > { %12200 = vst [vmem:[#allocation213_spill] sm:$0xff] %v10288_v0  ;;  %v10313_v0 = vld [vmem:[%s11991_s0 + $0xf4] sm:$0xf] }
  0xe5   : > { %12201 = vst [vmem:[#allocation214_spill] sm:$0xff] %v10293_v41  ;;  %v10318_v41 = vld [vmem:[%s11991_s0 + $0xf0] sm:$0xf] }
  0xe6   : > { %12202 = vst [vmem:[#allocation215_spill] sm:$0xff] %v10298_v5  ;;  %v10323_v5 = vld [vmem:[%s11991_s0 + $0xf4] sm:$0xf] }
  0xe7   : > { %12203 = vst [vmem:[#allocation216_spill] sm:$0xff] %v10303_v1  ;;  %v10418_v1 = vld [vmem:[%s12221_s19 + $0x28] sm:$0xff] }
  0xe8   : > { %12204 = vst [vmem:[#allocation217_spill] sm:$0xff] %v10308_v49  ;;  %v10423_v49 = vld [vmem:[%s12221_s19 + $0x30] sm:$0xff] }
  0xe9   : > { %12205 = vst [vmem:[#allocation218_spill] sm:$0xff] %v10313_v0  ;;  %v10338_v0 = vld [vmem:[%s11991_s0 + $0xf0] sm:$0xf] }
  0xea   : > { %12206 = vst [vmem:[#allocation219_spill] sm:$0xff] %v10318_v41  ;;  %v10343_v41 = vld [vmem:[%s11991_s0 + $0xf4] sm:$0xf] }
  0xeb   : > { %12207 = vst [vmem:[#allocation220_spill] sm:$0xff] %v10323_v5  ;;  %v10348_v5 = vld [vmem:[%s11991_s0 + $0xf0] sm:$0xf] }
  0xec   : > { %12208 = vst [vmem:[#allocation221_spill] sm:$0xff] %v10328_v48  ;;  %v10353_v48 = vld [vmem:[%s11991_s0 + $0xf8] sm:$0xf0] }
  0xed   : > { %12209 = vst [vmem:[#allocation222_spill] sm:$0xff] %v10333_v13  ;;  %v10358_v13 = vld [vmem:[%s11991_s0 + $0xf4] sm:$0xf0] }
  0xee   : > { %12210 = vst [vmem:[#allocation223_spill] sm:$0xff] %v10338_v0  ;;  %v10363_v0 = vld [vmem:[%s11991_s0 + $0xf8] sm:$0xf0] }
  0xef   : > { %12211 = vst [vmem:[#allocation224_spill] sm:$0xff] %v10343_v41  ;;  %v10368_v41 = vld [vmem:[%s11991_s0 + $0xf4] sm:$0xf0] }
  0xf0   : > { %12212 = vst [vmem:[#allocation225_spill] sm:$0xff] %v10348_v5  ;;  %v10373_v5 = vld [vmem:[%s11991_s0 + $0xf8] sm:$0xf0] }
  0xf1   : > { %12213 = vst [vmem:[#allocation226_spill] sm:$0xff] %v10353_v48  ;;  %v10378_v48 = vld [vmem:[%s11991_s0 + $0xf4] sm:$0xf0] }
  0xf2   : > { %12214 = vst [vmem:[#allocation227_spill] sm:$0xff] %v10358_v13  ;;  %v10383_v13 = vld [vmem:[%s11991_s0 + $0xf8] sm:$0xf0] }
  0xf3   : > { %12215 = vst [vmem:[#allocation228_spill] sm:$0xff] %v10363_v0  ;;  %v10388_v0 = vld [vmem:[%s11991_s0 + $0xf4] sm:$0xf0] }
  0xf4   : > { %12216 = vst [vmem:[#allocation229_spill] sm:$0xff] %v10368_v41  ;;  %v10393_v41 = vld [vmem:[%s12221_s19] sm:$0xff] }
  0xf5   : > { %12217 = vst [vmem:[#allocation230_spill] sm:$0xff] %v10373_v5  ;;  %v10398_v5 = vld [vmem:[%s12221_s19 + $0x8] sm:$0xff] }
  0xf6   : > { %12218 = vst [vmem:[#allocation231_spill] sm:$0xff] %v10378_v48  ;;  %v10403_v48 = vld [vmem:[%s12221_s19 + $0x10] sm:$0xff] }
  0xf7   : > { %12219 = vst [vmem:[#allocation232_spill] sm:$0xff] %v10383_v13  ;;  %v10408_v13 = vld [vmem:[%s12221_s19 + $0x18] sm:$0xff] }
  0xf8   : > { %12220 = vst [vmem:[#allocation233_spill] sm:$0xff] %v10388_v0  ;;  %v10413_v0 = vld [vmem:[%s12221_s19 + $0x20] sm:$0xff] }
  0xf9   : > { %12222 = vst [vmem:[#allocation234_spill] sm:$0xff] %v10403_v48 }
  0xfa   : > { %12223 = vst [vmem:[#allocation235_spill] sm:$0xff] %v10513_v25 }
  0xfb   : > { %12224 = vst [vmem:[#allocation236_spill] sm:$0xff] %v10518_v18 }
  0xfc   : > { %12225 = vst [vmem:[#allocation237_spill] sm:$0xff] %v10523_v32 }
  0xfd   : > { %12226 = vst [vmem:[#allocation238_spill] sm:$0xff] %v10528_v52  ;;  %626 = sbr.rel (%p6793_p4) target bundleno = 825 (0x339), region = 92 }
  0xfe   : > { %12227 = vst [vmem:[#allocation239_spill] sm:$0xff] %v10533_v2 }
  0xff   : > { %12228 = vst [vmem:[#allocation240_spill] sm:$0xff] %v10538_v57 }
 0x100   : > { %12229 = vst [vmem:[#allocation241_spill] sm:$0xff] %v10543_v50 }
 0x101   : > { %12230 = vst [vmem:[#allocation242_spill] sm:$0xff] %v10548_v34 }
 0x102   : > { %v8312_v26 = vld [vmem:[%s11961_s2 + $0x38] sm:$0xff]  ;;  %v8996_v11 = vmov 0   ;;  %v8311_v27 = vld [vmem:[%s11961_s2 + $0x30] sm:$0xff] }
 0x103   : > { %v8320_v10 = vld [vmem:[%s11961_s2 + $0x78] sm:$0xff]  ;;  %8954 = vset.pattern.permute.xlu1 %v8996_v11  ;;  %8953 = vset.pattern.permute.xlu0 %v8996_v11  ;;  %v8319_v58 = vld [vmem:[%s11961_s2 + $0x70] sm:$0xff] }
 0x104   : > { %1139 = vperm.xlu1 %8954, %v10403_v48   ;;  %1129 = vperm.xlu0 %8953, %v10393_v41   ;;  %v8310_v48 = vld [vmem:[%s11961_s2 + $0x28] sm:$0xff] }
 0x105   : > { %949 = vmatpush.bf16.msra.mxu0 %v8312_v26  ;;  %1038 = vmatpush.bf16.msra.mxu1 %v8320_v10  ;;  %v8318_v10 = vld [vmem:[%s11961_s2 + $0x68] sm:$0xff]  ;;  %v8317_v26 = vld [vmem:[%s11961_s2 + $0x60] sm:$0xff] }
 0x106   : > { %8955 = vset.pattern.permute.xlu2 %v8996_v11  ;;  %v8309_v11 = vld [vmem:[%s11961_s2 + $0x20] sm:$0xff] }
 0x107   : > { %1149 = vperm.xlu2 %8955, %v10413_v0  }
 0x109   : > { %950 = vmatpush.bf16.msra.mxu0 %v8311_v27  ;;  %1039 = vmatpush.bf16.msra.mxu1 %v8319_v58  ;;  %v8308_v27 = vld [vmem:[%s11961_s2 + $0x18] sm:$0xff]  ;;  %v8307_v58 = vld [vmem:[%s11961_s2 + $0x10] sm:$0xff] }
 0x10c   : > { %1144 = vperm.xlu1 %8954, %v10408_v13   ;;  %1134 = vperm.xlu0 %8953, %v10398_v5  }
 0x10d   : > { %951 = vmatpush.bf16.msra.mxu0 %v8310_v48  ;;  %1040 = vmatpush.bf16.msra.mxu1 %v8318_v10  ;;  %v8316_v48 = vld [vmem:[%s11961_s2 + $0x58] sm:$0xff]  ;;  %v8315_v10 = vld [vmem:[%s11961_s2 + $0x50] sm:$0xff] }
 0x10f   : > { %1154 = vperm.xlu2 %8955, %v10418_v1  }
 0x111   : > { %952 = vmatpush.bf16.msra.mxu0 %v8309_v11  ;;  %1041 = vmatpush.bf16.msra.mxu1 %v8317_v26  ;;  %v8306_v11 = vld [vmem:[%s11961_s2 + $0x8] sm:$0xff] }
 0x112   : > { %v8314_v26 = vld [vmem:[%s11961_s2 + $0x48] sm:$0xff] }
 0x114   : > { %1164 = vperm.xlu1 %8954, %v10428_v21   ;;  %1159 = vperm.xlu0 %8953, %v10423_v49  }
 0x115   : > { %953 = vmatpush.bf16.msra.mxu0 %v8308_v27  ;;  %1042 = vmatpush.bf16.msra.mxu1 %v8316_v48  ;;  %v8305_v27 = vld [vmem:[%s11961_s2] sm:$0xff] }
 0x116   : > { %v8313_v48 = vld [vmem:[%s11961_s2 + $0x40] sm:$0xff] }
 0x117   : > { %1169 = vperm.xlu2 %8955, %v10433_v29  }
 0x119   : > { %954 = vmatpush.bf16.msra.mxu0 %v8307_v58  ;;  %1043 = vmatpush.bf16.msra.mxu1 %v8315_v10  ;;  %v6797_v58 = vor.u32 %v9188_v15, %v9148_v7  ;;  %v6801_v10 = vor.u32 %v9143_v6, %v9183_v14  ;;  %v6805_v7 = vor.u32 %v9268_v31, %v9228_v23 }
 0x11a   : > { %v6809_v6 = vor.u32 %v9223_v22, %v9263_v30  ;;  %v6813_v14 = vor.u32 %v9348_v47, %v9308_v39  ;;  %v6817_v15 = vor.u32 %v9303_v38, %v9343_v46  ;;  %v6821_v22 = vor.u32 %v9428_v63, %v9388_v55  ;;  %v8344_v38 = vld [vmem:[%s11962_s3 + $0x38] sm:$0xff]  ;;  %v8343_v39 = vld [vmem:[%s11962_s3 + $0x30] sm:$0xff]  ;;  %v8342_v46 = vld [vmem:[%s11962_s3 + $0x28] sm:$0xff] }
 0x11b   : > { %v6825_v23 = vor.u32 %v9383_v54, %v9423_v62  ;;  %v6829_v30 = vor.u32 %v9508_v17, %v9468_v40  ;;  %v6833_v31 = vor.u32 %v9463_v56, %v9503_v33  ;;  %1675 = vmatpush.bf16.msra.mxu2 %v8344_v38  ;;  %v6837_v17 = vor.u32 %v9588_v24, %v9548_v9  ;;  %v8352_v40 = vld [vmem:[%s11962_s3 + $0x78] sm:$0xff]  ;;  %v8341_v47 = vld [vmem:[%s11962_s3 + $0x20] sm:$0xff]  ;;  %v8351_v54 = vld [vmem:[%s11962_s3 + $0x70] sm:$0xff] }
 0x11c   : > { %1179 = vperm.xlu1 %8954, %v10443_v35   ;;  %1174 = vperm.xlu0 %8953, %v10438_v51   ;;  %v6841_v33 = vor.u32 %v9543_v8, %v9583_v16  ;;  %v8340_v8 = vld [vmem:[%s11962_s3 + $0x18] sm:$0xff]  ;;  %v8350_v9 = vld [vmem:[%s11962_s3 + $0x68] sm:$0xff]  ;;  %v8339_v16 = vld [vmem:[%s11962_s3 + $0x10] sm:$0xff]  ;;  %v6845_v55 = vor.u32 %v9668_v43, %v9628_v59 }
 0x11d   : > { %955 = vmatpush.bf16.msra.mxu0 %v8306_v11  ;;  %1044 = vmatpush.bf16.msra.mxu1 %v8314_v26  ;;  %v8349_v24 = vld [vmem:[%s11962_s3 + $0x60] sm:$0xff]  ;;  %v12231_v56 = vld [vmem:[#allocation83_spill] sm:$0xff]  ;;  %v8348_v11 = vld [vmem:[%s11962_s3 + $0x58] sm:$0xff] }
 0x11e   : > { %1764 = vmatpush.bf16.msra.mxu3 %v8352_v40  ;;  %v6849_v62 = vor.u32 %v12231_v56, %v9663_v42  ;;  %v8338_v63 = vld [vmem:[%s11962_s3 + $0x8] sm:$0xff]  ;;  %v8337_v43 = vld [vmem:[%s11962_s3] sm:$0xff]  ;;  %v8347_v42 = vld [vmem:[%s11962_s3 + $0x50] sm:$0xff] }
 0x11f   : > { %1184 = vperm.xlu2 %8955, %v10448_v37   ;;  %1676 = vmatpush.bf16.msra.mxu2 %v8343_v39  ;;  %v8321_v59 = vld [vmem:[%s11961_s2] sm:$0xff]  ;;  %v8346_v26 = vld [vmem:[%s11962_s3 + $0x48] sm:$0xff]  ;;  %v12238_v38 = vld [vmem:[#allocation120_spill] sm:$0xff] }
 0x120   : > { %v12239_v39 = vld [vmem:[#allocation112_spill] sm:$0xff] }
 0x121   : > { %956 = vmatpush.bf16.msra.mxu0 %v8305_v27  ;;  %1045 = vmatpush.bf16.msra.mxu1 %v8313_v48  ;;  %v8345_v27 = vld [vmem:[%s11962_s3 + $0x40] sm:$0xff]  ;;  %v12232_v48 = vld [vmem:[#allocation97_spill] sm:$0xff] }
 0x122   : > { %1765 = vmatpush.bf16.msra.mxu3 %v8351_v54 }
 0x123   : > { %1677 = vmatpush.bf16.msra.mxu2 %v8342_v46  ;;  %v6865_v46 = vor.u32 %v12239_v39, %v12238_v38 }
 0x124   : > { %1194 = vperm.xlu1 %8954, %v10458_v19   ;;  %1189 = vperm.xlu0 %8953, %v10453_v45  }
 0x125   : > { %957 = vmatmul.bf16.vlgmr.msra.gmra.mxu0 %v6797_v58  ;;  %1046 = vmatmul.bf16.vlgmr.msra.gmra.mxu1 %v6801_v10  ;;  %v12233_v58 = vld [vmem:[#allocation105_spill] sm:$0xff] }
 0x126   : > { %1766 = vmatpush.bf16.msra.mxu3 %v8350_v9  ;;  %v6853_v10 = vor.u32 %v12233_v58, %v12232_v48  ;;  %v8323_v9 = vld [vmem:[%s11961_s2 + $0x10] sm:$0xff] }
 0x127   : > { %1199 = vperm.xlu2 %8955, %v10463_v12   ;;  %1678 = vmatpush.bf16.msra.mxu2 %v8341_v47 }
 0x12a   : > { %1767 = vmatpush.bf16.msra.mxu3 %v8349_v24 }
 0x12b   : > { %1679 = vmatpush.bf16.msra.mxu2 %v8340_v8 }
 0x12c   : > { %1209 = vperm.xlu1 %8954, %v10473_v61   ;;  %1204 = vperm.xlu0 %8953, %v10468_v53  }
 0x12e   : > { %1768 = vmatpush.bf16.msra.mxu3 %v8348_v11  ;;  %v12240_v11 = vld [vmem:[#allocation129_spill] sm:$0xff] }
 0x12f   : > { %1214 = vperm.xlu2 %8955, %v10478_v4   ;;  %1680 = vmatpush.bf16.msra.mxu2 %v8339_v16 }
 0x132   : > { %1769 = vmatpush.bf16.msra.mxu3 %v8347_v42 }
 0x133   : > { %1681 = vmatpush.bf16.msra.mxu2 %v8338_v63 }
 0x134   : > { %1224 = vperm.xlu1 %8954, %v10488_v44   ;;  %1219 = vperm.xlu0 %8953, %v10483_v28  }
 0x135   : > { %962 = vmatmul.bf16.gmra.mxu0 %v6805_v7  ;;  %1051 = vmatmul.bf16.gmra.mxu1 %v6809_v6  ;;  %v12234_v7 = vld [vmem:[#allocation104_spill] sm:$0xff] }
 0x136   : > { %1770 = vmatpush.bf16.msra.mxu3 %v8346_v26  ;;  %v12235_v6 = vld [vmem:[#allocation96_spill] sm:$0xff] }
 0x137   : > { %1229 = vperm.xlu2 %8955, %v10493_v36   ;;  %1682 = vmatpush.bf16.msra.mxu2 %v8337_v43  ;;  %v12241_v43 = vld [vmem:[#allocation137_spill] sm:$0xff]  ;;  %v12243_v26 = vld [vmem:[#allocation128_spill] sm:$0xff] }
 0x138   : > { %v6869_v42 = vor.u32 %v12241_v43, %v12240_v11 }
 0x13a   : > { %1683 = vmatmul.bf16.vlgmr.msra.gmra.mxu2 %v8321_v59  ;;  %1771 = vmatpush.bf16.msra.mxu3 %v8345_v27  ;;  %v12242_v59 = vld [vmem:[#allocation136_spill] sm:$0xff] }
 0x13b   : > { %v6873_v27 = vor.u32 %v12243_v26, %v12242_v59  ;;  %v8325_v26 = vld [vmem:[%s11961_s2 + $0x20] sm:$0xff] }
 0x13c   : > { %1239 = vperm.xlu1 %8954, %v10503_v3   ;;  %1234 = vperm.xlu0 %8953, %v10498_v20  }
 0x13f   : > { %1244 = vperm.xlu2 %8955, %v10508_v60  }
 0x144   : > { %1254 = vperm.xlu1 %8954, %v10518_v18   ;;  %1249 = vperm.xlu0 %8953, %v10513_v25  }
 0x145   : > { %967 = vmatmul.bf16.gmra.mxu0 %v6813_v14  ;;  %1056 = vmatmul.bf16.gmra.mxu1 %v6817_v15  ;;  %v6857_v14 = vor.u32 %v12235_v6, %v12234_v7  ;;  %v8322_v15 = vld [vmem:[%s11961_s2 + $0x8] sm:$0xff] }
 0x147   : > { %1259 = vperm.xlu2 %8955, %v10523_v32  }
 0x14a   : > { %1688 = vmatmul.bf16.gmra.mxu2 %v8322_v15 }
 0x14c   : > { %1269 = vperm.xlu1 %8954, %v10533_v2   ;;  %1264 = vperm.xlu0 %8953, %v10528_v52  }
 0x14f   : > { %1274 = vperm.xlu2 %8955, %v10538_v57  }
 0x154   : > { %1284 = vperm.xlu1 %8954, %v10548_v34   ;;  %1279 = vperm.xlu0 %8953, %v10543_v50  }
 0x155   : > { %972 = vmatmul.bf16.gmra.mxu0 %v6821_v22  ;;  %1061 = vmatmul.bf16.gmra.mxu1 %v6825_v23  ;;  %v12236_v23 = vld [vmem:[#allocation113_spill] sm:$0xff] }
 0x15a   : > { %1693 = vmatmul.bf16.gmra.mxu2 %v8323_v9  ;;  %v12247_v9 = vld [vmem:[#allocation144_spill] sm:$0xff] }
 0x165   : > { %977 = vmatmul.bf16.gmra.mxu0 %v6829_v30  ;;  %1066 = vmatmul.bf16.gmra.mxu1 %v6833_v31  ;;  %v12237_v30 = vld [vmem:[#allocation121_spill] sm:$0xff] }
 0x166   : > { %v6861_v31 = vor.u32 %v12237_v30, %v12236_v23  ;;  %v8324_v30 = vld [vmem:[%s11961_s2 + $0x18] sm:$0xff] }
 0x16a   : > { %1698 = vmatmul.bf16.gmra.mxu2 %v8324_v30 }
 0x175   : > { %982 = vmatmul.bf16.gmra.mxu0 %v6837_v17  ;;  %1071 = vmatmul.bf16.gmra.mxu1 %v6841_v33 }
 0x176   : > { %v1130_v22 = vpop.permute.xlu0 %1129  ;;  %v1140_v63 = vpop.permute.xlu1 %1139 }
 0x17a   : > { %1703 = vmatmul.bf16.gmra.mxu2 %v8325_v26 }
 0x17e   : > { %v1135_v24 = vpop.permute.xlu0 %1134  ;;  %v1145_v38 = vpop.permute.xlu1 %1144 }
 0x185   : > { %987 = vmatmul.bf16.gmra.mxu0 %v6845_v55  ;;  %1076 = vmatmul.bf16.gmra.mxu1 %v6849_v62 }
 0x195   : > { %992 = vmatmul.bf16.gmra.mxu0 %v6853_v10  ;;  %1081 = vmatmul.bf16.gmra.mxu1 %v6857_v14 }
 0x1a2   : > { %v958_v17 = vpop.f32.mrf.mxu0  ;;  %v1047_v33 = vpop.f32.mrf.mxu1 }
 0x1a3   : > { %v1048_v40 = vadd.f32 %v1047_v33, %v958_v17  ;;  %v1150_v33 = vpop.permute.xlu2 %1149 }
 0x1a5   : > { %997 = vmatmul.bf16.gmra.mxu0 %v6861_v31  ;;  %1086 = vmatmul.bf16.gmra.mxu1 %v6865_v46  ;;  %v1287_v47 = vmul.f32 %v1130_v22, %v1048_v40  ;;  %v12244_v40 = vld [vmem:[#allocation145_spill] sm:$0xff] }
 0x1a7   : > { %v1319_v55 = vpack.c.bf16 %v1287_v47, %v1287_v47  ;;  %v12245_v47 = vld [vmem:[#allocation153_spill] sm:$0xff] }
 0x1a9   : > { %v1479_v48 = vunpack.c.l.b16 %v1319_v55 }
 0x1aa   : > { %v960_v54 = vpop.f32.mrf.mxu0  ;;  %v1049_v8 = vpop.f32.mrf.mxu1 }
 0x1ab   : > { %v1050_v16 = vadd.f32 %v1049_v8, %v960_v54  ;;  %v6877_v54 = vor.u32 %v12245_v47, %v12244_v40  ;;  %v12246_v8 = vld [vmem:[#allocation152_spill] sm:$0xff]  ;;  %v1160_v40 = vpop.permute.xlu0 %1159 }
 0x1ad   : > { %v1288_v56 = vmul.f32 %v1135_v24, %v1050_v16  ;;  %v6881_v16 = vor.u32 %v12247_v9, %v12246_v8  ;;  %v8326_v9 = vld [vmem:[%s11961_s2 + $0x28] sm:$0xff] }
 0x1ae   : > { %1708 = vmatmul.bf16.gmra.mxu2 %v8326_v9 }
 0x1af   : > { %v1320_v62 = vpack.c.bf16 %v1288_v56, %v1288_v56 }
 0x1b1   : > { %v1480_v58 = vunpack.c.l.b16 %v1320_v62 }
 0x1b2   : > { %v963_v10 = vpop.f32.mrf.mxu0  ;;  %v1052_v7 = vpop.f32.mrf.mxu1 }
 0x1b3   : > { %v1511_v6 = vpack.c.b16 %v1480_v58, %v1479_v48  ;;  %v1053_v14 = vadd.f32 %v1052_v7, %v963_v10  ;;  %v1155_v48 = vpop.permute.xlu2 %1154 }
 0x1b5   : > { %1002 = vmatmul.bf16.gmra.mxu0 %v6869_v42  ;;  %1091 = vmatmul.bf16.gmra.mxu1 %v6873_v27  ;;  %v1289_v15 = vmul.f32 %v1140_v63, %v1053_v14  ;;  %v12249_v14 = vld [vmem:[#allocation169_spill] sm:$0xff] }
 0x1b6   : > { %1772 = vmatmul.bf16.vlgmr.msra.gmra.mxu3 %v1511_v6  ;;  %v12248_v6 = vld [vmem:[#allocation161_spill] sm:$0xff] }
 0x1b7   : > { %v1321_v39 = vpack.c.bf16 %v1289_v15, %v1289_v15  ;;  %v6885_v15 = vor.u32 %v12249_v14, %v12248_v6 }
 0x1b9   : > { %v1481_v24 = vunpack.c.l.b16 %v1321_v39 }
 0x1ba   : > { %v965_v22 = vpop.f32.mrf.mxu0  ;;  %v1054_v23 = vpop.f32.mrf.mxu1 }
 0x1bb   : > { %v1055_v31 = vadd.f32 %v1054_v23, %v965_v22  ;;  %v12250_v22 = vld [vmem:[#allocation168_spill] sm:$0xff]  ;;  %v1170_v14 = vpop.permute.xlu2 %1169 }
 0x1bc   : > { %v12251_v23 = vld [vmem:[#allocation160_spill] sm:$0xff] }
 0x1bd   : > { %v1290_v46 = vmul.f32 %v1145_v38, %v1055_v31  ;;  %v6889_v30 = vor.u32 %v12251_v23, %v12250_v22 }
 0x1bf   : > { %v1322_v17 = vpack.c.bf16 %v1290_v46, %v1290_v46 }
 0x1c1   : > { %v1482_v55 = vunpack.c.l.b16 %v1322_v17 }
 0x1c2   : > { %v968_v56 = vpop.f32.mrf.mxu0  ;;  %v1057_v62 = vpop.f32.mrf.mxu1 }
 0x1c3   : > { %v1512_v63 = vpack.c.b16 %v1482_v55, %v1481_v24  ;;  %v1058_v11 = vadd.f32 %v1057_v62, %v968_v56  ;;  %v1165_v24 = vpop.permute.xlu1 %1164 }
 0x1c5   : > { %1007 = vmatmul.bf16.gmra.mxu0 %v6877_v54  ;;  %1096 = vmatmul.bf16.gmra.mxu1 %v6881_v16  ;;  %v1291_v43 = vmul.f32 %v1150_v33, %v1058_v11  ;;  %v12253_v11 = vld [vmem:[#allocation185_spill] sm:$0xff] }
 0x1c6   : > { %1777 = vmatmul.bf16.gmra.mxu3 %v1512_v63  ;;  %v12252_v63 = vld [vmem:[#allocation177_spill] sm:$0xff] }
 0x1c7   : > { %v1323_v58 = vpack.c.bf16 %v1291_v43, %v1291_v43  ;;  %v6893_v43 = vor.u32 %v12253_v11, %v12252_v63 }
 0x1c9   : > { %v1483_v31 = vunpack.c.l.b16 %v1323_v58 }
 0x1ca   : > { %v970_v42 = vpop.f32.mrf.mxu0  ;;  %v1059_v59 = vpop.f32.mrf.mxu1 }
 0x1cb   : > { %v1060_v27 = vadd.f32 %v1059_v59, %v970_v42  ;;  %v12254_v42 = vld [vmem:[#allocation184_spill] sm:$0xff]  ;;  %v1180_v11 = vpop.permute.xlu1 %1179 }
 0x1cc   : > { %v12255_v59 = vld [vmem:[#allocation176_spill] sm:$0xff] }
 0x1cd   : > { %v1292_v10 = vmul.f32 %v1155_v48, %v1060_v27  ;;  %v6897_v26 = vor.u32 %v12255_v59, %v12254_v42 }
 0x1cf   : > { %v1324_v7 = vpack.c.bf16 %v1292_v10, %v1292_v10 }
 0x1d1   : > { %v1484_v38 = vunpack.c.l.b16 %v1324_v7 }
 0x1d2   : > { %v973_v39 = vpop.f32.mrf.mxu0  ;;  %v1062_v46 = vpop.f32.mrf.mxu1 }
 0x1d3   : > { %v1513_v17 = vpack.c.b16 %v1484_v38, %v1483_v31  ;;  %v1063_v33 = vadd.f32 %v1062_v46, %v973_v39  ;;  %v1175_v38 = vpop.permute.xlu0 %1174 }
 0x1d5   : > { %1012 = vmatmul.bf16.gmra.mxu0 %v6885_v15  ;;  %1101 = vmatmul.bf16.gmra.mxu1 %v6889_v30  ;;  %v1293_v47 = vmul.f32 %v1160_v40, %v1063_v33  ;;  %v8327_v30 = vld [vmem:[%s11961_s2 + $0x30] sm:$0xff]  ;;  %v12256_v33 = vld [vmem:[#allocation193_spill] sm:$0xff] }
 0x1d6   : > { %1782 = vmatmul.bf16.gmra.mxu3 %v1513_v17  ;;  %1713 = vmatmul.bf16.gmra.mxu2 %v8327_v30  ;;  %v12257_v40 = vld [vmem:[#allocation201_spill] sm:$0xff] }
 0x1d7   : > { %v1325_v55 = vpack.c.bf16 %v1293_v47, %v1293_v47  ;;  %v6901_v47 = vor.u32 %v12257_v40, %v12256_v33 }
 0x1d9   : > { %v1485_v27 = vunpack.c.l.b16 %v1325_v55 }
 0x1da   : > { %v975_v54 = vpop.f32.mrf.mxu0  ;;  %v1064_v8 = vpop.f32.mrf.mxu1 }
 0x1db   : > { %v1065_v16 = vadd.f32 %v1064_v8, %v975_v54  ;;  %v12258_v54 = vld [vmem:[#allocation200_spill] sm:$0xff]  ;;  %v1190_v40 = vpop.permute.xlu0 %1189 }
 0x1dc   : > { %v12259_v8 = vld [vmem:[#allocation192_spill] sm:$0xff] }
 0x1dd   : > { %v1294_v56 = vmul.f32 %v1165_v24, %v1065_v16  ;;  %v6905_v9 = vor.u32 %v12259_v8, %v12258_v54 }
 0x1df   : > { %v1326_v62 = vpack.c.bf16 %v1294_v56, %v1294_v56 }
 0x1e1   : > { %v1486_v48 = vunpack.c.l.b16 %v1326_v62 }
 0x1e2   : > { %v978_v58 = vpop.f32.mrf.mxu0  ;;  %v1067_v10 = vpop.f32.mrf.mxu1 }
 0x1e3   : > { %v1514_v7 = vpack.c.b16 %v1486_v48, %v1485_v27  ;;  %v1068_v6 = vadd.f32 %v1067_v10, %v978_v58  ;;  %v1185_v48 = vpop.permute.xlu2 %1184 }
 0x1e5   : > { %1017 = vmatmul.bf16.gmra.mxu0 %v6893_v43  ;;  %1106 = vmatmul.bf16.gmra.mxu1 %v6897_v26  ;;  %v1295_v15 = vmul.f32 %v1170_v14, %v1068_v6  ;;  %v8328_v26 = vld [vmem:[%s11961_s2 + $0x38] sm:$0xff] }
 0x1e6   : > { %1787 = vmatmul.bf16.gmra.mxu3 %v1514_v7  ;;  %1718 = vmatmul.bf16.gmra.mxu2 %v8328_v26  ;;  %v12260_v6 = vld [vmem:[#allocation209_spill] sm:$0xff]  ;;  %v12267_v26 = vld [vmem:[#allocation224_spill] sm:$0xff] }
 0x1e7   : > { %v1327_v39 = vpack.c.bf16 %v1295_v15, %v1295_v15  ;;  %v12261_v14 = vld [vmem:[#allocation217_spill] sm:$0xff] }
 0x1e8   : > { %v6909_v15 = vor.u32 %v12261_v14, %v12260_v6 }
 0x1e9   : > { %v1487_v16 = vunpack.c.l.b16 %v1327_v39 }
 0x1ea   : > { %v980_v22 = vpop.f32.mrf.mxu0  ;;  %v1069_v23 = vpop.f32.mrf.mxu1 }
 0x1eb   : > { %v1070_v31 = vadd.f32 %v1069_v23, %v980_v22  ;;  %v12262_v22 = vld [vmem:[#allocation216_spill] sm:$0xff] }
 0x1ec   : > { %v12263_v23 = vld [vmem:[#allocation208_spill] sm:$0xff] }
 0x1ed   : > { %v1296_v46 = vmul.f32 %v1175_v38, %v1070_v31  ;;  %v6913_v30 = vor.u32 %v12263_v23, %v12262_v22  ;;  %v1200_v22 = vpop.permute.xlu2 %1199 }
 0x1ef   : > { %v1328_v17 = vpack.c.bf16 %v1296_v46, %v1296_v46 }
 0x1f1   : > { %v1488_v24 = vunpack.c.l.b16 %v1328_v17 }
 0x1f2   : > { %v983_v55 = vpop.f32.mrf.mxu0  ;;  %v1072_v56 = vpop.f32.mrf.mxu1 }
 0x1f3   : > { %v1515_v62 = vpack.c.b16 %v1488_v24, %v1487_v16  ;;  %v1073_v63 = vadd.f32 %v1072_v56, %v983_v55  ;;  %v1195_v24 = vpop.permute.xlu1 %1194 }
 0x1f5   : > { %1022 = vmatmul.bf16.gmra.mxu0 %v6901_v47  ;;  %1111 = vmatmul.bf16.gmra.mxu1 %v6905_v9  ;;  %v1297_v43 = vmul.f32 %v1180_v11, %v1073_v63  ;;  %v8329_v9 = vld [vmem:[%s11961_s2 + $0x40] sm:$0xff]  ;;  %v1684_v63 = vpop.f32.mrf.mxu2  ;;  %v12264_v11 = vld [vmem:[#allocation225_spill] sm:$0xff] }
 0x1f6   : > { %1792 = vmatmul.bf16.gmra.mxu3 %v1515_v62  ;;  %1723 = vmatmul.bf16.gmra.mxu2 %v8329_v9 }
 0x1f7   : > { %v1329_v58 = vpack.c.bf16 %v1297_v43, %v1297_v43  ;;  %v12265_v43 = vld [vmem:[#allocation233_spill] sm:$0xff] }
 0x1f9   : > { %v1489_v31 = vunpack.c.l.b16 %v1329_v58 }
 0x1fa   : > { %v985_v42 = vpop.f32.mrf.mxu0  ;;  %v1074_v59 = vpop.f32.mrf.mxu1 }
 0x1fb   : > { %v1075_v27 = vadd.f32 %v1074_v59, %v985_v42  ;;  %v6917_v42 = vor.u32 %v12265_v43, %v12264_v11  ;;  %v12266_v59 = vld [vmem:[#allocation232_spill] sm:$0xff] }
 0x1fd   : > { %v1298_v10 = vmul.f32 %v1185_v48, %v1075_v27  ;;  %v6921_v27 = vor.u32 %v12267_v26, %v12266_v59  ;;  %v8331_v59 = vld [vmem:[%s11961_s2 + $0x50] sm:$0xff] }
 0x1ff   : > { %v1330_v7 = vpack.c.bf16 %v1298_v10, %v1298_v10 }
 0x201   : > { %v1490_v38 = vunpack.c.l.b16 %v1330_v7 }
 0x202   : > { %v988_v39 = vpop.f32.mrf.mxu0  ;;  %v1077_v46 = vpop.f32.mrf.mxu1 }
 0x203   : > { %v1516_v17 = vpack.c.b16 %v1490_v38, %v1489_v31  ;;  %v1078_v33 = vadd.f32 %v1077_v46, %v988_v39  ;;  %v8330_v38 = vld [vmem:[%s11961_s2 + $0x48] sm:$0xff]  ;;  %v1205_v46 = vpop.permute.xlu0 %1204 }
 0x205   : > { %1027 = vmatmul.bf16.gmra.mxu0 %v6909_v15  ;;  %1116 = vmatmul.bf16.gmra.mxu1 %v6913_v30  ;;  %v1299_v47 = vmul.f32 %v1190_v40, %v1078_v33  ;;  %v1686_v15 = vpop.f32.mrf.mxu2 }
 0x206   : > { %1797 = vmatmul.bf16.gmra.mxu3 %v1516_v17  ;;  %1728 = vmatmul.bf16.gmra.mxu2 %v8330_v38 }
 0x207   : > { %v1331_v55 = vpack.c.bf16 %v1299_v47, %v1299_v47 }
 0x209   : > { %v1491_v48 = vunpack.c.l.b16 %v1331_v55 }
 0x20a   : > { %v990_v54 = vpop.f32.mrf.mxu0  ;;  %v1079_v8 = vpop.f32.mrf.mxu1 }
 0x20b   : > { %v1080_v16 = vadd.f32 %v1079_v8, %v990_v54 }
 0x20d   : > { %v1300_v56 = vmul.f32 %v1195_v24, %v1080_v16  ;;  %v10773_v47 = vpop.f32.mrf.mxu2 }
 0x20f   : > { %v1332_v62 = vpack.c.bf16 %v1300_v56, %v1300_v56 }
 0x211   : > { %v1492_v58 = vunpack.c.l.b16 %v1332_v62  ;;  %v1210_v62 = vpop.permute.xlu1 %1209 }
 0x212   : > { %v993_v10 = vpop.f32.mrf.mxu0  ;;  %v1082_v7 = vpop.f32.mrf.mxu1 }
 0x213   : > { %v1517_v6 = vpack.c.b16 %v1492_v58, %v1491_v48  ;;  %v1083_v14 = vadd.f32 %v1082_v7, %v993_v10 }
 0x215   : > { %1032 = vmatmul.bf16.gmra.mxu0 %v6917_v42  ;;  %1121 = vmatmul.bf16.gmra.mxu1 %v6921_v27  ;;  %v1301_v23 = vmul.f32 %v1200_v22, %v1083_v14  ;;  %v10775_v56 = vpop.f32.mrf.mxu2  ;;  %v1215_v27 = vpop.permute.xlu2 %1214 }
 0x216   : > { %1802 = vmatmul.bf16.gmra.mxu3 %v1517_v6  ;;  %1733 = vmatmul.bf16.gmra.mxu2 %v8331_v59 }
 0x217   : > { %v1333_v17 = vpack.c.bf16 %v1301_v23, %v1301_v23 }
 0x219   : > { %v1493_v54 = vunpack.c.l.b16 %v1333_v17 }
 0x21a   : > { %v995_v30 = vpop.f32.mrf.mxu0  ;;  %v1084_v31 = vpop.f32.mrf.mxu1 }
 0x21b   : > { %v1085_v39 = vadd.f32 %v1084_v31, %v995_v30 }
 0x21d   : > { %v1302_v33 = vmul.f32 %v1205_v46, %v1085_v39  ;;  %v10780_v7 = vpop.f32.mrf.mxu2  ;;  %v1220_v39 = vpop.permute.xlu0 %1219  ;;  %v10787_v46 = vld [vmem:[%s11963_s4] ss:$0 sm:$0xff] }
 0x21f   : > { %v1334_v40 = vpack.c.bf16 %v1302_v33, %v1302_v33 }
 0x221   : > { %v1494_v8 = vunpack.c.l.b16 %v1334_v40 }
 0x222   : > { %v998_v9 = vpop.f32.mrf.mxu0  ;;  %v1087_v16 = vpop.f32.mrf.mxu1 }
 0x223   : > { %v1518_v24 = vpack.c.b16 %v1494_v8, %v1493_v54  ;;  %v1088_v55 = vadd.f32 %v1087_v16, %v998_v9  ;;  %v8332_v8 = vld [vmem:[%s11961_s2 + $0x58] sm:$0xff]  ;;  %v1225_v16 = vpop.permute.xlu1 %1224 }
 0x225   : > { %v1303_v11 = vmul.f32 %v1210_v62, %v1088_v55  ;;  %v10782_v38 = vpop.f32.mrf.mxu2 }
 0x226   : > { %1807 = vmatmul.bf16.gmra.mxu3 %v1518_v24  ;;  %v1685_v24 = vadd.f32 %v10787_v46, %v1684_v63  ;;  %1738 = vmatmul.bf16.gmra.mxu2 %v8332_v8 }
 0x227   : > { %v1335_v48 = vpack.c.bf16 %v1303_v11, %v1303_v11 }
 0x229   : > { %v1495_v6 = vunpack.c.l.b16 %v1335_v48 }
 0x22a   : > { %v1000_v43 = vpop.f32.mrf.mxu0  ;;  %v1089_v42 = vpop.f32.mrf.mxu1 }
 0x22b   : > { %v1090_v26 = vadd.f32 %v1089_v42, %v1000_v43  ;;  %v1687_v42 = vadd.f32 %v10787_v46, %v1686_v15 }
 0x22d   : > { %v1304_v58 = vmul.f32 %v1215_v27, %v1090_v26  ;;  %v10793_v43 = vpop.f32.mrf.mxu2 }
 0x22f   : > { %v1336_v10 = vpack.c.bf16 %v1304_v58, %v1304_v58 }
 0x231   : > { %v1496_v14 = vunpack.c.l.b16 %v1336_v10 }
 0x232   : > { %v1003_v22 = vpop.f32.mrf.mxu0  ;;  %v1092_v23 = vpop.f32.mrf.mxu1 }
 0x233   : > { %v1519_v30 = vpack.c.b16 %v1496_v14, %v1495_v6  ;;  %v1093_v31 = vadd.f32 %v1092_v23, %v1003_v22 }
 0x235   : > { %v1305_v17 = vmul.f32 %v1220_v39, %v1093_v31  ;;  %v10796_v31 = vpop.f32.mrf.mxu2  ;;  %v1230_v39 = vpop.permute.xlu2 %1229 }
 0x236   : > { %1812 = vmatmul.bf16.gmra.mxu3 %v1519_v30 }
 0x237   : > { %v1337_v55 = vpack.c.bf16 %v1305_v17, %v1305_v17 }
 0x239   : > { %v1773_v33 = vpop.f32.mrf.mxu3  ;;  %v1497_v27 = vunpack.c.l.b16 %v1337_v55 }
 0x23a   : > { %v1005_v40 = vpop.f32.mrf.mxu0  ;;  %v1094_v54 = vpop.f32.mrf.mxu1  ;;  %v1774_v59 = vadd.f32 %v1773_v33, %v1685_v24 }
 0x23b   : > { %v1095_v9 = vadd.f32 %v1094_v54, %v1005_v40  ;;  %v8333_v54 = vld [vmem:[%s11961_s2 + $0x60] sm:$0xff] }
 0x23c   : > { %v1853_v22 = vmax.f32 %v1774_v59, 0.0  ;;  %1743 = vmatmul.bf16.gmra.mxu2 %v8333_v54 }
 0x23d   : > { %v1306_v62 = vmul.f32 %v1225_v16, %v1095_v9  ;;  %v1235_v9 = vpop.permute.xlu0 %1234  ;;  %v1690_v16 = vadd.f32 %v10787_v46, %v10773_v47 }
 0x23f   : > { %v1338_v11 = vpack.c.bf16 %v1306_v62, %v1306_v62 }
 0x241   : > { %v1775_v26 = vpop.f32.mrf.mxu3  ;;  %v1498_v48 = vunpack.c.l.b16 %v1338_v11  ;;  %v10803_v11 = vpop.f32.mrf.mxu2 }
 0x242   : > { %v1776_v58 = vadd.f32 %v1775_v26, %v1687_v42  ;;  %v1008_v10 = vpop.f32.mrf.mxu0  ;;  %v1097_v6 = vpop.f32.mrf.mxu1  ;;  %v1692_v42 = vadd.f32 %v10787_v46, %v10775_v56 }
 0x243   : > { %v1520_v14 = vpack.c.b16 %v1498_v48, %v1497_v27  ;;  %v1098_v30 = vadd.f32 %v1097_v6, %v1008_v10 }
 0x244   : > { %v1854_v23 = vmax.f32 %v1776_v58, 0.0 }
 0x245   : > { %v1307_v17 = vmul.f32 %v1230_v39, %v1098_v30  ;;  %v1240_v39 = vpop.permute.xlu1 %1239 }
 0x246   : > { %v8524_v63 = vpack.c.bf16 %v1854_v23, %v1853_v22  ;;  %1817 = vmatmul.bf16.gmra.mxu3 %v1520_v14 }
 0x247   : > { %v1339_v24 = vpack.c.bf16 %v1307_v17, %v1307_v17 }
 0x248   : > { %8525 = vst [vmem:[#allocation2] sm:$0xff] %v8524_v63  }
 0x249   : > { %v1778_v40 = vpop.f32.mrf.mxu3  ;;  %v1499_v27 = vunpack.c.l.b16 %v1339_v24  ;;  %v10807_v63 = vpop.f32.mrf.mxu2 }
 0x24a   : > { %v1010_v15 = vpop.f32.mrf.mxu0  ;;  %v1099_v33 = vpop.f32.mrf.mxu1  ;;  %v1779_v59 = vadd.f32 %v1778_v40, %v1690_v16 }
 0x24b   : > { %v1100_v8 = vadd.f32 %v1099_v33, %v1010_v15  ;;  %v8334_v33 = vld [vmem:[%s11961_s2 + $0x68] sm:$0xff] }
 0x24c   : > { %v1855_v22 = vmax.f32 %v1779_v59, 0.0  ;;  %1748 = vmatmul.bf16.gmra.mxu2 %v8334_v33 }
 0x24d   : > { %v1308_v55 = vmul.f32 %v1235_v9, %v1100_v8  ;;  %v1245_v8 = vpop.permute.xlu2 %1244  ;;  %v1695_v9 = vadd.f32 %v10787_v46, %v10780_v7 }
 0x24f   : > { %v1340_v62 = vpack.c.bf16 %v1308_v55, %v1308_v55 }
 0x251   : > { %v1780_v26 = vpop.f32.mrf.mxu3  ;;  %v1500_v48 = vunpack.c.l.b16 %v1340_v62  ;;  %v10814_v62 = vpop.f32.mrf.mxu2 }
 0x252   : > { %v1781_v58 = vadd.f32 %v1780_v26, %v1692_v42  ;;  %v1013_v10 = vpop.f32.mrf.mxu0  ;;  %v1102_v6 = vpop.f32.mrf.mxu1  ;;  %v1697_v42 = vadd.f32 %v10787_v46, %v10782_v38 }
 0x253   : > { %v1521_v14 = vpack.c.b16 %v1500_v48, %v1499_v27  ;;  %v1103_v47 = vadd.f32 %v1102_v6, %v1013_v10 }
 0x254   : > { %v1856_v23 = vmax.f32 %v1781_v58, 0.0 }
 0x255   : > { %v1309_v17 = vmul.f32 %v1240_v39, %v1103_v47  ;;  %v1250_v39 = vpop.permute.xlu0 %1249 }
 0x256   : > { %v8529_v30 = vpack.c.bf16 %v1856_v23, %v1855_v22  ;;  %1822 = vmatmul.bf16.gmra.mxu3 %v1521_v14 }
 0x257   : > { %v1341_v16 = vpack.c.bf16 %v1309_v17, %v1309_v17 }
 0x258   : > { %8825 = vst [vmem:[#allocation2 + $0x8] sm:$0xff] %v8529_v30  }
 0x259   : > { %v1783_v15 = vpop.f32.mrf.mxu3  ;;  %v1501_v27 = vunpack.c.l.b16 %v1341_v16  ;;  %v10818_v30 = vpop.f32.mrf.mxu2 }
 0x25a   : > { %v1015_v56 = vpop.f32.mrf.mxu0  ;;  %v1104_v40 = vpop.f32.mrf.mxu1  ;;  %v1784_v59 = vadd.f32 %v1783_v15, %v1695_v9 }
 0x25b   : > { %v1105_v54 = vadd.f32 %v1104_v40, %v1015_v56  ;;  %v8335_v40 = vld [vmem:[%s11961_s2 + $0x70] sm:$0xff] }
 0x25c   : > { %v1857_v22 = vmax.f32 %v1784_v59, 0.0  ;;  %1753 = vmatmul.bf16.gmra.mxu2 %v8335_v40 }
 0x25d   : > { %v1310_v24 = vmul.f32 %v1245_v8, %v1105_v54  ;;  %v1255_v54 = vpop.permute.xlu1 %1254  ;;  %v1700_v8 = vadd.f32 %v10787_v46, %v10793_v43 }
 0x25f   : > { %v1342_v55 = vpack.c.bf16 %v1310_v24, %v1310_v24 }
 0x261   : > { %v1785_v26 = vpop.f32.mrf.mxu3  ;;  %v1502_v48 = vunpack.c.l.b16 %v1342_v55  ;;  %v10825_v55 = vpop.f32.mrf.mxu2 }
 0x262   : > { %v1786_v58 = vadd.f32 %v1785_v26, %v1697_v42  ;;  %v1018_v10 = vpop.f32.mrf.mxu0  ;;  %v1107_v6 = vpop.f32.mrf.mxu1  ;;  %v1702_v42 = vadd.f32 %v10787_v46, %v10796_v31 }
 0x263   : > { %v1522_v14 = vpack.c.b16 %v1502_v48, %v1501_v27  ;;  %v1108_v7 = vadd.f32 %v1107_v6, %v1018_v10 }
 0x264   : > { %v1858_v23 = vmax.f32 %v1786_v58, 0.0 }
 0x265   : > { %v1311_v17 = vmul.f32 %v1250_v39, %v1108_v7 }
 0x266   : > { %v8534_v47 = vpack.c.bf16 %v1858_v23, %v1857_v22  ;;  %1827 = vmatmul.bf16.gmra.mxu3 %v1522_v14 }
 0x267   : > { %v1343_v9 = vpack.c.bf16 %v1311_v17, %v1311_v17 }
 0x268   : > { %8826 = vst [vmem:[#allocation2 + $0x10] sm:$0xff] %v8534_v47   ;;  %v1260_v47 = vpop.permute.xlu2 %1259 }
 0x269   : > { %v1788_v56 = vpop.f32.mrf.mxu3  ;;  %v1503_v26 = vunpack.c.l.b16 %v1343_v9 }
 0x26a   : > { %v1020_v38 = vpop.f32.mrf.mxu0  ;;  %v1109_v15 = vpop.f32.mrf.mxu1  ;;  %v1789_v59 = vadd.f32 %v1788_v56, %v1700_v8 }
 0x26b   : > { %v1110_v33 = vadd.f32 %v1109_v15, %v1020_v38  ;;  %v10829_v38 = vpop.f32.mrf.mxu2  ;;  %v8336_v15 = vld [vmem:[%s11961_s2 + $0x78] sm:$0xff] }
 0x26c   : > { %v1859_v22 = vmax.f32 %v1789_v59, 0.0  ;;  %1758 = vmatmul.bf16.gmra.mxu2 %v8336_v15  ;;  %v1710_v15 = vadd.f32 %v10787_v46, %v10814_v62 }
 0x26d   : > { %v1312_v16 = vmul.f32 %v1255_v54, %v1110_v33  ;;  %v1265_v33 = vpop.permute.xlu0 %1264  ;;  %v1705_v54 = vadd.f32 %v10787_v46, %v10803_v11 }
 0x26f   : > { %v1344_v24 = vpack.c.bf16 %v1312_v16, %v1312_v16 }
 0x271   : > { %v1504_v27 = vunpack.c.l.b16 %v1344_v24  ;;  %v1790_v48 = vpop.f32.mrf.mxu3  ;;  %v1707_v24 = vadd.f32 %v10787_v46, %v10807_v63 }
 0x272   : > { %v1791_v58 = vadd.f32 %v1790_v48, %v1702_v42  ;;  %v1023_v10 = vpop.f32.mrf.mxu0  ;;  %v1112_v6 = vpop.f32.mrf.mxu1 }
 0x273   : > { %v1523_v14 = vpack.c.b16 %v1504_v27, %v1503_v26  ;;  %v1113_v43 = vadd.f32 %v1112_v6, %v1023_v10 }
 0x274   : > { %v1860_v23 = vmax.f32 %v1791_v58, 0.0 }
 0x275   : > { %v1313_v39 = vmul.f32 %v1260_v47, %v1113_v43 }
 0x276   : > { %v8539_v7 = vpack.c.bf16 %v1860_v23, %v1859_v22  ;;  %1832 = vmatmul.bf16.gmra.mxu3 %v1523_v14  ;;  %v1719_v14 = vpop.f32.mrf.mxu2 }
 0x277   : > { %v1345_v8 = vpack.c.bf16 %v1313_v39, %v1313_v39 }
 0x278   : > { %8827 = vst [vmem:[#allocation2 + $0x18] sm:$0xff] %v8539_v7   ;;  %v1270_v7 = vpop.permute.xlu1 %1269 }
 0x279   : > { %v1793_v17 = vpop.f32.mrf.mxu3  ;;  %v1505_v59 = vunpack.c.l.b16 %v1345_v8 }
 0x27a   : > { %v1025_v31 = vpop.f32.mrf.mxu0  ;;  %v1114_v56 = vpop.f32.mrf.mxu1  ;;  %v1794_v42 = vadd.f32 %v1793_v17, %v1705_v54 }
 0x27b   : > { %v1115_v40 = vadd.f32 %v1114_v56, %v1025_v31  ;;  %v1275_v56 = vpop.permute.xlu2 %1274 }
 0x27c   : > { %v1861_v22 = vmax.f32 %v1794_v42, 0.0 }
 0x27d   : > { %v1314_v9 = vmul.f32 %v1265_v33, %v1115_v40 }
 0x27e   : > { %v1721_v54 = vpop.f32.mrf.mxu2 }
 0x27f   : > { %v1346_v16 = vpack.c.bf16 %v1314_v9, %v1314_v9  ;;  %v1712_v9 = vadd.f32 %v10787_v46, %v10818_v30 }
 0x281   : > { %v1506_v26 = vunpack.c.l.b16 %v1346_v16  ;;  %v1795_v27 = vpop.f32.mrf.mxu3 }
 0x282   : > { %v1796_v48 = vadd.f32 %v1795_v27, %v1707_v24  ;;  %v1028_v58 = vpop.f32.mrf.mxu0  ;;  %v1117_v10 = vpop.f32.mrf.mxu1 }
 0x283   : > { %v1524_v6 = vpack.c.b16 %v1506_v26, %v1505_v59  ;;  %v1118_v43 = vadd.f32 %v1117_v10, %v1028_v58 }
 0x284   : > { %v1862_v23 = vmax.f32 %v1796_v48, 0.0 }
 0x285   : > { %v1315_v47 = vmul.f32 %v1270_v7, %v1118_v43  ;;  %v1280_v43 = vpop.permute.xlu0 %1279 }
 0x286   : > { %v8544_v11 = vpack.c.bf16 %v1862_v23, %v1861_v22  ;;  %1837 = vmatmul.bf16.gmra.mxu3 %v1524_v6  ;;  %v1724_v62 = vpop.f32.mrf.mxu2 }
 0x287   : > { %v1347_v40 = vpack.c.bf16 %v1315_v47, %v1315_v47 }
 0x288   : > { %8828 = vst [vmem:[#allocation2 + $0x20] sm:$0xff] %v8544_v11  }
 0x289   : > { %v1798_v39 = vpop.f32.mrf.mxu3  ;;  %v1507_v24 = vunpack.c.l.b16 %v1347_v40  ;;  %v1717_v40 = vadd.f32 %v10787_v46, %v10829_v38 }
 0x28a   : > { %v1030_v31 = vpop.f32.mrf.mxu0  ;;  %v1119_v63 = vpop.f32.mrf.mxu1  ;;  %v1799_v16 = vadd.f32 %v1798_v39, %v1710_v15 }
 0x28b   : > { %v1120_v17 = vadd.f32 %v1119_v63, %v1030_v31  ;;  %v1285_v31 = vpop.permute.xlu1 %1284  ;;  %v1715_v63 = vadd.f32 %v10787_v46, %v10825_v55 }
 0x28c   : > { %v1863_v10 = vmax.f32 %v1799_v16, 0.0 }
 0x28d   : > { %v1316_v33 = vmul.f32 %v1275_v56, %v1120_v17 }
 0x28f   : > { %v1348_v8 = vpack.c.bf16 %v1316_v33, %v1316_v33 }
 0x291   : > { %v1508_v42 = vunpack.c.l.b16 %v1348_v8  ;;  %v1800_v59 = vpop.f32.mrf.mxu3 }
 0x292   : > { %v1801_v26 = vadd.f32 %v1800_v59, %v1712_v9  ;;  %v1033_v27 = vpop.f32.mrf.mxu0  ;;  %v1122_v48 = vpop.f32.mrf.mxu1 }
 0x293   : > { %v1525_v58 = vpack.c.b16 %v1508_v42, %v1507_v24  ;;  %v1123_v22 = vadd.f32 %v1122_v48, %v1033_v27  ;;  %v1726_v24 = vpop.f32.mrf.mxu2 }
 0x294   : > { %v1864_v6 = vmax.f32 %v1801_v26, 0.0 }
 0x295   : > { %v1317_v11 = vmul.f32 %v1280_v43, %v1123_v22 }
 0x296   : > { %v8549_v23 = vpack.c.bf16 %v1864_v6, %v1863_v10  ;;  %1842 = vmatmul.bf16.gmra.mxu3 %v1525_v58  ;;  %v1720_v10 = vadd.f32 %v10787_v46, %v1719_v14  ;;  %v1722_v6 = vadd.f32 %v10787_v46, %v1721_v54 }
 0x297   : > { %v1349_v17 = vpack.c.bf16 %v1317_v11, %v1317_v11 }
 0x298   : > { %8829 = vst [vmem:[#allocation2 + $0x28] sm:$0xff] %v8549_v23  }
 0x299   : > { %v1803_v7 = vpop.f32.mrf.mxu3  ;;  %v1509_v8 = vunpack.c.l.b16 %v1349_v17 }
 0x29a   : > { %v1035_v47 = vpop.f32.mrf.mxu0  ;;  %v1124_v30 = vpop.f32.mrf.mxu1  ;;  %v1804_v33 = vadd.f32 %v1803_v7, %v1715_v63  ;;  %v1727_v63 = vadd.f32 %v10787_v46, %v1726_v24 }
 0x29b   : > { %v1125_v39 = vadd.f32 %v1124_v30, %v1035_v47  ;;  %v1729_v55 = vpop.f32.mrf.mxu2 }
 0x29c   : > { %v1865_v26 = vmax.f32 %v1804_v33, 0.0 }
 0x29d   : > { %v1318_v56 = vmul.f32 %v1285_v31, %v1125_v39  ;;  %v1725_v39 = vadd.f32 %v10787_v46, %v1724_v62 }
 0x29f   : > { %v1350_v15 = vpack.c.bf16 %v1318_v56, %v1318_v56 }
 0x2a1   : > { %v1510_v9 = vunpack.c.l.b16 %v1350_v15  ;;  %v1805_v16 = vpop.f32.mrf.mxu3 }
 0x2a2   : > { %v1806_v42 = vadd.f32 %v1805_v16, %v1717_v40 }
 0x2a3   : > { %v1526_v59 = vpack.c.b16 %v1510_v9, %v1509_v8  ;;  %v1731_v7 = vpop.f32.mrf.mxu2  ;;  %v1730_v9 = vadd.f32 %v10787_v46, %v1729_v55 }
 0x2a4   : > { %v1866_v27 = vmax.f32 %v1806_v42, 0.0  ;;  %v1732_v16 = vadd.f32 %v10787_v46, %v1731_v7 }
 0x2a6   : > { %v8554_v48 = vpack.c.bf16 %v1866_v27, %v1865_v26  ;;  %1847 = vmatmul.bf16.gmra.mxu3 %v1526_v59 }
 0x2a8   : > { %8830 = vst [vmem:[#allocation2 + $0x30] sm:$0xff] %v8554_v48  }
 0x2a9   : > { %v1808_v58 = vpop.f32.mrf.mxu3 }
 0x2aa   : > { %v1809_v22 = vadd.f32 %v1808_v58, %v1720_v10 }
 0x2ab   : > { %v1734_v31 = vpop.f32.mrf.mxu2 }
 0x2ac   : > { %v1867_v43 = vmax.f32 %v1809_v22, 0.0  ;;  %v1735_v10 = vadd.f32 %v10787_v46, %v1734_v31 }
 0x2b1   : > { %v1810_v38 = vpop.f32.mrf.mxu3 }
 0x2b2   : > { %v1811_v23 = vadd.f32 %v1810_v38, %v1722_v6 }
 0x2b3   : > { %v1736_v8 = vpop.f32.mrf.mxu2 }
 0x2b4   : > { %v1868_v11 = vmax.f32 %v1811_v23, 0.0  ;;  %v1737_v22 = vadd.f32 %v10787_v46, %v1736_v8 }
 0x2b6   : > { %v8559_v47 = vpack.c.bf16 %v1868_v11, %v1867_v43 }
 0x2b8   : > { %8831 = vst [vmem:[#allocation2 + $0x38] sm:$0xff] %v8559_v47  }
 0x2b9   : > { %v1813_v30 = vpop.f32.mrf.mxu3 }
 0x2ba   : > { %v1814_v17 = vadd.f32 %v1813_v30, %v1725_v39 }
 0x2bb   : > { %v1739_v62 = vpop.f32.mrf.mxu2 }
 0x2bc   : > { %v1869_v14 = vmax.f32 %v1814_v17, 0.0  ;;  %v1740_v39 = vadd.f32 %v10787_v46, %v1739_v62 }
 0x2c1   : > { %v1815_v56 = vpop.f32.mrf.mxu3 }
 0x2c2   : > { %v1816_v15 = vadd.f32 %v1815_v56, %v1727_v63 }
 0x2c3   : > { %v1741_v6 = vpop.f32.mrf.mxu2 }
 0x2c4   : > { %v1870_v40 = vmax.f32 %v1816_v15, 0.0  ;;  %v1742_v63 = vadd.f32 %v10787_v46, %v1741_v6 }
 0x2c6   : > { %v8564_v54 = vpack.c.bf16 %v1870_v40, %v1869_v14 }
 0x2c8   : > { %8832 = vst [vmem:[#allocation2 + $0x40] sm:$0xff] %v8564_v54  }
 0x2c9   : > { %v1818_v33 = vpop.f32.mrf.mxu3 }
 0x2ca   : > { %v1819_v42 = vadd.f32 %v1818_v33, %v1730_v9 }
 0x2cb   : > { %v1744_v47 = vpop.f32.mrf.mxu2 }
 0x2cc   : > { %v1871_v27 = vmax.f32 %v1819_v42, 0.0  ;;  %v1745_v9 = vadd.f32 %v10787_v46, %v1744_v47 }
 0x2d1   : > { %v1820_v59 = vpop.f32.mrf.mxu3 }
 0x2d2   : > { %v1821_v26 = vadd.f32 %v1820_v59, %v1732_v16 }
 0x2d3   : > { %v1746_v15 = vpop.f32.mrf.mxu2 }
 0x2d4   : > { %v1872_v48 = vmax.f32 %v1821_v26, 0.0  ;;  %v1747_v16 = vadd.f32 %v10787_v46, %v1746_v15 }
 0x2d6   : > { %v8569_v24 = vpack.c.bf16 %v1872_v48, %v1871_v27 }
 0x2d8   : > { %8833 = vst [vmem:[#allocation2 + $0x48] sm:$0xff] %v8569_v24  }
 0x2d9   : > { %v1823_v58 = vpop.f32.mrf.mxu3 }
 0x2da   : > { %v1824_v38 = vadd.f32 %v1823_v58, %v1735_v10 }
 0x2db   : > { %v1749_v8 = vpop.f32.mrf.mxu2 }
 0x2dc   : > { %v1873_v55 = vmax.f32 %v1824_v38, 0.0  ;;  %v1750_v10 = vadd.f32 %v10787_v46, %v1749_v8 }
 0x2e1   : > { %v1825_v23 = vpop.f32.mrf.mxu3 }
 0x2e2   : > { %v1826_v43 = vadd.f32 %v1825_v23, %v1737_v22 }
 0x2e3   : > { %v1751_v48 = vpop.f32.mrf.mxu2 }
 0x2e4   : > { %v1874_v11 = vmax.f32 %v1826_v43, 0.0  ;;  %v1752_v22 = vadd.f32 %v10787_v46, %v1751_v48 }
 0x2e6   : > { %v8574_v7 = vpack.c.bf16 %v1874_v11, %v1873_v55 }
 0x2e8   : > { %8834 = vst [vmem:[#allocation2 + $0x50] sm:$0xff] %v8574_v7  }
 0x2e9   : > { %v1828_v30 = vpop.f32.mrf.mxu3 }
 0x2ea   : > { %v1829_v17 = vadd.f32 %v1828_v30, %v1740_v39 }
 0x2eb   : > { %v1754_v6 = vpop.f32.mrf.mxu2 }
 0x2ec   : > { %v1875_v14 = vmax.f32 %v1829_v17, 0.0  ;;  %v1755_v39 = vadd.f32 %v10787_v46, %v1754_v6 }
 0x2f1   : > { %v1830_v56 = vpop.f32.mrf.mxu3 }
 0x2f2   : > { %v1831_v31 = vadd.f32 %v1830_v56, %v1742_v63 }
 0x2f3   : > { %v1756_v47 = vpop.f32.mrf.mxu2 }
 0x2f4   : > { %v1876_v40 = vmax.f32 %v1831_v31, 0.0  ;;  %v1757_v63 = vadd.f32 %v10787_v46, %v1756_v47 }
 0x2f6   : > { %v8579_v54 = vpack.c.bf16 %v1876_v40, %v1875_v14 }
 0x2f8   : > { %8835 = vst [vmem:[#allocation2 + $0x58] sm:$0xff] %v8579_v54  }
 0x2f9   : > { %v1833_v33 = vpop.f32.mrf.mxu3 }
 0x2fa   : > { %v1834_v42 = vadd.f32 %v1833_v33, %v1745_v9 }
 0x2fb   : > { %v1759_v31 = vpop.f32.mrf.mxu2 }
 0x2fc   : > { %v1877_v62 = vmax.f32 %v1834_v42, 0.0  ;;  %v1760_v8 = vadd.f32 %v10787_v46, %v1759_v31 }
 0x301   : > { %v1835_v59 = vpop.f32.mrf.mxu3 }
 0x302   : > { %v1836_v26 = vadd.f32 %v1835_v59, %v1747_v16 }
 0x303   : > { %v1761_v9 = vpop.f32.mrf.mxu2 }
 0x304   : > { %v1878_v27 = vmax.f32 %v1836_v26, 0.0  ;;  %v1762_v16 = vadd.f32 %v10787_v46, %v1761_v9 }
 0x306   : > { %v8584_v24 = vpack.c.bf16 %v1878_v27, %v1877_v62 }
 0x308   : > { %8836 = vst [vmem:[#allocation2 + $0x60] sm:$0xff] %v8584_v24  }
 0x309   : > { %v1838_v58 = vpop.f32.mrf.mxu3 }
 0x30a   : > { %v1839_v38 = vadd.f32 %v1838_v58, %v1750_v10 }
 0x30c   : > { %v1879_v55 = vmax.f32 %v1839_v38, 0.0 }
 0x311   : > { %v1840_v23 = vpop.f32.mrf.mxu3 }
 0x312   : > { %v1841_v43 = vadd.f32 %v1840_v23, %v1752_v22 }
 0x314   : > { %v1880_v11 = vmax.f32 %v1841_v43, 0.0 }
 0x316   : > { %v8589_v7 = vpack.c.bf16 %v1880_v11, %v1879_v55 }
 0x318   : > { %8837 = vst [vmem:[#allocation2 + $0x68] sm:$0xff] %v8589_v7  }
 0x319   : > { %v1843_v30 = vpop.f32.mrf.mxu3 }
 0x31a   : > { %v1844_v17 = vadd.f32 %v1843_v30, %v1755_v39 }
 0x31c   : > { %v1881_v14 = vmax.f32 %v1844_v17, 0.0 }
 0x321   : > { %v1845_v56 = vpop.f32.mrf.mxu3 }
 0x322   : > { %v1846_v15 = vadd.f32 %v1845_v56, %v1757_v63 }
 0x324   : > { %v1882_v40 = vmax.f32 %v1846_v15, 0.0 }
 0x326   : > { %v8594_v54 = vpack.c.bf16 %v1882_v40, %v1881_v14 }
 0x328   : > { %8838 = vst [vmem:[#allocation2 + $0x70] sm:$0xff] %v8594_v54  }
 0x329   : > { %v1848_v33 = vpop.f32.mrf.mxu3 }
 0x32a   : > { %v1849_v42 = vadd.f32 %v1848_v33, %v1760_v8 }
 0x32c   : > { %v1883_v62 = vmax.f32 %v1849_v42, 0.0 }
 0x331   : > { %v1850_v59 = vpop.f32.mrf.mxu3 }
 0x332   : > { %v1851_v26 = vadd.f32 %v1850_v59, %v1762_v16 }
 0x334   : > { %v1884_v27 = vmax.f32 %v1851_v26, 0.0 }
 0x336   : > { %v8599_v48 = vpack.c.bf16 %v1884_v27, %v1883_v62 }
 0x338   : > { %8839 = vst [vmem:[#allocation2 + $0x78] sm:$0xff] %v8599_v48  }
 0x339 PF: > { %p7114_p5 = scmp.ne.s32.totalorder %s8986_s24, 1 }
 0x33b   : > { %1954 = sbr.rel (%p7114_p5) target bundleno = 1602 (0x642), region = 96 }
 0x340   : > { %v8376_v24 = vld [vmem:[#allocation2 + $0x38] sm:$0xff]  ;;  %v8997_v58 = vmov 0   ;;  %v8375_v10 = vld [vmem:[#allocation2 + $0x30] sm:$0xff]  ;;  %v12268_v46 = vld [vmem:[#allocation234_spill] sm:$0xff] }
 0x341   : > { %8957 = vset.pattern.permute.xlu0 %v8997_v58  ;;  %8958 = vset.pattern.permute.xlu1 %v8997_v58  ;;  %v8374_v6 = vld [vmem:[#allocation2 + $0x28] sm:$0xff]  ;;  %v8373_v22 = vld [vmem:[#allocation2 + $0x20] sm:$0xff]  ;;  %v8372_v38 = vld [vmem:[#allocation2 + $0x18] sm:$0xff] }
 0x342   : > { %8885 = vmatpush.bf16.msra.mxu1 %v8376_v24  ;;  %2457 = vperm.xlu0 %8957, %v10393_v41   ;;  %v8371_v23 = vld [vmem:[#allocation2 + $0x10] sm:$0xff]  ;;  %v8370_v43 = vld [vmem:[#allocation2 + $0x8] sm:$0xff]  ;;  %v8369_v55 = vld [vmem:[#allocation2] sm:$0xff] }
 0x343   : > { %2467 = vperm.xlu1 %8958, %v12268_v46   ;;  %2277 = vmatpush.bf16.msra.mxu0 %v8376_v24  ;;  %v8384_v11 = vld [vmem:[#allocation2 + $0x78] sm:$0xff]  ;;  %v12269_v7 = vld [vmem:[#allocation58_spill] sm:$0xff]  ;;  %v8383_v39 = vld [vmem:[#allocation2 + $0x70] sm:$0xff] }
 0x344   : > { %8959 = vset.pattern.permute.xlu2 %v8997_v58  ;;  %8886 = vmatpush.bf16.msra.mxu2 %v8376_v24  ;;  %v12270_v47 = vld [vmem:[#allocation64_spill] sm:$0xff]  ;;  %v8382_v63 = vld [vmem:[#allocation2 + $0x68] sm:$0xff]  ;;  %v8381_v17 = vld [vmem:[#allocation2 + $0x60] sm:$0xff] }
 0x345   : > { %2477 = vperm.xlu2 %8959, %v10413_v0   ;;  %8887 = vmatpush.bf16.msra.mxu3 %v8376_v24  ;;  %v7150_v30 = vor.u32 %v12270_v47, %v12269_v7  ;;  %v8380_v56 = vld [vmem:[#allocation2 + $0x58] sm:$0xff]  ;;  %v12271_v15 = vld [vmem:[#allocation70_spill] sm:$0xff]  ;;  %v8379_v40 = vld [vmem:[#allocation2 + $0x50] sm:$0xff] }
 0x346   : > { %8888 = vmatpush.bf16.msra.mxu1 %v8375_v10  ;;  %v12272_v31 = vld [vmem:[#allocation76_spill] sm:$0xff]  ;;  %v12273_v54 = vld [vmem:[#allocation10_spill] sm:$0xff]  ;;  %v8377_v16 = vld [vmem:[#allocation2 + $0x40] sm:$0xff] }
 0x347   : > { %2278 = vmatpush.bf16.msra.mxu0 %v8375_v10  ;;  %v7158_v14 = vor.u32 %v12272_v31, %v12271_v15  ;;  %v12274_v33 = vld [vmem:[#allocation16_spill] sm:$0xff]  ;;  %v8378_v9 = vld [vmem:[#allocation2 + $0x48] sm:$0xff]  ;;  %v12276_v59 = vld [vmem:[#allocation89_spill] sm:$0xff] }
 0x348   : > { %8889 = vmatpush.bf16.msra.mxu2 %v8375_v10  ;;  %v7118_v8 = vor.u32 %v12274_v33, %v12273_v54  ;;  %v12275_v42 = vld [vmem:[#allocation82_spill] sm:$0xff]  ;;  %v12278_v27 = vld [vmem:[#allocation28_spill] sm:$0xff]  ;;  %v12279_v24 = vld [vmem:[#allocation95_spill] sm:$0xff] }
 0x349   : > { %8890 = vmatpush.bf16.msra.mxu3 %v8375_v10  ;;  %v7166_v26 = vor.u32 %v12276_v59, %v12275_v42  ;;  %v12277_v62 = vld [vmem:[#allocation22_spill] sm:$0xff]  ;;  %v12280_v58 = vld [vmem:[#allocation103_spill] sm:$0xff]  ;;  %v8392_v42 = vld [vmem:[%s11964_s5 + $0x38] sm:$0xff] }
 0x34a   : > { %8891 = vmatpush.bf16.msra.mxu1 %v8374_v6  ;;  %2462 = vperm.xlu0 %8957, %v10398_v5   ;;  %v7126_v48 = vor.u32 %v12278_v27, %v12277_v62  ;;  %v7174_v10 = vor.u32 %v12280_v58, %v12279_v24  ;;  %v12281_v46 = vld [vmem:[#allocation34_spill] sm:$0xff]  ;;  %v12287_v47 = vld [vmem:[#allocation27_spill] sm:$0xff]  ;;  %v8400_v59 = vld [vmem:[%s11964_s5 + $0x78] sm:$0xff] }
 0x34b   : > { %2472 = vperm.xlu1 %8958, %v10408_v13   ;;  %2279 = vmatpush.bf16.msra.mxu0 %v8374_v6  ;;  %v12291_v15 = vld [vmem:[#allocation111_spill] sm:$0xff] }
 0x34c   : > { %8892 = vmatpush.bf16.msra.mxu2 %v8374_v6  ;;  %v12292_v31 = vld [vmem:[#allocation119_spill] sm:$0xff] }
 0x34d   : > { %2482 = vperm.xlu2 %8959, %v10418_v1   ;;  %8893 = vmatpush.bf16.msra.mxu3 %v8374_v6  ;;  %v12282_v6 = vld [vmem:[#allocation40_spill] sm:$0xff]  ;;  %v12294_v54 = vld [vmem:[#allocation183_spill] sm:$0xff] }
 0x34e   : > { %8894 = vmatpush.bf16.msra.mxu1 %v8373_v22  ;;  %v12298_v62 = vld [vmem:[#allocation135_spill] sm:$0xff] }
 0x34f   : > { %2280 = vmatpush.bf16.msra.mxu0 %v8373_v22  ;;  %v12299_v24 = vld [vmem:[#allocation191_spill] sm:$0xff] }
 0x350   : > { %8895 = vmatpush.bf16.msra.mxu2 %v8373_v22  ;;  %v12300_v58 = vld [vmem:[#allocation199_spill] sm:$0xff] }
 0x351   : > { %8896 = vmatpush.bf16.msra.mxu3 %v8373_v22  ;;  %v7134_v22 = vor.u32 %v12282_v6, %v12281_v46  ;;  %v8399_v46 = vld [vmem:[%s11964_s5 + $0x70] sm:$0xff]  ;;  %v12301_v6 = vld [vmem:[#allocation63_spill] sm:$0xff] }
 0x352   : > { %8897 = vmatpush.bf16.msra.mxu1 %v8372_v38  ;;  %2487 = vperm.xlu0 %8957, %v10423_v49  }
 0x353   : > { %2492 = vperm.xlu1 %8958, %v10428_v21   ;;  %2281 = vmatpush.bf16.msra.mxu0 %v8372_v38 }
 0x354   : > { %8898 = vmatpush.bf16.msra.mxu2 %v8372_v38 }
 0x355   : > { %2497 = vperm.xlu2 %8959, %v10433_v29   ;;  %8899 = vmatpush.bf16.msra.mxu3 %v8372_v38  ;;  %v12283_v38 = vld [vmem:[#allocation15_spill] sm:$0xff] }
 0x356   : > { %8900 = vmatpush.bf16.msra.mxu1 %v8371_v23 }
 0x357   : > { %2282 = vmatpush.bf16.msra.mxu0 %v8371_v23 }
 0x358   : > { %8901 = vmatpush.bf16.msra.mxu2 %v8371_v23 }
 0x359   : > { %8902 = vmatpush.bf16.msra.mxu3 %v8371_v23  ;;  %v12284_v23 = vld [vmem:[#allocation9_spill] sm:$0xff] }
 0x35a   : > { %8903 = vmatpush.bf16.msra.mxu1 %v8370_v43  ;;  %2502 = vperm.xlu0 %8957, %v10438_v51  }
 0x35b   : > { %2507 = vperm.xlu1 %8958, %v10443_v35   ;;  %2283 = vmatpush.bf16.msra.mxu0 %v8370_v43 }
 0x35c   : > { %8904 = vmatpush.bf16.msra.mxu2 %v8370_v43 }
 0x35d   : > { %2512 = vperm.xlu2 %8959, %v10448_v37   ;;  %8905 = vmatpush.bf16.msra.mxu3 %v8370_v43  ;;  %v7122_v43 = vor.u32 %v12284_v23, %v12283_v38 }
 0x35e   : > { %8906 = vmatpush.bf16.msra.mxu1 %v8369_v55 }
 0x35f   : > { %2284 = vmatpush.bf16.msra.mxu0 %v8369_v55 }
 0x360   : > { %8907 = vmatpush.bf16.msra.mxu2 %v8369_v55 }
 0x361   : > { %2305 = vmatmul.bf16.vlgmr.msra.gmra.mxu1 %v7150_v30  ;;  %8908 = vmatpush.bf16.msra.mxu3 %v8369_v55  ;;  %v12285_v55 = vld [vmem:[#allocation46_spill] sm:$0xff]  ;;  %v12288_v30 = vld [vmem:[#allocation21_spill] sm:$0xff] }
 0x362   : > { %2366 = vmatpush.bf16.msrb.mxu1 %v8384_v11  ;;  %2517 = vperm.xlu0 %8957, %v10453_v45   ;;  %v12286_v11 = vld [vmem:[#allocation52_spill] sm:$0xff] }
 0x363   : > { %2522 = vperm.xlu1 %8958, %v10458_v19   ;;  %2285 = vmatmul.bf16.vlgmr.msra.gmra.mxu0 %v7118_v8  ;;  %v7142_v7 = vor.u32 %v12286_v11, %v12285_v55  ;;  %v12295_v8 = vld [vmem:[#allocation51_spill] sm:$0xff] }
 0x364   : > { %3003 = vmatpush.bf16.msrb.mxu2 %v8392_v42  ;;  %v8398_v55 = vld [vmem:[%s11964_s5 + $0x68] sm:$0xff] }
 0x365   : > { %2527 = vperm.xlu2 %8959, %v10463_v12   ;;  %3092 = vmatpush.bf16.msrb.mxu3 %v8400_v59  ;;  %v12303_v11 = vld [vmem:[#allocation143_spill] sm:$0xff] }
 0x366   : > { %2367 = vmatpush.bf16.msrb.mxu1 %v8383_v39  ;;  %v7130_v39 = vor.u32 %v12288_v30, %v12287_v47 }
 0x369   : > { %3093 = vmatpush.bf16.msrb.mxu3 %v8399_v46 }
 0x36a   : > { %2368 = vmatpush.bf16.msrb.mxu1 %v8382_v63  ;;  %2532 = vperm.xlu0 %8957, %v10468_v53   ;;  %v12289_v63 = vld [vmem:[#allocation39_spill] sm:$0xff] }
 0x36b   : > { %2537 = vperm.xlu1 %8958, %v10473_v61  }
 0x36d   : > { %2542 = vperm.xlu2 %8959, %v10478_v4   ;;  %3094 = vmatpush.bf16.msrb.mxu3 %v8398_v55  ;;  %v8353_v55 = vld [vmem:[#allocation2] sm:$0xff] }
 0x36e   : > { %2369 = vmatpush.bf16.msrb.mxu1 %v8381_v17  ;;  %v12290_v17 = vld [vmem:[#allocation33_spill] sm:$0xff] }
 0x371   : > { %2310 = vmatmul.bf16.gmra.mxu1 %v7158_v14  ;;  %v7182_v14 = vor.u32 %v12292_v31, %v12291_v15  ;;  %v8397_v15 = vld [vmem:[%s11964_s5 + $0x60] sm:$0xff]  ;;  %v12307_v31 = vld [vmem:[#allocation75_spill] sm:$0xff] }
 0x372   : > { %2370 = vmatpush.bf16.msrb.mxu1 %v8380_v56  ;;  %2547 = vperm.xlu0 %8957, %v10483_v28   ;;  %v7138_v56 = vor.u32 %v12290_v17, %v12289_v63  ;;  %v12305_v63 = vld [vmem:[#allocation207_spill] sm:$0xff] }
 0x373   : > { %2552 = vperm.xlu1 %8958, %v10488_v44   ;;  %2290 = vmatmul.bf16.gmra.mxu0 %v7126_v48  ;;  %v8391_v48 = vld [vmem:[%s11964_s5 + $0x30] sm:$0xff]  ;;  %v12306_v17 = vld [vmem:[#allocation215_spill] sm:$0xff] }
 0x374   : > { %2325 = vmatmul.bf16.vlgmr.msra.gmra.mxu2 %v7182_v14  ;;  %3095 = vmatpush.bf16.msrb.mxu3 %v8397_v15  ;;  %v12308_v14 = vld [vmem:[#allocation69_spill] sm:$0xff]  ;;  %v8354_v15 = vld [vmem:[#allocation2 + $0x8] sm:$0xff] }
 0x375   : > { %2557 = vperm.xlu2 %8959, %v10493_v36   ;;  %3004 = vmatpush.bf16.msrb.mxu2 %v8391_v48 }
 0x376   : > { %2371 = vmatpush.bf16.msrb.mxu1 %v8379_v40  ;;  %v12293_v40 = vld [vmem:[#allocation175_spill] sm:$0xff] }
 0x377   : > { %v7214_v33 = vor.u32 %v12294_v54, %v12293_v40  ;;  %v7162_v40 = vor.u32 %v12308_v14, %v12307_v31 }
 0x379   : > { %2345 = vmatmul.bf16.vlgmr.msra.gmra.mxu3 %v7214_v33  ;;  %v8388_v33 = vld [vmem:[%s11964_s5 + $0x18] sm:$0xff] }
 0x37a   : > { %2372 = vmatpush.bf16.msrb.mxu1 %v8378_v9  ;;  %2562 = vperm.xlu0 %8957, %v10498_v20   ;;  %v12296_v9 = vld [vmem:[#allocation45_spill] sm:$0xff] }
 0x37b   : > { %2567 = vperm.xlu1 %8958, %v10503_v3  }
 0x37d   : > { %2572 = vperm.xlu2 %8959, %v10508_v60  }
 0x37e   : > { %2373 = vmatpush.bf16.msrb.mxu1 %v8377_v16  ;;  %v7146_v16 = vor.u32 %v12296_v9, %v12295_v8  ;;  %v8396_v8 = vld [vmem:[%s11964_s5 + $0x58] sm:$0xff]  ;;  %v12309_v9 = vld [vmem:[#allocation159_spill] sm:$0xff] }
 0x37f   : > { %3096 = vmatpush.bf16.msrb.mxu3 %v8396_v8 }
 0x381   : > { %2315 = vmatmul.bf16.gmra.mxu1 %v7166_v26  ;;  %v12297_v26 = vld [vmem:[#allocation127_spill] sm:$0xff] }
 0x382   : > { %2577 = vperm.xlu0 %8957, %v10513_v25   ;;  %v7190_v27 = vor.u32 %v12298_v62, %v12297_v26  ;;  %v8387_v26 = vld [vmem:[%s11964_s5 + $0x10] sm:$0xff]  ;;  %v12311_v62 = vld [vmem:[#allocation223_spill] sm:$0xff] }
 0x383   : > { %2582 = vperm.xlu1 %8958, %v10518_v18   ;;  %2295 = vmatmul.bf16.gmra.mxu0 %v7134_v22  ;;  %v12302_v22 = vld [vmem:[#allocation57_spill] sm:$0xff] }
 0x384   : > { %2330 = vmatmul.bf16.gmra.mxu2 %v7190_v27  ;;  %v7154_v38 = vor.u32 %v12302_v22, %v12301_v6  ;;  %v12312_v27 = vld [vmem:[#allocation231_spill] sm:$0xff] }
 0x385   : > { %2587 = vperm.xlu2 %8959, %v10523_v32   ;;  %v7238_v48 = vor.u32 %v12312_v27, %v12311_v62  ;;  %v8386_v22 = vld [vmem:[%s11964_s5 + $0x8] sm:$0xff] }
 0x386   : > { %v8355_v27 = vld [vmem:[#allocation2 + $0x10] sm:$0xff] }
 0x38a   : > { %2592 = vperm.xlu0 %8957, %v10528_v52  }
 0x38b   : > { %2597 = vperm.xlu1 %8958, %v10533_v2  }
 0x38d   : > { %2602 = vperm.xlu2 %8959, %v10538_v57  }
 0x391   : > { %2320 = vmatmul.bf16.gmra.mxu1 %v7174_v10  ;;  %v7222_v10 = vor.u32 %v12300_v58, %v12299_v24  ;;  %v8395_v24 = vld [vmem:[%s11964_s5 + $0x50] sm:$0xff] }
 0x392   : > { %2607 = vperm.xlu0 %8957, %v10543_v50   ;;  %3097 = vmatpush.bf16.msrb.mxu3 %v8395_v24  ;;  %v12313_v58 = vld [vmem:[#allocation88_spill] sm:$0xff] }
 0x393   : > { %2612 = vperm.xlu1 %8958, %v10548_v34   ;;  %2300 = vmatmul.bf16.gmra.mxu0 %v7142_v7  ;;  %v12304_v7 = vld [vmem:[#allocation151_spill] sm:$0xff] }
 0x394   : > { %2350 = vmatmul.bf16.gmra.mxu3 %v7222_v10  ;;  %v7198_v47 = vor.u32 %v12304_v7, %v12303_v11  ;;  %v12314_v10 = vld [vmem:[#allocation81_spill] sm:$0xff]  ;;  %v8393_v7 = vld [vmem:[%s11964_s5 + $0x40] sm:$0xff] }
 0x395   : > { %v7170_v46 = vor.u32 %v12314_v10, %v12313_v58 }
 0x396   : > { %2335 = vmatmul.bf16.gmra.mxu2 %v7198_v47  ;;  %v12315_v47 = vld [vmem:[#allocation102_spill] sm:$0xff] }
 0x3a1   : > { %2374 = vmatmul.bf16.vlgmr.msrb.gmra.mxu1 %v7122_v43  ;;  %v8390_v43 = vld [vmem:[%s11964_s5 + $0x28] sm:$0xff] }
 0x3a2   : > { %3005 = vmatpush.bf16.msrb.mxu2 %v8390_v43  ;;  %v8394_v43 = vld [vmem:[%s11964_s5 + $0x48] sm:$0xff] }
 0x3a3   : > { %3098 = vmatpush.bf16.msrb.mxu3 %v8394_v43 }
 0x3a7   : > { %3099 = vmatpush.bf16.msrb.mxu3 %v8393_v7  ;;  %v12319_v7 = vld [vmem:[#allocation134_spill] sm:$0xff] }
 0x3b1   : > { %2379 = vmatmul.bf16.gmra.mxu1 %v7130_v39  ;;  %v8389_v39 = vld [vmem:[%s11964_s5 + $0x20] sm:$0xff] }
 0x3b2   : > { %3006 = vmatpush.bf16.msrb.mxu2 %v8389_v39  ;;  %v12316_v39 = vld [vmem:[#allocation94_spill] sm:$0xff] }
 0x3b6   : > { %3007 = vmatpush.bf16.msrb.mxu2 %v8388_v33  ;;  %v12318_v33 = vld [vmem:[#allocation110_spill] sm:$0xff] }
 0x3ba   : > { %3008 = vmatpush.bf16.msrb.mxu2 %v8387_v26 }
 0x3be   : > { %3009 = vmatpush.bf16.msrb.mxu2 %v8386_v22 }
 0x3c1   : > { %2384 = vmatmul.bf16.gmra.mxu1 %v7138_v56  ;;  %v7230_v56 = vor.u32 %v12306_v17, %v12305_v63  ;;  %v7178_v63 = vor.u32 %v12316_v39, %v12315_v47  ;;  %v12320_v47 = vld [vmem:[#allocation126_spill] sm:$0xff] }
 0x3c2   : > { %v7194_v39 = vor.u32 %v12320_v47, %v12319_v7  ;;  %v2478_v7 = vpop.permute.xlu2 %2477 }
 0x3c3   : > { %2355 = vmatmul.bf16.gmra.mxu3 %v7230_v56 }
 0x3d1   : > { %2389 = vmatmul.bf16.gmra.mxu1 %v7146_v16  ;;  %v12310_v16 = vld [vmem:[#allocation167_spill] sm:$0xff] }
 0x3d2   : > { %v7206_v42 = vor.u32 %v12310_v16, %v12309_v9  ;;  %v2458_v9 = vpop.permute.xlu0 %2457 }
 0x3d3   : > { %2360 = vmatmul.bf16.gmra.mxu3 %v7238_v48 }
 0x3d4   : > { %2340 = vmatmul.bf16.gmra.mxu2 %v7206_v42 }
 0x3da   : > { %v2463_v58 = vpop.permute.xlu0 %2462 }
 0x3de   : > { %v10943_v23 = vpop.f32.mrf.mxu1 }
 0x3e0   : > { %v2286_v56 = vpop.f32.mrf.mxu0 }
 0x3e1   : > { %2394 = vmatmul.bf16.gmra.mxu1 %v7154_v38  ;;  %v8385_v38 = vld [vmem:[%s11964_s5] sm:$0xff] }
 0x3e2   : > { %3010 = vmatpush.bf16.msrb.mxu2 %v8385_v38  ;;  %v2468_v38 = vpop.permute.xlu1 %2467 }
 0x3e5   : > { %3011 = vmatmul.bf16.vlgmr.msrb.gmra.mxu2 %v8353_v55 }
 0x3e6   : > { %v10953_v30 = vpop.f32.mrf.mxu1 }
 0x3e8   : > { %v2288_v14 = vpop.f32.mrf.mxu0 }
 0x3ee   : > { %v10965_v54 = vpop.f32.mrf.mxu1 }
 0x3f0   : > { %v2291_v26 = vpop.f32.mrf.mxu0 }
 0x3f1   : > { %2399 = vmatmul.bf16.gmra.mxu1 %v7162_v40  ;;  %v12317_v40 = vld [vmem:[#allocation118_spill] sm:$0xff] }
 0x3f2   : > { %v7186_v8 = vor.u32 %v12318_v33, %v12317_v40 }
 0x3f5   : > { %3016 = vmatmul.bf16.gmra.mxu2 %v8354_v15 }
 0x3f6   : > { %v10975_v59 = vpop.f32.mrf.mxu1 }
 0x3fe   : > { %v10987_v6 = vpop.f32.mrf.mxu1 }
 0x401   : > { %2404 = vmatmul.bf16.gmra.mxu1 %v7170_v46 }
 0x405   : > { %3021 = vmatmul.bf16.gmra.mxu2 %v8355_v27 }
 0x406   : > { %v10998_v11 = vpop.f32.mrf.mxu1 }
 0x40e   : > { %v11005_v17 = vpop.f32.mrf.mxu1 }
 0x411   : > { %2409 = vmatmul.bf16.gmra.mxu1 %v7178_v63  ;;  %v2293_v63 = vpop.f32.mrf.mxu0 }
 0x416   : > { %v11007_v31 = vpop.f32.mrf.mxu1 }
 0x41e   : > { %v2375_v16 = vpop.f32.mrf.mxu1 }
 0x41f   : > { %v2376_v42 = vadd.f32 %v2375_v16, %v2286_v56  ;;  %v2473_v16 = vpop.permute.xlu1 %2472 }
 0x421   : > { %2414 = vmatmul.bf16.gmra.mxu1 %v7186_v8  ;;  %v2615_v62 = vmul.f32 %v2458_v9, %v2376_v42  ;;  %v8356_v8 = vld [vmem:[#allocation2 + $0x18] sm:$0xff]  ;;  %v2296_v42 = vpop.f32.mrf.mxu0 }
 0x422   : > { %3026 = vmatmul.bf16.gmra.mxu2 %v8356_v8  ;;  %v11015_v8 = vpop.f32.mrf.mxu2 }
 0x423   : > { %v2647_v10 = vpack.c.bf16 %v2615_v62, %v2615_v62 }
 0x425   : > { %v2807_v43 = vunpack.c.l.b16 %v2647_v10 }
 0x426   : > { %v2377_v48 = vpop.f32.mrf.mxu1 }
 0x427   : > { %v2378_v24 = vadd.f32 %v2377_v48, %v2288_v14 }
 0x429   : > { %v2616_v46 = vmul.f32 %v2463_v58, %v2378_v24  ;;  %v12321_v24 = vld [vmem:[#allocation150_spill] sm:$0xff] }
 0x42a   : > { %v12322_v58 = vld [vmem:[#allocation142_spill] sm:$0xff] }
 0x42b   : > { %v2648_v22 = vpack.c.bf16 %v2616_v46, %v2616_v46  ;;  %v7202_v10 = vor.u32 %v12322_v58, %v12321_v24 }
 0x42d   : > { %v2808_v55 = vunpack.c.l.b16 %v2648_v22 }
 0x42e   : > { %v2380_v15 = vpop.f32.mrf.mxu1 }
 0x42f   : > { %v2839_v56 = vpack.c.b16 %v2808_v55, %v2807_v43  ;;  %v2381_v40 = vadd.f32 %v2380_v15, %v2291_v26 }
 0x431   : > { %2419 = vmatmul.bf16.gmra.mxu1 %v7194_v39  ;;  %3100 = vmatmul.bf16.vlgmr.msrb.gmra.mxu3 %v2839_v56  ;;  %v2617_v33 = vmul.f32 %v2468_v38, %v2381_v40  ;;  %v2298_v38 = vpop.f32.mrf.mxu0  ;;  %v8357_v39 = vld [vmem:[#allocation2 + $0x20] sm:$0xff]  ;;  %v2483_v56 = vpop.permute.xlu2 %2482 }
 0x432   : > { %3031 = vmatmul.bf16.gmra.mxu2 %v8357_v39 }
 0x433   : > { %v2649_v62 = vpack.c.bf16 %v2617_v33, %v2617_v33 }
 0x435   : > { %v2809_v46 = vunpack.c.l.b16 %v2649_v62  ;;  %v12324_v62 = vld [vmem:[#allocation158_spill] sm:$0xff] }
 0x436   : > { %v2382_v14 = vpop.f32.mrf.mxu1 }
 0x437   : > { %v2383_v9 = vadd.f32 %v2382_v14, %v2293_v63 }
 0x439   : > { %v2618_v27 = vmul.f32 %v2473_v16, %v2383_v9  ;;  %v2301_v9 = vpop.f32.mrf.mxu0  ;;  %v12323_v16 = vld [vmem:[#allocation166_spill] sm:$0xff] }
 0x43b   : > { %v2650_v48 = vpack.c.bf16 %v2618_v27, %v2618_v27  ;;  %v7210_v27 = vor.u32 %v12324_v62, %v12323_v16 }
 0x43d   : > { %v2810_v22 = vunpack.c.l.b16 %v2650_v48 }
 0x43e   : > { %v2385_v43 = vpop.f32.mrf.mxu1 }
 0x43f   : > { %v2840_v26 = vpack.c.b16 %v2810_v22, %v2809_v46  ;;  %v2386_v55 = vadd.f32 %v2385_v43, %v2296_v42  ;;  %v11019_v46 = vpop.f32.mrf.mxu2  ;;  %v2488_v22 = vpop.permute.xlu0 %2487  ;;  %v8358_v43 = vld [vmem:[#allocation2 + $0x28] sm:$0xff] }
 0x441   : > { %2424 = vmatmul.bf16.gmra.mxu1 %v7202_v10  ;;  %3105 = vmatmul.bf16.gmra.mxu3 %v2840_v26  ;;  %v2619_v47 = vmul.f32 %v2478_v7, %v2386_v55  ;;  %v2303_v26 = vpop.f32.mrf.mxu0 }
 0x442   : > { %3036 = vmatmul.bf16.gmra.mxu2 %v8358_v43  ;;  %v11031_v43 = vpop.f32.mrf.mxu3 }
 0x443   : > { %v2651_v40 = vpack.c.bf16 %v2619_v47, %v2619_v47  ;;  %v2493_v47 = vpop.permute.xlu1 %2492 }
 0x445   : > { %v2811_v48 = vunpack.c.l.b16 %v2651_v40  ;;  %v12325_v40 = vld [vmem:[#allocation182_spill] sm:$0xff] }
 0x446   : > { %v2387_v63 = vpop.f32.mrf.mxu1 }
 0x447   : > { %v2388_v15 = vadd.f32 %v2387_v63, %v2298_v38 }
 0x449   : > { %v2620_v33 = vmul.f32 %v2483_v56, %v2388_v15  ;;  %v11021_v15 = vpop.f32.mrf.mxu2 }
 0x44b   : > { %v2652_v14 = vpack.c.bf16 %v2620_v33, %v2620_v33  ;;  %v12326_v33 = vld [vmem:[#allocation174_spill] sm:$0xff] }
 0x44d   : > { %v2812_v42 = vunpack.c.l.b16 %v2652_v14  ;;  %v7218_v14 = vor.u32 %v12326_v33, %v12325_v40  ;;  %v12328_v40 = vld [vmem:[#allocation190_spill] sm:$0xff] }
 0x44e   : > { %v2390_v24 = vpop.f32.mrf.mxu1 }
 0x44f   : > { %v2841_v58 = vpack.c.b16 %v2812_v42, %v2811_v48  ;;  %v2391_v10 = vadd.f32 %v2390_v24, %v2301_v9  ;;  %v8408_v24 = vld [vmem:[%s11966_s7 + $0x38] sm:$0xff] }
 0x450   : > { %3361 = vmatpush.bf16.msrb.mxu0 %v8408_v24  ;;  %v8406_v24 = vld [vmem:[%s11966_s7 + $0x28] sm:$0xff] }
 0x451   : > { %2429 = vmatmul.bf16.gmra.mxu1 %v7210_v27  ;;  %3110 = vmatmul.bf16.gmra.mxu3 %v2841_v58  ;;  %v2621_v7 = vmul.f32 %v2488_v22, %v2391_v10  ;;  %v11026_v42 = vpop.f32.mrf.mxu2  ;;  %v2498_v58 = vpop.permute.xlu2 %2497  ;;  %v8359_v22 = vld [vmem:[#allocation2 + $0x30] sm:$0xff] }
 0x452   : > { %3041 = vmatmul.bf16.gmra.mxu2 %v8359_v22  ;;  %v8360_v22 = vld [vmem:[#allocation2 + $0x38] sm:$0xff] }
 0x453   : > { %v2653_v39 = vpack.c.bf16 %v2621_v7, %v2621_v7 }
 0x455   : > { %v2813_v9 = vunpack.c.l.b16 %v2653_v39 }
 0x456   : > { %v2392_v55 = vpop.f32.mrf.mxu1 }
 0x457   : > { %v2393_v38 = vadd.f32 %v2392_v55, %v2303_v26  ;;  %v2503_v55 = vpop.permute.xlu0 %2502 }
 0x459   : > { %v2622_v63 = vmul.f32 %v2493_v47, %v2393_v38  ;;  %v11034_v47 = vpop.f32.mrf.mxu2 }
 0x45b   : > { %v2654_v56 = vpack.c.bf16 %v2622_v63, %v2622_v63  ;;  %v8407_v63 = vld [vmem:[%s11966_s7 + $0x30] sm:$0xff] }
 0x45c   : > { %3362 = vmatpush.bf16.msrb.mxu0 %v8407_v63 }
 0x45d   : > { %v2814_v16 = vunpack.c.l.b16 %v2654_v56  ;;  %v12327_v56 = vld [vmem:[#allocation198_spill] sm:$0xff] }
 0x45e   : > { %v2395_v62 = vpop.f32.mrf.mxu1  ;;  %v7226_v33 = vor.u32 %v12328_v40, %v12327_v56  ;;  %v8405_v56 = vld [vmem:[%s11966_s7 + $0x20] sm:$0xff] }
 0x45f   : > { %v2842_v27 = vpack.c.b16 %v2814_v16, %v2813_v9  ;;  %v2396_v48 = vadd.f32 %v2395_v62, %v10943_v23  ;;  %v12329_v40 = vld [vmem:[#allocation214_spill] sm:$0xff] }
 0x460   : > { %3363 = vmatpush.bf16.msrb.mxu0 %v8406_v24 }
 0x461   : > { %2434 = vmatmul.bf16.gmra.mxu1 %v7218_v14  ;;  %3115 = vmatmul.bf16.gmra.mxu3 %v2842_v27  ;;  %v2623_v10 = vmul.f32 %v2498_v58, %v2396_v48  ;;  %v11044_v48 = vpop.f32.mrf.mxu2  ;;  %v2508_v58 = vpop.permute.xlu1 %2507 }
 0x462   : > { %3046 = vmatmul.bf16.gmra.mxu2 %v8360_v22 }
 0x463   : > { %v2655_v23 = vpack.c.bf16 %v2623_v10, %v2623_v10 }
 0x464   : > { %3364 = vmatpush.bf16.msrb.mxu0 %v8405_v56 }
 0x465   : > { %v2815_v14 = vunpack.c.l.b16 %v2655_v23 }
 0x466   : > { %v2397_v7 = vpop.f32.mrf.mxu1 }
 0x467   : > { %v2398_v26 = vadd.f32 %v2397_v7, %v10953_v30  ;;  %v11041_v30 = vpop.f32.mrf.mxu3 }
 0x469   : > { %v2624_v38 = vmul.f32 %v2503_v55, %v2398_v26  ;;  %v2513_v55 = vpop.permute.xlu2 %2512 }
 0x46b   : > { %v2656_v39 = vpack.c.bf16 %v2624_v38, %v2624_v38 }
 0x46d   : > { %v2816_v9 = vunpack.c.l.b16 %v2656_v39  ;;  %v11052_v39 = vpop.f32.mrf.mxu2 }
 0x46e   : > { %v2400_v16 = vpop.f32.mrf.mxu1 }
 0x46f   : > { %v2843_v62 = vpack.c.b16 %v2816_v9, %v2815_v14  ;;  %v2401_v27 = vadd.f32 %v2400_v16, %v10965_v54  ;;  %v11050_v54 = vpop.f32.mrf.mxu3 }
 0x471   : > { %2439 = vmatmul.bf16.gmra.mxu1 %v7226_v33  ;;  %3120 = vmatmul.bf16.gmra.mxu3 %v2843_v62  ;;  %v2625_v10 = vmul.f32 %v2508_v58, %v2401_v27  ;;  %v12330_v33 = vld [vmem:[#allocation206_spill] sm:$0xff]  ;;  %v2518_v58 = vpop.permute.xlu0 %2517 }
 0x472   : > { %v7234_v14 = vor.u32 %v12330_v33, %v12329_v40  ;;  %v12331_v33 = vld [vmem:[#allocation230_spill] sm:$0xff] }
 0x473   : > { %v2657_v23 = vpack.c.bf16 %v2625_v10, %v2625_v10 }
 0x475   : > { %v2817_v9 = vunpack.c.l.b16 %v2657_v23  ;;  %v11060_v24 = vpop.f32.mrf.mxu2 }
 0x476   : > { %v2402_v7 = vpop.f32.mrf.mxu1 }
 0x477   : > { %v2403_v26 = vadd.f32 %v2402_v7, %v10975_v59  ;;  %v11062_v10 = vpop.f32.mrf.mxu3  ;;  %v8404_v7 = vld [vmem:[%s11966_s7 + $0x18] sm:$0xff] }
 0x478   : > { %3365 = vmatpush.bf16.msrb.mxu0 %v8404_v7 }
 0x479   : > { %v2626_v38 = vmul.f32 %v2513_v55, %v2403_v26  ;;  %v8361_v26 = vld [vmem:[#allocation2 + $0x40] sm:$0xff] }
 0x47a   : > { %3051 = vmatmul.bf16.gmra.mxu2 %v8361_v26  ;;  %v2528_v26 = vpop.permute.xlu2 %2527 }
 0x47b   : > { %v2658_v63 = vpack.c.bf16 %v2626_v38, %v2626_v38  ;;  %v2523_v38 = vpop.permute.xlu1 %2522 }
 0x47d   : > { %v2818_v16 = vunpack.c.l.b16 %v2658_v63  ;;  %v3012_v56 = vpop.f32.mrf.mxu2 }
 0x47e   : > { %v2405_v59 = vpop.f32.mrf.mxu1 }
 0x47f   : > { %v2844_v62 = vpack.c.b16 %v2818_v16, %v2817_v9  ;;  %v2406_v27 = vadd.f32 %v2405_v59, %v10987_v6 }
 0x481   : > { %2444 = vmatmul.bf16.gmra.mxu1 %v7234_v14  ;;  %3125 = vmatmul.bf16.gmra.mxu3 %v2844_v62  ;;  %v2627_v22 = vmul.f32 %v2518_v58, %v2406_v27  ;;  %v12332_v14 = vld [vmem:[#allocation222_spill] sm:$0xff]  ;;  %v8403_v62 = vld [vmem:[%s11966_s7 + $0x10] sm:$0xff]  ;;  %v11073_v27 = vpop.f32.mrf.mxu3 }
 0x482   : > { %v7242_v9 = vor.u32 %v12332_v14, %v12331_v33  ;;  %3366 = vmatpush.bf16.msrb.mxu0 %v8403_v62 }
 0x483   : > { %v2659_v6 = vpack.c.bf16 %v2627_v22, %v2627_v22 }
 0x485   : > { %v2819_v16 = vunpack.c.l.b16 %v2659_v6  ;;  %v3014_v22 = vpop.f32.mrf.mxu2 }
 0x486   : > { %v2407_v55 = vpop.f32.mrf.mxu1 }
 0x487   : > { %v2408_v23 = vadd.f32 %v2407_v55, %v10998_v11 }
 0x489   : > { %v2628_v63 = vmul.f32 %v2523_v38, %v2408_v23  ;;  %v8362_v23 = vld [vmem:[#allocation2 + $0x48] sm:$0xff] }
 0x48a   : > { %3056 = vmatmul.bf16.gmra.mxu2 %v8362_v23  ;;  %v2538_v23 = vpop.permute.xlu1 %2537 }
 0x48b   : > { %v2660_v40 = vpack.c.bf16 %v2628_v63, %v2628_v63  ;;  %v2533_v63 = vpop.permute.xlu0 %2532 }
 0x48d   : > { %v2820_v59 = vunpack.c.l.b16 %v2660_v40  ;;  %v11077_v40 = vpop.f32.mrf.mxu3 }
 0x48e   : > { %v2410_v58 = vpop.f32.mrf.mxu1 }
 0x48f   : > { %v2845_v11 = vpack.c.b16 %v2820_v59, %v2819_v16  ;;  %v2411_v7 = vadd.f32 %v2410_v58, %v11005_v17  ;;  %v8402_v16 = vld [vmem:[%s11966_s7 + $0x8] sm:$0xff]  ;;  %v11082_v17 = vpop.f32.mrf.mxu2 }
 0x490   : > { %3367 = vmatpush.bf16.msrb.mxu0 %v8402_v16 }
 0x491   : > { %2449 = vmatmul.bf16.gmra.mxu1 %v7242_v9  ;;  %3130 = vmatmul.bf16.gmra.mxu3 %v2845_v11  ;;  %v2629_v55 = vmul.f32 %v2528_v26, %v2411_v7 }
 0x493   : > { %v2661_v33 = vpack.c.bf16 %v2629_v55, %v2629_v55 }
 0x495   : > { %v2821_v59 = vunpack.c.l.b16 %v2661_v33  ;;  %v11088_v26 = vpop.f32.mrf.mxu3 }
 0x496   : > { %v2412_v38 = vpop.f32.mrf.mxu1 }
 0x497   : > { %v2413_v6 = vadd.f32 %v2412_v38, %v11007_v31  ;;  %v8401_v31 = vld [vmem:[%s11966_s7] sm:$0xff]  ;;  %v11090_v55 = vpop.f32.mrf.mxu2 }
 0x498   : > { %3368 = vmatpush.bf16.msrb.mxu0 %v8401_v31 }
 0x499   : > { %v2630_v14 = vmul.f32 %v2533_v63, %v2413_v6  ;;  %v8363_v6 = vld [vmem:[#allocation2 + $0x50] sm:$0xff] }
 0x49a   : > { %3061 = vmatmul.bf16.gmra.mxu2 %v8363_v6 }
 0x49b   : > { %v2662_v9 = vpack.c.bf16 %v2630_v14, %v2630_v14  ;;  %v2543_v14 = vpop.permute.xlu2 %2542 }
 0x49d   : > { %v2822_v62 = vunpack.c.l.b16 %v2662_v9 }
 0x49e   : > { %v2415_v58 = vpop.f32.mrf.mxu1 }
 0x49f   : > { %v2846_v11 = vpack.c.b16 %v2822_v62, %v2821_v59  ;;  %v2416_v7 = vadd.f32 %v2415_v58, %v11015_v8  ;;  %v11093_v59 = vpop.f32.mrf.mxu2  ;;  %v11095_v8 = vpop.f32.mrf.mxu3 }
 0x4a1   : > { %3135 = vmatmul.bf16.gmra.mxu3 %v2846_v11  ;;  %v2631_v38 = vmul.f32 %v2538_v23, %v2416_v7  ;;  %v11100_v7 = vld [vmem:[%s11965_s6] ss:$0 sm:$0xff] }
 0x4a3   : > { %v2663_v16 = vpack.c.bf16 %v2631_v38, %v2631_v38  ;;  %v2548_v38 = vpop.permute.xlu0 %2547 }
 0x4a5   : > { %v2823_v58 = vunpack.c.l.b16 %v2663_v16 }
 0x4a6   : > { %v2417_v63 = vpop.f32.mrf.mxu1 }
 0x4a7   : > { %v2418_v33 = vadd.f32 %v2417_v63, %v11019_v46  ;;  %v11103_v23 = vpop.f32.mrf.mxu2  ;;  %v3013_v63 = vadd.f32 %v11100_v7, %v3012_v56 }
 0x4a9   : > { %v2632_v9 = vmul.f32 %v2543_v14, %v2418_v33  ;;  %v8364_v14 = vld [vmem:[#allocation2 + $0x58] sm:$0xff] }
 0x4aa   : > { %3066 = vmatmul.bf16.gmra.mxu2 %v8364_v14 }
 0x4ab   : > { %v2664_v62 = vpack.c.bf16 %v2632_v9, %v2632_v9 }
 0x4ad   : > { %v2824_v11 = vunpack.c.l.b16 %v2664_v62  ;;  %v2553_v62 = vpop.permute.xlu1 %2552 }
 0x4ae   : > { %v2420_v31 = vpop.f32.mrf.mxu1 }
 0x4af   : > { %v2847_v50 = vpack.c.b16 %v2824_v11, %v2823_v58  ;;  %v2421_v46 = vadd.f32 %v2420_v31, %v11021_v15  ;;  %v1957_v11 = vld [vmem:[#allocation2] sm:$0xff]   ;;  %v11107_v52 = vpop.f32.mrf.mxu2 }
 0x4b0   : > { %v3213_v31 = vunpack.c.l.bf16 %v1957_v11  ;;  %v3214_v32 = vunpack.c.h.bf16 %v1957_v11  ;;  %v2563_v11 = vpop.permute.xlu0 %2562 }
 0x4b1   : > { %3140 = vmatmul.bf16.gmra.mxu3 %v2847_v50  ;;  %v2633_v33 = vmul.f32 %v2548_v38, %v2421_v46  ;;  %v3015_v50 = vadd.f32 %v11100_v7, %v3014_v22  ;;  %v2558_v22 = vpop.permute.xlu2 %2557 }
 0x4b3   : > { %v2665_v58 = vpack.c.bf16 %v2633_v33, %v2633_v33 }
 0x4b4   : > { %v3101_v6 = vpop.f32.mrf.mxu3 }
 0x4b5   : > { %v3102_v34 = vadd.f32 %v3101_v6, %v3013_v63  ;;  %v2825_v56 = vunpack.c.l.b16 %v2665_v58 }
 0x4b6   : > { %v2422_v16 = vpop.f32.mrf.mxu1 }
 0x4b7   : > { %v2423_v9 = vadd.f32 %v2422_v16, %v11026_v42  ;;  %v3181_v46 = vmax.f32 %v3102_v34, 0.0  ;;  %v11111_v63 = vpop.f32.mrf.mxu2  ;;  %v8365_v34 = vld [vmem:[#allocation2 + $0x60] sm:$0xff] }
 0x4b9   : > { %v2634_v57 = vmul.f32 %v2553_v62, %v2423_v9  ;;  %v3245_v16 = vadd.f32 %v3213_v31, %v3181_v46  ;;  %v3018_v62 = vadd.f32 %v11100_v7, %v11082_v17  ;;  %v3020_v31 = vadd.f32 %v11100_v7, %v11090_v55  ;;  %v2568_v55 = vpop.permute.xlu1 %2567 }
 0x4ba   : > { %3071 = vmatmul.bf16.gmra.mxu2 %v8365_v34 }
 0x4bb   : > { %v2666_v15 = vpack.c.bf16 %v2634_v57, %v2634_v57 }
 0x4bc   : > { %v3103_v2 = vpop.f32.mrf.mxu3 }
 0x4bd   : > { %v2826_v38 = vunpack.c.l.b16 %v2666_v15  ;;  %v3104_v25 = vadd.f32 %v3103_v2, %v3015_v50  ;;  %v1959_v50 = vld [vmem:[#allocation2 + $0x8] sm:$0xff]  }
 0x4be   : > { %v2425_v18 = vpop.f32.mrf.mxu1  ;;  %v3215_v46 = vunpack.c.l.bf16 %v1959_v50 }
 0x4bf   : > { %v3182_v42 = vmax.f32 %v3104_v25, 0.0  ;;  %v2848_v14 = vpack.c.b16 %v2826_v38, %v2825_v56  ;;  %v2426_v6 = vadd.f32 %v2425_v18, %v11034_v47  ;;  %v11116_v15 = vpop.f32.mrf.mxu2  ;;  %v3216_v38 = vunpack.c.h.bf16 %v1959_v50 }
 0x4c1   : > { %v3246_v33 = vadd.f32 %v3214_v32, %v3182_v42  ;;  %3145 = vmatmul.bf16.gmra.mxu3 %v2848_v14  ;;  %v2635_v58 = vmul.f32 %v2558_v22, %v2426_v6 }
 0x4c3   : > { %v3277_v9 = vpack.c.bf16 %v3246_v33, %v3245_v16  ;;  %v2667_v32 = vpack.c.bf16 %v2635_v58, %v2635_v58 }
 0x4c4   : > { %v3106_v57 = vpop.f32.mrf.mxu3 }
 0x4c5   : > { %3369 = vmatmul.bf16.vlgmr.msrb.gmra.mxu0 %v3277_v9  ;;  %v3107_v18 = vadd.f32 %v3106_v57, %v3018_v62  ;;  %v2827_v42 = vunpack.c.l.b16 %v2667_v32  ;;  %v8366_v32 = vld [vmem:[#allocation2 + $0x68] sm:$0xff] }
 0x4c6   : > { %v2427_v2 = vpop.f32.mrf.mxu1 }
 0x4c7   : > { %v2428_v25 = vadd.f32 %v2427_v2, %v11044_v48  ;;  %v3183_v14 = vmax.f32 %v3107_v18, 0.0  ;;  %v11121_v58 = vpop.f32.mrf.mxu2 }
 0x4c9   : > { %v2636_v47 = vmul.f32 %v2563_v11, %v2428_v25  ;;  %v3247_v22 = vadd.f32 %v3215_v46, %v3183_v14  ;;  %v3023_v25 = vadd.f32 %v11100_v7, %v11093_v59 }
 0x4ca   : > { %3076 = vmatmul.bf16.gmra.mxu2 %v8366_v32  ;;  %v3028_v32 = vadd.f32 %v11100_v7, %v11107_v52 }
 0x4cb   : > { %v2668_v56 = vpack.c.bf16 %v2636_v47, %v2636_v47  ;;  %v2573_v47 = vpop.permute.xlu2 %2572 }
 0x4cc   : > { %v3108_v17 = vpop.f32.mrf.mxu3 }
 0x4cd   : > { %v2828_v16 = vunpack.c.l.b16 %v2668_v56  ;;  %v3109_v33 = vadd.f32 %v3108_v17, %v3020_v31 }
 0x4ce   : > { %v2430_v48 = vpop.f32.mrf.mxu1 }
 0x4cf   : > { %v3184_v6 = vmax.f32 %v3109_v33, 0.0  ;;  %v2849_v9 = vpack.c.b16 %v2828_v16, %v2827_v42  ;;  %v2431_v57 = vadd.f32 %v2430_v48, %v11052_v39  ;;  %v1961_v39 = vld [vmem:[#allocation2 + $0x10] sm:$0xff]   ;;  %v11126_v17 = vpop.f32.mrf.mxu2 }
 0x4d0   : > { %v3217_v14 = vunpack.c.l.bf16 %v1961_v39  ;;  %v3218_v16 = vunpack.c.h.bf16 %v1961_v39  ;;  %v2583_v39 = vpop.permute.xlu1 %2582 }
 0x4d1   : > { %3150 = vmatmul.bf16.gmra.mxu3 %v2849_v9  ;;  %v3248_v62 = vadd.f32 %v3216_v38, %v3184_v6  ;;  %v2637_v11 = vmul.f32 %v2568_v55, %v2431_v57  ;;  %v3025_v38 = vadd.f32 %v11100_v7, %v11103_v23  ;;  %v2578_v23 = vpop.permute.xlu0 %2577 }
 0x4d3   : > { %v3278_v34 = vpack.c.bf16 %v3248_v62, %v3247_v22  ;;  %v2669_v31 = vpack.c.bf16 %v2637_v11, %v2637_v11 }
 0x4d4   : > { %v3111_v2 = vpop.f32.mrf.mxu3 }
 0x4d5   : > { %3374 = vmatmul.bf16.gmra.mxu0 %v3278_v34  ;;  %v3112_v56 = vadd.f32 %v3111_v2, %v3023_v25  ;;  %v2829_v33 = vunpack.c.l.b16 %v2669_v31 }
 0x4d6   : > { %v2432_v50 = vpop.f32.mrf.mxu1 }
 0x4d7   : > { %v2433_v18 = vadd.f32 %v2432_v50, %v11060_v24  ;;  %v3185_v48 = vmax.f32 %v3112_v56, 0.0  ;;  %v11131_v2 = vpop.f32.mrf.mxu2 }
 0x4d9   : > { %v2638_v46 = vmul.f32 %v2573_v47, %v2433_v18  ;;  %v3249_v62 = vadd.f32 %v3217_v14, %v3185_v48  ;;  %v8367_v18 = vld [vmem:[#allocation2 + $0x70] sm:$0xff]  ;;  %v3030_v14 = vadd.f32 %v11100_v7, %v11111_v63 }
 0x4da   : > { %3081 = vmatmul.bf16.gmra.mxu2 %v8367_v18  ;;  %v8368_v18 = vld [vmem:[#allocation2 + $0x78] sm:$0xff] }
 0x4db   : > { %v2670_v42 = vpack.c.bf16 %v2638_v46, %v2638_v46 }
 0x4dc   : > { %v3113_v59 = vpop.f32.mrf.mxu3 }
 0x4dd   : > { %v2830_v6 = vunpack.c.l.b16 %v2670_v42  ;;  %v3114_v9 = vadd.f32 %v3113_v59, %v3025_v38 }
 0x4de   : > { %v2435_v24 = vpop.f32.mrf.mxu1 }
 0x4df   : > { %v3186_v22 = vmax.f32 %v3114_v9, 0.0  ;;  %v2850_v57 = vpack.c.b16 %v2830_v6, %v2829_v33  ;;  %v2436_v34 = vadd.f32 %v2435_v24, %v11031_v43  ;;  %v1963_v43 = vld [vmem:[#allocation2 + $0x18] sm:$0xff]   ;;  %v11136_v42 = vpop.f32.mrf.mxu2 }
 0x4e0   : > { %v3220_v33 = vunpack.c.h.bf16 %v1963_v43 }
 0x4e1   : > { %3155 = vmatmul.bf16.gmra.mxu3 %v2850_v57  ;;  %v3250_v55 = vadd.f32 %v3218_v16, %v3186_v22  ;;  %v2639_v50 = vmul.f32 %v2578_v23, %v2436_v34  ;;  %v3219_v16 = vunpack.c.l.bf16 %v1963_v43 }
 0x4e3   : > { %v3279_v25 = vpack.c.bf16 %v3250_v55, %v3249_v62  ;;  %v2671_v56 = vpack.c.bf16 %v2639_v50, %v2639_v50 }
 0x4e4   : > { %v3116_v11 = vpop.f32.mrf.mxu3 }
 0x4e5   : > { %3379 = vmatmul.bf16.gmra.mxu0 %v3279_v25  ;;  %v3117_v46 = vadd.f32 %v3116_v11, %v3028_v32  ;;  %v2831_v48 = vunpack.c.l.b16 %v2671_v56  ;;  %v2588_v25 = vpop.permute.xlu2 %2587  ;;  %v3033_v32 = vadd.f32 %v11100_v7, %v11116_v15 }
 0x4e6   : > { %v2437_v47 = vpop.f32.mrf.mxu1 }
 0x4e7   : > { %v2438_v31 = vadd.f32 %v2437_v47, %v11041_v30  ;;  %v3187_v6 = vmax.f32 %v3117_v46, 0.0  ;;  %v11141_v63 = vpop.f32.mrf.mxu2 }
 0x4e9   : > { %v2640_v38 = vmul.f32 %v2583_v39, %v2438_v31  ;;  %v3251_v62 = vadd.f32 %v3219_v16, %v3187_v6  ;;  %v2593_v39 = vpop.permute.xlu0 %2592 }
 0x4ea   : > { %3086 = vmatmul.bf16.gmra.mxu2 %v8368_v18 }
 0x4eb   : > { %v2672_v59 = vpack.c.bf16 %v2640_v38, %v2640_v38  ;;  %v3035_v38 = vadd.f32 %v11100_v7, %v11121_v58  ;;  %v2598_v58 = vpop.permute.xlu1 %2597 }
 0x4ec   : > { %v3118_v52 = vpop.f32.mrf.mxu3 }
 0x4ed   : > { %v2832_v9 = vunpack.c.l.b16 %v2672_v59  ;;  %v3119_v24 = vadd.f32 %v3118_v52, %v3030_v14 }
 0x4ee   : > { %v2440_v30 = vpop.f32.mrf.mxu1 }
 0x4ef   : > { %v3188_v22 = vmax.f32 %v3119_v24, 0.0  ;;  %v2851_v57 = vpack.c.b16 %v2832_v9, %v2831_v48  ;;  %v2441_v34 = vadd.f32 %v2440_v30, %v11050_v54  ;;  %v1965_v54 = vld [vmem:[#allocation2 + $0x20] sm:$0xff]   ;;  %v11148_v24 = vpop.f32.mrf.mxu2 }
 0x4f0   : > { %v3221_v59 = vunpack.c.l.bf16 %v1965_v54  ;;  %v3222_v52 = vunpack.c.h.bf16 %v1965_v54 }
 0x4f1   : > { %3160 = vmatmul.bf16.gmra.mxu3 %v2851_v57  ;;  %v3252_v55 = vadd.f32 %v3220_v33, %v3188_v22  ;;  %v2641_v50 = vmul.f32 %v2588_v25, %v2441_v34  ;;  %v3038_v25 = vadd.f32 %v11100_v7, %v11126_v17 }
 0x4f3   : > { %v3280_v23 = vpack.c.bf16 %v3252_v55, %v3251_v62  ;;  %v2673_v56 = vpack.c.bf16 %v2641_v50, %v2641_v50  ;;  %v2603_v50 = vpop.permute.xlu2 %2602 }
 0x4f4   : > { %v3121_v11 = vpop.f32.mrf.mxu3 }
 0x4f5   : > { %3384 = vmatmul.bf16.gmra.mxu0 %v3280_v23  ;;  %v3122_v43 = vadd.f32 %v3121_v11, %v3033_v32  ;;  %v2833_v15 = vunpack.c.l.b16 %v2673_v56 }
 0x4f6   : > { %v2442_v47 = vpop.f32.mrf.mxu1 }
 0x4f7   : > { %v2443_v31 = vadd.f32 %v2442_v47, %v11062_v10  ;;  %v3189_v33 = vmax.f32 %v3122_v43, 0.0  ;;  %v3049_v18 = vpop.f32.mrf.mxu2 }
 0x4f9   : > { %v2642_v46 = vmul.f32 %v2593_v39, %v2443_v31  ;;  %v3253_v22 = vadd.f32 %v3221_v59, %v3189_v33  ;;  %v1967_v31 = vld [vmem:[#allocation2 + $0x28] sm:$0xff]  }
 0x4fa   : > { %v3223_v43 = vunpack.c.l.bf16 %v1967_v31 }
 0x4fb   : > { %v2674_v14 = vpack.c.bf16 %v2642_v46, %v2642_v46 }
 0x4fc   : > { %v3123_v16 = vpop.f32.mrf.mxu3 }
 0x4fd   : > { %v2834_v48 = vunpack.c.l.b16 %v2674_v14  ;;  %v3124_v6 = vadd.f32 %v3123_v16, %v3035_v38  ;;  %v3224_v38 = vunpack.c.h.bf16 %v1967_v31 }
 0x4fe   : > { %v2445_v9 = vpop.f32.mrf.mxu1 }
 0x4ff   : > { %v3190_v10 = vmax.f32 %v3124_v6, 0.0  ;;  %v2852_v30 = vpack.c.b16 %v2834_v48, %v2833_v15  ;;  %v2446_v62 = vadd.f32 %v2445_v9, %v11073_v27  ;;  %v3040_v27 = vadd.f32 %v11100_v7, %v11131_v2  ;;  %v3052_v9 = vpop.f32.mrf.mxu2 }
 0x501   : > { %v3254_v57 = vadd.f32 %v3222_v52, %v3190_v10  ;;  %3165 = vmatmul.bf16.gmra.mxu3 %v2852_v30  ;;  %v2643_v23 = vmul.f32 %v2598_v58, %v2446_v62  ;;  %v2608_v30 = vpop.permute.xlu0 %2607  ;;  %v2613_v58 = vpop.permute.xlu1 %2612 }
 0x503   : > { %v3281_v34 = vpack.c.bf16 %v3254_v57, %v3253_v22  ;;  %v2675_v47 = vpack.c.bf16 %v2643_v23, %v2643_v23  ;;  %v3043_v22 = vadd.f32 %v11100_v7, %v11136_v42 }
 0x504   : > { %v3126_v55 = vpop.f32.mrf.mxu3 }
 0x505   : > { %3389 = vmatmul.bf16.gmra.mxu0 %v3281_v34  ;;  %v3127_v39 = vadd.f32 %v3126_v55, %v3038_v25  ;;  %v2835_v14 = vunpack.c.l.b16 %v2675_v47  ;;  %v1969_v25 = vld [vmem:[#allocation2 + $0x30] sm:$0xff]  }
 0x506   : > { %v2447_v11 = vpop.f32.mrf.mxu1  ;;  %v3226_v31 = vunpack.c.h.bf16 %v1969_v25 }
 0x507   : > { %v2448_v32 = vadd.f32 %v2447_v11, %v11077_v40  ;;  %v3191_v17 = vmax.f32 %v3127_v39, 0.0  ;;  %v3054_v39 = vpop.f32.mrf.mxu2 }
 0x509   : > { %v2644_v56 = vmul.f32 %v2603_v50, %v2448_v32  ;;  %v3255_v33 = vadd.f32 %v3223_v43, %v3191_v17  ;;  %v3225_v50 = vunpack.c.l.bf16 %v1969_v25 }
 0x50b   : > { %v2676_v54 = vpack.c.bf16 %v2644_v56, %v2644_v56 }
 0x50c   : > { %v3128_v46 = vpop.f32.mrf.mxu3 }
 0x50d   : > { %v2836_v59 = vunpack.c.l.b16 %v2676_v54  ;;  %v3129_v16 = vadd.f32 %v3128_v46, %v3040_v27 }
 0x50e   : > { %v2450_v52 = vpop.f32.mrf.mxu1 }
 0x50f   : > { %v3192_v15 = vmax.f32 %v3129_v16, 0.0  ;;  %v2853_v40 = vpack.c.b16 %v2836_v59, %v2835_v14  ;;  %v2451_v6 = vadd.f32 %v2450_v52, %v11088_v26  ;;  %v3045_v26 = vadd.f32 %v11100_v7, %v11141_v63  ;;  %v3057_v63 = vpop.f32.mrf.mxu2  ;;  %v1971_v52 = vld [vmem:[#allocation2 + $0x38] sm:$0xff]  }
 0x510   : > { %v3048_v59 = vadd.f32 %v11100_v7, %v11148_v24 }
 0x511   : > { %v3256_v48 = vadd.f32 %v3224_v38, %v3192_v15  ;;  %3170 = vmatmul.bf16.gmra.mxu3 %v2853_v40  ;;  %v2645_v57 = vmul.f32 %v2608_v30, %v2451_v6  ;;  %v3050_v15 = vadd.f32 %v11100_v7, %v3049_v18 }
 0x513   : > { %v3282_v10 = vpack.c.bf16 %v3256_v48, %v3255_v33  ;;  %v2677_v55 = vpack.c.bf16 %v2645_v57, %v2645_v57  ;;  %v3227_v48 = vunpack.c.l.bf16 %v1971_v52 }
 0x514   : > { %v3131_v2 = vpop.f32.mrf.mxu3 }
 0x515   : > { %3394 = vmatmul.bf16.gmra.mxu0 %v3282_v10  ;;  %v3132_v23 = vadd.f32 %v3131_v2, %v3043_v22  ;;  %v2837_v56 = vunpack.c.l.b16 %v2677_v55  ;;  %v3228_v10 = vunpack.c.h.bf16 %v1971_v52  ;;  %v1973_v55 = vld [vmem:[#allocation2 + $0x40] sm:$0xff]  }
 0x516   : > { %v2452_v62 = vpop.f32.mrf.mxu1 }
 0x517   : > { %v2453_v34 = vadd.f32 %v2452_v62, %v11095_v8  ;;  %v3193_v42 = vmax.f32 %v3132_v23, 0.0  ;;  %v3059_v2 = vpop.f32.mrf.mxu2  ;;  %v3055_v23 = vadd.f32 %v11100_v7, %v3054_v39 }
 0x519   : > { %v2646_v11 = vmul.f32 %v2613_v58, %v2453_v34  ;;  %v3257_v8 = vadd.f32 %v3225_v50, %v3193_v42  ;;  %v3053_v58 = vadd.f32 %v11100_v7, %v3052_v9  ;;  %v3230_v50 = vunpack.c.h.bf16 %v1973_v55 }
 0x51a   : > { %v3058_v9 = vadd.f32 %v11100_v7, %v3057_v63 }
 0x51b   : > { %v2678_v32 = vpack.c.bf16 %v2646_v11, %v2646_v11 }
 0x51c   : > { %v3133_v47 = vpop.f32.mrf.mxu3 }
 0x51d   : > { %v2838_v27 = vunpack.c.l.b16 %v2678_v32  ;;  %v3134_v54 = vadd.f32 %v3133_v47, %v3045_v26  ;;  %v3229_v26 = vunpack.c.l.bf16 %v1973_v55 }
 0x51f   : > { %v3194_v43 = vmax.f32 %v3134_v54, 0.0  ;;  %v2854_v46 = vpack.c.b16 %v2838_v27, %v2837_v56  ;;  %v3062_v25 = vpop.f32.mrf.mxu2 }
 0x521   : > { %v3258_v38 = vadd.f32 %v3226_v31, %v3194_v43  ;;  %3175 = vmatmul.bf16.gmra.mxu3 %v2854_v46  ;;  %v11171_v46 = vld [vmem:[%s11967_s8] ss:$0 sm:$0xff] }
 0x523   : > { %v3283_v14 = vpack.c.bf16 %v3258_v38, %v3257_v8  ;;  %v1975_v8 = vld [vmem:[#allocation2 + $0x48] sm:$0xff]  }
 0x524   : > { %v3136_v17 = vpop.f32.mrf.mxu3 }
 0x525   : > { %3399 = vmatmul.bf16.gmra.mxu0 %v3283_v14  ;;  %v3137_v16 = vadd.f32 %v3136_v17, %v3048_v59  ;;  %v3060_v17 = vadd.f32 %v11100_v7, %v3059_v2  ;;  %v3063_v2 = vadd.f32 %v11100_v7, %v3062_v25 }
 0x527   : > { %v3195_v33 = vmax.f32 %v3137_v16, 0.0  ;;  %v3064_v43 = vpop.f32.mrf.mxu2  ;;  %v3231_v16 = vunpack.c.l.bf16 %v1975_v8 }
 0x529   : > { %v3259_v22 = vadd.f32 %v3227_v48, %v3195_v33 }
 0x52c   : > { %v3138_v40 = vpop.f32.mrf.mxu3 }
 0x52d   : > { %v3139_v6 = vadd.f32 %v3138_v40, %v3050_v15  ;;  %v3232_v15 = vunpack.c.h.bf16 %v1975_v8 }
 0x52f   : > { %v3196_v30 = vmax.f32 %v3139_v6, 0.0  ;;  %v3067_v6 = vpop.f32.mrf.mxu2 }
 0x531   : > { %v3260_v57 = vadd.f32 %v3228_v10, %v3196_v30 }
 0x533   : > { %v3284_v62 = vpack.c.bf16 %v3260_v57, %v3259_v22 }
 0x534   : > { %v3141_v34 = vpop.f32.mrf.mxu3 }
 0x535   : > { %3404 = vmatmul.bf16.gmra.mxu0 %v3284_v62  ;;  %v3142_v24 = vadd.f32 %v3141_v34, %v3053_v58 }
 0x537   : > { %v3197_v11 = vmax.f32 %v3142_v24, 0.0  ;;  %v3069_v24 = vpop.f32.mrf.mxu2 }
 0x539   : > { %v3261_v31 = vadd.f32 %v3229_v26, %v3197_v11  ;;  %v3065_v26 = vadd.f32 %v11100_v7, %v3064_v43  ;;  %v3068_v43 = vadd.f32 %v11100_v7, %v3067_v6 }
 0x53c   : > { %v3143_v18 = vpop.f32.mrf.mxu3 }
 0x53d   : > { %v3144_v32 = vadd.f32 %v3143_v18, %v3055_v23  ;;  %v1977_v23 = vld [vmem:[#allocation2 + $0x50] sm:$0xff]  }
 0x53f   : > { %v3198_v47 = vmax.f32 %v3144_v32, 0.0 }
 0x541   : > { %v3262_v56 = vadd.f32 %v3230_v50, %v3198_v47  ;;  %v3233_v50 = vunpack.c.l.bf16 %v1977_v23 }
 0x542   : > { %v3370_v42 = vpop.f32.mrf.mxu0 }
 0x543   : > { %v3285_v27 = vpack.c.bf16 %v3262_v56, %v3261_v31  ;;  %v3371_v39 = vadd.f32 %v11171_v46, %v3370_v42  ;;  %v3234_v31 = vunpack.c.h.bf16 %v1977_v23 }
 0x544   : > { %v3146_v54 = vpop.f32.mrf.mxu3 }
 0x545   : > { %3409 = vmatmul.bf16.gmra.mxu0 %v3285_v27  ;;  %v3147_v38 = vadd.f32 %v3146_v54, %v3058_v9  ;;  %v3450_v40 = vmax.f32 %v3371_v39, 0.0 }
 0x547   : > { %v3199_v63 = vmax.f32 %v3147_v38, 0.0 }
 0x549   : > { %v3263_v22 = vadd.f32 %v3231_v16, %v3199_v63  ;;  %v3070_v63 = vadd.f32 %v11100_v7, %v3069_v24 }
 0x54a   : > { %v3372_v14 = vpop.f32.mrf.mxu0 }
 0x54b   : > { %v3373_v59 = vadd.f32 %v11171_v46, %v3372_v14  ;;  %v3072_v14 = vpop.f32.mrf.mxu2 }
 0x54c   : > { %v3148_v52 = vpop.f32.mrf.mxu3  ;;  %v3073_v24 = vadd.f32 %v11100_v7, %v3072_v14 }
 0x54d   : > { %v3451_v33 = vmax.f32 %v3373_v59, 0.0  ;;  %v3149_v48 = vadd.f32 %v3148_v52, %v3060_v17  ;;  %v1979_v52 = vld [vmem:[#allocation2 + $0x58] sm:$0xff]  }
 0x54f   : > { %v8604_v10 = vpack.c.bf16 %v3451_v33, %v3450_v40  ;;  %v3200_v30 = vmax.f32 %v3149_v48, 0.0  ;;  %v3235_v48 = vunpack.c.l.bf16 %v1979_v52 }
 0x551   : > { %8605 = vst [vmem:[#allocation3 + $0x30] sm:$0xff] %v8604_v10   ;;  %v3264_v57 = vadd.f32 %v3232_v15, %v3200_v30  ;;  %v3236_v30 = vunpack.c.h.bf16 %v1979_v52 }
 0x552   : > { %v3375_v62 = vpop.f32.mrf.mxu0 }
 0x553   : > { %v3286_v34 = vpack.c.bf16 %v3264_v57, %v3263_v22  ;;  %v3376_v55 = vadd.f32 %v11171_v46, %v3375_v62  ;;  %v3074_v22 = vpop.f32.mrf.mxu2 }
 0x554   : > { %v3151_v58 = vpop.f32.mrf.mxu3 }
 0x555   : > { %3414 = vmatmul.bf16.gmra.mxu0 %v3286_v34  ;;  %v3152_v18 = vadd.f32 %v3151_v58, %v3063_v2  ;;  %v3452_v56 = vmax.f32 %v3376_v55, 0.0 }
 0x557   : > { %v3201_v42 = vmax.f32 %v3152_v18, 0.0 }
 0x559   : > { %v3265_v39 = vadd.f32 %v3233_v50, %v3201_v42  ;;  %v3075_v42 = vadd.f32 %v11100_v7, %v3074_v22 }
 0x55a   : > { %v3377_v11 = vpop.f32.mrf.mxu0 }
 0x55b   : > { %v3378_v32 = vadd.f32 %v11171_v46, %v3377_v11 }
 0x55c   : > { %v3153_v47 = vpop.f32.mrf.mxu3 }
 0x55d   : > { %v3453_v27 = vmax.f32 %v3378_v32, 0.0  ;;  %v3154_v54 = vadd.f32 %v3153_v47, %v3065_v26  ;;  %v3077_v32 = vpop.f32.mrf.mxu2  ;;  %v1981_v47 = vld [vmem:[#allocation2 + $0x60] sm:$0xff]  }
 0x55f   : > { %v8609_v9 = vpack.c.bf16 %v3453_v27, %v3452_v56  ;;  %v3202_v25 = vmax.f32 %v3154_v54, 0.0  ;;  %v3237_v54 = vunpack.c.l.bf16 %v1981_v47 }
 0x561   : > { %8840 = vst [vmem:[#allocation3] sm:$0xff] %v8609_v9   ;;  %v3266_v8 = vadd.f32 %v3234_v31, %v3202_v25  ;;  %v3238_v25 = vunpack.c.h.bf16 %v1981_v47 }
 0x562   : > { %v3380_v38 = vpop.f32.mrf.mxu0 }
 0x563   : > { %v3287_v17 = vpack.c.bf16 %v3266_v8, %v3265_v39  ;;  %v3381_v16 = vadd.f32 %v11171_v46, %v3380_v38 }
 0x564   : > { %v3156_v59 = vpop.f32.mrf.mxu3 }
 0x565   : > { %3419 = vmatmul.bf16.gmra.mxu0 %v3287_v17  ;;  %v3157_v15 = vadd.f32 %v3156_v59, %v3068_v43  ;;  %v3454_v57 = vmax.f32 %v3381_v16, 0.0  ;;  %v3079_v43 = vpop.f32.mrf.mxu2 }
 0x567   : > { %v3203_v62 = vmax.f32 %v3157_v15, 0.0 }
 0x569   : > { %v3267_v55 = vadd.f32 %v3235_v48, %v3203_v62  ;;  %v3080_v62 = vadd.f32 %v11100_v7, %v3079_v43 }
 0x56a   : > { %v3382_v40 = vpop.f32.mrf.mxu0 }
 0x56b   : > { %v3383_v33 = vadd.f32 %v11171_v46, %v3382_v40 }
 0x56c   : > { %v3158_v10 = vpop.f32.mrf.mxu3 }
 0x56d   : > { %v3455_v34 = vmax.f32 %v3383_v33, 0.0  ;;  %v3159_v58 = vadd.f32 %v3158_v10, %v3070_v63  ;;  %v3078_v33 = vadd.f32 %v11100_v7, %v3077_v32  ;;  %v1983_v10 = vld [vmem:[#allocation2 + $0x68] sm:$0xff]   ;;  %v3082_v22 = vpop.f32.mrf.mxu2 }
 0x56f   : > { %v8614_v2 = vpack.c.bf16 %v3455_v34, %v3454_v57  ;;  %v3204_v6 = vmax.f32 %v3159_v58, 0.0  ;;  %v3239_v58 = vunpack.c.l.bf16 %v1983_v10 }
 0x571   : > { %8841 = vst [vmem:[#allocation3 + $0x58] sm:$0xff] %v8614_v2   ;;  %v3268_v23 = vadd.f32 %v3236_v30, %v3204_v6  ;;  %v3240_v6 = vunpack.c.h.bf16 %v1983_v10 }
 0x572   : > { %v3385_v18 = vpop.f32.mrf.mxu0 }
 0x573   : > { %v3288_v11 = vpack.c.bf16 %v3268_v23, %v3267_v55  ;;  %v3386_v50 = vadd.f32 %v11171_v46, %v3385_v18 }
 0x574   : > { %v3161_v26 = vpop.f32.mrf.mxu3 }
 0x575   : > { %3424 = vmatmul.bf16.gmra.mxu0 %v3288_v11  ;;  %v3162_v31 = vadd.f32 %v3161_v26, %v3073_v24  ;;  %v3456_v39 = vmax.f32 %v3386_v50, 0.0 }
 0x577   : > { %v3205_v8 = vmax.f32 %v3162_v31, 0.0 }
 0x579   : > { %v3269_v16 = vadd.f32 %v3237_v54, %v3205_v8 }
 0x57a   : > { %v3387_v56 = vpop.f32.mrf.mxu0 }
 0x57b   : > { %v3388_v27 = vadd.f32 %v11171_v46, %v3387_v56  ;;  %v3084_v56 = vpop.f32.mrf.mxu2 }
 0x57c   : > { %v3163_v9 = vpop.f32.mrf.mxu3  ;;  %v3085_v8 = vadd.f32 %v11100_v7, %v3084_v56 }
 0x57d   : > { %v3457_v38 = vmax.f32 %v3388_v27, 0.0  ;;  %v3164_v17 = vadd.f32 %v3163_v9, %v3075_v42  ;;  %v3083_v27 = vadd.f32 %v11100_v7, %v3082_v22  ;;  %v1985_v9 = vld [vmem:[#allocation2 + $0x70] sm:$0xff]  }
 0x57f   : > { %v8619_v59 = vpack.c.bf16 %v3457_v38, %v3456_v39  ;;  %v3206_v14 = vmax.f32 %v3164_v17, 0.0  ;;  %v3241_v17 = vunpack.c.l.bf16 %v1985_v9 }
 0x581   : > { %8842 = vst [vmem:[#allocation3 + $0x18] sm:$0xff] %v8619_v59   ;;  %v3270_v52 = vadd.f32 %v3238_v25, %v3206_v14  ;;  %v3242_v14 = vunpack.c.h.bf16 %v1985_v9 }
 0x582   : > { %v3390_v15 = vpop.f32.mrf.mxu0 }
 0x583   : > { %v3289_v40 = vpack.c.bf16 %v3270_v52, %v3269_v16  ;;  %v3391_v48 = vadd.f32 %v11171_v46, %v3390_v15 }
 0x584   : > { %v3166_v63 = vpop.f32.mrf.mxu3 }
 0x585   : > { %3429 = vmatmul.bf16.gmra.mxu0 %v3289_v40  ;;  %v3167_v30 = vadd.f32 %v3166_v63, %v3078_v33  ;;  %v3458_v55 = vmax.f32 %v3391_v48, 0.0  ;;  %v3087_v40 = vpop.f32.mrf.mxu2 }
 0x587   : > { %v3207_v23 = vmax.f32 %v3167_v30, 0.0 }
 0x589   : > { %v3271_v32 = vadd.f32 %v3239_v58, %v3207_v23 }
 0x58a   : > { %v3392_v57 = vpop.f32.mrf.mxu0 }
 0x58b   : > { %v3393_v34 = vadd.f32 %v11171_v46, %v3392_v57 }
 0x58c   : > { %v3168_v2 = vpop.f32.mrf.mxu3 }
 0x58d   : > { %v3459_v18 = vmax.f32 %v3393_v34, 0.0  ;;  %v3169_v11 = vadd.f32 %v3168_v2, %v3080_v62  ;;  %v3088_v62 = vadd.f32 %v11100_v7, %v3087_v40  ;;  %v3089_v34 = vpop.f32.mrf.mxu2  ;;  %v1987_v2 = vld [vmem:[#allocation2 + $0x78] sm:$0xff]  }
 0x58e   : > { %v3090_v23 = vadd.f32 %v11100_v7, %v3089_v34 }
 0x58f   : > { %v8624_v26 = vpack.c.bf16 %v3459_v18, %v3458_v55  ;;  %v3208_v24 = vmax.f32 %v3169_v11, 0.0  ;;  %v3243_v11 = vunpack.c.l.bf16 %v1987_v2 }
 0x591   : > { %8843 = vst [vmem:[#allocation3 + $0x50] sm:$0xff] %v8624_v26   ;;  %v3272_v50 = vadd.f32 %v3240_v6, %v3208_v24  ;;  %v3244_v24 = vunpack.c.h.bf16 %v1987_v2 }
 0x592   : > { %v3395_v47 = vpop.f32.mrf.mxu0 }
 0x593   : > { %v3290_v31 = vpack.c.bf16 %v3272_v50, %v3271_v32  ;;  %v3396_v54 = vadd.f32 %v11171_v46, %v3395_v47 }
 0x594   : > { %v3171_v42 = vpop.f32.mrf.mxu3 }
 0x595   : > { %3434 = vmatmul.bf16.gmra.mxu0 %v3290_v31  ;;  %v3172_v25 = vadd.f32 %v3171_v42, %v3083_v27  ;;  %v3460_v43 = vmax.f32 %v3396_v54, 0.0 }
 0x597   : > { %v3209_v16 = vmax.f32 %v3172_v25, 0.0 }
 0x599   : > { %v3273_v48 = vadd.f32 %v3241_v17, %v3209_v16 }
 0x59a   : > { %v3397_v39 = vpop.f32.mrf.mxu0 }
 0x59b   : > { %v3398_v38 = vadd.f32 %v11171_v46, %v3397_v39 }
 0x59c   : > { %v3173_v59 = vpop.f32.mrf.mxu3 }
 0x59d   : > { %v3461_v52 = vmax.f32 %v3398_v38, 0.0  ;;  %v3174_v15 = vadd.f32 %v3173_v59, %v3085_v8 }
 0x59f   : > { %v8629_v63 = vpack.c.bf16 %v3461_v52, %v3460_v43  ;;  %v3210_v33 = vmax.f32 %v3174_v15, 0.0 }
 0x5a1   : > { %8844 = vst [vmem:[#allocation3 + $0x68] sm:$0xff] %v8629_v63   ;;  %v3274_v10 = vadd.f32 %v3242_v14, %v3210_v33 }
 0x5a2   : > { %v3400_v30 = vpop.f32.mrf.mxu0 }
 0x5a3   : > { %v3291_v22 = vpack.c.bf16 %v3274_v10, %v3273_v48  ;;  %v3401_v58 = vadd.f32 %v11171_v46, %v3400_v30 }
 0x5a4   : > { %v3176_v57 = vpop.f32.mrf.mxu3 }
 0x5a5   : > { %3439 = vmatmul.bf16.gmra.mxu0 %v3291_v22  ;;  %v3177_v6 = vadd.f32 %v3176_v57, %v3088_v62  ;;  %v3462_v32 = vmax.f32 %v3401_v58, 0.0 }
 0x5a7   : > { %v3211_v50 = vmax.f32 %v3177_v6, 0.0 }
 0x5a9   : > { %v3275_v27 = vadd.f32 %v3243_v11, %v3211_v50 }
 0x5aa   : > { %v3402_v55 = vpop.f32.mrf.mxu0 }
 0x5ab   : > { %v3403_v18 = vadd.f32 %v11171_v46, %v3402_v55 }
 0x5ac   : > { %v3178_v26 = vpop.f32.mrf.mxu3 }
 0x5ad   : > { %v3463_v47 = vmax.f32 %v3403_v18, 0.0  ;;  %v3179_v31 = vadd.f32 %v3178_v26, %v3090_v23 }
 0x5af   : > { %v8634_v56 = vpack.c.bf16 %v3463_v47, %v3462_v32  ;;  %v3212_v42 = vmax.f32 %v3179_v31, 0.0 }
 0x5b1   : > { %8845 = vst [vmem:[#allocation3 + $0x8] sm:$0xff] %v8634_v56   ;;  %v3276_v54 = vadd.f32 %v3244_v24, %v3212_v42 }
 0x5b2   : > { %v3405_v9 = vpop.f32.mrf.mxu0 }
 0x5b3   : > { %v3292_v25 = vpack.c.bf16 %v3276_v54, %v3275_v27  ;;  %v3406_v39 = vadd.f32 %v11171_v46, %v3405_v9 }
 0x5b5   : > { %3444 = vmatmul.bf16.gmra.mxu0 %v3292_v25  ;;  %v3464_v38 = vmax.f32 %v3406_v39, 0.0 }
 0x5ba   : > { %v3407_v7 = vpop.f32.mrf.mxu0 }
 0x5bb   : > { %v3408_v8 = vadd.f32 %v11171_v46, %v3407_v7 }
 0x5bd   : > { %v3465_v17 = vmax.f32 %v3408_v8, 0.0 }
 0x5bf   : > { %v8639_v59 = vpack.c.bf16 %v3465_v17, %v3464_v38 }
 0x5c1   : > { %8846 = vst [vmem:[#allocation3 + $0x48] sm:$0xff] %v8639_v59  }
 0x5c2   : > { %v3410_v14 = vpop.f32.mrf.mxu0 }
 0x5c3   : > { %v3411_v43 = vadd.f32 %v11171_v46, %v3410_v14 }
 0x5c5   : > { %v3466_v15 = vmax.f32 %v3411_v43, 0.0 }
 0x5ca   : > { %v3412_v16 = vpop.f32.mrf.mxu0 }
 0x5cb   : > { %v3413_v52 = vadd.f32 %v11171_v46, %v3412_v16 }
 0x5cd   : > { %v3467_v40 = vmax.f32 %v3413_v52, 0.0 }
 0x5cf   : > { %v8644_v63 = vpack.c.bf16 %v3467_v40, %v3466_v15 }
 0x5d1   : > { %8847 = vst [vmem:[#allocation3 + $0x40] sm:$0xff] %v8644_v63  }
 0x5d2   : > { %v3415_v33 = vpop.f32.mrf.mxu0 }
 0x5d3   : > { %v3416_v48 = vadd.f32 %v11171_v46, %v3415_v33 }
 0x5d5   : > { %v3468_v22 = vmax.f32 %v3416_v48, 0.0 }
 0x5da   : > { %v3417_v10 = vpop.f32.mrf.mxu0 }
 0x5db   : > { %v3418_v30 = vadd.f32 %v11171_v46, %v3417_v10 }
 0x5dd   : > { %v3469_v57 = vmax.f32 %v3418_v30, 0.0 }
 0x5df   : > { %v8649_v62 = vpack.c.bf16 %v3469_v57, %v3468_v22 }
 0x5e1   : > { %8848 = vst [vmem:[#allocation3 + $0x20] sm:$0xff] %v8649_v62  }
 0x5e2   : > { %v3420_v34 = vpop.f32.mrf.mxu0 }
 0x5e3   : > { %v3421_v58 = vadd.f32 %v11171_v46, %v3420_v34 }
 0x5e5   : > { %v3470_v55 = vmax.f32 %v3421_v58, 0.0 }
 0x5ea   : > { %v3422_v2 = vpop.f32.mrf.mxu0 }
 0x5eb   : > { %v3423_v6 = vadd.f32 %v11171_v46, %v3422_v2 }
 0x5ed   : > { %v3471_v23 = vmax.f32 %v3423_v6, 0.0 }
 0x5ef   : > { %v8654_v18 = vpack.c.bf16 %v3471_v23, %v3470_v55 }
 0x5f1   : > { %8849 = vst [vmem:[#allocation3 + $0x10] sm:$0xff] %v8654_v18  }
 0x5f2   : > { %v3425_v11 = vpop.f32.mrf.mxu0 }
 0x5f3   : > { %v3426_v26 = vadd.f32 %v11171_v46, %v3425_v11 }
 0x5f5   : > { %v3472_v50 = vmax.f32 %v3426_v26, 0.0 }
 0x5fa   : > { %v3427_v24 = vpop.f32.mrf.mxu0 }
 0x5fb   : > { %v3428_v32 = vadd.f32 %v11171_v46, %v3427_v24 }
 0x5fd   : > { %v3473_v47 = vmax.f32 %v3428_v32, 0.0 }
 0x5ff   : > { %v8659_v31 = vpack.c.bf16 %v3473_v47, %v3472_v50 }
 0x601   : > { %8850 = vst [vmem:[#allocation3 + $0x38] sm:$0xff] %v8659_v31  }
 0x602   : > { %v3430_v56 = vpop.f32.mrf.mxu0 }
 0x603   : > { %v3431_v42 = vadd.f32 %v11171_v46, %v3430_v56 }
 0x605   : > { %v3474_v9 = vmax.f32 %v3431_v42, 0.0 }
 0x60a   : > { %v3432_v27 = vpop.f32.mrf.mxu0 }
 0x60b   : > { %v3433_v54 = vadd.f32 %v11171_v46, %v3432_v27 }
 0x60d   : > { %v3475_v25 = vmax.f32 %v3433_v54, 0.0 }
 0x60f   : > { %v8664_v39 = vpack.c.bf16 %v3475_v25, %v3474_v9 }
 0x611   : > { %8851 = vst [vmem:[#allocation3 + $0x60] sm:$0xff] %v8664_v39  }
 0x612   : > { %v3435_v7 = vpop.f32.mrf.mxu0 }
 0x613   : > { %v3436_v8 = vadd.f32 %v11171_v46, %v3435_v7 }
 0x615   : > { %v3476_v59 = vmax.f32 %v3436_v8, 0.0 }
 0x61a   : > { %v3437_v38 = vpop.f32.mrf.mxu0 }
 0x61b   : > { %v3438_v17 = vadd.f32 %v11171_v46, %v3437_v38 }
 0x61d   : > { %v3477_v14 = vmax.f32 %v3438_v17, 0.0 }
 0x61f   : > { %v8669_v43 = vpack.c.bf16 %v3477_v14, %v3476_v59 }
 0x621   : > { %8852 = vst [vmem:[#allocation3 + $0x70] sm:$0xff] %v8669_v43  }
 0x622   : > { %v3440_v16 = vpop.f32.mrf.mxu0 }
 0x623   : > { %v3441_v52 = vadd.f32 %v11171_v46, %v3440_v16 }
 0x625   : > { %v3478_v63 = vmax.f32 %v3441_v52, 0.0 }
 0x62a   : > { %v3442_v15 = vpop.f32.mrf.mxu0 }
 0x62b   : > { %v3443_v40 = vadd.f32 %v11171_v46, %v3442_v15 }
 0x62d   : > { %v3479_v33 = vmax.f32 %v3443_v40, 0.0 }
 0x62f   : > { %v8674_v48 = vpack.c.bf16 %v3479_v33, %v3478_v63 }
 0x631   : > { %8853 = vst [vmem:[#allocation3 + $0x78] sm:$0xff] %v8674_v48  }
 0x632   : > { %v3445_v10 = vpop.f32.mrf.mxu0 }
 0x633   : > { %v3446_v30 = vadd.f32 %v11171_v46, %v3445_v10 }
 0x635   : > { %v3480_v62 = vmax.f32 %v3446_v30, 0.0 }
 0x63a   : > { %v3447_v22 = vpop.f32.mrf.mxu0 }
 0x63b   : > { %v3448_v57 = vadd.f32 %v11171_v46, %v3447_v22 }
 0x63d   : > { %v3481_v34 = vmax.f32 %v3448_v57, 0.0 }
 0x63f   : > { %v8679_v58 = vpack.c.bf16 %v3481_v34, %v3480_v62 }
 0x641   : > { %8854 = vst [vmem:[#allocation3 + $0x28] sm:$0xff] %v8679_v58  }
 0x642 PF: > { %p7467_p6 = scmp.ne.s32.totalorder %s8986_s24, 2 }
 0x644   : > { %3551 = sbr.rel (%p7467_p6) target bundleno = 2174 (0x87e), region = 100 }
 0x649   : > { %v8432_v2 = vld [vmem:[#allocation3 + $0x48] sm:$0xff]  ;;  %v8998_v55 = vmov 0   ;;  %v8439_v18 = vld [vmem:[#allocation3 + $0x78] sm:$0xff]  ;;  %v8438_v26 = vld [vmem:[#allocation3 + $0x70] sm:$0xff] }
 0x64a   : > { %v8440_v6 = vld [vmem:[#allocation3 + $0x28] sm:$0xff]  ;;  %8963 = vset.pattern.permute.xlu1 %v8998_v55  ;;  %8962 = vset.pattern.permute.xlu0 %v8998_v55  ;;  %v8429_v24 = vld [vmem:[#allocation3 + $0x50] sm:$0xff]  ;;  %v8437_v32 = vld [vmem:[#allocation3 + $0x60] sm:$0xff] }
 0x64b   : > { %v12333_v23 = vld [vmem:[#allocation234_spill] sm:$0xff]  ;;  %4054 = vperm.xlu0 %8962, %v10393_v41   ;;  %3874 = vmatpush.bf16.msra.mxu0 %v8432_v2  ;;  %v8428_v50 = vld [vmem:[#allocation3 + $0x18] sm:$0xff]  ;;  %v8435_v56 = vld [vmem:[#allocation3 + $0x10] sm:$0xff] }
 0x64c   : > { %4064 = vperm.xlu1 %8963, %v12333_v23   ;;  %3963 = vmatpush.bf16.msra.mxu1 %v8440_v6  ;;  %v8431_v46 = vld [vmem:[#allocation3 + $0x8] sm:$0xff]  ;;  %v8436_v47 = vld [vmem:[#allocation3 + $0x38] sm:$0xff]  ;;  %v8426_v42 = vld [vmem:[#allocation3] sm:$0xff] }
 0x64d   : > { %8964 = vset.pattern.permute.xlu2 %v8998_v55  ;;  %v8430_v11 = vld [vmem:[#allocation3 + $0x68] sm:$0xff]  ;;  %v8427_v31 = vld [vmem:[#allocation3 + $0x58] sm:$0xff]  ;;  %v8434_v27 = vld [vmem:[#allocation3 + $0x20] sm:$0xff] }
 0x64e   : > { %4074 = vperm.xlu2 %8964, %v10413_v0   ;;  %v8425_v54 = vld [vmem:[#allocation3 + $0x30] sm:$0xff]  ;;  %v8433_v9 = vld [vmem:[#allocation3 + $0x40] sm:$0xff]  ;;  %v12334_v25 = vld [vmem:[#allocation8_spill] sm:$0xff] }
 0x64f   : > { %3875 = vmatpush.bf16.msra.mxu0 %v8431_v46  ;;  %v12335_v39 = vld [vmem:[#allocation14_spill] sm:$0xff]  ;;  %v12336_v8 = vld [vmem:[#allocation13_spill] sm:$0xff]  ;;  %v12337_v38 = vld [vmem:[#allocation7_spill] sm:$0xff] }
 0x650   : > { %3964 = vmatpush.bf16.msra.mxu1 %v8439_v18  ;;  %v7471_v7 = vor.u32 %v12335_v39, %v12334_v25  ;;  %v7475_v17 = vor.u32 %v12337_v38, %v12336_v8  ;;  %v12338_v59 = vld [vmem:[#allocation20_spill] sm:$0xff]  ;;  %v12339_v14 = vld [vmem:[#allocation26_spill] sm:$0xff]  ;;  %v12340_v16 = vld [vmem:[#allocation25_spill] sm:$0xff] }
 0x651   : > { %v7479_v43 = vor.u32 %v12339_v14, %v12338_v59  ;;  %v12341_v52 = vld [vmem:[#allocation19_spill] sm:$0xff]  ;;  %v12342_v40 = vld [vmem:[#allocation32_spill] sm:$0xff]  ;;  %v12343_v63 = vld [vmem:[#allocation38_spill] sm:$0xff] }
 0x652   : > { %v7483_v15 = vor.u32 %v12341_v52, %v12340_v16  ;;  %v7487_v33 = vor.u32 %v12343_v63, %v12342_v40  ;;  %v12344_v48 = vld [vmem:[#allocation37_spill] sm:$0xff]  ;;  %v12345_v10 = vld [vmem:[#allocation31_spill] sm:$0xff]  ;;  %v12346_v22 = vld [vmem:[#allocation236_spill] sm:$0xff] }
 0x653   : > { %4059 = vperm.xlu0 %8962, %v10398_v5   ;;  %3876 = vmatpush.bf16.msra.mxu0 %v8430_v11  ;;  %v7491_v30 = vor.u32 %v12345_v10, %v12344_v48  ;;  %v12347_v57 = vld [vmem:[#allocation235_spill] sm:$0xff]  ;;  %v12348_v62 = vld [vmem:[#allocation237_spill] sm:$0xff]  ;;  %v12350_v58 = vld [vmem:[#allocation238_spill] sm:$0xff] }
 0x654   : > { %4069 = vperm.xlu1 %8963, %v10408_v13   ;;  %3965 = vmatpush.bf16.msra.mxu1 %v8438_v26  ;;  %v12349_v34 = vld [vmem:[#allocation239_spill] sm:$0xff]  ;;  %v12351_v2 = vld [vmem:[#allocation240_spill] sm:$0xff]  ;;  %v12353_v55 = vld [vmem:[#allocation50_spill] sm:$0xff] }
 0x655   : > { %v12352_v6 = vld [vmem:[#allocation44_spill] sm:$0xff]  ;;  %v12354_v46 = vld [vmem:[#allocation49_spill] sm:$0xff]  ;;  %v12355_v18 = vld [vmem:[#allocation43_spill] sm:$0xff] }
 0x656   : > { %4079 = vperm.xlu2 %8964, %v10418_v1   ;;  %v7495_v23 = vor.u32 %v12353_v55, %v12352_v6  ;;  %v7499_v11 = vor.u32 %v12355_v18, %v12354_v46  ;;  %v12356_v26 = vld [vmem:[#allocation242_spill] sm:$0xff]  ;;  %v12362_v25 = vld [vmem:[#allocation68_spill] sm:$0xff]  ;;  %v12364_v8 = vld [vmem:[#allocation73_spill] sm:$0xff] }
 0x657   : > { %3877 = vmatpush.bf16.msra.mxu0 %v8429_v24  ;;  %v12357_v24 = vld [vmem:[#allocation241_spill] sm:$0xff]  ;;  %v12363_v39 = vld [vmem:[#allocation74_spill] sm:$0xff]  ;;  %v12365_v38 = vld [vmem:[#allocation67_spill] sm:$0xff] }
 0x658   : > { %3966 = vmatpush.bf16.msra.mxu1 %v8437_v32  ;;  %v12358_v32 = vld [vmem:[#allocation56_spill] sm:$0xff]  ;;  %v8456_v59 = vld [vmem:[%s11968_s9 + $0x78] sm:$0xff]  ;;  %v8445_v14 = vld [vmem:[%s11968_s9 + $0x20] sm:$0xff] }
 0x659   : > { %4689 = vmatpush.bf16.msra.mxu3 %v8456_v59  ;;  %v8444_v16 = vld [vmem:[%s11968_s9 + $0x18] sm:$0xff]  ;;  %v8454_v52 = vld [vmem:[%s11968_s9 + $0x68] sm:$0xff]  ;;  %v8453_v40 = vld [vmem:[%s11968_s9 + $0x60] sm:$0xff] }
 0x65a   : > { %v12366_v63 = vld [vmem:[#allocation80_spill] sm:$0xff]  ;;  %v12368_v10 = vld [vmem:[#allocation86_spill] sm:$0xff]  ;;  %v8450_v6 = vld [vmem:[%s11968_s9 + $0x48] sm:$0xff] }
 0x65b   : > { %4084 = vperm.xlu0 %8962, %v10423_v49   ;;  %3878 = vmatpush.bf16.msra.mxu0 %v8428_v50  ;;  %v12359_v50 = vld [vmem:[#allocation62_spill] sm:$0xff]  ;;  %v12371_v46 = vld [vmem:[#allocation101_spill] sm:$0xff] }
 0x65c   : > { %4089 = vperm.xlu1 %8963, %v10428_v21   ;;  %3967 = vmatpush.bf16.msra.mxu1 %v8436_v47  ;;  %v7503_v47 = vor.u32 %v12359_v50, %v12358_v32  ;;  %v8449_v55 = vld [vmem:[%s11968_s9 + $0x40] sm:$0xff]  ;;  %v8410_v32 = vld [vmem:[#allocation3] sm:$0xff] }
 0x65e   : > { %4094 = vperm.xlu2 %8964, %v10433_v29  }
 0x65f   : > { %3879 = vmatpush.bf16.msra.mxu0 %v8427_v31  ;;  %v12360_v31 = vld [vmem:[#allocation61_spill] sm:$0xff] }
 0x660   : > { %3968 = vmatpush.bf16.msra.mxu1 %v8435_v56  ;;  %v12361_v56 = vld [vmem:[#allocation55_spill] sm:$0xff] }
 0x663   : > { %4099 = vperm.xlu0 %8962, %v10438_v51   ;;  %3880 = vmatpush.bf16.msra.mxu0 %v8426_v42  ;;  %v7507_v42 = vor.u32 %v12361_v56, %v12360_v31  ;;  %v12375_v31 = vld [vmem:[#allocation117_spill] sm:$0xff] }
 0x664   : > { %4104 = vperm.xlu1 %8963, %v10443_v35   ;;  %3969 = vmatpush.bf16.msra.mxu1 %v8434_v27  ;;  %v8448_v27 = vld [vmem:[%s11968_s9 + $0x38] sm:$0xff] }
 0x665   : > { %4600 = vmatpush.bf16.msra.mxu2 %v8448_v27  ;;  %v12377_v27 = vld [vmem:[#allocation108_spill] sm:$0xff] }
 0x666   : > { %4109 = vperm.xlu2 %8964, %v10448_v37  }
 0x667   : > { %3881 = vmatpush.bf16.msra.mxu0 %v8425_v54  ;;  %v8447_v54 = vld [vmem:[%s11968_s9 + $0x30] sm:$0xff] }
 0x668   : > { %3970 = vmatpush.bf16.msra.mxu1 %v8433_v9  ;;  %v8446_v9 = vld [vmem:[%s11968_s9 + $0x28] sm:$0xff] }
 0x669   : > { %4601 = vmatpush.bf16.msra.mxu2 %v8447_v54 }
 0x66a   : > { %3882 = vmatmul.bf16.vlgmr.msra.gmra.mxu0 %v7471_v7  ;;  %v7511_v7 = vor.u32 %v12363_v39, %v12362_v25 }
 0x66b   : > { %4114 = vperm.xlu0 %8962, %v10453_v45   ;;  %3971 = vmatmul.bf16.vlgmr.msra.gmra.mxu1 %v7475_v17  ;;  %v7515_v17 = vor.u32 %v12365_v38, %v12364_v8 }
 0x66c   : > { %4119 = vperm.xlu1 %8963, %v10458_v19  }
 0x66d   : > { %4602 = vmatpush.bf16.msra.mxu2 %v8446_v9 }
 0x66e   : > { %4124 = vperm.xlu2 %8964, %v10463_v12  }
 0x671   : > { %4603 = vmatpush.bf16.msra.mxu2 %v8445_v14 }
 0x673   : > { %4129 = vperm.xlu0 %8962, %v10468_v53  }
 0x674   : > { %4134 = vperm.xlu1 %8963, %v10473_v61  }
 0x675   : > { %4604 = vmatpush.bf16.msra.mxu2 %v8444_v16 }
 0x676   : > { %4139 = vperm.xlu2 %8964, %v10478_v4  }
 0x67a   : > { %3887 = vmatmul.bf16.gmra.mxu0 %v7479_v43  ;;  %v8455_v43 = vld [vmem:[%s11968_s9 + $0x70] sm:$0xff] }
 0x67b   : > { %4144 = vperm.xlu0 %8962, %v10483_v28   ;;  %3976 = vmatmul.bf16.gmra.mxu1 %v7483_v15  ;;  %v8443_v15 = vld [vmem:[%s11968_s9 + $0x10] sm:$0xff] }
 0x67c   : > { %4149 = vperm.xlu1 %8963, %v10488_v44   ;;  %4690 = vmatpush.bf16.msra.mxu3 %v8455_v43 }
 0x67d   : > { %4605 = vmatpush.bf16.msra.mxu2 %v8443_v15 }
 0x67e   : > { %4154 = vperm.xlu2 %8964, %v10493_v36  }
 0x680   : > { %4691 = vmatpush.bf16.msra.mxu3 %v8454_v52 }
 0x683   : > { %4159 = vperm.xlu0 %8962, %v10498_v20  }
 0x684   : > { %4164 = vperm.xlu1 %8963, %v10503_v3   ;;  %4692 = vmatpush.bf16.msra.mxu3 %v8453_v40  ;;  %v12378_v40 = vld [vmem:[#allocation125_spill] sm:$0xff] }
 0x686   : > { %4169 = vperm.xlu2 %8964, %v10508_v60  }
 0x68a   : > { %3892 = vmatmul.bf16.gmra.mxu0 %v7487_v33  ;;  %v12367_v33 = vld [vmem:[#allocation87_spill] sm:$0xff] }
 0x68b   : > { %4174 = vperm.xlu0 %8962, %v12347_v57   ;;  %3981 = vmatmul.bf16.gmra.mxu1 %v7491_v30  ;;  %v7519_v48 = vor.u32 %v12367_v33, %v12366_v63  ;;  %v12369_v30 = vld [vmem:[#allocation79_spill] sm:$0xff]  ;;  %v12379_v63 = vld [vmem:[#allocation133_spill] sm:$0xff] }
 0x68c   : > { %4179 = vperm.xlu1 %8963, %v12346_v22   ;;  %v7523_v22 = vor.u32 %v12369_v30, %v12368_v10  ;;  %v8442_v57 = vld [vmem:[%s11968_s9 + $0x8] sm:$0xff]  ;;  %v7543_v33 = vor.u32 %v12379_v63, %v12378_v40  ;;  %v12381_v10 = vld [vmem:[#allocation124_spill] sm:$0xff] }
 0x68d   : > { %4606 = vmatpush.bf16.msra.mxu2 %v8442_v57 }
 0x68e   : > { %4184 = vperm.xlu2 %8964, %v12348_v62   ;;  %v8452_v62 = vld [vmem:[%s11968_s9 + $0x58] sm:$0xff] }
 0x68f   : > { %4693 = vmatpush.bf16.msra.mxu3 %v8452_v62 }
 0x693   : > { %4189 = vperm.xlu0 %8962, %v12350_v58   ;;  %v8451_v58 = vld [vmem:[%s11968_s9 + $0x50] sm:$0xff] }
 0x694   : > { %4194 = vperm.xlu1 %8963, %v12349_v34   ;;  %v8441_v34 = vld [vmem:[%s11968_s9] sm:$0xff]  ;;  %4694 = vmatpush.bf16.msra.mxu3 %v8451_v58 }
 0x695   : > { %4607 = vmatpush.bf16.msra.mxu2 %v8441_v34 }
 0x696   : > { %4199 = vperm.xlu2 %8964, %v12351_v2   ;;  %v8409_v2 = vld [vmem:[#allocation3 + $0x30] sm:$0xff] }
 0x698   : > { %4608 = vmatmul.bf16.vlgmr.msra.gmra.mxu2 %v8409_v2  ;;  %4695 = vmatpush.bf16.msra.mxu3 %v8450_v6 }
 0x69a   : > { %3897 = vmatmul.bf16.gmra.mxu0 %v7495_v23  ;;  %v12370_v23 = vld [vmem:[#allocation93_spill] sm:$0xff] }
 0x69b   : > { %4204 = vperm.xlu0 %8962, %v12357_v24   ;;  %3986 = vmatmul.bf16.gmra.mxu1 %v7499_v11  ;;  %v7527_v18 = vor.u32 %v12371_v46, %v12370_v23  ;;  %v12372_v11 = vld [vmem:[#allocation100_spill] sm:$0xff] }
 0x69c   : > { %4209 = vperm.xlu1 %8963, %v12356_v26   ;;  %v12373_v26 = vld [vmem:[#allocation92_spill] sm:$0xff]  ;;  %4696 = vmatpush.bf16.msra.mxu3 %v8449_v55 }
 0x69d   : > { %v7531_v24 = vor.u32 %v12373_v26, %v12372_v11  ;;  %v8412_v46 = vld [vmem:[#allocation3 + $0x18] sm:$0xff] }
 0x6a8   : > { %4613 = vmatmul.bf16.gmra.mxu2 %v8410_v32 }
 0x6aa   : > { %3902 = vmatmul.bf16.gmra.mxu0 %v7503_v47  ;;  %v12374_v47 = vld [vmem:[#allocation109_spill] sm:$0xff] }
 0x6ab   : > { %3991 = vmatmul.bf16.gmra.mxu1 %v7507_v42  ;;  %v7535_v56 = vor.u32 %v12375_v31, %v12374_v47  ;;  %v12376_v42 = vld [vmem:[#allocation116_spill] sm:$0xff]  ;;  %v12382_v47 = vld [vmem:[#allocation141_spill] sm:$0xff] }
 0x6ac   : > { %v7539_v54 = vor.u32 %v12377_v27, %v12376_v42  ;;  %v12383_v31 = vld [vmem:[#allocation149_spill] sm:$0xff]  ;;  %v12384_v42 = vld [vmem:[#allocation148_spill] sm:$0xff] }
 0x6ad   : > { %v12385_v27 = vld [vmem:[#allocation140_spill] sm:$0xff] }
 0x6ba   : > { %3907 = vmatmul.bf16.gmra.mxu0 %v7511_v7 }
 0x6bb   : > { %3996 = vmatmul.bf16.gmra.mxu1 %v7515_v17  ;;  %v8411_v17 = vld [vmem:[#allocation3 + $0x58] sm:$0xff] }
 0x6bc   : > { %4618 = vmatmul.bf16.gmra.mxu2 %v8411_v17 }
 0x6bd   : > { %v4055_v50 = vpop.permute.xlu0 %4054 }
 0x6be   : > { %v4065_v15 = vpop.permute.xlu1 %4064 }
 0x6c5   : > { %v4060_v14 = vpop.permute.xlu0 %4059 }
 0x6c6   : > { %v4070_v11 = vpop.permute.xlu1 %4069 }
 0x6ca   : > { %3912 = vmatmul.bf16.gmra.mxu0 %v7519_v48  ;;  %v12380_v48 = vld [vmem:[#allocation132_spill] sm:$0xff] }
 0x6cb   : > { %4001 = vmatmul.bf16.gmra.mxu1 %v7523_v22  ;;  %v7547_v30 = vor.u32 %v12381_v10, %v12380_v48  ;;  %v12387_v48 = vld [vmem:[#allocation165_spill] sm:$0xff] }
 0x6cc   : > { %4623 = vmatmul.bf16.gmra.mxu2 %v8412_v46 }
 0x6da   : > { %3917 = vmatmul.bf16.gmra.mxu0 %v7527_v18 }
 0x6db   : > { %4006 = vmatmul.bf16.gmra.mxu1 %v7531_v24 }
 0x6e7   : > { %v3883_v9 = vpop.f32.mrf.mxu0 }
 0x6e8   : > { %v3972_v25 = vpop.f32.mrf.mxu1 }
 0x6e9   : > { %v3973_v39 = vadd.f32 %v3972_v25, %v3883_v9 }
 0x6ea   : > { %3922 = vmatmul.bf16.gmra.mxu0 %v7535_v56  ;;  %v7551_v56 = vor.u32 %v12383_v31, %v12382_v47 }
 0x6eb   : > { %4011 = vmatmul.bf16.gmra.mxu1 %v7539_v54  ;;  %v4212_v7 = vmul.f32 %v4055_v50, %v3973_v39  ;;  %v4075_v50 = vpop.permute.xlu2 %4074  ;;  %v7555_v54 = vor.u32 %v12385_v27, %v12384_v42  ;;  %v12391_v42 = vld [vmem:[#allocation181_spill] sm:$0xff] }
 0x6ed   : > { %v4244_v43 = vpack.c.bf16 %v4212_v7, %v4212_v7 }
 0x6ef   : > { %v3885_v8 = vpop.f32.mrf.mxu0  ;;  %v4404_v22 = vunpack.c.l.b16 %v4244_v43  ;;  %v8413_v43 = vld [vmem:[#allocation3 + $0x50] sm:$0xff] }
 0x6f0   : > { %v3974_v38 = vpop.f32.mrf.mxu1  ;;  %4628 = vmatmul.bf16.gmra.mxu2 %v8413_v43 }
 0x6f1   : > { %v3975_v59 = vadd.f32 %v3974_v38, %v3885_v8 }
 0x6f3   : > { %v4213_v16 = vmul.f32 %v4060_v14, %v3975_v59 }
 0x6f5   : > { %v4245_v52 = vpack.c.bf16 %v4213_v16, %v4213_v16 }
 0x6f7   : > { %v4405_v57 = vunpack.c.l.b16 %v4245_v52  ;;  %v3888_v62 = vpop.f32.mrf.mxu0  ;;  %v4080_v52 = vpop.permute.xlu2 %4079 }
 0x6f8   : > { %v3977_v34 = vpop.f32.mrf.mxu1 }
 0x6f9   : > { %v4436_v58 = vpack.c.b16 %v4405_v57, %v4404_v22  ;;  %v3978_v2 = vadd.f32 %v3977_v34, %v3888_v62  ;;  %v12389_v22 = vld [vmem:[#allocation156_spill] sm:$0xff] }
 0x6fa   : > { %3927 = vmatmul.bf16.gmra.mxu0 %v7543_v33  ;;  %v12386_v33 = vld [vmem:[#allocation157_spill] sm:$0xff] }
 0x6fb   : > { %4016 = vmatmul.bf16.gmra.mxu1 %v7547_v30  ;;  %4697 = vmatmul.bf16.vlgmr.msra.gmra.mxu3 %v4436_v58  ;;  %v4214_v6 = vmul.f32 %v4065_v15, %v3978_v2  ;;  %v7559_v10 = vor.u32 %v12387_v48, %v12386_v33  ;;  %v12388_v30 = vld [vmem:[#allocation164_spill] sm:$0xff] }
 0x6fc   : > { %v7563_v57 = vor.u32 %v12389_v22, %v12388_v30  ;;  %v12394_v30 = vld [vmem:[#allocation189_spill] sm:$0xff] }
 0x6fd   : > { %v4246_v26 = vpack.c.bf16 %v4214_v6, %v4214_v6  ;;  %v12395_v22 = vld [vmem:[#allocation197_spill] sm:$0xff] }
 0x6ff   : > { %v3890_v55 = vpop.f32.mrf.mxu0  ;;  %v4406_v9 = vunpack.c.l.b16 %v4246_v26  ;;  %v8414_v26 = vld [vmem:[#allocation3 + $0x68] sm:$0xff] }
 0x700   : > { %v3979_v23 = vpop.f32.mrf.mxu1  ;;  %4633 = vmatmul.bf16.gmra.mxu2 %v8414_v26 }
 0x701   : > { %v3980_v18 = vadd.f32 %v3979_v23, %v3890_v55  ;;  %v4085_v23 = vpop.permute.xlu0 %4084 }
 0x703   : > { %v4215_v24 = vmul.f32 %v4070_v11, %v3980_v18 }
 0x705   : > { %v4247_v32 = vpack.c.bf16 %v4215_v24, %v4215_v24 }
 0x707   : > { %v4407_v25 = vunpack.c.l.b16 %v4247_v32  ;;  %v3893_v39 = vpop.f32.mrf.mxu0  ;;  %v4090_v32 = vpop.permute.xlu1 %4089 }
 0x708   : > { %v3982_v7 = vpop.f32.mrf.mxu1 }
 0x709   : > { %v4437_v8 = vpack.c.b16 %v4407_v25, %v4406_v9  ;;  %v3983_v38 = vadd.f32 %v3982_v7, %v3893_v39  ;;  %v12393_v9 = vld [vmem:[#allocation172_spill] sm:$0xff] }
 0x70a   : > { %3932 = vmatmul.bf16.gmra.mxu0 %v7551_v56  ;;  %v12390_v56 = vld [vmem:[#allocation173_spill] sm:$0xff] }
 0x70b   : > { %4021 = vmatmul.bf16.gmra.mxu1 %v7555_v54  ;;  %4702 = vmatmul.bf16.gmra.mxu3 %v4437_v8  ;;  %v4216_v17 = vmul.f32 %v4075_v50, %v3983_v38  ;;  %v7567_v27 = vor.u32 %v12391_v42, %v12390_v56  ;;  %v12392_v54 = vld [vmem:[#allocation180_spill] sm:$0xff] }
 0x70c   : > { %v7571_v25 = vor.u32 %v12393_v9, %v12392_v54  ;;  %v12398_v54 = vld [vmem:[#allocation205_spill] sm:$0xff] }
 0x70d   : > { %v4248_v15 = vpack.c.bf16 %v4216_v17, %v4216_v17  ;;  %v12399_v9 = vld [vmem:[#allocation213_spill] sm:$0xff] }
 0x70f   : > { %v3895_v59 = vpop.f32.mrf.mxu0  ;;  %v4408_v62 = vunpack.c.l.b16 %v4248_v15  ;;  %v8415_v15 = vld [vmem:[#allocation3 + $0x8] sm:$0xff] }
 0x710   : > { %v3984_v14 = vpop.f32.mrf.mxu1  ;;  %4638 = vmatmul.bf16.gmra.mxu2 %v8415_v15 }
 0x711   : > { %v3985_v16 = vadd.f32 %v3984_v14, %v3895_v59  ;;  %v4095_v14 = vpop.permute.xlu2 %4094 }
 0x713   : > { %v4217_v40 = vmul.f32 %v4080_v52, %v3985_v16 }
 0x715   : > { %v4249_v63 = vpack.c.bf16 %v4217_v40, %v4217_v40 }
 0x717   : > { %v4409_v34 = vunpack.c.l.b16 %v4249_v63  ;;  %v3898_v58 = vpop.f32.mrf.mxu0  ;;  %v4100_v63 = vpop.permute.xlu0 %4099 }
 0x718   : > { %v3987_v2 = vpop.f32.mrf.mxu1 }
 0x719   : > { %v4438_v6 = vpack.c.b16 %v4409_v34, %v4408_v62  ;;  %v3988_v55 = vadd.f32 %v3987_v2, %v3898_v58  ;;  %v12396_v62 = vld [vmem:[#allocation196_spill] sm:$0xff] }
 0x71a   : > { %3937 = vmatmul.bf16.gmra.mxu0 %v7559_v10  ;;  %v12397_v34 = vld [vmem:[#allocation188_spill] sm:$0xff] }
 0x71b   : > { %4026 = vmatmul.bf16.gmra.mxu1 %v7563_v57  ;;  %4707 = vmatmul.bf16.gmra.mxu3 %v4438_v6  ;;  %v4218_v46 = vmul.f32 %v4085_v23, %v3988_v55  ;;  %v7575_v57 = vor.u32 %v12395_v22, %v12394_v30  ;;  %v7579_v58 = vor.u32 %v12397_v34, %v12396_v62  ;;  %v4609_v62 = vpop.f32.mrf.mxu2  ;;  %v12402_v34 = vld [vmem:[#allocation221_spill] sm:$0xff] }
 0x71d   : > { %v4250_v50 = vpack.c.bf16 %v4218_v46, %v4218_v46 }
 0x71f   : > { %v3900_v18 = vpop.f32.mrf.mxu0  ;;  %v4410_v39 = vunpack.c.l.b16 %v4250_v50  ;;  %v8416_v50 = vld [vmem:[#allocation3 + $0x48] sm:$0xff] }
 0x720   : > { %v3989_v11 = vpop.f32.mrf.mxu1  ;;  %4643 = vmatmul.bf16.gmra.mxu2 %v8416_v50 }
 0x721   : > { %v3990_v24 = vadd.f32 %v3989_v11, %v3900_v18  ;;  %v4105_v11 = vpop.permute.xlu1 %4104 }
 0x723   : > { %v4219_v47 = vmul.f32 %v4090_v32, %v3990_v24  ;;  %v4611_v50 = vpop.f32.mrf.mxu2 }
 0x725   : > { %v4251_v31 = vpack.c.bf16 %v4219_v47, %v4219_v47 }
 0x727   : > { %v4411_v7 = vunpack.c.l.b16 %v4251_v31  ;;  %v3903_v8 = vpop.f32.mrf.mxu0  ;;  %v4110_v31 = vpop.permute.xlu2 %4109 }
 0x728   : > { %v3992_v38 = vpop.f32.mrf.mxu1 }
 0x729   : > { %v4439_v17 = vpack.c.b16 %v4411_v7, %v4410_v39  ;;  %v3993_v59 = vadd.f32 %v3992_v38, %v3903_v8  ;;  %v12400_v39 = vld [vmem:[#allocation212_spill] sm:$0xff] }
 0x72a   : > { %3942 = vmatmul.bf16.gmra.mxu0 %v7567_v27  ;;  %v12401_v7 = vld [vmem:[#allocation204_spill] sm:$0xff] }
 0x72b   : > { %4031 = vmatmul.bf16.gmra.mxu1 %v7571_v25  ;;  %4712 = vmatmul.bf16.gmra.mxu3 %v4439_v17  ;;  %v4220_v43 = vmul.f32 %v4095_v14, %v3993_v59  ;;  %v7583_v25 = vor.u32 %v12399_v9, %v12398_v54  ;;  %v7587_v8 = vor.u32 %v12401_v7, %v12400_v39 }
 0x72d   : > { %v4252_v33 = vpack.c.bf16 %v4220_v43, %v4220_v43 }
 0x72f   : > { %v3905_v16 = vpop.f32.mrf.mxu0  ;;  %v4412_v2 = vunpack.c.l.b16 %v4252_v33  ;;  %v8417_v33 = vld [vmem:[#allocation3 + $0x40] sm:$0xff] }
 0x730   : > { %v3994_v52 = vpop.f32.mrf.mxu1  ;;  %4648 = vmatmul.bf16.gmra.mxu2 %v8417_v33 }
 0x731   : > { %v3995_v40 = vadd.f32 %v3994_v52, %v3905_v16  ;;  %v4115_v52 = vpop.permute.xlu0 %4114 }
 0x733   : > { %v4221_v48 = vmul.f32 %v4100_v63, %v3995_v40 }
 0x735   : > { %v4253_v10 = vpack.c.bf16 %v4221_v48, %v4221_v48 }
 0x737   : > { %v4413_v6 = vunpack.c.l.b16 %v4253_v10  ;;  %v3908_v55 = vpop.f32.mrf.mxu0  ;;  %v4120_v10 = vpop.permute.xlu1 %4119 }
 0x738   : > { %v3997_v23 = vpop.f32.mrf.mxu1 }
 0x739   : > { %v4440_v46 = vpack.c.b16 %v4413_v6, %v4412_v2  ;;  %v3998_v18 = vadd.f32 %v3997_v23, %v3908_v55  ;;  %v12404_v6 = vld [vmem:[#allocation228_spill] sm:$0xff]  ;;  %v4130_v9 = vpop.permute.xlu0 %4129 }
 0x73a   : > { %3947 = vmatmul.bf16.gmra.mxu0 %v7575_v57  ;;  %v12405_v55 = vld [vmem:[#allocation220_spill] sm:$0xff] }
 0x73b   : > { %4036 = vmatmul.bf16.gmra.mxu1 %v7579_v58  ;;  %4717 = vmatmul.bf16.gmra.mxu3 %v4440_v46  ;;  %v4222_v26 = vmul.f32 %v4105_v11, %v3998_v18  ;;  %v12403_v58 = vld [vmem:[#allocation229_spill] sm:$0xff]  ;;  %v7595_v23 = vor.u32 %v12405_v55, %v12404_v6 }
 0x73c   : > { %v7591_v2 = vor.u32 %v12403_v58, %v12402_v34 }
 0x73d   : > { %v4254_v56 = vpack.c.bf16 %v4222_v26, %v4222_v26 }
 0x73f   : > { %v3910_v24 = vpop.f32.mrf.mxu0  ;;  %v4414_v38 = vunpack.c.l.b16 %v4254_v56 }
 0x740   : > { %v3999_v32 = vpop.f32.mrf.mxu1 }
 0x741   : > { %v4000_v47 = vadd.f32 %v3999_v32, %v3910_v24 }
 0x743   : > { %v4223_v42 = vmul.f32 %v4110_v31, %v4000_v47  ;;  %v4125_v47 = vpop.permute.xlu2 %4124 }
 0x745   : > { %v4255_v27 = vpack.c.bf16 %v4223_v42, %v4223_v42 }
 0x747   : > { %v4415_v17 = vunpack.c.l.b16 %v4255_v27  ;;  %v3913_v59 = vpop.f32.mrf.mxu0  ;;  %v8418_v27 = vld [vmem:[#allocation3 + $0x20] sm:$0xff] }
 0x748   : > { %v4002_v14 = vpop.f32.mrf.mxu1  ;;  %4653 = vmatmul.bf16.gmra.mxu2 %v8418_v27 }
 0x749   : > { %v4441_v43 = vpack.c.b16 %v4415_v17, %v4414_v38  ;;  %v4003_v16 = vadd.f32 %v4002_v14, %v3913_v59 }
 0x74a   : > { %3952 = vmatmul.bf16.gmra.mxu0 %v7583_v25 }
 0x74b   : > { %4041 = vmatmul.bf16.gmra.mxu1 %v7587_v8  ;;  %4722 = vmatmul.bf16.gmra.mxu3 %v4441_v43  ;;  %v4224_v15 = vmul.f32 %v4115_v52, %v4003_v16  ;;  %v11363_v8 = vpop.f32.mrf.mxu2 }
 0x74d   : > { %v4256_v30 = vpack.c.bf16 %v4224_v15, %v4224_v15  ;;  %v4135_v15 = vpop.permute.xlu1 %4134 }
 0x74f   : > { %v3915_v40 = vpop.f32.mrf.mxu0  ;;  %v4416_v46 = vunpack.c.l.b16 %v4256_v30  ;;  %v4140_v30 = vpop.permute.xlu2 %4139 }
 0x750   : > { %v4004_v63 = vpop.f32.mrf.mxu1 }
 0x751   : > { %v4005_v48 = vadd.f32 %v4004_v63, %v3915_v40 }
 0x753   : > { %v4225_v22 = vmul.f32 %v4120_v10, %v4005_v48  ;;  %v11365_v52 = vpop.f32.mrf.mxu2  ;;  %v8419_v48 = vld [vmem:[#allocation3 + $0x10] sm:$0xff] }
 0x755   : > { %v4257_v57 = vpack.c.bf16 %v4225_v22, %v4225_v22 }
 0x757   : > { %v4417_v18 = vunpack.c.l.b16 %v4257_v57  ;;  %v3918_v11 = vpop.f32.mrf.mxu0 }
 0x758   : > { %v4007_v26 = vpop.f32.mrf.mxu1  ;;  %4658 = vmatmul.bf16.gmra.mxu2 %v8419_v48 }
 0x759   : > { %v4442_v24 = vpack.c.b16 %v4417_v18, %v4416_v46  ;;  %v4008_v32 = vadd.f32 %v4007_v26, %v3918_v11  ;;  %v4145_v26 = vpop.permute.xlu0 %4144 }
 0x75a   : > { %3957 = vmatmul.bf16.gmra.mxu0 %v7591_v2 }
 0x75b   : > { %4046 = vmatmul.bf16.gmra.mxu1 %v7595_v23  ;;  %4727 = vmatmul.bf16.gmra.mxu3 %v4442_v24  ;;  %v4226_v31 = vmul.f32 %v4125_v47, %v4008_v32  ;;  %v11367_v58 = vpop.f32.mrf.mxu2  ;;  %v11374_v24 = vld [vmem:[%s11969_s10] ss:$0 sm:$0xff] }
 0x75d   : > { %v4258_v25 = vpack.c.bf16 %v4226_v31, %v4226_v31 }
 0x75f   : > { %v3920_v56 = vpop.f32.mrf.mxu0  ;;  %v4418_v38 = vunpack.c.l.b16 %v4258_v25 }
 0x760   : > { %v4009_v42 = vpop.f32.mrf.mxu1 }
 0x761   : > { %v4010_v54 = vadd.f32 %v4009_v42, %v3920_v56  ;;  %v8420_v42 = vld [vmem:[#allocation3 + $0x38] sm:$0xff] }
 0x763   : > { %v4227_v39 = vmul.f32 %v4130_v9, %v4010_v54  ;;  %v11369_v11 = vpop.f32.mrf.mxu2  ;;  %v4150_v54 = vpop.permute.xlu1 %4149  ;;  %v4610_v9 = vadd.f32 %v11374_v24, %v4609_v62 }
 0x765   : > { %v4259_v7 = vpack.c.bf16 %v4227_v39, %v4227_v39 }
 0x767   : > { %v4419_v17 = vunpack.c.l.b16 %v4259_v7  ;;  %v3923_v59 = vpop.f32.mrf.mxu0 }
 0x768   : > { %v4012_v14 = vpop.f32.mrf.mxu1  ;;  %4663 = vmatmul.bf16.gmra.mxu2 %v8420_v42 }
 0x769   : > { %v4443_v43 = vpack.c.b16 %v4419_v17, %v4418_v38  ;;  %v4013_v16 = vadd.f32 %v4012_v14, %v3923_v59  ;;  %v4612_v17 = vadd.f32 %v11374_v24, %v4611_v50 }
 0x76b   : > { %4732 = vmatmul.bf16.gmra.mxu3 %v4443_v43  ;;  %v4228_v40 = vmul.f32 %v4135_v15, %v4013_v16  ;;  %v11377_v38 = vpop.f32.mrf.mxu2 }
 0x76d   : > { %v4260_v22 = vpack.c.bf16 %v4228_v40, %v4228_v40 }
 0x76f   : > { %v3925_v63 = vpop.f32.mrf.mxu0  ;;  %v4420_v2 = vunpack.c.l.b16 %v4260_v22 }
 0x770   : > { %v4014_v33 = vpop.f32.mrf.mxu1 }
 0x771   : > { %v4015_v10 = vadd.f32 %v4014_v33, %v3925_v63 }
 0x773   : > { %v4229_v57 = vmul.f32 %v4140_v30, %v4015_v10  ;;  %v11380_v22 = vpop.f32.mrf.mxu2 }
 0x775   : > { %v4261_v34 = vpack.c.bf16 %v4229_v57, %v4229_v57  ;;  %v4155_v57 = vpop.permute.xlu2 %4154 }
 0x777   : > { %v4421_v6 = vunpack.c.l.b16 %v4261_v34  ;;  %v3928_v55 = vpop.f32.mrf.mxu0 }
 0x778   : > { %v4017_v23 = vpop.f32.mrf.mxu1 }
 0x779   : > { %v4444_v46 = vpack.c.b16 %v4421_v6, %v4420_v2  ;;  %v4018_v18 = vadd.f32 %v4017_v23, %v3928_v55  ;;  %v8421_v55 = vld [vmem:[#allocation3 + $0x60] sm:$0xff] }
 0x77a   : > { %4668 = vmatmul.bf16.gmra.mxu2 %v8421_v55 }
 0x77b   : > { %4737 = vmatmul.bf16.gmra.mxu3 %v4444_v46  ;;  %v4230_v32 = vmul.f32 %v4145_v26, %v4018_v18  ;;  %v4160_v46 = vpop.permute.xlu0 %4159  ;;  %v4615_v18 = vadd.f32 %v11374_v24, %v11363_v8 }
 0x77d   : > { %v4262_v25 = vpack.c.bf16 %v4230_v32, %v4230_v32 }
 0x77e   : > { %v4698_v47 = vpop.f32.mrf.mxu3 }
 0x77f   : > { %v3930_v31 = vpop.f32.mrf.mxu0  ;;  %v4699_v59 = vadd.f32 %v4698_v47, %v4610_v9  ;;  %v4422_v43 = vunpack.c.l.b16 %v4262_v25 }
 0x780   : > { %v4019_v56 = vpop.f32.mrf.mxu1 }
 0x781   : > { %v4020_v27 = vadd.f32 %v4019_v56, %v3930_v31  ;;  %v4778_v48 = vmax.f32 %v4699_v59, 0.0  ;;  %v11384_v31 = vpop.f32.mrf.mxu2  ;;  %v4617_v56 = vadd.f32 %v11374_v24, %v11365_v52 }
 0x783   : > { %v4231_v39 = vmul.f32 %v4150_v54, %v4020_v27 }
 0x785   : > { %v4263_v7 = vpack.c.bf16 %v4231_v39, %v4231_v39 }
 0x786   : > { %v4700_v14 = vpop.f32.mrf.mxu3 }
 0x787   : > { %v4423_v16 = vunpack.c.l.b16 %v4263_v7  ;;  %v4701_v15 = vadd.f32 %v4700_v14, %v4612_v17  ;;  %v3933_v40 = vpop.f32.mrf.mxu0 }
 0x788   : > { %v4022_v63 = vpop.f32.mrf.mxu1 }
 0x789   : > { %v4445_v33 = vpack.c.b16 %v4423_v16, %v4422_v43  ;;  %v4779_v10 = vmax.f32 %v4701_v15, 0.0  ;;  %v4023_v30 = vadd.f32 %v4022_v63, %v3933_v40  ;;  %v11388_v16 = vpop.f32.mrf.mxu2  ;;  %v4165_v15 = vpop.permute.xlu1 %4164 }
 0x78b   : > { %v8684_v62 = vpack.c.bf16 %v4779_v10, %v4778_v48  ;;  %4742 = vmatmul.bf16.gmra.mxu3 %v4445_v33  ;;  %v4232_v34 = vmul.f32 %v4155_v57, %v4023_v30  ;;  %v8422_v48 = vld [vmem:[#allocation3 + $0x70] sm:$0xff]  ;;  %v4170_v30 = vpop.permute.xlu2 %4169 }
 0x78c   : > { %4673 = vmatmul.bf16.gmra.mxu2 %v8422_v48 }
 0x78d   : > { %8685 = vst [vmem:[#allocation2] sm:$0xff] %v8684_v62   ;;  %v4264_v26 = vpack.c.bf16 %v4232_v34, %v4232_v34  ;;  %v4620_v62 = vadd.f32 %v11374_v24, %v11367_v58 }
 0x78e   : > { %v4703_v2 = vpop.f32.mrf.mxu3 }
 0x78f   : > { %v3935_v50 = vpop.f32.mrf.mxu0  ;;  %v4704_v42 = vadd.f32 %v4703_v2, %v4615_v18  ;;  %v4424_v54 = vunpack.c.l.b16 %v4264_v26 }
 0x790   : > { %v4024_v6 = vpop.f32.mrf.mxu1 }
 0x791   : > { %v4025_v23 = vadd.f32 %v4024_v6, %v3935_v50  ;;  %v4780_v59 = vmax.f32 %v4704_v42, 0.0  ;;  %v11392_v50 = vpop.f32.mrf.mxu2  ;;  %v4622_v6 = vadd.f32 %v11374_v24, %v11369_v11 }
 0x793   : > { %v4233_v32 = vmul.f32 %v4160_v46, %v4025_v23 }
 0x795   : > { %v4265_v47 = vpack.c.bf16 %v4233_v32, %v4233_v32 }
 0x796   : > { %v4705_v27 = vpop.f32.mrf.mxu3 }
 0x797   : > { %v4425_v9 = vunpack.c.l.b16 %v4265_v47  ;;  %v4706_v25 = vadd.f32 %v4705_v27, %v4617_v56  ;;  %v3938_v39 = vpop.f32.mrf.mxu0 }
 0x798   : > { %v4027_v7 = vpop.f32.mrf.mxu1 }
 0x799   : > { %v4446_v17 = vpack.c.b16 %v4425_v9, %v4424_v54  ;;  %v4781_v14 = vmax.f32 %v4706_v25, 0.0  ;;  %v4028_v8 = vadd.f32 %v4027_v7, %v3938_v39  ;;  %v11396_v9 = vpop.f32.mrf.mxu2  ;;  %v4175_v25 = vpop.permute.xlu0 %4174 }
 0x79b   : > { %v8689_v43 = vpack.c.bf16 %v4781_v14, %v4780_v59  ;;  %4747 = vmatmul.bf16.gmra.mxu3 %v4446_v17  ;;  %v4234_v40 = vmul.f32 %v4165_v15, %v4028_v8  ;;  %v8423_v59 = vld [vmem:[#allocation3 + $0x78] sm:$0xff]  ;;  %v4180_v8 = vpop.permute.xlu1 %4179 }
 0x79c   : > { %4678 = vmatmul.bf16.gmra.mxu2 %v8423_v59 }
 0x79d   : > { %8855 = vst [vmem:[#allocation2 + $0x8] sm:$0xff] %v8689_v43   ;;  %v4266_v57 = vpack.c.bf16 %v4234_v40, %v4234_v40  ;;  %v4625_v43 = vadd.f32 %v11374_v24, %v11377_v38 }
 0x79e   : > { %v4708_v63 = vpop.f32.mrf.mxu3 }
 0x79f   : > { %v3940_v52 = vpop.f32.mrf.mxu0  ;;  %v4709_v55 = vadd.f32 %v4708_v63, %v4620_v62  ;;  %v4426_v46 = vunpack.c.l.b16 %v4266_v57 }
 0x7a0   : > { %v4029_v33 = vpop.f32.mrf.mxu1 }
 0x7a1   : > { %v4030_v10 = vadd.f32 %v4029_v33, %v3940_v52  ;;  %v4782_v42 = vmax.f32 %v4709_v55, 0.0  ;;  %v11400_v52 = vpop.f32.mrf.mxu2  ;;  %v4627_v33 = vadd.f32 %v11374_v24, %v11380_v22 }
 0x7a3   : > { %v4235_v34 = vmul.f32 %v4170_v30, %v4030_v10 }
 0x7a5   : > { %v4267_v2 = vpack.c.bf16 %v4235_v34, %v4235_v34 }
 0x7a6   : > { %v4710_v23 = vpop.f32.mrf.mxu3 }
 0x7a7   : > { %v4427_v18 = vunpack.c.l.b16 %v4267_v2  ;;  %v4711_v26 = vadd.f32 %v4710_v23, %v4622_v6  ;;  %v3943_v32 = vpop.f32.mrf.mxu0 }
 0x7a8   : > { %v4032_v47 = vpop.f32.mrf.mxu1 }
 0x7a9   : > { %v4447_v56 = vpack.c.b16 %v4427_v18, %v4426_v46  ;;  %v4783_v27 = vmax.f32 %v4711_v26, 0.0  ;;  %v4033_v58 = vadd.f32 %v4032_v47, %v3943_v32  ;;  %v4185_v18 = vpop.permute.xlu2 %4184  ;;  %v11404_v47 = vpop.f32.mrf.mxu2 }
 0x7ab   : > { %v8694_v54 = vpack.c.bf16 %v4783_v27, %v4782_v42  ;;  %4752 = vmatmul.bf16.gmra.mxu3 %v4447_v56  ;;  %v4236_v39 = vmul.f32 %v4175_v25, %v4033_v58  ;;  %v8424_v42 = vld [vmem:[#allocation3 + $0x28] sm:$0xff]  ;;  %v4190_v58 = vpop.permute.xlu0 %4189 }
 0x7ac   : > { %4683 = vmatmul.bf16.gmra.mxu2 %v8424_v42 }
 0x7ad   : > { %8856 = vst [vmem:[#allocation2 + $0x10] sm:$0xff] %v8694_v54   ;;  %v4268_v15 = vpack.c.bf16 %v4236_v39, %v4236_v39  ;;  %v4630_v54 = vadd.f32 %v11374_v24, %v11384_v31 }
 0x7ae   : > { %v4713_v7 = vpop.f32.mrf.mxu3 }
 0x7af   : > { %v3945_v11 = vpop.f32.mrf.mxu0  ;;  %v4714_v48 = vadd.f32 %v4713_v7, %v4625_v43  ;;  %v4428_v10 = vunpack.c.l.b16 %v4268_v15 }
 0x7b0   : > { %v4034_v17 = vpop.f32.mrf.mxu1 }
 0x7b1   : > { %v4035_v14 = vadd.f32 %v4034_v17, %v3945_v11  ;;  %v4784_v55 = vmax.f32 %v4714_v48, 0.0  ;;  %v4632_v11 = vadd.f32 %v11374_v24, %v11388_v16 }
 0x7b3   : > { %v4237_v40 = vmul.f32 %v4180_v8, %v4035_v14 }
 0x7b5   : > { %v4269_v63 = vpack.c.bf16 %v4237_v40, %v4237_v40 }
 0x7b6   : > { %v4715_v62 = vpop.f32.mrf.mxu3 }
 0x7b7   : > { %v4429_v30 = vunpack.c.l.b16 %v4269_v63  ;;  %v4716_v57 = vadd.f32 %v4715_v62, %v4627_v33  ;;  %v3948_v34 = vpop.f32.mrf.mxu0  ;;  %v4644_v33 = vpop.f32.mrf.mxu2 }
 0x7b8   : > { %v4037_v2 = vpop.f32.mrf.mxu1  ;;  %v4195_v62 = vpop.permute.xlu1 %4194 }
 0x7b9   : > { %v4448_v6 = vpack.c.b16 %v4429_v30, %v4428_v10  ;;  %v4785_v23 = vmax.f32 %v4716_v57, 0.0  ;;  %v4038_v38 = vadd.f32 %v4037_v2, %v3948_v34 }
 0x7bb   : > { %v8699_v46 = vpack.c.bf16 %v4785_v23, %v4784_v55  ;;  %4757 = vmatmul.bf16.gmra.mxu3 %v4448_v6  ;;  %v4238_v26 = vmul.f32 %v4185_v18, %v4038_v38  ;;  %v4200_v55 = vpop.permute.xlu2 %4199  ;;  %v4635_v23 = vadd.f32 %v11374_v24, %v11392_v50 }
 0x7bd   : > { %8857 = vst [vmem:[#allocation2 + $0x18] sm:$0xff] %v8699_v46   ;;  %v4270_v25 = vpack.c.bf16 %v4238_v26, %v4238_v26 }
 0x7be   : > { %v4718_v32 = vpop.f32.mrf.mxu3 }
 0x7bf   : > { %v3950_v22 = vpop.f32.mrf.mxu0  ;;  %v4719_v17 = vadd.f32 %v4718_v32, %v4630_v54  ;;  %v4430_v59 = vunpack.c.l.b16 %v4270_v25  ;;  %v4646_v18 = vpop.f32.mrf.mxu2  ;;  %v4637_v32 = vadd.f32 %v11374_v24, %v11396_v9 }
 0x7c0   : > { %v4039_v56 = vpop.f32.mrf.mxu1 }
 0x7c1   : > { %v4040_v27 = vadd.f32 %v4039_v56, %v3950_v22  ;;  %v4786_v48 = vmax.f32 %v4719_v17, 0.0 }
 0x7c3   : > { %v4239_v39 = vmul.f32 %v4190_v58, %v4040_v27 }
 0x7c5   : > { %v4271_v7 = vpack.c.bf16 %v4239_v39, %v4239_v39 }
 0x7c6   : > { %v4720_v8 = vpop.f32.mrf.mxu3 }
 0x7c7   : > { %v4431_v14 = vunpack.c.l.b16 %v4271_v7  ;;  %v4721_v43 = vadd.f32 %v4720_v8, %v4632_v11  ;;  %v3953_v15 = vpop.f32.mrf.mxu0  ;;  %v4649_v50 = vpop.f32.mrf.mxu2 }
 0x7c8   : > { %v4042_v40 = vpop.f32.mrf.mxu1 }
 0x7c9   : > { %v4449_v63 = vpack.c.b16 %v4431_v14, %v4430_v59  ;;  %v4787_v10 = vmax.f32 %v4721_v43, 0.0  ;;  %v4043_v30 = vadd.f32 %v4042_v40, %v3953_v15  ;;  %v4205_v14 = vpop.permute.xlu0 %4204 }
 0x7cb   : > { %v8704_v31 = vpack.c.bf16 %v4787_v10, %v4786_v48  ;;  %4762 = vmatmul.bf16.gmra.mxu3 %v4449_v63  ;;  %v4240_v57 = vmul.f32 %v4195_v62, %v4043_v30  ;;  %v4210_v63 = vpop.permute.xlu1 %4209  ;;  %v4640_v48 = vadd.f32 %v11374_v24, %v11400_v52  ;;  %v4642_v62 = vadd.f32 %v11374_v24, %v11404_v47 }
 0x7cd   : > { %8858 = vst [vmem:[#allocation2 + $0x20] sm:$0xff] %v8704_v31   ;;  %v4272_v38 = vpack.c.bf16 %v4240_v57, %v4240_v57 }
 0x7ce   : > { %v4723_v34 = vpop.f32.mrf.mxu3 }
 0x7cf   : > { %v3955_v2 = vpop.f32.mrf.mxu0  ;;  %v4724_v22 = vadd.f32 %v4723_v34, %v4635_v23  ;;  %v4432_v56 = vunpack.c.l.b16 %v4272_v38 }
 0x7d0   : > { %v4044_v16 = vpop.f32.mrf.mxu1 }
 0x7d1   : > { %v4045_v6 = vadd.f32 %v4044_v16, %v3955_v2  ;;  %v4788_v7 = vmax.f32 %v4724_v22, 0.0  ;;  %v4645_v22 = vadd.f32 %v11374_v24, %v4644_v33 }
 0x7d3   : > { %v4241_v46 = vmul.f32 %v4200_v55, %v4045_v6  ;;  %v4651_v6 = vpop.f32.mrf.mxu2 }
 0x7d5   : > { %v4273_v26 = vpack.c.bf16 %v4241_v46, %v4241_v46 }
 0x7d6   : > { %v4725_v27 = vpop.f32.mrf.mxu3 }
 0x7d7   : > { %v4433_v42 = vunpack.c.l.b16 %v4273_v26  ;;  %v4726_v58 = vadd.f32 %v4725_v27, %v4637_v32  ;;  %v3958_v54 = vpop.f32.mrf.mxu0 }
 0x7d8   : > { %v4047_v25 = vpop.f32.mrf.mxu1 }
 0x7d9   : > { %v4450_v39 = vpack.c.b16 %v4433_v42, %v4432_v56  ;;  %v4789_v11 = vmax.f32 %v4726_v58, 0.0  ;;  %v4048_v17 = vadd.f32 %v4047_v25, %v3958_v54  ;;  %v4647_v56 = vadd.f32 %v11374_v24, %v4646_v18 }
 0x7db   : > { %v8709_v59 = vpack.c.bf16 %v4789_v11, %v4788_v7  ;;  %4767 = vmatmul.bf16.gmra.mxu3 %v4450_v39  ;;  %v4242_v8 = vmul.f32 %v4205_v14, %v4048_v17  ;;  %v4654_v52 = vpop.f32.mrf.mxu2  ;;  %v4650_v11 = vadd.f32 %v11374_v24, %v4649_v50 }
 0x7dd   : > { %8859 = vst [vmem:[#allocation2 + $0x28] sm:$0xff] %v8709_v59   ;;  %v4274_v10 = vpack.c.bf16 %v4242_v8, %v4242_v8  ;;  %v4652_v59 = vadd.f32 %v11374_v24, %v4651_v6 }
 0x7de   : > { %v4728_v43 = vpop.f32.mrf.mxu3 }
 0x7df   : > { %v3960_v15 = vpop.f32.mrf.mxu0  ;;  %v4729_v57 = vadd.f32 %v4728_v43, %v4640_v48  ;;  %v4434_v34 = vunpack.c.l.b16 %v4274_v10 }
 0x7e0   : > { %v4049_v9 = vpop.f32.mrf.mxu1 }
 0x7e1   : > { %v4050_v40 = vadd.f32 %v4049_v9, %v3960_v15  ;;  %v4790_v38 = vmax.f32 %v4729_v57, 0.0 }
 0x7e3   : > { %v4243_v30 = vmul.f32 %v4210_v63, %v4050_v40  ;;  %v4656_v25 = vpop.f32.mrf.mxu2  ;;  %v4655_v63 = vadd.f32 %v11374_v24, %v4654_v52 }
 0x7e4   : > { %v4657_v48 = vadd.f32 %v11374_v24, %v4656_v25 }
 0x7e5   : > { %v4275_v31 = vpack.c.bf16 %v4243_v30, %v4243_v30 }
 0x7e6   : > { %v4730_v16 = vpop.f32.mrf.mxu3 }
 0x7e7   : > { %v4435_v2 = vunpack.c.l.b16 %v4275_v31  ;;  %v4731_v55 = vadd.f32 %v4730_v16, %v4642_v62 }
 0x7e9   : > { %v4451_v23 = vpack.c.b16 %v4435_v2, %v4434_v34  ;;  %v4791_v46 = vmax.f32 %v4731_v55, 0.0 }
 0x7eb   : > { %v8714_v26 = vpack.c.bf16 %v4791_v46, %v4790_v38  ;;  %4772 = vmatmul.bf16.gmra.mxu3 %v4451_v23  ;;  %v4659_v17 = vpop.f32.mrf.mxu2 }
 0x7ec   : > { %v4660_v16 = vadd.f32 %v11374_v24, %v4659_v17 }
 0x7ed   : > { %8860 = vst [vmem:[#allocation2 + $0x30] sm:$0xff] %v8714_v26  }
 0x7ee   : > { %v4733_v32 = vpop.f32.mrf.mxu3 }
 0x7ef   : > { %v4734_v42 = vadd.f32 %v4733_v32, %v4645_v22 }
 0x7f1   : > { %v4792_v58 = vmax.f32 %v4734_v42, 0.0 }
 0x7f3   : > { %v4661_v40 = vpop.f32.mrf.mxu2 }
 0x7f4   : > { %v4662_v55 = vadd.f32 %v11374_v24, %v4661_v40 }
 0x7f6   : > { %v4735_v47 = vpop.f32.mrf.mxu3 }
 0x7f7   : > { %v4736_v27 = vadd.f32 %v4735_v47, %v4647_v56 }
 0x7f9   : > { %v4793_v54 = vmax.f32 %v4736_v27, 0.0 }
 0x7fb   : > { %v8719_v39 = vpack.c.bf16 %v4793_v54, %v4792_v58  ;;  %v4664_v50 = vpop.f32.mrf.mxu2 }
 0x7fc   : > { %v4665_v42 = vadd.f32 %v11374_v24, %v4664_v50 }
 0x7fd   : > { %8861 = vst [vmem:[#allocation2 + $0x38] sm:$0xff] %v8719_v39  }
 0x7fe   : > { %v4738_v7 = vpop.f32.mrf.mxu3 }
 0x7ff   : > { %v4739_v14 = vadd.f32 %v4738_v7, %v4650_v11 }
 0x801   : > { %v4794_v33 = vmax.f32 %v4739_v14, 0.0 }
 0x803   : > { %v4666_v6 = vpop.f32.mrf.mxu2 }
 0x804   : > { %v4667_v47 = vadd.f32 %v11374_v24, %v4666_v6 }
 0x806   : > { %v4740_v8 = vpop.f32.mrf.mxu3 }
 0x807   : > { %v4741_v43 = vadd.f32 %v4740_v8, %v4652_v59 }
 0x809   : > { %v4795_v15 = vmax.f32 %v4741_v43, 0.0 }
 0x80b   : > { %v8724_v18 = vpack.c.bf16 %v4795_v15, %v4794_v33  ;;  %v4669_v22 = vpop.f32.mrf.mxu2 }
 0x80c   : > { %v4670_v14 = vadd.f32 %v11374_v24, %v4669_v22 }
 0x80d   : > { %8862 = vst [vmem:[#allocation2 + $0x40] sm:$0xff] %v8724_v18  }
 0x80e   : > { %v4743_v9 = vpop.f32.mrf.mxu3 }
 0x80f   : > { %v4744_v10 = vadd.f32 %v4743_v9, %v4655_v63 }
 0x811   : > { %v4796_v62 = vmax.f32 %v4744_v10, 0.0 }
 0x813   : > { %v4671_v54 = vpop.f32.mrf.mxu2 }
 0x814   : > { %v4672_v8 = vadd.f32 %v11374_v24, %v4671_v54 }
 0x816   : > { %v4745_v30 = vpop.f32.mrf.mxu3 }
 0x817   : > { %v4746_v31 = vadd.f32 %v4745_v30, %v4657_v48 }
 0x819   : > { %v4797_v57 = vmax.f32 %v4746_v31, 0.0 }
 0x81b   : > { %v8729_v34 = vpack.c.bf16 %v4797_v57, %v4796_v62  ;;  %v4674_v59 = vpop.f32.mrf.mxu2 }
 0x81c   : > { %v4675_v10 = vadd.f32 %v11374_v24, %v4674_v59 }
 0x81d   : > { %8863 = vst [vmem:[#allocation2 + $0x48] sm:$0xff] %v8729_v34  }
 0x81e   : > { %v4748_v2 = vpop.f32.mrf.mxu3 }
 0x81f   : > { %v4749_v23 = vadd.f32 %v4748_v2, %v4660_v16 }
 0x821   : > { %v4798_v26 = vmax.f32 %v4749_v23, 0.0 }
 0x823   : > { %v4676_v40 = vpop.f32.mrf.mxu2 }
 0x824   : > { %v4677_v31 = vadd.f32 %v11374_v24, %v4676_v40 }
 0x826   : > { %v4750_v38 = vpop.f32.mrf.mxu3 }
 0x827   : > { %v4751_v46 = vadd.f32 %v4750_v38, %v4662_v55 }
 0x829   : > { %v4799_v32 = vmax.f32 %v4751_v46, 0.0 }
 0x82b   : > { %v8734_v52 = vpack.c.bf16 %v4799_v32, %v4798_v26  ;;  %v4679_v30 = vpop.f32.mrf.mxu2 }
 0x82c   : > { %v4680_v23 = vadd.f32 %v11374_v24, %v4679_v30 }
 0x82d   : > { %8864 = vst [vmem:[#allocation2 + $0x50] sm:$0xff] %v8734_v52  }
 0x82e   : > { %v4753_v56 = vpop.f32.mrf.mxu3 }
 0x82f   : > { %v4754_v27 = vadd.f32 %v4753_v56, %v4665_v42 }
 0x831   : > { %v4800_v39 = vmax.f32 %v4754_v27, 0.0 }
 0x833   : > { %v4681_v6 = vpop.f32.mrf.mxu2 }
 0x834   : > { %v4682_v38 = vadd.f32 %v11374_v24, %v4681_v6 }
 0x836   : > { %v4755_v58 = vpop.f32.mrf.mxu3 }
 0x837   : > { %v4756_v25 = vadd.f32 %v4755_v58, %v4667_v47 }
 0x839   : > { %v4801_v7 = vmax.f32 %v4756_v25, 0.0 }
 0x83b   : > { %v8739_v11 = vpack.c.bf16 %v4801_v7, %v4800_v39  ;;  %v4684_v52 = vpop.f32.mrf.mxu2 }
 0x83c   : > { %v4685_v27 = vadd.f32 %v11374_v24, %v4684_v52 }
 0x83d   : > { %8865 = vst [vmem:[#allocation2 + $0x58] sm:$0xff] %v8739_v11  }
 0x83e   : > { %v4758_v17 = vpop.f32.mrf.mxu3 }
 0x83f   : > { %v4759_v43 = vadd.f32 %v4758_v17, %v4670_v14 }
 0x841   : > { %v4802_v18 = vmax.f32 %v4759_v43, 0.0 }
 0x843   : > { %v4686_v58 = vpop.f32.mrf.mxu2 }
 0x844   : > { %v4687_v54 = vadd.f32 %v11374_v24, %v4686_v58 }
 0x846   : > { %v4760_v33 = vpop.f32.mrf.mxu3 }
 0x847   : > { %v4761_v15 = vadd.f32 %v4760_v33, %v4672_v8 }
 0x849   : > { %v4803_v9 = vmax.f32 %v4761_v15, 0.0 }
 0x84b   : > { %v8744_v63 = vpack.c.bf16 %v4803_v9, %v4802_v18 }
 0x84d   : > { %8866 = vst [vmem:[#allocation2 + $0x60] sm:$0xff] %v8744_v63  }
 0x84e   : > { %v4763_v48 = vpop.f32.mrf.mxu3 }
 0x84f   : > { %v4764_v50 = vadd.f32 %v4763_v48, %v4675_v10 }
 0x851   : > { %v4804_v34 = vmax.f32 %v4764_v50, 0.0 }
 0x856   : > { %v4765_v62 = vpop.f32.mrf.mxu3 }
 0x857   : > { %v4766_v57 = vadd.f32 %v4765_v62, %v4677_v31 }
 0x859   : > { %v4805_v2 = vmax.f32 %v4766_v57, 0.0 }
 0x85b   : > { %v8749_v16 = vpack.c.bf16 %v4805_v2, %v4804_v34 }
 0x85d   : > { %8867 = vst [vmem:[#allocation2 + $0x68] sm:$0xff] %v8749_v16  }
 0x85e   : > { %v4768_v55 = vpop.f32.mrf.mxu3 }
 0x85f   : > { %v4769_v46 = vadd.f32 %v4768_v55, %v4680_v23 }
 0x861   : > { %v4806_v22 = vmax.f32 %v4769_v46, 0.0 }
 0x866   : > { %v4770_v26 = vpop.f32.mrf.mxu3 }
 0x867   : > { %v4771_v32 = vadd.f32 %v4770_v26, %v4682_v38 }
 0x869   : > { %v4807_v56 = vmax.f32 %v4771_v32, 0.0 }
 0x86b   : > { %v8754_v42 = vpack.c.bf16 %v4807_v56, %v4806_v22 }
 0x86d   : > { %8868 = vst [vmem:[#allocation2 + $0x70] sm:$0xff] %v8754_v42  }
 0x86e   : > { %v4773_v47 = vpop.f32.mrf.mxu3 }
 0x86f   : > { %v4774_v25 = vadd.f32 %v4773_v47, %v4685_v27 }
 0x871   : > { %v4808_v11 = vmax.f32 %v4774_v25, 0.0 }
 0x876   : > { %v4775_v39 = vpop.f32.mrf.mxu3 }
 0x877   : > { %v4776_v7 = vadd.f32 %v4775_v39, %v4687_v54 }
 0x879   : > { %v4809_v17 = vmax.f32 %v4776_v7, 0.0 }
 0x87b   : > { %v8759_v59 = vpack.c.bf16 %v4809_v17, %v4808_v11 }
 0x87d   : > { %8869 = vst [vmem:[#allocation2 + $0x78] sm:$0xff] %v8759_v59  }
 0x87e PF: > { %p7788_p7 = scmp.ne.s32.totalorder %s8986_s24, 3 }
 0x880   : > { %4879 = sbr.rel (%p7788_p7) target bundleno = 3029 (0xbd5), region = 104 }
 0x885   : > { %v8480_v14 = vld [vmem:[#allocation2 + $0x38] sm:$0xff]  ;;  %v8999_v43 = vmov 0   ;;  %v12406_v33 = vld [vmem:[#allocation234_spill] sm:$0xff]  ;;  %v8479_v24 = vld [vmem:[#allocation2 + $0x30] sm:$0xff] }
 0x886   : > { %v8488_v8 = vld [vmem:[#allocation2 + $0x78] sm:$0xff]  ;;  %8967 = vset.pattern.permute.xlu1 %v8999_v43  ;;  %8966 = vset.pattern.permute.xlu0 %v8999_v43  ;;  %v8487_v15 = vld [vmem:[#allocation2 + $0x70] sm:$0xff]  ;;  %v8478_v18 = vld [vmem:[#allocation2 + $0x28] sm:$0xff] }
 0x887   : > { %5392 = vperm.xlu1 %8967, %v12406_v33   ;;  %5382 = vperm.xlu0 %8966, %v10393_v41   ;;  %v8486_v9 = vld [vmem:[#allocation2 + $0x68] sm:$0xff]  ;;  %v8477_v41 = vld [vmem:[#allocation2 + $0x20] sm:$0xff]  ;;  %v8484_v63 = vld [vmem:[#allocation2 + $0x58] sm:$0xff] }
 0x888   : > { %5202 = vmatpush.bf16.msra.mxu0 %v8480_v14  ;;  %8909 = vmatpush.bf16.msra.mxu2 %v8480_v14  ;;  %v8485_v40 = vld [vmem:[#allocation2 + $0x60] sm:$0xff]  ;;  %v8482_v48 = vld [vmem:[#allocation2 + $0x48] sm:$0xff]  ;;  %v12409_v31 = vld [vmem:[#allocation107_spill] sm:$0xff] }
 0x889   : > { %5291 = vmatpush.bf16.msra.mxu1 %v8488_v8  ;;  %8917 = vmatpush.bf16.msra.mxu3 %v8488_v8  ;;  %v8504_v10 = vld [vmem:[%s11970_s11 + $0x78] sm:$0xff]  ;;  %v12410_v50 = vld [vmem:[#allocation115_spill] sm:$0xff]  ;;  %v12413_v16 = vld [vmem:[#allocation114_spill] sm:$0xff] }
 0x88a   : > { %8968 = vset.pattern.permute.xlu2 %v8999_v43  ;;  %v7856_v62 = vor.u32 %v12410_v50, %v12409_v31  ;;  %v12411_v57 = vld [vmem:[#allocation11_spill] sm:$0xff]  ;;  %v12412_v34 = vld [vmem:[#allocation5_spill] sm:$0xff]  ;;  %v12414_v6 = vld [vmem:[#allocation106_spill] sm:$0xff] }
 0x88b   : > { %5402 = vperm.xlu2 %8968, %v10413_v0   ;;  %v8476_v0 = vld [vmem:[#allocation2 + $0x18] sm:$0xff]  ;;  %v7796_v2 = vor.u32 %v12412_v34, %v12411_v57  ;;  %v7860_v55 = vor.u32 %v12414_v6, %v12413_v16  ;;  %v12417_v26 = vld [vmem:[#allocation123_spill] sm:$0xff]  ;;  %v12421_v42 = vld [vmem:[#allocation130_spill] sm:$0xff] }
 0x88c   : > { %5203 = vmatpush.bf16.msra.mxu0 %v8479_v24  ;;  %8910 = vmatpush.bf16.msra.mxu2 %v8479_v24  ;;  %v8503_v23 = vld [vmem:[%s11970_s11 + $0x70] sm:$0xff]  ;;  %v12418_v32 = vld [vmem:[#allocation131_spill] sm:$0xff]  ;;  %v12428_v7 = vld [vmem:[#allocation29_spill] sm:$0xff] }
 0x88d   : > { %5292 = vmatpush.bf16.msra.mxu1 %v8487_v15  ;;  %8918 = vmatpush.bf16.msra.mxu3 %v8487_v15  ;;  %v12416_v38 = vld [vmem:[#allocation24_spill] sm:$0xff]  ;;  %v7864_v52 = vor.u32 %v12418_v32, %v12417_v26  ;;  %v12419_v22 = vld [vmem:[#allocation23_spill] sm:$0xff]  ;;  %v12429_v17 = vld [vmem:[#allocation146_spill] sm:$0xff] }
 0x88e   : > { %v12425_v58 = vld [vmem:[#allocation139_spill] sm:$0xff]  ;;  %v12430_v59 = vld [vmem:[#allocation138_spill] sm:$0xff]  ;;  %v12431_v14 = vld [vmem:[#allocation236_spill] sm:$0xff] }
 0x88f   : > { %5397 = vperm.xlu1 %8967, %v10408_v13   ;;  %5387 = vperm.xlu0 %8966, %v10398_v5   ;;  %v8475_v5 = vld [vmem:[#allocation2 + $0x10] sm:$0xff]  ;;  %v12435_v33 = vld [vmem:[#allocation238_spill] sm:$0xff]  ;;  %v12436_v24 = vld [vmem:[#allocation240_spill] sm:$0xff] }
 0x890   : > { %5204 = vmatpush.bf16.msra.mxu0 %v8478_v18  ;;  %8911 = vmatpush.bf16.msra.mxu2 %v8478_v18  ;;  %v8483_v13 = vld [vmem:[#allocation2 + $0x50] sm:$0xff]  ;;  %v12437_v15 = vld [vmem:[#allocation42_spill] sm:$0xff]  ;;  %v12438_v18 = vld [vmem:[#allocation48_spill] sm:$0xff] }
 0x891   : > { %5293 = vmatpush.bf16.msra.mxu1 %v8486_v9  ;;  %8919 = vmatpush.bf16.msra.mxu3 %v8486_v9  ;;  %v12426_v54 = vld [vmem:[#allocation147_spill] sm:$0xff]  ;;  %v7816_v9 = vor.u32 %v12438_v18, %v12437_v15  ;;  %v12453_v6 = vld [vmem:[#allocation178_spill] sm:$0xff] }
 0x892   : > { %v7872_v25 = vor.u32 %v12426_v54, %v12425_v58  ;;  %v12427_v39 = vld [vmem:[#allocation35_spill] sm:$0xff] }
 0x893   : > { %5407 = vperm.xlu2 %8968, %v10418_v1   ;;  %v8474_v1 = vld [vmem:[#allocation2 + $0x8] sm:$0xff]  ;;  %v7812_v11 = vor.u32 %v12428_v7, %v12427_v39  ;;  %v12432_v8 = vld [vmem:[#allocation235_spill] sm:$0xff]  ;;  %v12467_v7 = vld [vmem:[#allocation84_spill] sm:$0xff] }
 0x894   : > { %5205 = vmatpush.bf16.msra.mxu0 %v8477_v41  ;;  %8912 = vmatpush.bf16.msra.mxu2 %v8477_v41  ;;  %v12434_v43 = vld [vmem:[#allocation239_spill] sm:$0xff] }
 0x895   : > { %5294 = vmatpush.bf16.msra.mxu1 %v8485_v40  ;;  %8920 = vmatpush.bf16.msra.mxu3 %v8485_v40  ;;  %v12439_v41 = vld [vmem:[#allocation155_spill] sm:$0xff] }
 0x896   : > { %v12440_v40 = vld [vmem:[#allocation163_spill] sm:$0xff] }
 0x897   : > { %5417 = vperm.xlu1 %8967, %v10428_v21   ;;  %5412 = vperm.xlu0 %8966, %v10423_v49   ;;  %v8473_v21 = vld [vmem:[#allocation2] sm:$0xff]  ;;  %v12449_v50 = vld [vmem:[#allocation171_spill] sm:$0xff] }
 0x898   : > { %5206 = vmatpush.bf16.msra.mxu0 %v8476_v0  ;;  %8913 = vmatpush.bf16.msra.mxu2 %v8476_v0  ;;  %v8481_v49 = vld [vmem:[#allocation2 + $0x40] sm:$0xff]  ;;  %v7880_v0 = vor.u32 %v12440_v40, %v12439_v41  ;;  %v12451_v34 = vld [vmem:[#allocation59_spill] sm:$0xff] }
 0x899   : > { %5295 = vmatpush.bf16.msra.mxu1 %v8484_v63  ;;  %8921 = vmatpush.bf16.msra.mxu3 %v8484_v63  ;;  %v12441_v63 = vld [vmem:[#allocation47_spill] sm:$0xff] }
 0x89a   : > { %v12457_v26 = vld [vmem:[#allocation187_spill] sm:$0xff] }
 0x89b   : > { %5422 = vperm.xlu2 %8968, %v10433_v29   ;;  %v8496_v29 = vld [vmem:[%s11970_s11 + $0x38] sm:$0xff]  ;;  %v12458_v32 = vld [vmem:[#allocation195_spill] sm:$0xff] }
 0x89c   : > { %5207 = vmatpush.bf16.msra.mxu0 %v8475_v5  ;;  %8914 = vmatpush.bf16.msra.mxu2 %v8475_v5  ;;  %v12442_v5 = vld [vmem:[#allocation41_spill] sm:$0xff]  ;;  %v12465_v54 = vld [vmem:[#allocation203_spill] sm:$0xff] }
 0x89d   : > { %5296 = vmatpush.bf16.msra.mxu1 %v8483_v13  ;;  %8922 = vmatpush.bf16.msra.mxu3 %v8483_v13  ;;  %v7820_v13 = vor.u32 %v12442_v5, %v12441_v63  ;;  %v12471_v15 = vld [vmem:[#allocation91_spill] sm:$0xff]  ;;  %v12475_v63 = vld [vmem:[#allocation98_spill] sm:$0xff] }
 0x89e   : > { %v12472_v18 = vld [vmem:[#allocation99_spill] sm:$0xff]  ;;  %v12476_v5 = vld [vmem:[#allocation90_spill] sm:$0xff] }
 0x89f   : > { %5432 = vperm.xlu1 %8967, %v10443_v35   ;;  %5427 = vperm.xlu0 %8966, %v10438_v51   ;;  %v12407_v35 = vld [vmem:[#allocation6_spill] sm:$0xff]  ;;  %v12408_v51 = vld [vmem:[#allocation12_spill] sm:$0xff]  ;;  %v12473_v41 = vld [vmem:[#allocation219_spill] sm:$0xff] }
 0x8a0   : > { %5208 = vmatpush.bf16.msra.mxu0 %v8474_v1  ;;  %8915 = vmatpush.bf16.msra.mxu2 %v8474_v1  ;;  %v7792_v30 = vor.u32 %v12408_v51, %v12407_v35  ;;  %v12443_v1 = vld [vmem:[#allocation162_spill] sm:$0xff]  ;;  %v8491_v35 = vld [vmem:[%s11970_s11 + $0x10] sm:$0xff]  ;;  %v12474_v40 = vld [vmem:[#allocation227_spill] sm:$0xff] }
 0x8a1   : > { %5297 = vmatpush.bf16.msra.mxu1 %v8482_v48  ;;  %8923 = vmatpush.bf16.msra.mxu3 %v8482_v48  ;;  %v12444_v48 = vld [vmem:[#allocation154_spill] sm:$0xff] }
 0x8a2   : > { %v12447_v51 = vld [vmem:[#allocation54_spill] sm:$0xff] }
 0x8a3   : > { %5437 = vperm.xlu2 %8968, %v10448_v37   ;;  %v8495_v37 = vld [vmem:[%s11970_s11 + $0x30] sm:$0xff] }
 0x8a4   : > { %5209 = vmatpush.bf16.msra.mxu0 %v8473_v21  ;;  %8916 = vmatpush.bf16.msra.mxu2 %v8473_v21  ;;  %v7884_v21 = vor.u32 %v12444_v48, %v12443_v1  ;;  %v12477_v1 = vld [vmem:[#allocation226_spill] sm:$0xff] }
 0x8a5   : > { %5298 = vmatpush.bf16.msra.mxu1 %v8481_v49  ;;  %8924 = vmatpush.bf16.msra.mxu3 %v8481_v49  ;;  %v12445_v49 = vld [vmem:[#allocation242_spill] sm:$0xff] }
 0x8a6   : > { %v12478_v48 = vld [vmem:[#allocation218_spill] sm:$0xff] }
 0x8a7   : > { %5447 = vperm.xlu1 %8967, %v10458_v19   ;;  %5442 = vperm.xlu0 %8966, %v10453_v45   ;;  %v8494_v19 = vld [vmem:[%s11970_s11 + $0x28] sm:$0xff]  ;;  %v12415_v45 = vld [vmem:[#allocation18_spill] sm:$0xff] }
 0x8a8   : > { %5928 = vmatpush.bf16.msrb.mxu2 %v8496_v29  ;;  %5210 = vmatmul.bf16.vlgmr.msra.gmra.mxu0 %v7792_v30  ;;  %v7800_v46 = vor.u32 %v12416_v38, %v12415_v45  ;;  %v12446_v29 = vld [vmem:[#allocation241_spill] sm:$0xff]  ;;  %v12448_v30 = vld [vmem:[#allocation60_spill] sm:$0xff]  ;;  %v12455_v45 = vld [vmem:[#allocation66_spill] sm:$0xff] }
 0x8a9   : > { %6017 = vmatpush.bf16.msrb.mxu3 %v8504_v10  ;;  %5250 = vmatmul.bf16.vlgmr.msra.gmra.mxu2 %v7856_v62  ;;  %v8500_v10 = vld [vmem:[%s11970_s11 + $0x58] sm:$0xff]  ;;  %v7824_v31 = vor.u32 %v12448_v30, %v12447_v51  ;;  %v12450_v62 = vld [vmem:[#allocation179_spill] sm:$0xff]  ;;  %v12456_v38 = vld [vmem:[#allocation72_spill] sm:$0xff] }
 0x8aa   : > { %5299 = vmatmul.bf16.vlgmr.msra.gmra.mxu1 %v7796_v2  ;;  %5339 = vmatmul.bf16.vlgmr.msra.gmra.mxu3 %v7860_v55  ;;  %v7888_v57 = vor.u32 %v12450_v62, %v12449_v50  ;;  %v12452_v2 = vld [vmem:[#allocation53_spill] sm:$0xff]  ;;  %v12454_v55 = vld [vmem:[#allocation170_spill] sm:$0xff] }
 0x8ab   : > { %5452 = vperm.xlu2 %8968, %v10463_v12   ;;  %v12420_v12 = vld [vmem:[#allocation17_spill] sm:$0xff]  ;;  %v7828_v16 = vor.u32 %v12452_v2, %v12451_v34 }
 0x8ac   : > { %5929 = vmatpush.bf16.msrb.mxu2 %v8495_v37  ;;  %v7804_v56 = vor.u32 %v12420_v12, %v12419_v22  ;;  %v7892_v37 = vor.u32 %v12454_v55, %v12453_v6  ;;  %v12459_v22 = vld [vmem:[#allocation71_spill] sm:$0xff]  ;;  %v12460_v12 = vld [vmem:[#allocation65_spill] sm:$0xff] }
 0x8ad   : > { %6018 = vmatpush.bf16.msrb.mxu3 %v8503_v23  ;;  %v8499_v23 = vld [vmem:[%s11970_s11 + $0x50] sm:$0xff]  ;;  %v8457_v30 = vld [vmem:[#allocation2] sm:$0xff] }
 0x8af   : > { %5462 = vperm.xlu1 %8967, %v10473_v61   ;;  %5457 = vperm.xlu0 %8966, %v10468_v53   ;;  %v12422_v61 = vld [vmem:[#allocation122_spill] sm:$0xff] }
 0x8b0   : > { %5930 = vmatpush.bf16.msrb.mxu2 %v8494_v19  ;;  %v7868_v47 = vor.u32 %v12422_v61, %v12421_v42  ;;  %v8493_v53 = vld [vmem:[%s11970_s11 + $0x20] sm:$0xff]  ;;  %v8490_v19 = vld [vmem:[%s11970_s11 + $0x8] sm:$0xff] }
 0x8b1   : > { %v12461_v42 = vld [vmem:[#allocation194_spill] sm:$0xff] }
 0x8b2   : > { %v12462_v61 = vld [vmem:[#allocation186_spill] sm:$0xff] }
 0x8b3   : > { %5467 = vperm.xlu2 %8968, %v10478_v4   ;;  %v8502_v4 = vld [vmem:[%s11970_s11 + $0x68] sm:$0xff] }
 0x8b4   : > { %6019 = vmatpush.bf16.msrb.mxu3 %v8502_v4  ;;  %5931 = vmatpush.bf16.msrb.mxu2 %v8493_v53  ;;  %v8498_v4 = vld [vmem:[%s11970_s11 + $0x48] sm:$0xff] }
 0x8b7   : > { %5477 = vperm.xlu1 %8967, %v10488_v44   ;;  %5472 = vperm.xlu0 %8966, %v10483_v28   ;;  %v12423_v28 = vld [vmem:[#allocation30_spill] sm:$0xff]  ;;  %v12424_v44 = vld [vmem:[#allocation36_spill] sm:$0xff] }
 0x8b8   : > { %5215 = vmatmul.bf16.gmra.mxu0 %v7800_v46  ;;  %v7808_v27 = vor.u32 %v12424_v44, %v12423_v28  ;;  %v7832_v46 = vor.u32 %v12456_v38, %v12455_v45  ;;  %v12463_v44 = vld [vmem:[#allocation78_spill] sm:$0xff] }
 0x8b9   : > { %5255 = vmatmul.bf16.gmra.mxu2 %v7864_v52  ;;  %v7896_v52 = vor.u32 %v12458_v32, %v12457_v26 }
 0x8ba   : > { %5304 = vmatmul.bf16.gmra.mxu1 %v7804_v56  ;;  %5344 = vmatmul.bf16.gmra.mxu3 %v7868_v47  ;;  %v7836_v56 = vor.u32 %v12460_v12, %v12459_v22  ;;  %v7900_v47 = vor.u32 %v12462_v61, %v12461_v42  ;;  %v8512_v12 = vld [vmem:[%s11972_s13 + $0x38] sm:$0xff]  ;;  %v8458_v42 = vld [vmem:[#allocation2 + $0x8] sm:$0xff] }
 0x8bb   : > { %5482 = vperm.xlu2 %8968, %v10493_v36   ;;  %v7876_v36 = vor.u32 %v12430_v59, %v12429_v17  ;;  %v12469_v59 = vld [vmem:[#allocation210_spill] sm:$0xff]  ;;  %6286 = vmatpush.bf16.msrb.mxu0 %v8512_v12 }
 0x8bf   : > { %5492 = vperm.xlu1 %8967, %v10503_v3   ;;  %5487 = vperm.xlu0 %8966, %v10498_v20   ;;  %v8501_v3 = vld [vmem:[%s11970_s11 + $0x60] sm:$0xff]  ;;  %v8492_v20 = vld [vmem:[%s11970_s11 + $0x18] sm:$0xff] }
 0x8c0   : > { %6020 = vmatpush.bf16.msrb.mxu3 %v8501_v3  ;;  %5932 = vmatpush.bf16.msrb.mxu2 %v8492_v20  ;;  %v8489_v20 = vld [vmem:[%s11970_s11] sm:$0xff] }
 0x8c3   : > { %5497 = vperm.xlu2 %8968, %v10508_v60   ;;  %v12433_v60 = vld [vmem:[#allocation237_spill] sm:$0xff] }
 0x8c4   : > { %6021 = vmatpush.bf16.msrb.mxu3 %v8500_v10  ;;  %5933 = vmatpush.bf16.msrb.mxu2 %v8491_v35 }
 0x8c7   : > { %5507 = vperm.xlu1 %8967, %v12431_v14   ;;  %5502 = vperm.xlu0 %8966, %v12432_v8  }
 0x8c8   : > { %5220 = vmatmul.bf16.gmra.mxu0 %v7808_v27  ;;  %6022 = vmatpush.bf16.msrb.mxu3 %v8499_v23  ;;  %v12464_v27 = vld [vmem:[#allocation85_spill] sm:$0xff] }
 0x8c9   : > { %5260 = vmatmul.bf16.gmra.mxu2 %v7872_v25  ;;  %v7840_v58 = vor.u32 %v12464_v27, %v12463_v44  ;;  %v12466_v25 = vld [vmem:[#allocation211_spill] sm:$0xff] }
 0x8ca   : > { %5309 = vmatmul.bf16.gmra.mxu1 %v7812_v11  ;;  %5349 = vmatmul.bf16.gmra.mxu3 %v7876_v36  ;;  %v7904_v39 = vor.u32 %v12466_v25, %v12465_v54  ;;  %v12468_v11 = vld [vmem:[#allocation77_spill] sm:$0xff]  ;;  %v12470_v36 = vld [vmem:[#allocation202_spill] sm:$0xff] }
 0x8cb   : > { %5512 = vperm.xlu2 %8968, %v12433_v60   ;;  %5934 = vmatpush.bf16.msrb.mxu2 %v8490_v19  ;;  %v7844_v17 = vor.u32 %v12468_v11, %v12467_v7  ;;  %v7908_v14 = vor.u32 %v12470_v36, %v12469_v59  ;;  %v8497_v60 = vld [vmem:[%s11970_s11 + $0x40] sm:$0xff] }
 0x8cc   : > { %6023 = vmatpush.bf16.msrb.mxu3 %v8498_v4 }
 0x8cf   : > { %5522 = vperm.xlu1 %8967, %v12434_v43   ;;  %5517 = vperm.xlu0 %8966, %v12435_v33  }
 0x8d0   : > { %5935 = vmatpush.bf16.msrb.mxu2 %v8489_v20  ;;  %6024 = vmatpush.bf16.msrb.mxu3 %v8497_v60 }
 0x8d3   : > { %5527 = vperm.xlu2 %8968, %v12436_v24  }
 0x8d7   : > { %5537 = vperm.xlu1 %8967, %v12445_v49   ;;  %5532 = vperm.xlu0 %8966, %v12446_v29  }
 0x8d8   : > { %5225 = vmatmul.bf16.gmra.mxu0 %v7816_v9  ;;  %v7848_v9 = vor.u32 %v12472_v18, %v12471_v15 }
 0x8d9   : > { %5265 = vmatmul.bf16.gmra.mxu2 %v7880_v0  ;;  %v7912_v0 = vor.u32 %v12474_v40, %v12473_v41 }
 0x8da   : > { %5314 = vmatmul.bf16.gmra.mxu1 %v7820_v13  ;;  %5354 = vmatmul.bf16.gmra.mxu3 %v7884_v21  ;;  %v7852_v13 = vor.u32 %v12476_v5, %v12475_v63  ;;  %v7916_v21 = vor.u32 %v12478_v48, %v12477_v1  ;;  %v8511_v1 = vld [vmem:[%s11972_s13 + $0x30] sm:$0xff] }
 0x8db   : > { %6287 = vmatpush.bf16.msrb.mxu0 %v8511_v1 }
 0x8e5   : > { %v11561_v28 = vpop.permute.xlu2 %5402 }
 0x8e8   : > { %5230 = vmatmul.bf16.gmra.mxu0 %v7824_v31 }
 0x8e9   : > { %5270 = vmatmul.bf16.gmra.mxu2 %v7888_v57 }
 0x8ea   : > { %5319 = vmatmul.bf16.gmra.mxu1 %v7828_v16  ;;  %5359 = vmatmul.bf16.gmra.mxu3 %v7892_v37 }
 0x8ed   : > { %v11579_v43 = vpop.permute.xlu2 %5407 }
 0x8f5   : > { %v11591_v49 = vpop.permute.xlu2 %5422 }
 0x8f8   : > { %5235 = vmatmul.bf16.gmra.mxu0 %v7832_v46 }
 0x8f9   : > { %5275 = vmatmul.bf16.gmra.mxu2 %v7896_v52  ;;  %v11559_v53 = vpop.permute.xlu1 %5392  ;;  %v5383_v8 = vpop.permute.xlu0 %5382 }
 0x8fa   : > { %5324 = vmatmul.bf16.gmra.mxu1 %v7836_v56  ;;  %5364 = vmatmul.bf16.gmra.mxu3 %v7900_v47 }
 0x8fd   : > { %v11597_v35 = vpop.permute.xlu2 %5437 }
 0x901   : > { %v11571_v3 = vpop.permute.xlu1 %5397  ;;  %v5388_v33 = vpop.permute.xlu0 %5387 }
 0x905   : > { %v11603_v2 = vpop.permute.xlu2 %5452 }
 0x908   : > { %5240 = vmatmul.bf16.gmra.mxu0 %v7840_v58 }
 0x909   : > { %5280 = vmatmul.bf16.gmra.mxu2 %v7904_v39  ;;  %v11581_v24 = vpop.permute.xlu1 %5417  ;;  %v11593_v29 = vpop.permute.xlu0 %5412 }
 0x90a   : > { %5329 = vmatmul.bf16.gmra.mxu1 %v7844_v17  ;;  %5369 = vmatmul.bf16.gmra.mxu3 %v7908_v14 }
 0x90d   : > { %v5468_v58 = vpop.permute.xlu2 %5467 }
 0x911   : > { %v11595_v10 = vpop.permute.xlu1 %5432  ;;  %v11599_v51 = vpop.permute.xlu0 %5427 }
 0x918   : > { %5245 = vmatmul.bf16.gmra.mxu0 %v7848_v9 }
 0x919   : > { %5285 = vmatmul.bf16.gmra.mxu2 %v7912_v0  ;;  %v11601_v50 = vpop.permute.xlu1 %5447  ;;  %v11605_v23 = vpop.permute.xlu0 %5442 }
 0x91a   : > { %5334 = vmatmul.bf16.gmra.mxu1 %v7852_v13  ;;  %5374 = vmatmul.bf16.gmra.mxu3 %v7916_v21 }
 0x921   : > { %v5463_v38 = vpop.permute.xlu1 %5462  ;;  %v11610_v7 = vpop.permute.xlu0 %5457 }
 0x925   : > { %v5211_v31 = vpop.f32.mrf.mxu0 }
 0x927   : > { %v5300_v62 = vpop.f32.mrf.mxu1 }
 0x928   : > { %v5301_v57 = vadd.f32 %v5300_v62, %v5211_v31 }
 0x929   : > { %5936 = vmatmul.bf16.vlgmr.msrb.gmra.mxu2 %v8457_v30  ;;  %v5473_v0 = vpop.permute.xlu0 %5472 }
 0x92a   : > { %v5540_v6 = vmul.f32 %v5383_v8, %v5301_v57  ;;  %v5478_v57 = vpop.permute.xlu1 %5477 }
 0x92c   : > { %v5251_v34 = vpop.f32.mrf.mxu2  ;;  %v5572_v46 = vpack.c.bf16 %v5540_v6, %v5540_v6 }
 0x92d   : > { %v5340_v16 = vpop.f32.mrf.mxu3  ;;  %v5213_v37 = vpop.f32.mrf.mxu0 }
 0x92e   : > { %v5341_v55 = vadd.f32 %v5340_v16, %v5251_v34  ;;  %v5732_v61 = vunpack.c.l.b16 %v5572_v46 }
 0x92f   : > { %v5302_v19 = vpop.f32.mrf.mxu1 }
 0x930   : > { %v5303_v45 = vadd.f32 %v5302_v19, %v5213_v37  ;;  %v5556_v26 = vmul.f32 %v5463_v38, %v5341_v55 }
 0x932   : > { %v5541_v32 = vmul.f32 %v5388_v33, %v5303_v45  ;;  %v5588_v47 = vpack.c.bf16 %v5556_v26, %v5556_v26 }
 0x934   : > { %v5573_v52 = vpack.c.bf16 %v5541_v32, %v5541_v32  ;;  %v5253_v22 = vpop.f32.mrf.mxu2  ;;  %v11612_v11 = vunpack.c.l.b16 %v5588_v47  ;;  %v5483_v47 = vpop.permute.xlu2 %5482 }
 0x935   : > { %v5342_v56 = vpop.f32.mrf.mxu3  ;;  %v5216_v27 = vpop.f32.mrf.mxu0 }
 0x936   : > { %v5733_v4 = vunpack.c.l.b16 %v5573_v52  ;;  %v5343_v44 = vadd.f32 %v5342_v56, %v5253_v22 }
 0x937   : > { %v5305_v54 = vpop.f32.mrf.mxu1 }
 0x938   : > { %v5557_v25 = vmul.f32 %v5468_v58, %v5343_v44  ;;  %v5764_v39 = vpack.c.b16 %v5733_v4, %v5732_v61  ;;  %v5306_v59 = vadd.f32 %v5305_v54, %v5216_v27  ;;  %v8510_v58 = vld [vmem:[%s11972_s13 + $0x28] sm:$0xff] }
 0x939   : > { %5941 = vmatmul.bf16.gmra.mxu2 %v8458_v42  ;;  %6288 = vmatpush.bf16.msrb.mxu0 %v8510_v58 }
 0x93a   : > { %v5589_v17 = vpack.c.bf16 %v5557_v25, %v5557_v25  ;;  %6025 = vmatmul.bf16.vlgmr.msrb.gmra.mxu3 %v5764_v39  ;;  %v5542_v20 = vmul.f32 %v11559_v53, %v5306_v59  ;;  %v8459_v53 = vld [vmem:[#allocation2 + $0x10] sm:$0xff] }
 0x93c   : > { %v11614_v36 = vunpack.c.l.b16 %v5589_v17  ;;  %v5256_v14 = vpop.f32.mrf.mxu2  ;;  %v5574_v41 = vpack.c.bf16 %v5542_v20, %v5542_v20 }
 0x93d   : > { %v5345_v8 = vpop.f32.mrf.mxu3  ;;  %v5218_v33 = vpop.f32.mrf.mxu0 }
 0x93e   : > { %v5346_v60 = vadd.f32 %v5345_v8, %v5256_v14  ;;  %v5772_v15 = vpack.c.b16 %v11614_v36, %v11612_v11  ;;  %v5734_v31 = vunpack.c.l.b16 %v5574_v41  ;;  %v5488_v14 = vpop.permute.xlu0 %5487 }
 0x93f   : > { %v5307_v18 = vpop.f32.mrf.mxu1 }
 0x940   : > { %v5308_v9 = vadd.f32 %v5307_v18, %v5218_v33  ;;  %v5558_v63 = vmul.f32 %v5473_v0, %v5346_v60 }
 0x942   : > { %v5543_v40 = vmul.f32 %v11571_v3, %v5308_v9  ;;  %v5590_v16 = vpack.c.bf16 %v5558_v63, %v5558_v63 }
 0x944   : > { %v5258_v5 = vpop.f32.mrf.mxu2  ;;  %v5575_v13 = vpack.c.bf16 %v5543_v40, %v5543_v40  ;;  %v11623_v19 = vunpack.c.l.b16 %v5590_v16  ;;  %v8509_v16 = vld [vmem:[%s11972_s13 + $0x20] sm:$0xff] }
 0x945   : > { %v5347_v48 = vpop.f32.mrf.mxu3  ;;  %v5221_v30 = vpop.f32.mrf.mxu0  ;;  %6289 = vmatpush.bf16.msrb.mxu0 %v8509_v16 }
 0x946   : > { %v5348_v21 = vadd.f32 %v5347_v48, %v5258_v5  ;;  %v5735_v62 = vunpack.c.l.b16 %v5575_v13 }
 0x947   : > { %v5310_v34 = vpop.f32.mrf.mxu1 }
 0x948   : > { %v5559_v6 = vmul.f32 %v5478_v57, %v5348_v21  ;;  %v5765_v3 = vpack.c.b16 %v5735_v62, %v5734_v31  ;;  %v5311_v37 = vadd.f32 %v5310_v34, %v5221_v30  ;;  %v5493_v31 = vpop.permute.xlu1 %5492 }
 0x949   : > { %5946 = vmatmul.bf16.gmra.mxu2 %v8459_v53 }
 0x94a   : > { %v5591_v55 = vpack.c.bf16 %v5559_v6, %v5559_v6  ;;  %6030 = vmatmul.bf16.gmra.mxu3 %v5765_v3  ;;  %v5544_v26 = vmul.f32 %v11561_v28, %v5311_v37  ;;  %v8460_v28 = vld [vmem:[#allocation2 + $0x18] sm:$0xff] }
 0x94c   : > { %v11625_v45 = vunpack.c.l.b16 %v5591_v55  ;;  %v5261_v38 = vpop.f32.mrf.mxu2  ;;  %v5576_v42 = vpack.c.bf16 %v5544_v26, %v5544_v26 }
 0x94d   : > { %v5350_v46 = vpop.f32.mrf.mxu3  ;;  %v5223_v52 = vpop.f32.mrf.mxu0 }
 0x94e   : > { %v5351_v32 = vadd.f32 %v5350_v46, %v5261_v38  ;;  %v5773_v22 = vpack.c.b16 %v11625_v45, %v11623_v19  ;;  %v5736_v17 = vunpack.c.l.b16 %v5576_v42  ;;  %v5498_v46 = vpop.permute.xlu2 %5497 }
 0x94f   : > { %v5312_v12 = vpop.f32.mrf.mxu1 }
 0x950   : > { %v5313_v56 = vadd.f32 %v5312_v12, %v5223_v52  ;;  %v5560_v4 = vmul.f32 %v5483_v47, %v5351_v32 }
 0x952   : > { %v5545_v61 = vmul.f32 %v11579_v43, %v5313_v56  ;;  %v5592_v20 = vpack.c.bf16 %v5560_v4, %v5560_v4 }
 0x954   : > { %v5263_v44 = vpop.f32.mrf.mxu2  ;;  %v5577_v27 = vpack.c.bf16 %v5545_v61, %v5545_v61  ;;  %v11634_v9 = vunpack.c.l.b16 %v5592_v20 }
 0x955   : > { %v5352_v54 = vpop.f32.mrf.mxu3  ;;  %v5226_v39 = vpop.f32.mrf.mxu0 }
 0x956   : > { %v5353_v25 = vadd.f32 %v5352_v54, %v5263_v44  ;;  %v5737_v59 = vunpack.c.l.b16 %v5577_v27 }
 0x957   : > { %v5315_v8 = vpop.f32.mrf.mxu1 }
 0x958   : > { %v5561_v60 = vmul.f32 %v5488_v14, %v5353_v25  ;;  %v5766_v43 = vpack.c.b16 %v5737_v59, %v5736_v17  ;;  %v5316_v18 = vadd.f32 %v5315_v8, %v5226_v39  ;;  %v5503_v59 = vpop.permute.xlu0 %5502 }
 0x959   : > { %5951 = vmatmul.bf16.gmra.mxu2 %v8460_v28 }
 0x95a   : > { %v5593_v33 = vpack.c.bf16 %v5561_v60, %v5561_v60  ;;  %6035 = vmatmul.bf16.gmra.mxu3 %v5766_v43  ;;  %v5546_v63 = vmul.f32 %v11593_v29, %v5316_v18  ;;  %v8461_v29 = vld [vmem:[#allocation2 + $0x20] sm:$0xff] }
 0x95b   : > { %v8508_v60 = vld [vmem:[%s11972_s13 + $0x18] sm:$0xff] }
 0x95c   : > { %v11636_v41 = vunpack.c.l.b16 %v5593_v33  ;;  %v5266_v40 = vpop.f32.mrf.mxu2  ;;  %v5578_v21 = vpack.c.bf16 %v5546_v63, %v5546_v63  ;;  %6290 = vmatpush.bf16.msrb.mxu0 %v8508_v60  ;;  %v5508_v63 = vpop.permute.xlu1 %5507 }
 0x95d   : > { %v5355_v0 = vpop.f32.mrf.mxu3  ;;  %v5228_v13 = vpop.f32.mrf.mxu0 }
 0x95e   : > { %v5356_v5 = vadd.f32 %v5355_v0, %v5266_v40  ;;  %v5774_v1 = vpack.c.b16 %v11636_v41, %v11634_v9  ;;  %v5738_v37 = vunpack.c.l.b16 %v5578_v21  ;;  %v8469_v9 = vld [vmem:[#allocation2 + $0x60] sm:$0xff] }
 0x95f   : > { %v5317_v48 = vpop.f32.mrf.mxu1 }
 0x960   : > { %v5318_v53 = vadd.f32 %v5317_v48, %v5228_v13  ;;  %v5562_v62 = vmul.f32 %v5493_v31, %v5356_v5 }
 0x962   : > { %v5547_v30 = vmul.f32 %v11581_v24, %v5318_v53  ;;  %v5594_v32 = vpack.c.bf16 %v5562_v62, %v5562_v62 }
 0x964   : > { %v5268_v57 = vpop.f32.mrf.mxu2  ;;  %v5579_v34 = vpack.c.bf16 %v5547_v30, %v5547_v30  ;;  %v11645_v42 = vunpack.c.l.b16 %v5594_v32 }
 0x965   : > { %v5357_v6 = vpop.f32.mrf.mxu3  ;;  %v5231_v55 = vpop.f32.mrf.mxu0 }
 0x966   : > { %v5358_v3 = vadd.f32 %v5357_v6, %v5268_v57  ;;  %v5739_v38 = vunpack.c.l.b16 %v5579_v34 }
 0x967   : > { %v5320_v26 = vpop.f32.mrf.mxu1 }
 0x968   : > { %v5563_v52 = vmul.f32 %v5498_v46, %v5358_v3  ;;  %v5767_v24 = vpack.c.b16 %v5739_v38, %v5738_v37  ;;  %v5321_v56 = vadd.f32 %v5320_v26, %v5231_v55  ;;  %v5513_v46 = vpop.permute.xlu2 %5512 }
 0x969   : > { %5956 = vmatmul.bf16.gmra.mxu2 %v8461_v29 }
 0x96a   : > { %v5595_v12 = vpack.c.bf16 %v5563_v52, %v5563_v52  ;;  %6040 = vmatmul.bf16.gmra.mxu3 %v5767_v24  ;;  %v5548_v44 = vmul.f32 %v11591_v49, %v5321_v56  ;;  %v8462_v49 = vld [vmem:[#allocation2 + $0x28] sm:$0xff]  ;;  %v8507_v24 = vld [vmem:[%s11972_s13 + $0x10] sm:$0xff] }
 0x96b   : > { %6291 = vmatpush.bf16.msrb.mxu0 %v8507_v24 }
 0x96c   : > { %v11647_v61 = vunpack.c.l.b16 %v5595_v12  ;;  %v5271_v47 = vpop.f32.mrf.mxu2  ;;  %v5580_v39 = vpack.c.bf16 %v5548_v44, %v5548_v44 }
 0x96d   : > { %v5360_v4 = vpop.f32.mrf.mxu3  ;;  %v5233_v58 = vpop.f32.mrf.mxu0 }
 0x96e   : > { %v5361_v27 = vadd.f32 %v5360_v4, %v5271_v47  ;;  %v5775_v54 = vpack.c.b16 %v11647_v61, %v11645_v42  ;;  %v5740_v33 = vunpack.c.l.b16 %v5580_v39  ;;  %v8470_v42 = vld [vmem:[#allocation2 + $0x68] sm:$0xff] }
 0x96f   : > { %v5322_v28 = vpop.f32.mrf.mxu1 }
 0x970   : > { %v5323_v25 = vadd.f32 %v5322_v28, %v5233_v58  ;;  %v5564_v14 = vmul.f32 %v5503_v59, %v5361_v27  ;;  %v5518_v27 = vpop.permute.xlu0 %5517 }
 0x972   : > { %v5549_v17 = vmul.f32 %v11599_v51, %v5323_v25  ;;  %v5596_v13 = vpack.c.bf16 %v5564_v14, %v5564_v14 }
 0x974   : > { %v5581_v8 = vpack.c.bf16 %v5549_v17, %v5549_v17  ;;  %v5273_v20 = vpop.f32.mrf.mxu2  ;;  %v11656_v30 = vunpack.c.l.b16 %v5596_v13  ;;  %v5523_v13 = vpop.permute.xlu1 %5522 }
 0x975   : > { %v5362_v43 = vpop.f32.mrf.mxu3  ;;  %v5236_v0 = vpop.f32.mrf.mxu0 }
 0x976   : > { %v5741_v18 = vunpack.c.l.b16 %v5581_v8  ;;  %v5363_v40 = vadd.f32 %v5362_v43, %v5273_v20  ;;  %v8506_v20 = vld [vmem:[%s11972_s13 + $0x8] sm:$0xff] }
 0x977   : > { %v5325_v5 = vpop.f32.mrf.mxu1  ;;  %6292 = vmatpush.bf16.msrb.mxu0 %v8506_v20 }
 0x978   : > { %v5565_v48 = vmul.f32 %v5508_v63, %v5363_v40  ;;  %v5768_v51 = vpack.c.b16 %v5741_v18, %v5740_v33  ;;  %v5326_v21 = vadd.f32 %v5325_v5, %v5236_v0 }
 0x979   : > { %5961 = vmatmul.bf16.gmra.mxu2 %v8462_v49 }
 0x97a   : > { %v5597_v53 = vpack.c.bf16 %v5565_v48, %v5565_v48  ;;  %6045 = vmatmul.bf16.gmra.mxu3 %v5768_v51  ;;  %v5550_v34 = vmul.f32 %v11595_v10, %v5326_v21  ;;  %v8463_v10 = vld [vmem:[#allocation2 + $0x30] sm:$0xff] }
 0x97c   : > { %v11658_v31 = vunpack.c.l.b16 %v5597_v53  ;;  %v5276_v62 = vpop.f32.mrf.mxu2  ;;  %v5582_v37 = vpack.c.bf16 %v5550_v34, %v5550_v34 }
 0x97d   : > { %v5365_v57 = vpop.f32.mrf.mxu3  ;;  %v5238_v6 = vpop.f32.mrf.mxu0 }
 0x97e   : > { %v5366_v16 = vadd.f32 %v5365_v57, %v5276_v62  ;;  %v5776_v29 = vpack.c.b16 %v11658_v31, %v11656_v30  ;;  %v5742_v56 = vunpack.c.l.b16 %v5582_v37  ;;  %v8464_v62 = vld [vmem:[#allocation2 + $0x38] sm:$0xff]  ;;  %v8471_v30 = vld [vmem:[#allocation2 + $0x70] sm:$0xff] }
 0x97f   : > { %v5327_v3 = vpop.f32.mrf.mxu1 }
 0x980   : > { %v5328_v55 = vadd.f32 %v5327_v3, %v5238_v6  ;;  %v5566_v26 = vmul.f32 %v5513_v46, %v5366_v16  ;;  %v5528_v6 = vpop.permute.xlu2 %5527 }
 0x982   : > { %v5551_v38 = vmul.f32 %v11597_v35, %v5328_v55  ;;  %v5598_v28 = vpack.c.bf16 %v5566_v26, %v5566_v26 }
 0x984   : > { %v5583_v32 = vpack.c.bf16 %v5551_v38, %v5551_v38  ;;  %v5278_v52 = vpop.f32.mrf.mxu2  ;;  %v11667_v59 = vunpack.c.l.b16 %v5598_v28  ;;  %v8505_v28 = vld [vmem:[%s11972_s13] sm:$0xff] }
 0x985   : > { %v5367_v12 = vpop.f32.mrf.mxu3  ;;  %v5241_v44 = vpop.f32.mrf.mxu0  ;;  %6293 = vmatpush.bf16.msrb.mxu0 %v8505_v28 }
 0x986   : > { %v5743_v47 = vunpack.c.l.b16 %v5583_v32  ;;  %v5368_v4 = vadd.f32 %v5367_v12, %v5278_v52 }
 0x987   : > { %v5330_v58 = vpop.f32.mrf.mxu1 }
 0x988   : > { %v5567_v25 = vmul.f32 %v5518_v27, %v5368_v4  ;;  %v5769_v35 = vpack.c.b16 %v5743_v47, %v5742_v56  ;;  %v5331_v17 = vadd.f32 %v5330_v58, %v5241_v44 }
 0x989   : > { %5966 = vmatmul.bf16.gmra.mxu2 %v8463_v10 }
 0x98a   : > { %v5599_v39 = vpack.c.bf16 %v5567_v25, %v5567_v25  ;;  %6050 = vmatmul.bf16.gmra.mxu3 %v5769_v35  ;;  %v5552_v43 = vmul.f32 %v11605_v23, %v5331_v17  ;;  %v5533_v25 = vpop.permute.xlu0 %5532 }
 0x98c   : > { %v11669_v14 = vunpack.c.l.b16 %v5599_v39  ;;  %v5281_v8 = vpop.f32.mrf.mxu2  ;;  %v5584_v63 = vpack.c.bf16 %v5552_v43, %v5552_v43 }
 0x98d   : > { %v5370_v60 = vpop.f32.mrf.mxu3  ;;  %v5243_v33 = vpop.f32.mrf.mxu0 }
 0x98e   : > { %v5371_v49 = vadd.f32 %v5370_v60, %v5281_v8  ;;  %v5777_v18 = vpack.c.b16 %v11669_v14, %v11667_v59  ;;  %v5744_v57 = vunpack.c.l.b16 %v5584_v63  ;;  %v8465_v8 = vld [vmem:[#allocation2 + $0x40] sm:$0xff] }
 0x98f   : > { %v5332_v40 = vpop.f32.mrf.mxu1 }
 0x990   : > { %v5333_v0 = vadd.f32 %v5332_v40, %v5243_v33  ;;  %v5568_v48 = vmul.f32 %v5523_v13, %v5371_v49  ;;  %v5538_v49 = vpop.permute.xlu1 %5537 }
 0x992   : > { %v5553_v5 = vmul.f32 %v11601_v50, %v5333_v0  ;;  %v5600_v55 = vpack.c.bf16 %v5568_v48, %v5568_v48 }
 0x994   : > { %v5585_v51 = vpack.c.bf16 %v5553_v5, %v5553_v5  ;;  %v5283_v53 = vpop.f32.mrf.mxu2  ;;  %v11678_v50 = vunpack.c.l.b16 %v5600_v55 }
 0x995   : > { %v5372_v21 = vpop.f32.mrf.mxu3  ;;  %v5246_v16 = vpop.f32.mrf.mxu0 }
 0x996   : > { %v5745_v34 = vunpack.c.l.b16 %v5585_v51  ;;  %v5373_v23 = vadd.f32 %v5372_v21, %v5283_v53  ;;  %v8466_v53 = vld [vmem:[#allocation2 + $0x48] sm:$0xff] }
 0x997   : > { %v5335_v3 = vpop.f32.mrf.mxu1  ;;  %v11698_v21 = vld [vmem:[%s11971_s12] ss:$0 sm:$0xff] }
 0x998   : > { %v5569_v37 = vmul.f32 %v5528_v6, %v5373_v23  ;;  %v5770_v38 = vpack.c.b16 %v5745_v34, %v5744_v57  ;;  %v5336_v26 = vadd.f32 %v5335_v3, %v5246_v16  ;;  %v4882_v6 = vld [vmem:[#allocation2] sm:$0xff]  }
 0x999   : > { %5971 = vmatmul.bf16.gmra.mxu2 %v8464_v62  ;;  %v8520_v62 = vld [vmem:[%s11974_s15 + $0x38] sm:$0xff]  ;;  %v6139_v36 = vunpack.c.h.bf16 %v4882_v6 }
 0x99a   : > { %v5601_v46 = vpack.c.bf16 %v5569_v37, %v5569_v37  ;;  %6055 = vmatmul.bf16.gmra.mxu3 %v5770_v38  ;;  %v5554_v12 = vmul.f32 %v11603_v2, %v5336_v26  ;;  %6589 = vmatpush.bf16.msrb.mxu1 %v8520_v62  ;;  %v8467_v38 = vld [vmem:[#allocation2 + $0x50] sm:$0xff]  ;;  %v6138_v26 = vunpack.c.l.bf16 %v4882_v6  ;;  %v8517_v6 = vld [vmem:[%s11974_s15 + $0x20] sm:$0xff] }
 0x99c   : > { %v11680_v32 = vunpack.c.l.b16 %v5601_v46  ;;  %v5286_v52 = vpop.f32.mrf.mxu2  ;;  %v5586_v27 = vpack.c.bf16 %v5554_v12, %v5554_v12  ;;  %v8519_v12 = vld [vmem:[%s11974_s15 + $0x30] sm:$0xff] }
 0x99d   : > { %v5375_v24 = vpop.f32.mrf.mxu3  ;;  %v5248_v56 = vpop.f32.mrf.mxu0 }
 0x99e   : > { %v5376_v10 = vadd.f32 %v5375_v24, %v5286_v52  ;;  %v5778_v47 = vpack.c.b16 %v11680_v32, %v11678_v50  ;;  %v5746_v20 = vunpack.c.l.b16 %v5586_v27  ;;  %6590 = vmatpush.bf16.msrb.mxu1 %v8519_v12 }
 0x99f   : > { %v5337_v4 = vpop.f32.mrf.mxu1 }
 0x9a0   : > { %v5338_v44 = vadd.f32 %v5337_v4, %v5248_v56  ;;  %v5570_v35 = vmul.f32 %v5533_v25, %v5376_v10 }
 0x9a2   : > { %v5555_v58 = vmul.f32 %v11610_v7, %v5338_v44  ;;  %v5602_v33 = vpack.c.bf16 %v5570_v35, %v5570_v35 }
 0x9a4   : > { %v5587_v39 = vpack.c.bf16 %v5555_v58, %v5555_v58  ;;  %v5288_v17 = vpop.f32.mrf.mxu2  ;;  %v11689_v63 = vunpack.c.l.b16 %v5602_v33  ;;  %v4884_v58 = vld [vmem:[#allocation2 + $0x8] sm:$0xff]  }
 0x9a5   : > { %v5377_v2 = vpop.f32.mrf.mxu3  ;;  %v6140_v45 = vunpack.c.l.bf16 %v4884_v58 }
 0x9a6   : > { %v5747_v60 = vunpack.c.l.b16 %v5587_v39  ;;  %v5378_v43 = vadd.f32 %v5377_v2, %v5288_v17  ;;  %v8468_v39 = vld [vmem:[#allocation2 + $0x58] sm:$0xff]  ;;  %v6141_v17 = vunpack.c.h.bf16 %v4884_v58 }
 0x9a8   : > { %v5571_v40 = vmul.f32 %v5538_v49, %v5378_v43  ;;  %v5771_v0 = vpack.c.b16 %v5747_v60, %v5746_v20  ;;  %v8518_v60 = vld [vmem:[%s11974_s15 + $0x28] sm:$0xff] }
 0x9a9   : > { %5976 = vmatmul.bf16.gmra.mxu2 %v8465_v8  ;;  %6591 = vmatpush.bf16.msrb.mxu1 %v8518_v60  ;;  %v8515_v60 = vld [vmem:[%s11974_s15 + $0x10] sm:$0xff] }
 0x9aa   : > { %v5603_v7 = vpack.c.bf16 %v5571_v40, %v5571_v40  ;;  %6060 = vmatmul.bf16.gmra.mxu3 %v5771_v0 }
 0x9ac   : > { %v11691_v5 = vunpack.c.l.b16 %v5603_v7  ;;  %v5937_v13 = vpop.f32.mrf.mxu2  ;;  %v4886_v7 = vld [vmem:[#allocation2 + $0x10] sm:$0xff]  }
 0x9ad   : > { %v5938_v23 = vadd.f32 %v11698_v21, %v5937_v13  ;;  %6592 = vmatpush.bf16.msrb.mxu1 %v8517_v6 }
 0x9ae   : > { %v5779_v48 = vpack.c.b16 %v11691_v5, %v11689_v63 }
 0x9b4   : > { %v5939_v51 = vpop.f32.mrf.mxu2 }
 0x9b5   : > { %v5940_v3 = vadd.f32 %v11698_v21, %v5939_v51 }
 0x9b9   : > { %5981 = vmatmul.bf16.gmra.mxu2 %v8466_v53 }
 0x9ba   : > { %6065 = vmatmul.bf16.gmra.mxu3 %v5772_v15 }
 0x9bc   : > { %v5942_v57 = vpop.f32.mrf.mxu2 }
 0x9bd   : > { %v6026_v34 = vpop.f32.mrf.mxu3  ;;  %v5943_v44 = vadd.f32 %v11698_v21, %v5942_v57  ;;  %v6143_v57 = vunpack.c.h.bf16 %v4886_v7 }
 0x9be   : > { %v6027_v16 = vadd.f32 %v6026_v34, %v5938_v23 }
 0x9c0   : > { %v6106_v46 = vmax.f32 %v6027_v16, 0.0 }
 0x9c2   : > { %v6170_v52 = vadd.f32 %v6138_v26, %v6106_v46  ;;  %v4888_v26 = vld [vmem:[#allocation2 + $0x18] sm:$0xff]  }
 0x9c4   : > { %v5944_v55 = vpop.f32.mrf.mxu2 }
 0x9c5   : > { %v6028_v37 = vpop.f32.mrf.mxu3  ;;  %v5945_v28 = vadd.f32 %v11698_v21, %v5944_v55 }
 0x9c6   : > { %v6029_v11 = vadd.f32 %v6028_v37, %v5940_v3 }
 0x9c8   : > { %v6107_v15 = vmax.f32 %v6029_v11, 0.0 }
 0x9c9   : > { %5986 = vmatmul.bf16.gmra.mxu2 %v8467_v38 }
 0x9ca   : > { %v6171_v24 = vadd.f32 %v6139_v36, %v6107_v15  ;;  %6070 = vmatmul.bf16.gmra.mxu3 %v5773_v22 }
 0x9cc   : > { %v6202_v10 = vpack.c.bf16 %v6171_v24, %v6170_v52  ;;  %v5947_v56 = vpop.f32.mrf.mxu2  ;;  %v6145_v24 = vunpack.c.h.bf16 %v4888_v26 }
 0x9cd   : > { %v6031_v4 = vpop.f32.mrf.mxu3  ;;  %v5948_v40 = vadd.f32 %v11698_v21, %v5947_v56 }
 0x9ce   : > { %6294 = vmatmul.bf16.vlgmr.msrb.gmra.mxu0 %v6202_v10  ;;  %v6032_v27 = vadd.f32 %v6031_v4, %v5943_v44  ;;  %v8516_v4 = vld [vmem:[%s11974_s15 + $0x18] sm:$0xff] }
 0x9cf   : > { %6593 = vmatpush.bf16.msrb.mxu1 %v8516_v4 }
 0x9d0   : > { %v6108_v19 = vmax.f32 %v6032_v27, 0.0 }
 0x9d2   : > { %v6172_v8 = vadd.f32 %v6140_v45, %v6108_v19 }
 0x9d3   : > { %6594 = vmatpush.bf16.msrb.mxu1 %v8515_v60 }
 0x9d4   : > { %v5949_v25 = vpop.f32.mrf.mxu2 }
 0x9d5   : > { %v6033_v35 = vpop.f32.mrf.mxu3  ;;  %v5950_v13 = vadd.f32 %v11698_v21, %v5949_v25 }
 0x9d6   : > { %v6034_v22 = vadd.f32 %v6033_v35, %v5945_v28  ;;  %v4890_v35 = vld [vmem:[#allocation2 + $0x20] sm:$0xff]  }
 0x9d8   : > { %v6109_v2 = vmax.f32 %v6034_v22, 0.0 }
 0x9d9   : > { %5991 = vmatmul.bf16.gmra.mxu2 %v8468_v39 }
 0x9da   : > { %6075 = vmatmul.bf16.gmra.mxu3 %v5774_v1  ;;  %v6173_v20 = vadd.f32 %v6141_v17, %v6109_v2  ;;  %v6142_v1 = vunpack.c.l.bf16 %v4886_v7  ;;  %v6147_v17 = vunpack.c.h.bf16 %v4890_v35  ;;  %v4892_v7 = vld [vmem:[#allocation2 + $0x28] sm:$0xff]  }
 0x9db   : > { %v6148_v14 = vunpack.c.l.bf16 %v4892_v7 }
 0x9dc   : > { %v6203_v43 = vpack.c.bf16 %v6173_v20, %v6172_v8  ;;  %v5952_v49 = vpop.f32.mrf.mxu2 }
 0x9dd   : > { %v6036_v33 = vpop.f32.mrf.mxu3  ;;  %v5953_v38 = vadd.f32 %v11698_v21, %v5952_v49 }
 0x9de   : > { %6299 = vmatmul.bf16.gmra.mxu0 %v6203_v43  ;;  %v6037_v0 = vadd.f32 %v6036_v33, %v5948_v40 }
 0x9e0   : > { %v6110_v41 = vmax.f32 %v6037_v0, 0.0 }
 0x9e2   : > { %v6174_v23 = vadd.f32 %v6142_v1, %v6110_v41  ;;  %v6149_v41 = vunpack.c.h.bf16 %v4892_v7  ;;  %v11769_v7 = vld [vmem:[%s11973_s14] ss:$0 sm:$0xff] }
 0x9e4   : > { %v5954_v51 = vpop.f32.mrf.mxu2 }
 0x9e5   : > { %v6038_v53 = vpop.f32.mrf.mxu3  ;;  %v5955_v11 = vadd.f32 %v11698_v21, %v5954_v51 }
 0x9e6   : > { %v6039_v62 = vadd.f32 %v6038_v53, %v5950_v13 }
 0x9e8   : > { %v6111_v34 = vmax.f32 %v6039_v62, 0.0 }
 0x9e9   : > { %5996 = vmatmul.bf16.gmra.mxu2 %v8469_v9  ;;  %v8472_v9 = vld [vmem:[#allocation2 + $0x78] sm:$0xff] }
 0x9ea   : > { %6080 = vmatmul.bf16.gmra.mxu3 %v5775_v54  ;;  %v6175_v16 = vadd.f32 %v6143_v57, %v6111_v34  ;;  %v6144_v54 = vunpack.c.l.bf16 %v4888_v26  ;;  %v8514_v34 = vld [vmem:[%s11974_s15 + $0x8] sm:$0xff] }
 0x9eb   : > { %6595 = vmatpush.bf16.msrb.mxu1 %v8514_v34 }
 0x9ec   : > { %v6204_v3 = vpack.c.bf16 %v6175_v16, %v6174_v23  ;;  %v5957_v55 = vpop.f32.mrf.mxu2 }
 0x9ed   : > { %v6041_v37 = vpop.f32.mrf.mxu3  ;;  %v5958_v28 = vadd.f32 %v11698_v21, %v5957_v55 }
 0x9ee   : > { %6304 = vmatmul.bf16.gmra.mxu0 %v6204_v3  ;;  %v6042_v46 = vadd.f32 %v6041_v37, %v5953_v38  ;;  %v4894_v37 = vld [vmem:[#allocation2 + $0x30] sm:$0xff]  }
 0x9ef   : > { %v6150_v50 = vunpack.c.l.bf16 %v4894_v37 }
 0x9f0   : > { %v6112_v61 = vmax.f32 %v6042_v46, 0.0 }
 0x9f2   : > { %v6176_v10 = vadd.f32 %v6144_v54, %v6112_v61 }
 0x9f4   : > { %v5959_v36 = vpop.f32.mrf.mxu2 }
 0x9f5   : > { %v6043_v15 = vpop.f32.mrf.mxu3  ;;  %v5960_v39 = vadd.f32 %v11698_v21, %v5959_v36 }
 0x9f6   : > { %v6044_v52 = vadd.f32 %v6043_v15, %v5955_v11 }
 0x9f8   : > { %v6113_v12 = vmax.f32 %v6044_v52, 0.0 }
 0x9f9   : > { %6001 = vmatmul.bf16.gmra.mxu2 %v8470_v42 }
 0x9fa   : > { %6085 = vmatmul.bf16.gmra.mxu3 %v5776_v29  ;;  %v6177_v56 = vadd.f32 %v6145_v24, %v6113_v12  ;;  %v6146_v29 = vunpack.c.l.bf16 %v4890_v35  ;;  %v8513_v12 = vld [vmem:[%s11974_s15] sm:$0xff] }
 0x9fb   : > { %6596 = vmatpush.bf16.msrb.mxu1 %v8513_v12 }
 0x9fc   : > { %v6205_v44 = vpack.c.bf16 %v6177_v56, %v6176_v10  ;;  %v5962_v27 = vpop.f32.mrf.mxu2  ;;  %v4896_v56 = vld [vmem:[#allocation2 + $0x38] sm:$0xff]  }
 0x9fd   : > { %v6046_v58 = vpop.f32.mrf.mxu3  ;;  %v5963_v40 = vadd.f32 %v11698_v21, %v5962_v27  ;;  %v6152_v63 = vunpack.c.l.bf16 %v4896_v56 }
 0x9fe   : > { %6309 = vmatmul.bf16.gmra.mxu0 %v6205_v44  ;;  %v6047_v25 = vadd.f32 %v6046_v58, %v5958_v28 }
 0xa00   : > { %v6114_v31 = vmax.f32 %v6047_v25, 0.0 }
 0xa02   : > { %v6178_v8 = vadd.f32 %v6146_v29, %v6114_v31  ;;  %v4898_v29 = vld [vmem:[#allocation2 + $0x40] sm:$0xff]  }
 0xa04   : > { %v5964_v19 = vpop.f32.mrf.mxu2 }
 0xa05   : > { %v6048_v45 = vpop.f32.mrf.mxu3  ;;  %v5965_v13 = vadd.f32 %v11698_v21, %v5964_v19 }
 0xa06   : > { %v6049_v22 = vadd.f32 %v6048_v45, %v5960_v39 }
 0xa08   : > { %v6115_v2 = vmax.f32 %v6049_v22, 0.0 }
 0xa09   : > { %6006 = vmatmul.bf16.gmra.mxu2 %v8471_v30 }
 0xa0a   : > { %v6179_v20 = vadd.f32 %v6147_v17, %v6115_v2  ;;  %6090 = vmatmul.bf16.gmra.mxu3 %v5777_v18 }
 0xa0c   : > { %v6206_v43 = vpack.c.bf16 %v6179_v20, %v6178_v8  ;;  %v5967_v49 = vpop.f32.mrf.mxu2  ;;  %v6154_v20 = vunpack.c.l.bf16 %v4898_v29 }
 0xa0d   : > { %v6051_v33 = vpop.f32.mrf.mxu3  ;;  %v5968_v3 = vadd.f32 %v11698_v21, %v5967_v49 }
 0xa0e   : > { %6314 = vmatmul.bf16.gmra.mxu0 %v6206_v43  ;;  %v6052_v0 = vadd.f32 %v6051_v33, %v5963_v40  ;;  %v6155_v43 = vunpack.c.h.bf16 %v4898_v29 }
 0xa10   : > { %v6116_v59 = vmax.f32 %v6052_v0, 0.0 }
 0xa12   : > { %v6180_v62 = vadd.f32 %v6148_v14, %v6116_v59  ;;  %v8762_v14 = vld [vmem:[#allocation3 + $0x30] sm:$0xff]  }
 0xa14   : > { %v5969_v51 = vpop.f32.mrf.mxu2 }
 0xa15   : > { %v6053_v53 = vpop.f32.mrf.mxu3  ;;  %v5970_v38 = vadd.f32 %v11698_v21, %v5969_v51 }
 0xa16   : > { %v6054_v18 = vadd.f32 %v6053_v53, %v5965_v13 }
 0xa18   : > { %v6117_v1 = vmax.f32 %v6054_v18, 0.0  ;;  %v4900_v18 = vld [vmem:[#allocation2 + $0x48] sm:$0xff]  }
 0xa19   : > { %6011 = vmatmul.bf16.gmra.mxu2 %v8472_v9 }
 0xa1a   : > { %v6181_v57 = vadd.f32 %v6149_v41, %v6117_v1  ;;  %6095 = vmatmul.bf16.gmra.mxu3 %v5778_v47  ;;  %v6151_v47 = vunpack.c.h.bf16 %v4894_v37  ;;  %v8763_v1 = vunpack.c.l.bf16 %v8762_v14 }
 0xa1c   : > { %v6207_v23 = vpack.c.bf16 %v6181_v57, %v6180_v62  ;;  %v5972_v16 = vpop.f32.mrf.mxu2 }
 0xa1d   : > { %v6056_v6 = vpop.f32.mrf.mxu3  ;;  %v5973_v24 = vadd.f32 %v11698_v21, %v5972_v16  ;;  %v8764_v16 = vunpack.c.h.bf16 %v8762_v14 }
 0xa1e   : > { %6319 = vmatmul.bf16.gmra.mxu0 %v6207_v23  ;;  %v6057_v55 = vadd.f32 %v6056_v6, %v5968_v3  ;;  %v6156_v3 = vunpack.c.l.bf16 %v4900_v18 }
 0xa20   : > { %v6118_v11 = vmax.f32 %v6057_v55, 0.0 }
 0xa22   : > { %v6182_v15 = vadd.f32 %v6150_v50, %v6118_v11 }
 0xa24   : > { %v5974_v46 = vpop.f32.mrf.mxu2 }
 0xa25   : > { %v6058_v26 = vpop.f32.mrf.mxu3  ;;  %v5975_v4 = vadd.f32 %v11698_v21, %v5974_v46 }
 0xa26   : > { %v6059_v32 = vadd.f32 %v6058_v26, %v5970_v38  ;;  %v6157_v26 = vunpack.c.h.bf16 %v4900_v18 }
 0xa28   : > { %v6119_v36 = vmax.f32 %v6059_v32, 0.0 }
 0xa2a   : > { %v6183_v42 = vadd.f32 %v6151_v47, %v6119_v36  ;;  %6100 = vmatmul.bf16.gmra.mxu3 %v5779_v48  ;;  %v6153_v48 = vunpack.c.h.bf16 %v4896_v56  ;;  %v4902_v56 = vld [vmem:[#allocation2 + $0x50] sm:$0xff]  }
 0xa2c   : > { %v6208_v61 = vpack.c.bf16 %v6183_v42, %v6182_v15  ;;  %v5977_v54 = vpop.f32.mrf.mxu2 }
 0xa2d   : > { %v6061_v52 = vpop.f32.mrf.mxu3  ;;  %v5978_v30 = vadd.f32 %v11698_v21, %v5977_v54 }
 0xa2e   : > { %6324 = vmatmul.bf16.gmra.mxu0 %v6208_v61  ;;  %v6062_v10 = vadd.f32 %v6061_v52, %v5973_v24 }
 0xa30   : > { %v6120_v58 = vmax.f32 %v6062_v10, 0.0  ;;  %v8870_v10 = vld [vmem:[#allocation3] sm:$0xff]  }
 0xa32   : > { %v6184_v25 = vadd.f32 %v6152_v63, %v6120_v58 }
 0xa34   : > { %v5979_v44 = vpop.f32.mrf.mxu2 }
 0xa35   : > { %v6063_v27 = vpop.f32.mrf.mxu3  ;;  %v5980_v22 = vadd.f32 %v11698_v21, %v5979_v44  ;;  %v8767_v44 = vunpack.c.l.bf16 %v8870_v10 }
 0xa36   : > { %v6064_v5 = vadd.f32 %v6063_v27, %v5975_v4 }
 0xa38   : > { %v6121_v28 = vmax.f32 %v6064_v5, 0.0 }
 0xa3a   : > { %v6185_v35 = vadd.f32 %v6153_v48, %v6121_v28  ;;  %v8768_v28 = vunpack.c.h.bf16 %v8870_v10 }
 0xa3c   : > { %v6209_v39 = vpack.c.bf16 %v6185_v35, %v6184_v25  ;;  %v5982_v19 = vpop.f32.mrf.mxu2  ;;  %v6158_v25 = vunpack.c.l.bf16 %v4902_v56 }
 0xa3d   : > { %v6066_v45 = vpop.f32.mrf.mxu3  ;;  %v5983_v9 = vadd.f32 %v11698_v21, %v5982_v19 }
 0xa3e   : > { %6329 = vmatmul.bf16.gmra.mxu0 %v6209_v39  ;;  %v6067_v31 = vadd.f32 %v6066_v45, %v5978_v30  ;;  %v6159_v30 = vunpack.c.h.bf16 %v4902_v56 }
 0xa40   : > { %v6122_v8 = vmax.f32 %v6067_v31, 0.0 }
 0xa42   : > { %v6186_v33 = vadd.f32 %v6154_v20, %v6122_v8 }
 0xa44   : > { %v5984_v17 = vpop.f32.mrf.mxu2 }
 0xa45   : > { %v6068_v2 = vpop.f32.mrf.mxu3  ;;  %v5985_v57 = vadd.f32 %v11698_v21, %v5984_v17 }
 0xa46   : > { %v6069_v60 = vadd.f32 %v6068_v2, %v5980_v22 }
 0xa48   : > { %v6123_v49 = vmax.f32 %v6069_v60, 0.0 }
 0xa4a   : > { %v6187_v40 = vadd.f32 %v6155_v43, %v6123_v49 }
 0xa4b   : > { %v6295_v0 = vpop.f32.mrf.mxu0 }
 0xa4c   : > { %v6210_v13 = vpack.c.bf16 %v6187_v40, %v6186_v33  ;;  %v5987_v51 = vpop.f32.mrf.mxu2  ;;  %v6296_v59 = vadd.f32 %v11769_v7, %v6295_v0  ;;  %v8871_v0 = vld [vmem:[#allocation3 + $0x58] sm:$0xff]  }
 0xa4d   : > { %v6071_v53 = vpop.f32.mrf.mxu3  ;;  %v5988_v24 = vadd.f32 %v11698_v21, %v5987_v51 }
 0xa4e   : > { %6334 = vmatmul.bf16.gmra.mxu0 %v6210_v13  ;;  %v6072_v41 = vadd.f32 %v6071_v53, %v5983_v9  ;;  %v6375_v34 = vmax.f32 %v6296_v59, 0.0  ;;  %v4904_v13 = vld [vmem:[#allocation2 + $0x58] sm:$0xff]   ;;  %v8771_v53 = vunpack.c.l.bf16 %v8871_v0 }
 0xa50   : > { %v6124_v37 = vmax.f32 %v6072_v41, 0.0  ;;  %v6473_v11 = vadd.f32 %v8763_v1, %v6375_v34  ;;  %v8772_v41 = vunpack.c.h.bf16 %v8871_v0  ;;  %v6160_v1 = vunpack.c.l.bf16 %v4904_v13 }
 0xa52   : > { %v6188_v47 = vadd.f32 %v6156_v3, %v6124_v37 }
 0xa53   : > { %v6297_v62 = vpop.f32.mrf.mxu0 }
 0xa54   : > { %v6298_v23 = vadd.f32 %v11769_v7, %v6297_v62  ;;  %v5989_v6 = vpop.f32.mrf.mxu2 }
 0xa55   : > { %v6073_v55 = vpop.f32.mrf.mxu3  ;;  %v5990_v58 = vadd.f32 %v11698_v21, %v5989_v6  ;;  %v6161_v6 = vunpack.c.h.bf16 %v4904_v13 }
 0xa56   : > { %v6376_v38 = vmax.f32 %v6298_v23, 0.0  ;;  %v6074_v46 = vadd.f32 %v6073_v55, %v5985_v57 }
 0xa58   : > { %v6474_v50 = vadd.f32 %v8764_v16, %v6376_v38  ;;  %v6125_v32 = vmax.f32 %v6074_v46, 0.0 }
 0xa5a   : > { %v6189_v36 = vadd.f32 %v6157_v26, %v6125_v32  ;;  %v6505_v15 = vpack.c.bf16 %v6474_v50, %v6473_v11 }
 0xa5b   : > { %v6300_v42 = vpop.f32.mrf.mxu0 }
 0xa5c   : > { %6597 = vmatmul.bf16.vlgmr.msrb.gmra.mxu1 %v6505_v15  ;;  %v6211_v61 = vpack.c.bf16 %v6189_v36, %v6188_v47  ;;  %v5992_v54 = vpop.f32.mrf.mxu2  ;;  %v6301_v12 = vadd.f32 %v11769_v7, %v6300_v42  ;;  %v8872_v42 = vld [vmem:[#allocation3 + $0x18] sm:$0xff]  }
 0xa5d   : > { %v6076_v52 = vpop.f32.mrf.mxu3  ;;  %v5993_v33 = vadd.f32 %v11698_v21, %v5992_v54 }
 0xa5e   : > { %6339 = vmatmul.bf16.gmra.mxu0 %v6211_v61  ;;  %v6077_v4 = vadd.f32 %v6076_v52, %v5988_v24  ;;  %v6377_v63 = vmax.f32 %v6301_v12, 0.0  ;;  %v4906_v61 = vld [vmem:[#allocation2 + $0x60] sm:$0xff]   ;;  %v8775_v52 = vunpack.c.l.bf16 %v8872_v42 }
 0xa60   : > { %v6126_v39 = vmax.f32 %v6077_v4, 0.0  ;;  %v6475_v31 = vadd.f32 %v8767_v44, %v6377_v63  ;;  %v8776_v4 = vunpack.c.h.bf16 %v8872_v42  ;;  %v6162_v44 = vunpack.c.l.bf16 %v4906_v61 }
 0xa62   : > { %v6190_v17 = vadd.f32 %v6158_v25, %v6126_v39 }
 0xa63   : > { %v6302_v27 = vpop.f32.mrf.mxu0 }
 0xa64   : > { %v6303_v5 = vadd.f32 %v11769_v7, %v6302_v27  ;;  %v5994_v48 = vpop.f32.mrf.mxu2 }
 0xa65   : > { %v6078_v35 = vpop.f32.mrf.mxu3  ;;  %v5995_v59 = vadd.f32 %v11698_v21, %v5994_v48  ;;  %v6163_v48 = vunpack.c.h.bf16 %v4906_v61 }
 0xa66   : > { %v6378_v19 = vmax.f32 %v6303_v5, 0.0  ;;  %v6079_v45 = vadd.f32 %v6078_v35, %v5990_v58 }
 0xa68   : > { %v6127_v29 = vmax.f32 %v6079_v45, 0.0  ;;  %v6476_v22 = vadd.f32 %v8768_v28, %v6378_v19 }
 0xa6a   : > { %v6191_v2 = vadd.f32 %v6159_v30, %v6127_v29  ;;  %v6506_v8 = vpack.c.bf16 %v6476_v22, %v6475_v31 }
 0xa6b   : > { %v6305_v20 = vpop.f32.mrf.mxu0 }
 0xa6c   : > { %6602 = vmatmul.bf16.gmra.mxu1 %v6506_v8  ;;  %v6212_v60 = vpack.c.bf16 %v6191_v2, %v6190_v17  ;;  %v5997_v43 = vpop.f32.mrf.mxu2  ;;  %v6306_v40 = vadd.f32 %v11769_v7, %v6305_v20  ;;  %v8873_v8 = vld [vmem:[#allocation3 + $0x50] sm:$0xff]   ;;  %v4908_v20 = vld [vmem:[#allocation2 + $0x68] sm:$0xff]  }
 0xa6d   : > { %v6081_v49 = vpop.f32.mrf.mxu3  ;;  %v5998_v47 = vadd.f32 %v11698_v21, %v5997_v43  ;;  %v8779_v43 = vunpack.c.l.bf16 %v8873_v8 }
 0xa6e   : > { %6344 = vmatmul.bf16.gmra.mxu0 %v6212_v60  ;;  %v6082_v51 = vadd.f32 %v6081_v49, %v5993_v33  ;;  %v6379_v14 = vmax.f32 %v6306_v40, 0.0 }
 0xa70   : > { %v6128_v34 = vmax.f32 %v6082_v51, 0.0  ;;  %v6477_v3 = vadd.f32 %v8771_v53, %v6379_v14  ;;  %v8780_v51 = vunpack.c.h.bf16 %v8873_v8  ;;  %v6164_v53 = vunpack.c.l.bf16 %v4908_v20 }
 0xa72   : > { %v6192_v38 = vadd.f32 %v6160_v1, %v6128_v34 }
 0xa73   : > { %v6307_v9 = vpop.f32.mrf.mxu0 }
 0xa74   : > { %v6308_v18 = vadd.f32 %v11769_v7, %v6307_v9  ;;  %v5999_v57 = vpop.f32.mrf.mxu2 }
 0xa75   : > { %v6083_v62 = vpop.f32.mrf.mxu3  ;;  %v6000_v12 = vadd.f32 %v11698_v21, %v5999_v57 }
 0xa76   : > { %v6380_v23 = vmax.f32 %v6308_v18, 0.0  ;;  %v6084_v16 = vadd.f32 %v6083_v62, %v5995_v59 }
 0xa78   : > { %v6129_v55 = vmax.f32 %v6084_v16, 0.0  ;;  %v6478_v37 = vadd.f32 %v8772_v41, %v6380_v23  ;;  %v6165_v41 = vunpack.c.h.bf16 %v4908_v20 }
 0xa7a   : > { %v6193_v46 = vadd.f32 %v6161_v6, %v6129_v55  ;;  %v6507_v26 = vpack.c.bf16 %v6478_v37, %v6477_v3 }
 0xa7b   : > { %v6310_v11 = vpop.f32.mrf.mxu0 }
 0xa7c   : > { %6607 = vmatmul.bf16.gmra.mxu1 %v6507_v26  ;;  %v6213_v50 = vpack.c.bf16 %v6193_v46, %v6192_v38  ;;  %v6002_v36 = vpop.f32.mrf.mxu2  ;;  %v6311_v15 = vadd.f32 %v11769_v7, %v6310_v11  ;;  %v8874_v26 = vld [vmem:[#allocation3 + $0x68] sm:$0xff]   ;;  %v4910_v11 = vld [vmem:[#allocation2 + $0x70] sm:$0xff]  }
 0xa7d   : > { %v6086_v32 = vpop.f32.mrf.mxu3  ;;  %v6003_v17 = vadd.f32 %v11698_v21, %v6002_v36  ;;  %v8784_v61 = vunpack.c.h.bf16 %v8874_v26 }
 0xa7e   : > { %6349 = vmatmul.bf16.gmra.mxu0 %v6213_v50  ;;  %v6087_v54 = vadd.f32 %v6086_v32, %v5998_v47  ;;  %v6381_v10 = vmax.f32 %v6311_v15, 0.0  ;;  %v8783_v32 = vunpack.c.l.bf16 %v8874_v26 }
 0xa80   : > { %v6130_v58 = vmax.f32 %v6087_v54, 0.0  ;;  %v6479_v28 = vadd.f32 %v8775_v52, %v6381_v10  ;;  %v6166_v54 = vunpack.c.l.bf16 %v4910_v11 }
 0xa82   : > { %v6194_v19 = vadd.f32 %v6162_v44, %v6130_v58 }
 0xa83   : > { %v6312_v24 = vpop.f32.mrf.mxu0 }
 0xa84   : > { %v6313_v56 = vadd.f32 %v11769_v7, %v6312_v24  ;;  %v6004_v39 = vpop.f32.mrf.mxu2 }
 0xa85   : > { %v6088_v27 = vpop.f32.mrf.mxu3  ;;  %v6005_v40 = vadd.f32 %v11698_v21, %v6004_v39 }
 0xa86   : > { %v6382_v63 = vmax.f32 %v6313_v56, 0.0  ;;  %v6089_v5 = vadd.f32 %v6088_v27, %v6000_v12  ;;  %v6167_v56 = vunpack.c.h.bf16 %v4910_v11  ;;  %v8877_v11 = vld [vmem:[#allocation3 + $0x40] sm:$0xff]  }
 0xa88   : > { %v6131_v25 = vmax.f32 %v6089_v5, 0.0  ;;  %v6480_v35 = vadd.f32 %v8776_v4, %v6382_v63 }
 0xa8a   : > { %v6195_v45 = vadd.f32 %v6163_v48, %v6131_v25  ;;  %v6508_v30 = vpack.c.bf16 %v6480_v35, %v6479_v28 }
 0xa8b   : > { %v6315_v31 = vpop.f32.mrf.mxu0 }
 0xa8c   : > { %6612 = vmatmul.bf16.gmra.mxu1 %v6508_v30  ;;  %v6214_v29 = vpack.c.bf16 %v6195_v45, %v6194_v19  ;;  %v6316_v2 = vadd.f32 %v11769_v7, %v6315_v31  ;;  %v6007_v49 = vpop.f32.mrf.mxu2  ;;  %v8875_v45 = vld [vmem:[#allocation3 + $0x8] sm:$0xff]   ;;  %v4912_v31 = vld [vmem:[#allocation2 + $0x78] sm:$0xff]  }
 0xa8d   : > { %v6091_v22 = vpop.f32.mrf.mxu3  ;;  %v6008_v38 = vadd.f32 %v11698_v21, %v6007_v49 }
 0xa8e   : > { %6354 = vmatmul.bf16.gmra.mxu0 %v6214_v29  ;;  %v6092_v60 = vadd.f32 %v6091_v22, %v6003_v17  ;;  %v6383_v0 = vmax.f32 %v6316_v2, 0.0  ;;  %v8787_v22 = vunpack.c.l.bf16 %v8875_v45 }
 0xa90   : > { %v6132_v59 = vmax.f32 %v6092_v60, 0.0  ;;  %v6481_v1 = vadd.f32 %v8779_v43, %v6383_v0  ;;  %v8788_v60 = vunpack.c.h.bf16 %v8875_v45  ;;  %v6168_v43 = vunpack.c.l.bf16 %v4912_v31 }
 0xa92   : > { %v6196_v34 = vadd.f32 %v6164_v53, %v6132_v59 }
 0xa93   : > { %v6317_v33 = vpop.f32.mrf.mxu0 }
 0xa94   : > { %v6318_v13 = vadd.f32 %v11769_v7, %v6317_v33  ;;  %v6009_v55 = vpop.f32.mrf.mxu2 }
 0xa95   : > { %v6093_v9 = vpop.f32.mrf.mxu3  ;;  %v6010_v36 = vadd.f32 %v11698_v21, %v6009_v55 }
 0xa96   : > { %v6384_v14 = vmax.f32 %v6318_v13, 0.0  ;;  %v6094_v18 = vadd.f32 %v6093_v9, %v6005_v40  ;;  %v6169_v13 = vunpack.c.h.bf16 %v4912_v31 }
 0xa98   : > { %v6482_v62 = vadd.f32 %v8780_v51, %v6384_v14  ;;  %v6133_v57 = vmax.f32 %v6094_v18, 0.0 }
 0xa9a   : > { %v6197_v23 = vadd.f32 %v6165_v41, %v6133_v57  ;;  %v6509_v16 = vpack.c.bf16 %v6482_v62, %v6481_v1  ;;  %v8876_v62 = vld [vmem:[#allocation3 + $0x48] sm:$0xff]  }
 0xa9b   : > { %v6320_v6 = vpop.f32.mrf.mxu0 }
 0xa9c   : > { %6617 = vmatmul.bf16.gmra.mxu1 %v6509_v16  ;;  %v6215_v3 = vpack.c.bf16 %v6197_v23, %v6196_v34  ;;  %v6321_v46 = vadd.f32 %v11769_v7, %v6320_v6  ;;  %v6012_v4 = vpop.f32.mrf.mxu2  ;;  %v8791_v23 = vunpack.c.l.bf16 %v8876_v62  ;;  %v8792_v6 = vunpack.c.h.bf16 %v8876_v62 }
 0xa9d   : > { %v6096_v37 = vpop.f32.mrf.mxu3  ;;  %v6013_v39 = vadd.f32 %v11698_v21, %v6012_v4 }
 0xa9e   : > { %6359 = vmatmul.bf16.gmra.mxu0 %v6215_v3  ;;  %v6097_v50 = vadd.f32 %v6096_v37, %v6008_v38  ;;  %v6385_v15 = vmax.f32 %v6321_v46, 0.0 }
 0xaa0   : > { %v6134_v24 = vmax.f32 %v6097_v50, 0.0  ;;  %v6483_v44 = vadd.f32 %v8783_v32, %v6385_v15  ;;  %v8796_v15 = vunpack.c.h.bf16 %v8877_v11 }
 0xaa2   : > { %v6198_v63 = vadd.f32 %v6166_v54, %v6134_v24 }
 0xaa3   : > { %v6322_v47 = vpop.f32.mrf.mxu0 }
 0xaa4   : > { %v6323_v42 = vadd.f32 %v11769_v7, %v6322_v47  ;;  %v6014_v30 = vpop.f32.mrf.mxu2  ;;  %v8795_v47 = vunpack.c.l.bf16 %v8877_v11  ;;  %v8881_v11 = vld [vmem:[#allocation3 + $0x60] sm:$0xff]  }
 0xaa5   : > { %v6098_v52 = vpop.f32.mrf.mxu3  ;;  %v6015_v2 = vadd.f32 %v11698_v21, %v6014_v30 }
 0xaa6   : > { %v6386_v12 = vmax.f32 %v6323_v42, 0.0  ;;  %v6099_v10 = vadd.f32 %v6098_v52, %v6010_v36 }
 0xaa8   : > { %v6484_v27 = vadd.f32 %v8784_v61, %v6386_v12  ;;  %v6135_v58 = vmax.f32 %v6099_v10, 0.0  ;;  %v11806_v61 = vld [vmem:[%s11975_s16] ss:$0 sm:$0xff] }
 0xaaa   : > { %v6199_v5 = vadd.f32 %v6167_v56, %v6135_v58  ;;  %v6510_v48 = vpack.c.bf16 %v6484_v27, %v6483_v44  ;;  %v8878_v44 = vld [vmem:[#allocation3 + $0x20] sm:$0xff]  }
 0xaab   : > { %v6325_v28 = vpop.f32.mrf.mxu0 }
 0xaac   : > { %6622 = vmatmul.bf16.gmra.mxu1 %v6510_v48  ;;  %v6216_v25 = vpack.c.bf16 %v6199_v5, %v6198_v63  ;;  %v6326_v19 = vadd.f32 %v11769_v7, %v6325_v28  ;;  %v8799_v48 = vunpack.c.l.bf16 %v8878_v44 }
 0xaad   : > { %v6101_v35 = vpop.f32.mrf.mxu3 }
 0xaae   : > { %6364 = vmatmul.bf16.gmra.mxu0 %v6216_v25  ;;  %v6102_v29 = vadd.f32 %v6101_v35, %v6013_v39  ;;  %v6387_v8 = vmax.f32 %v6326_v19, 0.0  ;;  %v8800_v25 = vunpack.c.h.bf16 %v8878_v44 }
 0xab0   : > { %v6136_v33 = vmax.f32 %v6102_v29, 0.0  ;;  %v6485_v51 = vadd.f32 %v8787_v22, %v6387_v8 }
 0xab2   : > { %v6200_v59 = vadd.f32 %v6168_v43, %v6136_v33 }
 0xab3   : > { %v6327_v17 = vpop.f32.mrf.mxu0 }
 0xab4   : > { %v6328_v20 = vadd.f32 %v11769_v7, %v6327_v17  ;;  %v8879_v17 = vld [vmem:[#allocation3 + $0x10] sm:$0xff]  }
 0xab5   : > { %v6103_v49 = vpop.f32.mrf.mxu3  ;;  %v8803_v43 = vunpack.c.l.bf16 %v8879_v17  ;;  %v8804_v33 = vunpack.c.h.bf16 %v8879_v17 }
 0xab6   : > { %v6388_v40 = vmax.f32 %v6328_v20, 0.0  ;;  %v6104_v0 = vadd.f32 %v6103_v49, %v6015_v2 }
 0xab8   : > { %v6486_v53 = vadd.f32 %v8788_v60, %v6388_v40  ;;  %v6137_v9 = vmax.f32 %v6104_v0, 0.0 }
 0xaba   : > { %v6201_v14 = vadd.f32 %v6169_v13, %v6137_v9  ;;  %v6511_v18 = vpack.c.bf16 %v6486_v53, %v6485_v51 }
 0xabb   : > { %v6330_v41 = vpop.f32.mrf.mxu0 }
 0xabc   : > { %6627 = vmatmul.bf16.gmra.mxu1 %v6511_v18  ;;  %v6217_v1 = vpack.c.bf16 %v6201_v14, %v6200_v59  ;;  %v6331_v21 = vadd.f32 %v11769_v7, %v6330_v41  ;;  %v8880_v18 = vld [vmem:[#allocation3 + $0x38] sm:$0xff]  }
 0xabe   : > { %6369 = vmatmul.bf16.gmra.mxu0 %v6217_v1  ;;  %v6389_v34 = vmax.f32 %v6331_v21, 0.0 }
 0xac0   : > { %v6487_v55 = vadd.f32 %v8791_v23, %v6389_v34  ;;  %v8808_v23 = vunpack.c.h.bf16 %v8880_v18 }
 0xac3   : > { %v6332_v57 = vpop.f32.mrf.mxu0 }
 0xac4   : > { %v6333_v16 = vadd.f32 %v11769_v7, %v6332_v57  ;;  %v8807_v57 = vunpack.c.l.bf16 %v8880_v18 }
 0xac6   : > { %v6390_v3 = vmax.f32 %v6333_v16, 0.0 }
 0xac8   : > { %v6488_v37 = vadd.f32 %v8792_v6, %v6390_v3 }
 0xaca   : > { %v6512_v38 = vpack.c.bf16 %v6488_v37, %v6487_v55 }
 0xacb   : > { %v6335_v46 = vpop.f32.mrf.mxu0 }
 0xacc   : > { %6632 = vmatmul.bf16.gmra.mxu1 %v6512_v38  ;;  %v6336_v26 = vadd.f32 %v11769_v7, %v6335_v46 }
 0xace   : > { %v6391_v32 = vmax.f32 %v6336_v26, 0.0 }
 0xad0   : > { %v6489_v54 = vadd.f32 %v8795_v47, %v6391_v32 }
 0xad3   : > { %v6337_v50 = vpop.f32.mrf.mxu0 }
 0xad4   : > { %v6338_v36 = vadd.f32 %v11769_v7, %v6337_v50 }
 0xad6   : > { %v6392_v42 = vmax.f32 %v6338_v36, 0.0 }
 0xad8   : > { %v6490_v52 = vadd.f32 %v8796_v15, %v6392_v42  ;;  %v8811_v15 = vunpack.c.l.bf16 %v8881_v11 }
 0xad9   : > { %v6598_v24 = vpop.f32.mrf.mxu1 }
 0xada   : > { %v6599_v12 = vadd.f32 %v11806_v61, %v6598_v24  ;;  %v6513_v10 = vpack.c.bf16 %v6490_v52, %v6489_v54  ;;  %v8812_v54 = vunpack.c.h.bf16 %v8881_v11 }
 0xadb   : > { %v6340_v56 = vpop.f32.mrf.mxu0 }
 0xadc   : > { %6678 = vst [vmem:[%s11976_s17] sm:$0xff] %v6599_v12  ;;  %6637 = vmatmul.bf16.gmra.mxu1 %v6513_v10  ;;  %v6341_v4 = vadd.f32 %v11769_v7, %v6340_v56 }
 0xade   : > { %v6393_v5 = vmax.f32 %v6341_v4, 0.0 }
 0xae0   : > { %v6491_v39 = vadd.f32 %v8799_v48, %v6393_v5 }
 0xae1   : > { %v6600_v27 = vpop.f32.mrf.mxu1 }
 0xae2   : > { %v6601_v58 = vadd.f32 %v11806_v61, %v6600_v27 }
 0xae3   : > { %v6342_v63 = vpop.f32.mrf.mxu0 }
 0xae4   : > { %6679 = vst [vmem:[%s11976_s17 + $0x8] sm:$0xff] %v6601_v58  ;;  %v6343_v28 = vadd.f32 %v11769_v7, %v6342_v63  ;;  %v8882_v58 = vld [vmem:[#allocation3 + $0x70] sm:$0xff]  }
 0xae6   : > { %v6394_v35 = vmax.f32 %v6343_v28, 0.0 }
 0xae8   : > { %v6492_v19 = vadd.f32 %v8800_v25, %v6394_v35  ;;  %v8815_v25 = vunpack.c.l.bf16 %v8882_v58 }
 0xae9   : > { %v6603_v45 = vpop.f32.mrf.mxu1 }
 0xaea   : > { %v6604_v30 = vadd.f32 %v11806_v61, %v6603_v45  ;;  %v6514_v31 = vpack.c.bf16 %v6492_v19, %v6491_v39  ;;  %v8816_v39 = vunpack.c.h.bf16 %v8882_v58 }
 0xaeb   : > { %v6345_v29 = vpop.f32.mrf.mxu0 }
 0xaec   : > { %6680 = vst [vmem:[%s11976_s17 + $0x10] sm:$0xff] %v6604_v30  ;;  %6642 = vmatmul.bf16.gmra.mxu1 %v6514_v31  ;;  %v6346_v22 = vadd.f32 %v11769_v7, %v6345_v29 }
 0xaee   : > { %v6395_v60 = vmax.f32 %v6346_v22, 0.0 }
 0xaf0   : > { %v6493_v0 = vadd.f32 %v8803_v43, %v6395_v60 }
 0xaf1   : > { %v6605_v2 = vpop.f32.mrf.mxu1 }
 0xaf2   : > { %v6606_v8 = vadd.f32 %v11806_v61, %v6605_v2 }
 0xaf3   : > { %v6347_v20 = vpop.f32.mrf.mxu0 }
 0xaf4   : > { %6681 = vst [vmem:[%s11976_s17 + $0x18] sm:$0xff] %v6606_v8  ;;  %v6348_v49 = vadd.f32 %v11769_v7, %v6347_v20  ;;  %v8883_v8 = vld [vmem:[#allocation3 + $0x78] sm:$0xff]  }
 0xaf6   : > { %v6396_v40 = vmax.f32 %v6348_v49, 0.0 }
 0xaf8   : > { %v6494_v13 = vadd.f32 %v8804_v33, %v6396_v40  ;;  %v8819_v33 = vunpack.c.l.bf16 %v8883_v8 }
 0xaf9   : > { %v6608_v51 = vpop.f32.mrf.mxu1 }
 0xafa   : > { %v6609_v53 = vadd.f32 %v11806_v61, %v6608_v51  ;;  %v6515_v9 = vpack.c.bf16 %v6494_v13, %v6493_v0  ;;  %v8820_v0 = vunpack.c.h.bf16 %v8883_v8 }
 0xafb   : > { %v6350_v59 = vpop.f32.mrf.mxu0 }
 0xafc   : > { %6682 = vst [vmem:[%s11976_s17 + $0x20] sm:$0xff] %v6609_v53  ;;  %6647 = vmatmul.bf16.gmra.mxu1 %v6515_v9  ;;  %v6351_v14 = vadd.f32 %v11769_v7, %v6350_v59 }
 0xafe   : > { %v6397_v62 = vmax.f32 %v6351_v14, 0.0 }
 0xb00   : > { %v6495_v6 = vadd.f32 %v8807_v57, %v6397_v62 }
 0xb01   : > { %v6610_v41 = vpop.f32.mrf.mxu1 }
 0xb02   : > { %v6611_v1 = vadd.f32 %v11806_v61, %v6610_v41 }
 0xb03   : > { %v6352_v21 = vpop.f32.mrf.mxu0 }
 0xb04   : > { %6683 = vst [vmem:[%s11976_s17 + $0x28] sm:$0xff] %v6611_v1  ;;  %v6353_v34 = vadd.f32 %v11769_v7, %v6352_v21  ;;  %v8884_v1 = vld [vmem:[#allocation3 + $0x28] sm:$0xff]  }
 0xb06   : > { %v6398_v16 = vmax.f32 %v6353_v34, 0.0 }
 0xb08   : > { %v6496_v3 = vadd.f32 %v8808_v23, %v6398_v16  ;;  %v8823_v23 = vunpack.c.l.bf16 %v8884_v1 }
 0xb09   : > { %v6613_v55 = vpop.f32.mrf.mxu1 }
 0xb0a   : > { %v6614_v37 = vadd.f32 %v11806_v61, %v6613_v55  ;;  %v6516_v38 = vpack.c.bf16 %v6496_v3, %v6495_v6  ;;  %v8824_v6 = vunpack.c.h.bf16 %v8884_v1 }
 0xb0b   : > { %v6355_v46 = vpop.f32.mrf.mxu0 }
 0xb0c   : > { %6684 = vst [vmem:[%s11976_s17 + $0x30] sm:$0xff] %v6614_v37  ;;  %6652 = vmatmul.bf16.gmra.mxu1 %v6516_v38  ;;  %v6356_v26 = vadd.f32 %v11769_v7, %v6355_v46 }
 0xb0e   : > { %v6399_v36 = vmax.f32 %v6356_v26, 0.0 }
 0xb10   : > { %v6497_v24 = vadd.f32 %v8811_v15, %v6399_v36 }
 0xb11   : > { %v6615_v50 = vpop.f32.mrf.mxu1 }
 0xb12   : > { %v6616_v32 = vadd.f32 %v11806_v61, %v6615_v50 }
 0xb13   : > { %v6357_v47 = vpop.f32.mrf.mxu0 }
 0xb14   : > { %6685 = vst [vmem:[%s11976_s17 + $0x38] sm:$0xff] %v6616_v32  ;;  %v6358_v42 = vadd.f32 %v11769_v7, %v6357_v47 }
 0xb16   : > { %v6400_v52 = vmax.f32 %v6358_v42, 0.0 }
 0xb18   : > { %v6498_v12 = vadd.f32 %v8812_v54, %v6400_v52 }
 0xb19   : > { %v6618_v10 = vpop.f32.mrf.mxu1 }
 0xb1a   : > { %v6619_v56 = vadd.f32 %v11806_v61, %v6618_v10  ;;  %v6517_v4 = vpack.c.bf16 %v6498_v12, %v6497_v24 }
 0xb1b   : > { %v6360_v44 = vpop.f32.mrf.mxu0 }
 0xb1c   : > { %6686 = vst [vmem:[%s11976_s17 + $0x40] sm:$0xff] %v6619_v56  ;;  %6657 = vmatmul.bf16.gmra.mxu1 %v6517_v4  ;;  %v6361_v27 = vadd.f32 %v11769_v7, %v6360_v44 }
 0xb1e   : > { %v6401_v28 = vmax.f32 %v6361_v27, 0.0 }
 0xb20   : > { %v6499_v45 = vadd.f32 %v8815_v25, %v6401_v28 }
 0xb21   : > { %v6620_v63 = vpop.f32.mrf.mxu1 }
 0xb22   : > { %v6621_v5 = vadd.f32 %v11806_v61, %v6620_v63 }
 0xb23   : > { %v6362_v48 = vpop.f32.mrf.mxu0 }
 0xb24   : > { %6687 = vst [vmem:[%s11976_s17 + $0x48] sm:$0xff] %v6621_v5  ;;  %v6363_v35 = vadd.f32 %v11769_v7, %v6362_v48 }
 0xb26   : > { %v6402_v19 = vmax.f32 %v6363_v35, 0.0 }
 0xb28   : > { %v6500_v30 = vadd.f32 %v8816_v39, %v6402_v19 }
 0xb29   : > { %v6623_v31 = vpop.f32.mrf.mxu1 }
 0xb2a   : > { %v6624_v29 = vadd.f32 %v11806_v61, %v6623_v31  ;;  %v6518_v22 = vpack.c.bf16 %v6500_v30, %v6499_v45 }
 0xb2b   : > { %v6365_v17 = vpop.f32.mrf.mxu0 }
 0xb2c   : > { %6688 = vst [vmem:[%s11976_s17 + $0x50] sm:$0xff] %v6624_v29  ;;  %6662 = vmatmul.bf16.gmra.mxu1 %v6518_v22  ;;  %v6366_v2 = vadd.f32 %v11769_v7, %v6365_v17 }
 0xb2e   : > { %v6403_v49 = vmax.f32 %v6366_v2, 0.0 }
 0xb30   : > { %v6501_v51 = vadd.f32 %v8819_v33, %v6403_v49 }
 0xb31   : > { %v6625_v20 = vpop.f32.mrf.mxu1 }
 0xb32   : > { %v6626_v60 = vadd.f32 %v11806_v61, %v6625_v20 }
 0xb33   : > { %v6367_v43 = vpop.f32.mrf.mxu0 }
 0xb34   : > { %6689 = vst [vmem:[%s11976_s17 + $0x58] sm:$0xff] %v6626_v60  ;;  %v6368_v40 = vadd.f32 %v11769_v7, %v6367_v43 }
 0xb36   : > { %v6404_v13 = vmax.f32 %v6368_v40, 0.0 }
 0xb38   : > { %v6502_v53 = vadd.f32 %v8820_v0, %v6404_v13 }
 0xb39   : > { %v6628_v9 = vpop.f32.mrf.mxu1 }
 0xb3a   : > { %v6629_v59 = vadd.f32 %v11806_v61, %v6628_v9  ;;  %v6519_v14 = vpack.c.bf16 %v6502_v53, %v6501_v51 }
 0xb3b   : > { %v6370_v18 = vpop.f32.mrf.mxu0 }
 0xb3c   : > { %6690 = vst [vmem:[%s11976_s17 + $0x60] sm:$0xff] %v6629_v59  ;;  %6667 = vmatmul.bf16.gmra.mxu1 %v6519_v14  ;;  %v6371_v41 = vadd.f32 %v11769_v7, %v6370_v18 }
 0xb3e   : > { %v6405_v34 = vmax.f32 %v6371_v41, 0.0 }
 0xb40   : > { %v6503_v55 = vadd.f32 %v8823_v23, %v6405_v34 }
 0xb41   : > { %v6630_v21 = vpop.f32.mrf.mxu1 }
 0xb42   : > { %v6631_v62 = vadd.f32 %v11806_v61, %v6630_v21 }
 0xb43   : > { %v6372_v57 = vpop.f32.mrf.mxu0 }
 0xb44   : > { %6691 = vst [vmem:[%s11976_s17 + $0x68] sm:$0xff] %v6631_v62  ;;  %v6373_v16 = vadd.f32 %v11769_v7, %v6372_v57 }
 0xb46   : > { %v6406_v3 = vmax.f32 %v6373_v16, 0.0 }
 0xb48   : > { %v6504_v37 = vadd.f32 %v8824_v6, %v6406_v3 }
 0xb49   : > { %v6633_v38 = vpop.f32.mrf.mxu1 }
 0xb4a   : > { %v6634_v46 = vadd.f32 %v11806_v61, %v6633_v38  ;;  %v6520_v26 = vpack.c.bf16 %v6504_v37, %v6503_v55 }
 0xb4c   : > { %6692 = vst [vmem:[%s11976_s17 + $0x70] sm:$0xff] %v6634_v46  ;;  %6672 = vmatmul.bf16.gmra.mxu1 %v6520_v26 }
 0xb51   : > { %v6635_v11 = vpop.f32.mrf.mxu1 }
 0xb52   : > { %v6636_v50 = vadd.f32 %v11806_v61, %v6635_v11 }
 0xb54   : > { %6693 = vst [vmem:[%s11976_s17 + $0x78] sm:$0xff] %v6636_v50 }
 0xb59   : > { %v6638_v7 = vpop.f32.mrf.mxu1 }
 0xb5a   : > { %v6639_v32 = vadd.f32 %v11806_v61, %v6638_v7 }
 0xb5c   : > { %6694 = vst [vmem:[%s11976_s17 + $0x80] sm:$0xff] %v6639_v32 }
 0xb61   : > { %v6640_v47 = vpop.f32.mrf.mxu1 }
 0xb62   : > { %v6641_v36 = vadd.f32 %v11806_v61, %v6640_v47 }
 0xb64   : > { %6695 = vst [vmem:[%s11976_s17 + $0x88] sm:$0xff] %v6641_v36 }
 0xb69   : > { %v6643_v15 = vpop.f32.mrf.mxu1 }
 0xb6a   : > { %v6644_v42 = vadd.f32 %v11806_v61, %v6643_v15 }
 0xb6c   : > { %6696 = vst [vmem:[%s11976_s17 + $0x90] sm:$0xff] %v6644_v42 }
 0xb71   : > { %v6645_v54 = vpop.f32.mrf.mxu1 }
 0xb72   : > { %v6646_v52 = vadd.f32 %v11806_v61, %v6645_v54 }
 0xb74   : > { %6697 = vst [vmem:[%s11976_s17 + $0x98] sm:$0xff] %v6646_v52 }
 0xb79   : > { %v6648_v24 = vpop.f32.mrf.mxu1 }
 0xb7a   : > { %v6649_v12 = vadd.f32 %v11806_v61, %v6648_v24 }
 0xb7c   : > { %6698 = vst [vmem:[%s11976_s17 + $0xa0] sm:$0xff] %v6649_v12 }
 0xb81   : > { %v6650_v10 = vpop.f32.mrf.mxu1 }
 0xb82   : > { %v6651_v56 = vadd.f32 %v11806_v61, %v6650_v10 }
 0xb84   : > { %6699 = vst [vmem:[%s11976_s17 + $0xa8] sm:$0xff] %v6651_v56 }
 0xb89   : > { %v6653_v4 = vpop.f32.mrf.mxu1 }
 0xb8a   : > { %v6654_v44 = vadd.f32 %v11806_v61, %v6653_v4 }
 0xb8c   : > { %6700 = vst [vmem:[%s11976_s17 + $0xb0] sm:$0xff] %v6654_v44 }
 0xb91   : > { %v6655_v27 = vpop.f32.mrf.mxu1 }
 0xb92   : > { %v6656_v58 = vadd.f32 %v11806_v61, %v6655_v27 }
 0xb94   : > { %6701 = vst [vmem:[%s11976_s17 + $0xb8] sm:$0xff] %v6656_v58 }
 0xb99   : > { %v6658_v63 = vpop.f32.mrf.mxu1 }
 0xb9a   : > { %v6659_v5 = vadd.f32 %v11806_v61, %v6658_v63 }
 0xb9c   : > { %6702 = vst [vmem:[%s11976_s17 + $0xc0] sm:$0xff] %v6659_v5 }
 0xba1   : > { %v6660_v48 = vpop.f32.mrf.mxu1 }
 0xba2   : > { %v6661_v28 = vadd.f32 %v11806_v61, %v6660_v48 }
 0xba4   : > { %6703 = vst [vmem:[%s11976_s17 + $0xc8] sm:$0xff] %v6661_v28 }
 0xba9   : > { %v6663_v25 = vpop.f32.mrf.mxu1 }
 0xbaa   : > { %v6664_v35 = vadd.f32 %v11806_v61, %v6663_v25 }
 0xbac   : > { %6704 = vst [vmem:[%s11976_s17 + $0xd0] sm:$0xff] %v6664_v35 }
 0xbb1   : > { %v6665_v39 = vpop.f32.mrf.mxu1 }
 0xbb2   : > { %v6666_v19 = vadd.f32 %v11806_v61, %v6665_v39 }
 0xbb4   : > { %6705 = vst [vmem:[%s11976_s17 + $0xd8] sm:$0xff] %v6666_v19 }
 0xbb9   : > { %v6668_v45 = vpop.f32.mrf.mxu1 }
 0xbba   : > { %v6669_v30 = vadd.f32 %v11806_v61, %v6668_v45 }
 0xbbc   : > { %6706 = vst [vmem:[%s11976_s17 + $0xe0] sm:$0xff] %v6669_v30 }
 0xbc1   : > { %v6670_v31 = vpop.f32.mrf.mxu1 }
 0xbc2   : > { %v6671_v29 = vadd.f32 %v11806_v61, %v6670_v31 }
 0xbc4   : > { %6707 = vst [vmem:[%s11976_s17 + $0xe8] sm:$0xff] %v6671_v29 }
 0xbc9   : > { %v6673_v22 = vpop.f32.mrf.mxu1 }
 0xbca   : > { %v6674_v17 = vadd.f32 %v11806_v61, %v6673_v22 }
 0xbcc   : > { %6708 = vst [vmem:[%s11976_s17 + $0xf0] sm:$0xff] %v6674_v17 }
 0xbd1   : > { %v6675_v2 = vpop.f32.mrf.mxu1 }
 0xbd2   : > { %v6676_v8 = vadd.f32 %v11806_v61, %v6675_v2 }
 0xbd4   : > { %6709 = vst [vmem:[%s11976_s17 + $0xf8] sm:$0xff] %v6676_v8 }
 0xbd5 PF: > { %s27_s26 = sadd.s32 1, %s8994_s26   ;;  %s12479_s29 = sld [smem:[#allocation4_spill]] }
 0xbd6   : > { %p24_p8 = scmp.ge.s32.totalorder %s27_s26, 6   ;;  %s12480_s24 = smov %s8990_s25 }
 0xbd8   :  { %26 = sbr.rel (!%p24_p8) target bundleno = 3 (0x3), region = 141 }
 0xbdb   : > { %s12481_s25 = smov %s12479_s29 }

</bundles_post_ra>
